<compile_context>
chip_gen: v7x
topology: tpu7x:2x2x1
jax: 0.10.0
libtpu: 0.0.40
codegen_flags: <defaults>
</compile_context>

<pallas_src>
import numpy as np
import jax
import jax.numpy as jnp
from jax.experimental import pallas as pl
from jax.experimental.pallas import tpu as pltpu

_EPS = 1e-5
_NEG_SLOPE = 0.2


def _cdiv(a, b):
    return -(-a // b)


def _round_up(a, b):
    return _cdiv(a, b) * b


def _largest_aligned_divisor(total, cap, align):
    """Largest d <= cap with d % align == 0 and total % d == 0 (total % align == 0)."""
    best = align
    for mult in range(1, total // align + 1):
        d = align * mult
        if d > cap:
            break
        if total % d == 0:
            best = d
    return best


def _device_plan():
    """Per-generation tile / VMEM plan.  Conservative default is v7x-safe (64 MiB
    VMEM, 2 TensorCores); v5e/v6e (128 MiB VMEM, lower HBM bandwidth) go bigger so
    weights stay resident longer and HBM reads are amortized."""
    try:
        kind = jax.devices()[0].device_kind.lower()
    except Exception:
        kind = ""
    if any(s in kind for s in ("v5 lite", "v5e", "v5lite", "v6 lite", "v6e", "v6lite")):
        return dict(tm_max=2048, tk_max=4096, tn_max=512, vmem=100 * 1024 * 1024)
    return dict(tm_max=1024, tk_max=2048, tn_max=512, vmem=48 * 1024 * 1024)


def _apply_act(y, act):
    if act == "leaky":
        return jnp.where(y >= 0.0, y, _NEG_SLOPE * y)
    if act == "sigmoid":
        return jax.nn.sigmoid(y)
    return y


# ---------------------------------------------------------------------------
# Pass 1: K-tiled matmul + bias (+ fused activation when no norm follows).
# When a BatchNorm follows, also emit masked per-M-tile channel sum / sum-sq
# computed from the fp32 accumulator via a mask-row MXU dot.
# ---------------------------------------------------------------------------
def _make_matmul_kernel(n_k, act, with_stats, true_m, tm):
    def kernel(*refs):
        if with_stats:
            p_ref, w_ref, b_ref, y_ref, s_ref, ss_ref, acc_ref = refs
        else:
            p_ref, w_ref, b_ref, y_ref, acc_ref = refs

        # program_id reads must stay at kernel top level (NOT inside pl.when bodies).
        m_id = pl.program_id(0)
        k = pl.program_id(2)

        @pl.when(k == 0)
        def _():
            acc_ref[...] = jnp.zeros_like(acc_ref)

        acc_ref[...] += jnp.dot(p_ref[...], w_ref[...],
                                preferred_element_type=jnp.float32)

        @pl.when(k == n_k - 1)
        def _():
            y = acc_ref[...] + b_ref[...]
            y_ref[...] = _apply_act(y, act).astype(y_ref.dtype)
            if with_stats:
                # Mask row: 1.0 for real rows, 0.0 for padded rows; reductions over
                # the M (sublane) axis go through the MXU instead of a cross-sublane
                # VPU/XLU sum.
                rows = jax.lax.broadcasted_iota(jnp.int32, (1, tm), 1) + m_id * tm
                mrow = (rows < true_m).astype(jnp.float32)
                s_ref[0] = jnp.dot(mrow, y, preferred_element_type=jnp.float32)
                ss_ref[0] = jnp.dot(mrow, y * y, preferred_element_type=jnp.float32)

    return kernel


# ---------------------------------------------------------------------------
# Pass 2: elementwise  y * scale + shift  -> activation  (BatchNorm apply).
# ---------------------------------------------------------------------------
def _make_scale_shift_kernel(act):
    def kernel(y_ref, sc_ref, sh_ref, o_ref):
        y = y_ref[...].astype(jnp.float32) * sc_ref[...] + sh_ref[...]
        o_ref[...] = _apply_act(y, act).astype(o_ref.dtype)
    return kernel


def _conv_matmul(patches, w2d, bias, *, norm, act, gamma=None, beta=None, plan):
    """patches: (M, K) bf16; w2d: (K, N) f32; bias: (N,) f32.
    Returns a (Mp, Np) bf16 array (caller slices off padded rows / channels)."""
    M, K = patches.shape
    N = w2d.shape[1]
    tm_max, tk_max, tn_max, vmem = (plan["tm_max"], plan["tk_max"],
                                    plan["tn_max"], plan["vmem"])

    # ----- tile plan -----
    tm = min(tm_max, _round_up(M, 8))
    if _cdiv(M, tm) == 1 and M > 512:
        # Keep >=2 blocks on the parallel M axis so both v7x TensorCores get work.
        tm = _round_up(_cdiv(M, 2), 8)
    Mp = _round_up(M, tm)
    n_m = Mp // tm

    Kp = _round_up(K, 128)
    tk = _largest_aligned_divisor(Kp, tk_max, 128)
    n_k = Kp // tk

    Np = _round_up(N, 128)                 # lane-dense, unmasked stores (even N=1/64)
    tn = _largest_aligned_divisor(Np, tn_max, 128)
    n_n = Np // tn

    # ----- operand padding (jnp.pad only; K is normally already 128-aligned) -----
    if Mp > M or Kp > K:
        patches = jnp.pad(patches, ((0, Mp - M), (0, Kp - K)))
    w_pad = jnp.pad(w2d.astype(jnp.bfloat16), ((0, Kp - K), (0, Np - N)))
    b_pad = jnp.pad(bias.astype(jnp.float32), (0, Np - N)).reshape(1, Np)

    fused_act = None if norm else act
    kernel = _make_matmul_kernel(n_k, fused_act, norm, M, tm)

    # bf16 intermediate even when a BatchNorm follows (stats come from the fp32 acc).
    out_shape = [jax.ShapeDtypeStruct((Mp, Np), jnp.bfloat16)]
    out_specs = [pl.BlockSpec((tm, tn), lambda m, n, k: (m, n))]
    if norm:
        out_shape += [jax.ShapeDtypeStruct((n_m, 1, Np), jnp.float32)] * 2
        out_specs += [pl.BlockSpec((1, 1, tn), lambda m, n, k: (m, 0, n))] * 2

    results = pl.pallas_call(
        kernel,
        out_shape=out_shape,
        grid=(n_m, n_n, n_k),
        in_specs=[
            pl.BlockSpec((tm, tk), lambda m, n, k: (m, k)),
            pl.BlockSpec((tk, tn), lambda m, n, k: (k, n)),
            pl.BlockSpec((1, tn), lambda m, n, k: (0, n)),
        ],
        out_specs=out_specs,
        scratch_shapes=[pltpu.VMEM((tm, tn), jnp.float32)],
        compiler_params=pltpu.CompilerParams(
            dimension_semantics=("parallel", "parallel", "arbitrary"),
            vmem_limit_bytes=vmem),
    )(patches.astype(jnp.bfloat16), w_pad, b_pad)

    y_bf16 = results[0]
    if not norm:
        return y_bf16

    psum, psumsq = results[1], results[2]
    cnt = jnp.float32(M)
    mean = jnp.sum(psum[:, 0, :], axis=0) / cnt
    # E[x^2] - mean^2 in fp32, clamped >= 0.  NOTE: can lose precision by cancellation
    # when |mean| >> std; acceptable here (values are O(1) post-conv).
    var = jnp.maximum(jnp.sum(psumsq[:, 0, :], axis=0) / cnt - mean * mean, 0.0)
    # gamma/beta are zero-padded in the extra lanes, so padded channels normalize to 0
    # (they are sliced away by the caller anyway).
    gamma_pad = jnp.pad(gamma.astype(jnp.float32), (0, Np - N))
    beta_pad = jnp.pad(beta.astype(jnp.float32), (0, Np - N))
    scale = gamma_pad * jax.lax.rsqrt(var + _EPS)
    shift = beta_pad - mean * scale

    # Pass 2: purely HBM-bound; use lane-dense full-Np blocks and a larger M tile.
    tm2 = _largest_aligned_divisor(Mp, max(2048, tm), tm)
    n_m2 = Mp // tm2
    y_out = pl.pallas_call(
        _make_scale_shift_kernel(act),
        out_shape=jax.ShapeDtypeStruct((Mp, Np), jnp.bfloat16),
        grid=(n_m2,),
        in_specs=[
            pl.BlockSpec((tm2, Np), lambda m: (m, 0)),
            pl.BlockSpec((1, Np), lambda m: (0, 0)),
            pl.BlockSpec((1, Np), lambda m: (0, 0)),
        ],
        out_specs=pl.BlockSpec((tm2, Np), lambda m: (m, 0)),
        compiler_params=pltpu.CompilerParams(
            dimension_semantics=("parallel",),
            vmem_limit_bytes=vmem),
    )(y_bf16, scale.reshape(1, Np), shift.reshape(1, Np))
    return y_out


# ---------------------------------------------------------------------------
# JAX-side glue: channels-last im2col, layer / network wrappers
# ---------------------------------------------------------------------------
def conv_layer(x, p, *, stride, pad, norm, act, plan):
    """x: (B, H, W, Cp) NHWC bf16, Cp % 8 == 0 (extra channels are zero).
    p['w']: (Cout, Cin, kh, kw) PyTorch OIHW.  Returns (B, Ho, Wo, Cout) bf16."""
    B, H, W, Cp = x.shape
    Cout, Cin, kh, kw = p["w"].shape
    xp = jnp.pad(x, ((0, 0), (pad, pad), (pad, pad), (0, 0)))
    Ho = (H + 2 * pad - kh) // stride + 1
    Wo = (W + 2 * pad - kw) // stride + 1
    # im2col with K ordered (kh, kw, C) so C stays lane-dense / fastest.
    # TODO(synk): fold this kh*kw tap gather into the matmul kernel as an extra
    # reduction grid axis over shifted (phase-split for stride 2) NHWC windows so the
    # kh*kw-inflated patches tensor is never materialized in HBM.
    cols = [xp[:, di:di + stride * (Ho - 1) + 1:stride,
               dj:dj + stride * (Wo - 1) + 1:stride, :]
            for di in range(kh) for dj in range(kw)]
    patches = jnp.concatenate(cols, axis=-1).reshape(B * Ho * Wo, kh * kw * Cp)
    # Weight rows for the zero-padded input channels are themselves zero.
    w = jnp.transpose(p["w"], (2, 3, 1, 0))               # (kh, kw, Cin, Cout)
    if Cp > Cin:
        w = jnp.pad(w, ((0, 0), (0, 0), (0, Cp - Cin), (0, 0)))
    w2d = w.reshape(kh * kw * Cp, Cout)
    y = _conv_matmul(patches, w2d, p["b"], norm=norm, act=act,
                     gamma=p.get("gamma"), beta=p.get("beta"), plan=plan)
    M = B * Ho * Wo
    y = y[:M, :Cout] if y.shape[1] > Cout else y[:M]
    return y.reshape(B, Ho, Wo, Cout)


def discriminator_config(input_nc, ndf=64, n_layers=3, use_sigmoid=False):
    kw_ = 4
    padw = int(np.ceil((kw_ - 1.0) / 2))        # = 2
    cfgs = [dict(cin=input_nc, cout=ndf, stride=2, norm=False, act="leaky")]
    nf = ndf
    for _ in range(1, n_layers):
        nf_prev, nf = nf, min(nf * 2, 512)
        cfgs.append(dict(cin=nf_prev, cout=nf, stride=2, norm=True, act="leaky"))
    nf_prev, nf = nf, min(nf * 2, 512)
    cfgs.append(dict(cin=nf_prev, cout=nf, stride=1, norm=True, act="leaky"))
    # Sigmoid (when requested) is fused into the last conv block here.
    cfgs.append(dict(cin=nf, cout=1, stride=1, norm=False,
                     act="sigmoid" if use_sigmoid else None))
    for c in cfgs:
        c["k"] = kw_
        c["pad"] = padw
    return cfgs


def init_params(key, cfgs):
    params = []
    keys = jax.random.split(key, len(cfgs))
    for cfg, kk in zip(cfgs, keys):
        k1, k2 = jax.random.split(kk)
        fan_in = cfg["cin"] * cfg["k"] * cfg["k"]
        bound = 1.0 / np.sqrt(fan_in)
        p = {"w": jax.random.uniform(k1, (cfg["cout"], cfg["cin"], cfg["k"], cfg["k"]),
                                     jnp.float32, -bound, bound),
             "b": jax.random.uniform(k2, (cfg["cout"],), jnp.float32, -bound, bound)}
        if cfg["norm"]:   # BatchNorm2d affine params (init: gamma=1, beta=0)
            p["gamma"] = jnp.ones((cfg["cout"],), jnp.float32)
            p["beta"] = jnp.zeros((cfg["cout"],), jnp.float32)
        params.append(p)
    return params


def nlayer_discriminator_forward(params, cfgs, x, get_interm_feat=False):
    """x: (B, input_nc, H, W) fp32 NCHW -> PatchGAN logits (B, 1, H', W') fp32.
    BatchNorm uses training-mode batch statistics (fresh-module forward behaviour)."""
    plan = _device_plan()
    B, Cin0, H, W = x.shape
    h = jnp.transpose(x, (0, 2, 3, 1)).astype(jnp.bfloat16)        # NHWC bf16
    Cp0 = _round_up(Cin0, 8)
    if Cp0 > Cin0:            # pad channels so K = kh*kw*C is 128-aligned, no K-pad copy
        h = jnp.pad(h, ((0, 0), (0, 0), (0, 0), (0, Cp0 - Cin0)))
    feats = []
    for p, cfg in zip(params, cfgs):
        h = conv_layer(h, p, stride=cfg["stride"], pad=cfg["pad"],
                       norm=cfg["norm"], act=cfg["act"], plan=plan)
        if get_interm_feat:
            feats.append(jnp.transpose(h, (0, 3, 1, 2)).astype(jnp.float32))
    if get_interm_feat:
        return feats
    return jnp.transpose(h, (0, 3, 1, 2)).astype(jnp.float32)


# ---------------------------------------------------------------------------
# Matched-precision reference (lax conv, same bf16 cast points as the kernel path):
# validates the Pallas conv / BatchNorm / activation kernels.
# ---------------------------------------------------------------------------
def _quant(x):
    return x.astype(jnp.bfloat16).astype(jnp.float32)


def _ref_forward_matched(params, cfgs, x):
    h = _quant(x)
    for p, cfg in zip(params, cfgs):
        w = _quant(p["w"])
        y = jax.lax.conv_general_dilated(
            h, w, (cfg["stride"],) * 2, ((cfg["pad"],) * 2,) * 2,
            dimension_numbers=("NCHW", "OIHW", "NCHW"),
            precision=jax.lax.Precision.HIGHEST)
        y = y + p["b"][None, :, None, None]
        if cfg["norm"]:
            mean = y.mean(axis=(0, 2, 3), keepdims=True)
            var = jnp.maximum((y * y).mean(axis=(0, 2, 3), keepdims=True) - mean * mean,
                              0.0)
            scale = p["gamma"][None, :, None, None] * jax.lax.rsqrt(var + _EPS)
            shift = p["beta"][None, :, None, None] - mean * scale
            y = _quant(y) * scale + shift        # pass-1 stores bf16; stats from fp32
        if cfg["act"] == "leaky":
            y = jnp.where(y >= 0, y, _NEG_SLOPE * y)
        elif cfg["act"] == "sigmoid":
            y = jax.nn.sigmoid(y)
        h = _quant(y)
    return h


if __name__ == "__main__":
    key = jax.random.PRNGKey(0)
    k_params, k_x = jax.random.split(key)

    input_nc = 4
    B, H, W = 2, 16, 16
    cfgs = discriminator_config(input_nc, ndf=64, n_layers=3, use_sigmoid=False)
    params = init_params(k_params, cfgs)
    x = jax.random.normal(k_x, (B, input_nc, H, W), jnp.float32)

    fwd = jax.jit(lambda prm, xx: nlayer_discriminator_forward(prm, cfgs, xx))
    y = jax.block_until_ready(fwd(params, x))
    assert y.shape == (B, 1, 5, 5), y.shape
    assert bool(jnp.all(jnp.isfinite(y)))

    # Correctness: compare against a lax-conv reference with matched bf16 cast points.
    y_ref = _ref_forward_matched(params, cfgs, x)
    np.testing.assert_allclose(np.asarray(y), np.asarray(y_ref), rtol=2e-2, atol=2e-2)

    print("KERNEL_OK")
</pallas_src>

<mosaic_0001>
module attributes {stable_mosaic.version = 11 : i64} {
  func.func @kernel(%arg0: i32, %arg1: i32, %arg2: i32, %arg3: memref<168x128xbf16, #tpu.memory_space<vmem>>, %arg4: memref<128x128xbf16, #tpu.memory_space<vmem>>, %arg5: memref<1x128xf32, #tpu.memory_space<vmem>>, %arg6: memref<168x128xbf16, #tpu.memory_space<vmem>>, %arg7: memref<168x128xf32, #tpu.memory_space<vmem>>) attributes {dimension_semantics = [#tpu.dimension_semantics<parallel>, #tpu.dimension_semantics<parallel>, #tpu.dimension_semantics<arbitrary>], iteration_bounds = array<i64: 1, 1, 1>, scalar_prefetch = 0 : i64, scratch_operands = 1 : i64, tpu.core_type = #tpu.core_type<tc>, window_params = [{transform_indices = @transform_0, window_bounds = array<i64: 168, 128>}, {transform_indices = @transform_1, window_bounds = array<i64: 128, 128>}, {transform_indices = @transform_2, window_bounds = array<i64: 1, 128>}, {transform_indices = @transform_3, window_bounds = array<i64: 168, 128>}]} {
    %c0_i32 = arith.constant 0 : i32
    %0 = arith.cmpi eq, %arg2, %c0_i32 : i32
    %1 = arith.extui %0 : i1 to i32
    %c0_i32_0 = arith.constant 0 : i32
    %2 = arith.cmpi ne, %1, %c0_i32_0 : i32
    scf.if %2 {
      %cst_10 = arith.constant 0.000000e+00 : f32
      %12 = vector.broadcast %cst_10 : f32 to vector<168x128xf32>
      %c0_11 = arith.constant 0 : index
      %c0_12 = arith.constant 0 : index
      %13 = vector.load %arg7[%c0_11, %c0_12] : memref<168x128xf32, #tpu.memory_space<vmem>>, vector<168x128xf32>
      tpu.vector_store %arg7[%c0_11, %c0_12], %12 {strides = array<i32>} : memref<168x128xf32, #tpu.memory_space<vmem>>, vector<168x128xf32>,
    } else {
    }
    %c0 = arith.constant 0 : index
    %c0_1 = arith.constant 0 : index
    %3 = vector.load %arg7[%c0, %c0_1] : memref<168x128xf32, #tpu.memory_space<vmem>>, vector<168x128xf32>
    %c0_2 = arith.constant 0 : index
    %c0_3 = arith.constant 0 : index
    %4 = vector.load %arg3[%c0_2, %c0_3] : memref<168x128xbf16, #tpu.memory_space<vmem>>, vector<168x128xbf16>
    %c0_4 = arith.constant 0 : index
    %c0_5 = arith.constant 0 : index
    %5 = vector.load %arg4[%c0_4, %c0_5] : memref<128x128xbf16, #tpu.memory_space<vmem>>, vector<128x128xbf16>
    %cst = arith.constant dense<0.000000e+00> : vector<168x128xf32>
    %6 = tpu.matmul %4, %5, %cst {dimension_numbers = #tpu.dot_dimension_numbers<[1], [0], [0], [1], [0, 0, 1, 1], [], []>} : vector<168x128xbf16>, vector<128x128xbf16>, vector<168x128xf32> -> vector<168x128xf32>
    %7 = arith.addf %3, %6 : vector<168x128xf32>
    %c0_6 = arith.constant 0 : index
    %c0_7 = arith.constant 0 : index
    %8 = vector.load %arg7[%c0_6, %c0_7] : memref<168x128xf32, #tpu.memory_space<vmem>>, vector<168x128xf32>
    tpu.vector_store %arg7[%c0_6, %c0_7], %7 {strides = array<i32>} : memref<168x128xf32, #tpu.memory_space<vmem>>, vector<168x128xf32>,
    %c0_i32_8 = arith.constant 0 : i32
    %9 = arith.cmpi eq, %arg2, %c0_i32_8 : i32
    %10 = arith.extui %9 : i1 to i32
    %c0_i32_9 = arith.constant 0 : i32
    %11 = arith.cmpi ne, %10, %c0_i32_9 : i32
    scf.if %11 {
      %c0_10 = arith.constant 0 : index
      %c0_11 = arith.constant 0 : index
      %12 = vector.load %arg7[%c0_10, %c0_11] : memref<168x128xf32, #tpu.memory_space<vmem>>, vector<168x128xf32>
      %c0_12 = arith.constant 0 : index
      %c0_13 = arith.constant 0 : index
      %13 = vector.load %arg5[%c0_12, %c0_13] : memref<1x128xf32, #tpu.memory_space<vmem>>, vector<1x128xf32>
      %14 = vector.broadcast %13 : vector<1x128xf32> to vector<168x128xf32>
      %15 = arith.addf %12, %14 : vector<168x128xf32>
      %cst_14 = arith.constant 0.000000e+00 : f32
      %16 = vector.broadcast %cst_14 : f32 to vector<168x128xf32>
      %17 = arith.cmpf oge, %15, %16 : vector<168x128xf32>
      %cst_15 = arith.constant 2.000000e-01 : f32
      %18 = vector.broadcast %cst_15 : f32 to vector<168x128xf32>
      %19 = arith.mulf %18, %15 : vector<168x128xf32>
      %20 = arith.select %17, %15, %19 : vector<168x128xi1>, vector<168x128xf32>
      %21 = arith.truncf %20 : vector<168x128xf32> to vector<168x128xbf16>
      %c0_16 = arith.constant 0 : index
      %c0_17 = arith.constant 0 : index
      %22 = vector.load %arg6[%c0_16, %c0_17] : memref<168x128xbf16, #tpu.memory_space<vmem>>, vector<168x128xbf16>
      tpu.vector_store %arg6[%c0_16, %c0_17], %21 {strides = array<i32>} : memref<168x128xbf16, #tpu.memory_space<vmem>>, vector<168x128xbf16>,
    } else {
    }
    return
  }
  func.func @transform_0(%arg0: i32, %arg1: i32, %arg2: i32) -> (i32, i32) {
    %c0_i32 = arith.constant 0 : i32
    return %arg0, %arg2 : i32, i32
  }
  func.func @transform_1(%arg0: i32, %arg1: i32, %arg2: i32) -> (i32, i32) {
    %c0_i32 = arith.constant 0 : i32
    return %arg2, %arg1 : i32, i32
  }
  func.func @transform_2(%arg0: i32, %arg1: i32, %arg2: i32) -> (i32, i32) {
    %c0_i32 = arith.constant 0 : i32
    %c0_i32_0 = arith.constant 0 : i32
    return %c0_i32, %arg1 : i32, i32
  }
  func.func @transform_3(%arg0: i32, %arg1: i32, %arg2: i32) -> (i32, i32) {
    %c0_i32 = arith.constant 0 : i32
    return %arg0, %arg1 : i32, i32
  }
}

module attributes {stable_mosaic.version = 11 : i64} {
  func.func @kernel(%arg0: i32, %arg1: i32, %arg2: i32, %arg3: memref<56x1024xbf16, #tpu.memory_space<vmem>>, %arg4: memref<1024x128xbf16, #tpu.memory_space<vmem>>, %arg5: memref<1x128xf32, #tpu.memory_space<vmem>>, %arg6: memref<56x128xbf16, #tpu.memory_space<vmem>>, %arg7: memref<1x1x128xf32, #tpu.memory_space<vmem>>, %arg8: memref<1x1x128xf32, #tpu.memory_space<vmem>>, %arg9: memref<56x128xf32, #tpu.memory_space<vmem>>) attributes {dimension_semantics = [#tpu.dimension_semantics<parallel>, #tpu.dimension_semantics<parallel>, #tpu.dimension_semantics<arbitrary>], iteration_bounds = array<i64: 1, 1, 1>, scalar_prefetch = 0 : i64, scratch_operands = 1 : i64, tpu.core_type = #tpu.core_type<tc>, window_params = [{transform_indices = @transform_0, window_bounds = array<i64: 56, 1024>}, {transform_indices = @transform_1, window_bounds = array<i64: 1024, 128>}, {transform_indices = @transform_2, window_bounds = array<i64: 1, 128>}, {transform_indices = @transform_3, window_bounds = array<i64: 56, 128>}, {transform_indices = @transform_4, window_bounds = array<i64: 1, 1, 128>}, {transform_indices = @transform_5, window_bounds = array<i64: 1, 1, 128>}]} {
    %c0_i32 = arith.constant 0 : i32
    %0 = arith.cmpi eq, %arg2, %c0_i32 : i32
    %1 = arith.extui %0 : i1 to i32
    %c0_i32_0 = arith.constant 0 : i32
    %2 = arith.cmpi ne, %1, %c0_i32_0 : i32
    scf.if %2 {
      %cst_10 = arith.constant 0.000000e+00 : f32
      %12 = vector.broadcast %cst_10 : f32 to vector<56x128xf32>
      %c0_11 = arith.constant 0 : index
      %c0_12 = arith.constant 0 : index
      %13 = vector.load %arg9[%c0_11, %c0_12] : memref<56x128xf32, #tpu.memory_space<vmem>>, vector<56x128xf32>
      tpu.vector_store %arg9[%c0_11, %c0_12], %12 {strides = array<i32>} : memref<56x128xf32, #tpu.memory_space<vmem>>, vector<56x128xf32>,
    } else {
    }
    %c0 = arith.constant 0 : index
    %c0_1 = arith.constant 0 : index
    %3 = vector.load %arg9[%c0, %c0_1] : memref<56x128xf32, #tpu.memory_space<vmem>>, vector<56x128xf32>
    %c0_2 = arith.constant 0 : index
    %c0_3 = arith.constant 0 : index
    %4 = vector.load %arg3[%c0_2, %c0_3] : memref<56x1024xbf16, #tpu.memory_space<vmem>>, vector<56x1024xbf16>
    %c0_4 = arith.constant 0 : index
    %c0_5 = arith.constant 0 : index
    %5 = vector.load %arg4[%c0_4, %c0_5] : memref<1024x128xbf16, #tpu.memory_space<vmem>>, vector<1024x128xbf16>
    %cst = arith.constant dense<0.000000e+00> : vector<56x128xf32>
    %6 = tpu.matmul %4, %5, %cst {dimension_numbers = #tpu.dot_dimension_numbers<[1], [0], [0], [1], [0, 0, 1, 1], [], []>} : vector<56x1024xbf16>, vector<1024x128xbf16>, vector<56x128xf32> -> vector<56x128xf32>
    %7 = arith.addf %3, %6 : vector<56x128xf32>
    %c0_6 = arith.constant 0 : index
    %c0_7 = arith.constant 0 : index
    %8 = vector.load %arg9[%c0_6, %c0_7] : memref<56x128xf32, #tpu.memory_space<vmem>>, vector<56x128xf32>
    tpu.vector_store %arg9[%c0_6, %c0_7], %7 {strides = array<i32>} : memref<56x128xf32, #tpu.memory_space<vmem>>, vector<56x128xf32>,
    %c0_i32_8 = arith.constant 0 : i32
    %9 = arith.cmpi eq, %arg2, %c0_i32_8 : i32
    %10 = arith.extui %9 : i1 to i32
    %c0_i32_9 = arith.constant 0 : i32
    %11 = arith.cmpi ne, %10, %c0_i32_9 : i32
    scf.if %11 {
      %c0_10 = arith.constant 0 : index
      %c0_11 = arith.constant 0 : index
      %12 = vector.load %arg9[%c0_10, %c0_11] : memref<56x128xf32, #tpu.memory_space<vmem>>, vector<56x128xf32>
      %c0_12 = arith.constant 0 : index
      %c0_13 = arith.constant 0 : index
      %13 = vector.load %arg5[%c0_12, %c0_13] : memref<1x128xf32, #tpu.memory_space<vmem>>, vector<1x128xf32>
      %14 = vector.broadcast %13 : vector<1x128xf32> to vector<56x128xf32>
      %15 = arith.addf %12, %14 : vector<56x128xf32>
      %16 = arith.truncf %15 : vector<56x128xf32> to vector<56x128xbf16>
      %c0_14 = arith.constant 0 : index
      %c0_15 = arith.constant 0 : index
      %17 = vector.load %arg6[%c0_14, %c0_15] : memref<56x128xbf16, #tpu.memory_space<vmem>>, vector<56x128xbf16>
      tpu.vector_store %arg6[%c0_14, %c0_15], %16 {strides = array<i32>} : memref<56x128xbf16, #tpu.memory_space<vmem>>, vector<56x128xbf16>,
      %18 = tpu.iota {dimensions = array<i32: 1>} : vector<1x56xi32>
      %c56_i32 = arith.constant 56 : i32
      %19 = arith.muli %arg0, %c56_i32 : i32
      %20 = vector.broadcast %19 : i32 to vector<1x56xi32>
      %21 = arith.addi %18, %20 : vector<1x56xi32>
      %c50_i32 = arith.constant 50 : i32
      %22 = vector.broadcast %c50_i32 : i32 to vector<1x56xi32>
      %23 = arith.cmpi slt, %21, %22 : vector<1x56xi32>
      %24 = arith.extui %23 : vector<1x56xi1> to vector<1x56xi32>
      %25 = arith.sitofp %24 : vector<1x56xi32> to vector<1x56xf32>
      %cst_16 = arith.constant dense<0.000000e+00> : vector<1x128xf32>
      %26 = tpu.matmul %25, %15, %cst_16 {dimension_numbers = #tpu.dot_dimension_numbers<[1], [0], [0], [1], [0, 0, 1, 1], [], []>} : vector<1x56xf32>, vector<56x128xf32>, vector<1x128xf32> -> vector<1x128xf32>
      %c0_17 = arith.constant 0 : index
      %c0_18 = arith.constant 0 : index
      %c0_19 = arith.constant 0 : index
      %27 = vector.load %arg7[%c0_17, %c0_18, %c0_19] : memref<1x1x128xf32, #tpu.memory_space<vmem>>, vector<1x1x128xf32>
      %28 = vector.shape_cast %27 : vector<1x1x128xf32> to vector<1x128xf32>
      %29 = vector.shape_cast %26 : vector<1x128xf32> to vector<1x1x128xf32>
      tpu.vector_store %arg7[%c0_17, %c0_18, %c0_19], %29 {strides = array<i32>} : memref<1x1x128xf32, #tpu.memory_space<vmem>>, vector<1x1x128xf32>,
      %30 = arith.mulf %15, %15 : vector<56x128xf32>
      %cst_20 = arith.constant dense<0.000000e+00> : vector<1x128xf32>
      %31 = tpu.matmul %25, %30, %cst_20 {dimension_numbers = #tpu.dot_dimension_numbers<[1], [0], [0], [1], [0, 0, 1, 1], [], []>} : vector<1x56xf32>, vector<56x128xf32>, vector<1x128xf32> -> vector<1x128xf32>
      %c0_21 = arith.constant 0 : index
      %c0_22 = arith.constant 0 : index
      %c0_23 = arith.constant 0 : index
      %32 = vector.load %arg8[%c0_21, %c0_22, %c0_23] : memref<1x1x128xf32, #tpu.memory_space<vmem>>, vector<1x1x128xf32>
      %33 = vector.shape_cast %32 : vector<1x1x128xf32> to vector<1x128xf32>
      %34 = vector.shape_cast %31 : vector<1x128xf32> to vector<1x1x128xf32>
      tpu.vector_store %arg8[%c0_21, %c0_22, %c0_23], %34 {strides = array<i32>} : memref<1x1x128xf32, #tpu.memory_space<vmem>>, vector<1x1x128xf32>,
    } else {
    }
    return
  }
  func.func @transform_0(%arg0: i32, %arg1: i32, %arg2: i32) -> (i32, i32) {
    %c0_i32 = arith.constant 0 : i32
    return %arg0, %arg2 : i32, i32
  }
  func.func @transform_1(%arg0: i32, %arg1: i32, %arg2: i32) -> (i32, i32) {
    %c0_i32 = arith.constant 0 : i32
    return %arg2, %arg1 : i32, i32
  }
  func.func @transform_2(%arg0: i32, %arg1: i32, %arg2: i32) -> (i32, i32) {
    %c0_i32 = arith.constant 0 : i32
    %c0_i32_0 = arith.constant 0 : i32
    return %c0_i32, %arg1 : i32, i32
  }
  func.func @transform_3(%arg0: i32, %arg1: i32, %arg2: i32) -> (i32, i32) {
    %c0_i32 = arith.constant 0 : i32
    return %arg0, %arg1 : i32, i32
  }
  func.func @transform_4(%arg0: i32, %arg1: i32, %arg2: i32) -> (i32, i32, i32) {
    %c0_i32 = arith.constant 0 : i32
    %c0_i32_0 = arith.constant 0 : i32
    return %arg0, %c0_i32, %arg1 : i32, i32, i32
  }
  func.func @transform_5(%arg0: i32, %arg1: i32, %arg2: i32) -> (i32, i32, i32) {
    %c0_i32 = arith.constant 0 : i32
    %c0_i32_0 = arith.constant 0 : i32
    return %arg0, %c0_i32, %arg1 : i32, i32, i32
  }
}

module attributes {stable_mosaic.version = 11 : i64} {
  func.func @kernel(%arg0: i32, %arg1: memref<56x128xbf16, #tpu.memory_space<vmem>>, %arg2: memref<1x128xf32, #tpu.memory_space<vmem>>, %arg3: memref<1x128xf32, #tpu.memory_space<vmem>>, %arg4: memref<56x128xbf16, #tpu.memory_space<vmem>>) attributes {dimension_semantics = [#tpu.dimension_semantics<parallel>], iteration_bounds = array<i64: 1>, scalar_prefetch = 0 : i64, scratch_operands = 0 : i64, tpu.core_type = #tpu.core_type<tc>, window_params = [{transform_indices = @transform_0, window_bounds = array<i64: 56, 128>}, {pipeline_mode = #tpu.pipeline_mode<synchronous>, transform_indices = @transform_1, window_bounds = array<i64: 1, 128>}, {pipeline_mode = #tpu.pipeline_mode<synchronous>, transform_indices = @transform_2, window_bounds = array<i64: 1, 128>}, {transform_indices = @transform_3, window_bounds = array<i64: 56, 128>}]} {
    %c0 = arith.constant 0 : index
    %c0_0 = arith.constant 0 : index
    %0 = vector.load %arg1[%c0, %c0_0] : memref<56x128xbf16, #tpu.memory_space<vmem>>, vector<56x128xbf16>
    %1 = arith.extf %0 : vector<56x128xbf16> to vector<56x128xf32>
    %c0_1 = arith.constant 0 : index
    %c0_2 = arith.constant 0 : index
    %2 = vector.load %arg2[%c0_1, %c0_2] : memref<1x128xf32, #tpu.memory_space<vmem>>, vector<1x128xf32>
    %3 = vector.broadcast %2 : vector<1x128xf32> to vector<56x128xf32>
    %4 = arith.mulf %1, %3 : vector<56x128xf32>
    %c0_3 = arith.constant 0 : index
    %c0_4 = arith.constant 0 : index
    %5 = vector.load %arg3[%c0_3, %c0_4] : memref<1x128xf32, #tpu.memory_space<vmem>>, vector<1x128xf32>
    %6 = vector.broadcast %5 : vector<1x128xf32> to vector<56x128xf32>
    %7 = arith.addf %4, %6 : vector<56x128xf32>
    %cst = arith.constant 0.000000e+00 : f32
    %8 = vector.broadcast %cst : f32 to vector<56x128xf32>
    %9 = arith.cmpf oge, %7, %8 : vector<56x128xf32>
    %cst_5 = arith.constant 2.000000e-01 : f32
    %10 = vector.broadcast %cst_5 : f32 to vector<56x128xf32>
    %11 = arith.mulf %10, %7 : vector<56x128xf32>
    %12 = arith.select %9, %7, %11 : vector<56x128xi1>, vector<56x128xf32>
    %13 = arith.truncf %12 : vector<56x128xf32> to vector<56x128xbf16>
    %c0_6 = arith.constant 0 : index
    %c0_7 = arith.constant 0 : index
    %14 = vector.load %arg4[%c0_6, %c0_7] : memref<56x128xbf16, #tpu.memory_space<vmem>>, vector<56x128xbf16>
    tpu.vector_store %arg4[%c0_6, %c0_7], %13 {strides = array<i32>} : memref<56x128xbf16, #tpu.memory_space<vmem>>, vector<56x128xbf16>,
    return
  }
  func.func @transform_0(%arg0: i32) -> (i32, i32) {
    %c0_i32 = arith.constant 0 : i32
    %c0_i32_0 = arith.constant 0 : i32
    return %arg0, %c0_i32 : i32, i32
  }
  func.func @transform_1(%arg0: i32) -> (i32, i32) {
    %c0_i32 = arith.constant 0 : i32
    %c0_i32_0 = arith.constant 0 : i32
    %c0_i32_1 = arith.constant 0 : i32
    return %c0_i32, %c0_i32_0 : i32, i32
  }
  func.func @transform_2(%arg0: i32) -> (i32, i32) {
    %c0_i32 = arith.constant 0 : i32
    %c0_i32_0 = arith.constant 0 : i32
    %c0_i32_1 = arith.constant 0 : i32
    return %c0_i32, %c0_i32_0 : i32, i32
  }
  func.func @transform_3(%arg0: i32) -> (i32, i32) {
    %c0_i32 = arith.constant 0 : i32
    %c0_i32_0 = arith.constant 0 : i32
    return %arg0, %c0_i32 : i32, i32
  }
}

module attributes {stable_mosaic.version = 11 : i64} {
  func.func @kernel(%arg0: i32, %arg1: i32, %arg2: i32, %arg3: memref<24x2048xbf16, #tpu.memory_space<vmem>>, %arg4: memref<2048x256xbf16, #tpu.memory_space<vmem>>, %arg5: memref<1x256xf32, #tpu.memory_space<vmem>>, %arg6: memref<24x256xbf16, #tpu.memory_space<vmem>>, %arg7: memref<1x1x256xf32, #tpu.memory_space<vmem>>, %arg8: memref<1x1x256xf32, #tpu.memory_space<vmem>>, %arg9: memref<24x256xf32, #tpu.memory_space<vmem>>) attributes {dimension_semantics = [#tpu.dimension_semantics<parallel>, #tpu.dimension_semantics<parallel>, #tpu.dimension_semantics<arbitrary>], iteration_bounds = array<i64: 1, 1, 1>, scalar_prefetch = 0 : i64, scratch_operands = 1 : i64, tpu.core_type = #tpu.core_type<tc>, window_params = [{transform_indices = @transform_0, window_bounds = array<i64: 24, 2048>}, {transform_indices = @transform_1, window_bounds = array<i64: 2048, 256>}, {transform_indices = @transform_2, window_bounds = array<i64: 1, 256>}, {transform_indices = @transform_3, window_bounds = array<i64: 24, 256>}, {transform_indices = @transform_4, window_bounds = array<i64: 1, 1, 256>}, {transform_indices = @transform_5, window_bounds = array<i64: 1, 1, 256>}]} {
    %c0_i32 = arith.constant 0 : i32
    %0 = arith.cmpi eq, %arg2, %c0_i32 : i32
    %1 = arith.extui %0 : i1 to i32
    %c0_i32_0 = arith.constant 0 : i32
    %2 = arith.cmpi ne, %1, %c0_i32_0 : i32
    scf.if %2 {
      %cst_10 = arith.constant 0.000000e+00 : f32
      %12 = vector.broadcast %cst_10 : f32 to vector<24x256xf32>
      %c0_11 = arith.constant 0 : index
      %c0_12 = arith.constant 0 : index
      %13 = vector.load %arg9[%c0_11, %c0_12] : memref<24x256xf32, #tpu.memory_space<vmem>>, vector<24x256xf32>
      tpu.vector_store %arg9[%c0_11, %c0_12], %12 {strides = array<i32>} : memref<24x256xf32, #tpu.memory_space<vmem>>, vector<24x256xf32>,
    } else {
    }
    %c0 = arith.constant 0 : index
    %c0_1 = arith.constant 0 : index
    %3 = vector.load %arg9[%c0, %c0_1] : memref<24x256xf32, #tpu.memory_space<vmem>>, vector<24x256xf32>
    %c0_2 = arith.constant 0 : index
    %c0_3 = arith.constant 0 : index
    %4 = vector.load %arg3[%c0_2, %c0_3] : memref<24x2048xbf16, #tpu.memory_space<vmem>>, vector<24x2048xbf16>
    %c0_4 = arith.constant 0 : index
    %c0_5 = arith.constant 0 : index
    %5 = vector.load %arg4[%c0_4, %c0_5] : memref<2048x256xbf16, #tpu.memory_space<vmem>>, vector<2048x256xbf16>
    %cst = arith.constant dense<0.000000e+00> : vector<24x256xf32>
    %6 = tpu.matmul %4, %5, %cst {dimension_numbers = #tpu.dot_dimension_numbers<[1], [0], [0], [1], [0, 0, 1, 1], [], []>} : vector<24x2048xbf16>, vector<2048x256xbf16>, vector<24x256xf32> -> vector<24x256xf32>
    %7 = arith.addf %3, %6 : vector<24x256xf32>
    %c0_6 = arith.constant 0 : index
    %c0_7 = arith.constant 0 : index
    %8 = vector.load %arg9[%c0_6, %c0_7] : memref<24x256xf32, #tpu.memory_space<vmem>>, vector<24x256xf32>
    tpu.vector_store %arg9[%c0_6, %c0_7], %7 {strides = array<i32>} : memref<24x256xf32, #tpu.memory_space<vmem>>, vector<24x256xf32>,
    %c0_i32_8 = arith.constant 0 : i32
    %9 = arith.cmpi eq, %arg2, %c0_i32_8 : i32
    %10 = arith.extui %9 : i1 to i32
    %c0_i32_9 = arith.constant 0 : i32
    %11 = arith.cmpi ne, %10, %c0_i32_9 : i32
    scf.if %11 {
      %c0_10 = arith.constant 0 : index
      %c0_11 = arith.constant 0 : index
      %12 = vector.load %arg9[%c0_10, %c0_11] : memref<24x256xf32, #tpu.memory_space<vmem>>, vector<24x256xf32>
      %c0_12 = arith.constant 0 : index
      %c0_13 = arith.constant 0 : index
      %13 = vector.load %arg5[%c0_12, %c0_13] : memref<1x256xf32, #tpu.memory_space<vmem>>, vector<1x256xf32>
      %14 = vector.broadcast %13 : vector<1x256xf32> to vector<24x256xf32>
      %15 = arith.addf %12, %14 : vector<24x256xf32>
      %16 = arith.truncf %15 : vector<24x256xf32> to vector<24x256xbf16>
      %c0_14 = arith.constant 0 : index
      %c0_15 = arith.constant 0 : index
      %17 = vector.load %arg6[%c0_14, %c0_15] : memref<24x256xbf16, #tpu.memory_space<vmem>>, vector<24x256xbf16>
      tpu.vector_store %arg6[%c0_14, %c0_15], %16 {strides = array<i32>} : memref<24x256xbf16, #tpu.memory_space<vmem>>, vector<24x256xbf16>,
      %18 = tpu.iota {dimensions = array<i32: 1>} : vector<1x24xi32>
      %c24_i32 = arith.constant 24 : i32
      %19 = arith.muli %arg0, %c24_i32 : i32
      %20 = vector.broadcast %19 : i32 to vector<1x24xi32>
      %21 = arith.addi %18, %20 : vector<1x24xi32>
      %c18_i32 = arith.constant 18 : i32
      %22 = vector.broadcast %c18_i32 : i32 to vector<1x24xi32>
      %23 = arith.cmpi slt, %21, %22 : vector<1x24xi32>
      %24 = arith.extui %23 : vector<1x24xi1> to vector<1x24xi32>
      %25 = arith.sitofp %24 : vector<1x24xi32> to vector<1x24xf32>
      %cst_16 = arith.constant dense<0.000000e+00> : vector<1x256xf32>
      %26 = tpu.matmul %25, %15, %cst_16 {dimension_numbers = #tpu.dot_dimension_numbers<[1], [0], [0], [1], [0, 0, 1, 1], [], []>} : vector<1x24xf32>, vector<24x256xf32>, vector<1x256xf32> -> vector<1x256xf32>
      %c0_17 = arith.constant 0 : index
      %c0_18 = arith.constant 0 : index
      %c0_19 = arith.constant 0 : index
      %27 = vector.load %arg7[%c0_17, %c0_18, %c0_19] : memref<1x1x256xf32, #tpu.memory_space<vmem>>, vector<1x1x256xf32>
      %28 = vector.shape_cast %27 : vector<1x1x256xf32> to vector<1x256xf32>
      %29 = vector.shape_cast %26 : vector<1x256xf32> to vector<1x1x256xf32>
      tpu.vector_store %arg7[%c0_17, %c0_18, %c0_19], %29 {strides = array<i32>} : memref<1x1x256xf32, #tpu.memory_space<vmem>>, vector<1x1x256xf32>,
      %30 = arith.mulf %15, %15 : vector<24x256xf32>
      %cst_20 = arith.constant dense<0.000000e+00> : vector<1x256xf32>
      %31 = tpu.matmul %25, %30, %cst_20 {dimension_numbers = #tpu.dot_dimension_numbers<[1], [0], [0], [1], [0, 0, 1, 1], [], []>} : vector<1x24xf32>, vector<24x256xf32>, vector<1x256xf32> -> vector<1x256xf32>
      %c0_21 = arith.constant 0 : index
      %c0_22 = arith.constant 0 : index
      %c0_23 = arith.constant 0 : index
      %32 = vector.load %arg8[%c0_21, %c0_22, %c0_23] : memref<1x1x256xf32, #tpu.memory_space<vmem>>, vector<1x1x256xf32>
      %33 = vector.shape_cast %32 : vector<1x1x256xf32> to vector<1x256xf32>
      %34 = vector.shape_cast %31 : vector<1x256xf32> to vector<1x1x256xf32>
      tpu.vector_store %arg8[%c0_21, %c0_22, %c0_23], %34 {strides = array<i32>} : memref<1x1x256xf32, #tpu.memory_space<vmem>>, vector<1x1x256xf32>,
    } else {
    }
    return
  }
  func.func @transform_0(%arg0: i32, %arg1: i32, %arg2: i32) -> (i32, i32) {
    %c0_i32 = arith.constant 0 : i32
    return %arg0, %arg2 : i32, i32
  }
  func.func @transform_1(%arg0: i32, %arg1: i32, %arg2: i32) -> (i32, i32) {
    %c0_i32 = arith.constant 0 : i32
    return %arg2, %arg1 : i32, i32
  }
  func.func @transform_2(%arg0: i32, %arg1: i32, %arg2: i32) -> (i32, i32) {
    %c0_i32 = arith.constant 0 : i32
    %c0_i32_0 = arith.constant 0 : i32
    return %c0_i32, %arg1 : i32, i32
  }
  func.func @transform_3(%arg0: i32, %arg1: i32, %arg2: i32) -> (i32, i32) {
    %c0_i32 = arith.constant 0 : i32
    return %arg0, %arg1 : i32, i32
  }
  func.func @transform_4(%arg0: i32, %arg1: i32, %arg2: i32) -> (i32, i32, i32) {
    %c0_i32 = arith.constant 0 : i32
    %c0_i32_0 = arith.constant 0 : i32
    return %arg0, %c0_i32, %arg1 : i32, i32, i32
  }
  func.func @transform_5(%arg0: i32, %arg1: i32, %arg2: i32) -> (i32, i32, i32) {
    %c0_i32 = arith.constant 0 : i32
    %c0_i32_0 = arith.constant 0 : i32
    return %arg0, %c0_i32, %arg1 : i32, i32, i32
  }
}

module attributes {stable_mosaic.version = 11 : i64} {
  func.func @kernel(%arg0: i32, %arg1: memref<24x256xbf16, #tpu.memory_space<vmem>>, %arg2: memref<1x256xf32, #tpu.memory_space<vmem>>, %arg3: memref<1x256xf32, #tpu.memory_space<vmem>>, %arg4: memref<24x256xbf16, #tpu.memory_space<vmem>>) attributes {dimension_semantics = [#tpu.dimension_semantics<parallel>], iteration_bounds = array<i64: 1>, scalar_prefetch = 0 : i64, scratch_operands = 0 : i64, tpu.core_type = #tpu.core_type<tc>, window_params = [{transform_indices = @transform_0, window_bounds = array<i64: 24, 256>}, {pipeline_mode = #tpu.pipeline_mode<synchronous>, transform_indices = @transform_1, window_bounds = array<i64: 1, 256>}, {pipeline_mode = #tpu.pipeline_mode<synchronous>, transform_indices = @transform_2, window_bounds = array<i64: 1, 256>}, {transform_indices = @transform_3, window_bounds = array<i64: 24, 256>}]} {
    %c0 = arith.constant 0 : index
    %c0_0 = arith.constant 0 : index
    %0 = vector.load %arg1[%c0, %c0_0] : memref<24x256xbf16, #tpu.memory_space<vmem>>, vector<24x256xbf16>
    %1 = arith.extf %0 : vector<24x256xbf16> to vector<24x256xf32>
    %c0_1 = arith.constant 0 : index
    %c0_2 = arith.constant 0 : index
    %2 = vector.load %arg2[%c0_1, %c0_2] : memref<1x256xf32, #tpu.memory_space<vmem>>, vector<1x256xf32>
    %3 = vector.broadcast %2 : vector<1x256xf32> to vector<24x256xf32>
    %4 = arith.mulf %1, %3 : vector<24x256xf32>
    %c0_3 = arith.constant 0 : index
    %c0_4 = arith.constant 0 : index
    %5 = vector.load %arg3[%c0_3, %c0_4] : memref<1x256xf32, #tpu.memory_space<vmem>>, vector<1x256xf32>
    %6 = vector.broadcast %5 : vector<1x256xf32> to vector<24x256xf32>
    %7 = arith.addf %4, %6 : vector<24x256xf32>
    %cst = arith.constant 0.000000e+00 : f32
    %8 = vector.broadcast %cst : f32 to vector<24x256xf32>
    %9 = arith.cmpf oge, %7, %8 : vector<24x256xf32>
    %cst_5 = arith.constant 2.000000e-01 : f32
    %10 = vector.broadcast %cst_5 : f32 to vector<24x256xf32>
    %11 = arith.mulf %10, %7 : vector<24x256xf32>
    %12 = arith.select %9, %7, %11 : vector<24x256xi1>, vector<24x256xf32>
    %13 = arith.truncf %12 : vector<24x256xf32> to vector<24x256xbf16>
    %c0_6 = arith.constant 0 : index
    %c0_7 = arith.constant 0 : index
    %14 = vector.load %arg4[%c0_6, %c0_7] : memref<24x256xbf16, #tpu.memory_space<vmem>>, vector<24x256xbf16>
    tpu.vector_store %arg4[%c0_6, %c0_7], %13 {strides = array<i32>} : memref<24x256xbf16, #tpu.memory_space<vmem>>, vector<24x256xbf16>,
    return
  }
  func.func @transform_0(%arg0: i32) -> (i32, i32) {
    %c0_i32 = arith.constant 0 : i32
    %c0_i32_0 = arith.constant 0 : i32
    return %arg0, %c0_i32 : i32, i32
  }
  func.func @transform_1(%arg0: i32) -> (i32, i32) {
    %c0_i32 = arith.constant 0 : i32
    %c0_i32_0 = arith.constant 0 : i32
    %c0_i32_1 = arith.constant 0 : i32
    return %c0_i32, %c0_i32_0 : i32, i32
  }
  func.func @transform_2(%arg0: i32) -> (i32, i32) {
    %c0_i32 = arith.constant 0 : i32
    %c0_i32_0 = arith.constant 0 : i32
    %c0_i32_1 = arith.constant 0 : i32
    return %c0_i32, %c0_i32_0 : i32, i32
  }
  func.func @transform_3(%arg0: i32) -> (i32, i32) {
    %c0_i32 = arith.constant 0 : i32
    %c0_i32_0 = arith.constant 0 : i32
    return %arg0, %c0_i32 : i32, i32
  }
}

module attributes {stable_mosaic.version = 11 : i64} {
  func.func @kernel(%arg0: i32, %arg1: i32, %arg2: i32, %arg3: memref<32x2048xbf16, #tpu.memory_space<vmem>>, %arg4: memref<2048x512xbf16, #tpu.memory_space<vmem>>, %arg5: memref<1x512xf32, #tpu.memory_space<vmem>>, %arg6: memref<32x512xbf16, #tpu.memory_space<vmem>>, %arg7: memref<1x1x512xf32, #tpu.memory_space<vmem>>, %arg8: memref<1x1x512xf32, #tpu.memory_space<vmem>>, %arg9: memref<32x512xf32, #tpu.memory_space<vmem>>) attributes {dimension_semantics = [#tpu.dimension_semantics<parallel>, #tpu.dimension_semantics<parallel>, #tpu.dimension_semantics<arbitrary>], iteration_bounds = array<i64: 1, 1, 2>, scalar_prefetch = 0 : i64, scratch_operands = 1 : i64, tpu.core_type = #tpu.core_type<tc>, window_params = [{transform_indices = @transform_0, window_bounds = array<i64: 32, 2048>}, {transform_indices = @transform_1, window_bounds = array<i64: 2048, 512>}, {transform_indices = @transform_2, window_bounds = array<i64: 1, 512>}, {transform_indices = @transform_3, window_bounds = array<i64: 32, 512>}, {transform_indices = @transform_4, window_bounds = array<i64: 1, 1, 512>}, {transform_indices = @transform_5, window_bounds = array<i64: 1, 1, 512>}]} {
    %c0_i32 = arith.constant 0 : i32
    %0 = arith.cmpi eq, %arg2, %c0_i32 : i32
    %1 = arith.extui %0 : i1 to i32
    %c0_i32_0 = arith.constant 0 : i32
    %2 = arith.cmpi ne, %1, %c0_i32_0 : i32
    scf.if %2 {
      %cst_9 = arith.constant 0.000000e+00 : f32
      %12 = vector.broadcast %cst_9 : f32 to vector<32x512xf32>
      %c0_10 = arith.constant 0 : index
      %c0_11 = arith.constant 0 : index
      %13 = vector.load %arg9[%c0_10, %c0_11] : memref<32x512xf32, #tpu.memory_space<vmem>>, vector<32x512xf32>
      tpu.vector_store %arg9[%c0_10, %c0_11], %12 {strides = array<i32>} : memref<32x512xf32, #tpu.memory_space<vmem>>, vector<32x512xf32>,
    } else {
    }
    %c0 = arith.constant 0 : index
    %c0_1 = arith.constant 0 : index
    %3 = vector.load %arg9[%c0, %c0_1] : memref<32x512xf32, #tpu.memory_space<vmem>>, vector<32x512xf32>
    %c0_2 = arith.constant 0 : index
    %c0_3 = arith.constant 0 : index
    %4 = vector.load %arg3[%c0_2, %c0_3] : memref<32x2048xbf16, #tpu.memory_space<vmem>>, vector<32x2048xbf16>
    %c0_4 = arith.constant 0 : index
    %c0_5 = arith.constant 0 : index
    %5 = vector.load %arg4[%c0_4, %c0_5] : memref<2048x512xbf16, #tpu.memory_space<vmem>>, vector<2048x512xbf16>
    %cst = arith.constant dense<0.000000e+00> : vector<32x512xf32>
    %6 = tpu.matmul %4, %5, %cst {dimension_numbers = #tpu.dot_dimension_numbers<[1], [0], [0], [1], [0, 0, 1, 1], [], []>} : vector<32x2048xbf16>, vector<2048x512xbf16>, vector<32x512xf32> -> vector<32x512xf32>
    %7 = arith.addf %3, %6 : vector<32x512xf32>
    %c0_6 = arith.constant 0 : index
    %c0_7 = arith.constant 0 : index
    %8 = vector.load %arg9[%c0_6, %c0_7] : memref<32x512xf32, #tpu.memory_space<vmem>>, vector<32x512xf32>
    tpu.vector_store %arg9[%c0_6, %c0_7], %7 {strides = array<i32>} : memref<32x512xf32, #tpu.memory_space<vmem>>, vector<32x512xf32>,
    %c1_i32 = arith.constant 1 : i32
    %9 = arith.cmpi eq, %arg2, %c1_i32 : i32
    %10 = arith.extui %9 : i1 to i32
    %c0_i32_8 = arith.constant 0 : i32
    %11 = arith.cmpi ne, %10, %c0_i32_8 : i32
    scf.if %11 {
      %c0_9 = arith.constant 0 : index
      %c0_10 = arith.constant 0 : index
      %12 = vector.load %arg9[%c0_9, %c0_10] : memref<32x512xf32, #tpu.memory_space<vmem>>, vector<32x512xf32>
      %c0_11 = arith.constant 0 : index
      %c0_12 = arith.constant 0 : index
      %13 = vector.load %arg5[%c0_11, %c0_12] : memref<1x512xf32, #tpu.memory_space<vmem>>, vector<1x512xf32>
      %14 = vector.broadcast %13 : vector<1x512xf32> to vector<32x512xf32>
      %15 = arith.addf %12, %14 : vector<32x512xf32>
      %16 = arith.truncf %15 : vector<32x512xf32> to vector<32x512xbf16>
      %c0_13 = arith.constant 0 : index
      %c0_14 = arith.constant 0 : index
      %17 = vector.load %arg6[%c0_13, %c0_14] : memref<32x512xbf16, #tpu.memory_space<vmem>>, vector<32x512xbf16>
      tpu.vector_store %arg6[%c0_13, %c0_14], %16 {strides = array<i32>} : memref<32x512xbf16, #tpu.memory_space<vmem>>, vector<32x512xbf16>,
      %18 = tpu.iota {dimensions = array<i32: 1>} : vector<1x32xi32>
      %c32_i32 = arith.constant 32 : i32
      %19 = arith.muli %arg0, %c32_i32 : i32
      %20 = vector.broadcast %19 : i32 to vector<1x32xi32>
      %21 = arith.addi %18, %20 : vector<1x32xi32>
      %c32_i32_15 = arith.constant 32 : i32
      %22 = vector.broadcast %c32_i32_15 : i32 to vector<1x32xi32>
      %23 = arith.cmpi slt, %21, %22 : vector<1x32xi32>
      %24 = arith.extui %23 : vector<1x32xi1> to vector<1x32xi32>
      %25 = arith.sitofp %24 : vector<1x32xi32> to vector<1x32xf32>
      %cst_16 = arith.constant dense<0.000000e+00> : vector<1x512xf32>
      %26 = tpu.matmul %25, %15, %cst_16 {dimension_numbers = #tpu.dot_dimension_numbers<[1], [0], [0], [1], [0, 0, 1, 1], [], []>} : vector<1x32xf32>, vector<32x512xf32>, vector<1x512xf32> -> vector<1x512xf32>
      %c0_17 = arith.constant 0 : index
      %c0_18 = arith.constant 0 : index
      %c0_19 = arith.constant 0 : index
      %27 = vector.load %arg7[%c0_17, %c0_18, %c0_19] : memref<1x1x512xf32, #tpu.memory_space<vmem>>, vector<1x1x512xf32>
      %28 = vector.shape_cast %27 : vector<1x1x512xf32> to vector<1x512xf32>
      %29 = vector.shape_cast %26 : vector<1x512xf32> to vector<1x1x512xf32>
      tpu.vector_store %arg7[%c0_17, %c0_18, %c0_19], %29 {strides = array<i32>} : memref<1x1x512xf32, #tpu.memory_space<vmem>>, vector<1x1x512xf32>,
      %30 = arith.mulf %15, %15 : vector<32x512xf32>
      %cst_20 = arith.constant dense<0.000000e+00> : vector<1x512xf32>
      %31 = tpu.matmul %25, %30, %cst_20 {dimension_numbers = #tpu.dot_dimension_numbers<[1], [0], [0], [1], [0, 0, 1, 1], [], []>} : vector<1x32xf32>, vector<32x512xf32>, vector<1x512xf32> -> vector<1x512xf32>
      %c0_21 = arith.constant 0 : index
      %c0_22 = arith.constant 0 : index
      %c0_23 = arith.constant 0 : index
      %32 = vector.load %arg8[%c0_21, %c0_22, %c0_23] : memref<1x1x512xf32, #tpu.memory_space<vmem>>, vector<1x1x512xf32>
      %33 = vector.shape_cast %32 : vector<1x1x512xf32> to vector<1x512xf32>
      %34 = vector.shape_cast %31 : vector<1x512xf32> to vector<1x1x512xf32>
      tpu.vector_store %arg8[%c0_21, %c0_22, %c0_23], %34 {strides = array<i32>} : memref<1x1x512xf32, #tpu.memory_space<vmem>>, vector<1x1x512xf32>,
    } else {
    }
    return
  }
  func.func @transform_0(%arg0: i32, %arg1: i32, %arg2: i32) -> (i32, i32) {
    %c0_i32 = arith.constant 0 : i32
    return %arg0, %arg2 : i32, i32
  }
  func.func @transform_1(%arg0: i32, %arg1: i32, %arg2: i32) -> (i32, i32) {
    %c0_i32 = arith.constant 0 : i32
    return %arg2, %arg1 : i32, i32
  }
  func.func @transform_2(%arg0: i32, %arg1: i32, %arg2: i32) -> (i32, i32) {
    %c0_i32 = arith.constant 0 : i32
    %c0_i32_0 = arith.constant 0 : i32
    return %c0_i32, %arg1 : i32, i32
  }
  func.func @transform_3(%arg0: i32, %arg1: i32, %arg2: i32) -> (i32, i32) {
    %c0_i32 = arith.constant 0 : i32
    return %arg0, %arg1 : i32, i32
  }
  func.func @transform_4(%arg0: i32, %arg1: i32, %arg2: i32) -> (i32, i32, i32) {
    %c0_i32 = arith.constant 0 : i32
    %c0_i32_0 = arith.constant 0 : i32
    return %arg0, %c0_i32, %arg1 : i32, i32, i32
  }
  func.func @transform_5(%arg0: i32, %arg1: i32, %arg2: i32) -> (i32, i32, i32) {
    %c0_i32 = arith.constant 0 : i32
    %c0_i32_0 = arith.constant 0 : i32
    return %arg0, %c0_i32, %arg1 : i32, i32, i32
  }
}

module attributes {stable_mosaic.version = 11 : i64} {
  func.func @kernel(%arg0: i32, %arg1: memref<32x512xbf16, #tpu.memory_space<vmem>>, %arg2: memref<1x512xf32, #tpu.memory_space<vmem>>, %arg3: memref<1x512xf32, #tpu.memory_space<vmem>>, %arg4: memref<32x512xbf16, #tpu.memory_space<vmem>>) attributes {dimension_semantics = [#tpu.dimension_semantics<parallel>], iteration_bounds = array<i64: 1>, scalar_prefetch = 0 : i64, scratch_operands = 0 : i64, tpu.core_type = #tpu.core_type<tc>, window_params = [{transform_indices = @transform_0, window_bounds = array<i64: 32, 512>}, {pipeline_mode = #tpu.pipeline_mode<synchronous>, transform_indices = @transform_1, window_bounds = array<i64: 1, 512>}, {pipeline_mode = #tpu.pipeline_mode<synchronous>, transform_indices = @transform_2, window_bounds = array<i64: 1, 512>}, {transform_indices = @transform_3, window_bounds = array<i64: 32, 512>}]} {
    %c0 = arith.constant 0 : index
    %c0_0 = arith.constant 0 : index
    %0 = vector.load %arg1[%c0, %c0_0] : memref<32x512xbf16, #tpu.memory_space<vmem>>, vector<32x512xbf16>
    %1 = arith.extf %0 : vector<32x512xbf16> to vector<32x512xf32>
    %c0_1 = arith.constant 0 : index
    %c0_2 = arith.constant 0 : index
    %2 = vector.load %arg2[%c0_1, %c0_2] : memref<1x512xf32, #tpu.memory_space<vmem>>, vector<1x512xf32>
    %3 = vector.broadcast %2 : vector<1x512xf32> to vector<32x512xf32>
    %4 = arith.mulf %1, %3 : vector<32x512xf32>
    %c0_3 = arith.constant 0 : index
    %c0_4 = arith.constant 0 : index
    %5 = vector.load %arg3[%c0_3, %c0_4] : memref<1x512xf32, #tpu.memory_space<vmem>>, vector<1x512xf32>
    %6 = vector.broadcast %5 : vector<1x512xf32> to vector<32x512xf32>
    %7 = arith.addf %4, %6 : vector<32x512xf32>
    %cst = arith.constant 0.000000e+00 : f32
    %8 = vector.broadcast %cst : f32 to vector<32x512xf32>
    %9 = arith.cmpf oge, %7, %8 : vector<32x512xf32>
    %cst_5 = arith.constant 2.000000e-01 : f32
    %10 = vector.broadcast %cst_5 : f32 to vector<32x512xf32>
    %11 = arith.mulf %10, %7 : vector<32x512xf32>
    %12 = arith.select %9, %7, %11 : vector<32x512xi1>, vector<32x512xf32>
    %13 = arith.truncf %12 : vector<32x512xf32> to vector<32x512xbf16>
    %c0_6 = arith.constant 0 : index
    %c0_7 = arith.constant 0 : index
    %14 = vector.load %arg4[%c0_6, %c0_7] : memref<32x512xbf16, #tpu.memory_space<vmem>>, vector<32x512xbf16>
    tpu.vector_store %arg4[%c0_6, %c0_7], %13 {strides = array<i32>} : memref<32x512xbf16, #tpu.memory_space<vmem>>, vector<32x512xbf16>,
    return
  }
  func.func @transform_0(%arg0: i32) -> (i32, i32) {
    %c0_i32 = arith.constant 0 : i32
    %c0_i32_0 = arith.constant 0 : i32
    return %arg0, %c0_i32 : i32, i32
  }
  func.func @transform_1(%arg0: i32) -> (i32, i32) {
    %c0_i32 = arith.constant 0 : i32
    %c0_i32_0 = arith.constant 0 : i32
    %c0_i32_1 = arith.constant 0 : i32
    return %c0_i32, %c0_i32_0 : i32, i32
  }
  func.func @transform_2(%arg0: i32) -> (i32, i32) {
    %c0_i32 = arith.constant 0 : i32
    %c0_i32_0 = arith.constant 0 : i32
    %c0_i32_1 = arith.constant 0 : i32
    return %c0_i32, %c0_i32_0 : i32, i32
  }
  func.func @transform_3(%arg0: i32) -> (i32, i32) {
    %c0_i32 = arith.constant 0 : i32
    %c0_i32_0 = arith.constant 0 : i32
    return %arg0, %c0_i32 : i32, i32
  }
}

module attributes {stable_mosaic.version = 11 : i64} {
  func.func @kernel(%arg0: i32, %arg1: i32, %arg2: i32, %arg3: memref<56x2048xbf16, #tpu.memory_space<vmem>>, %arg4: memref<2048x128xbf16, #tpu.memory_space<vmem>>, %arg5: memref<1x128xf32, #tpu.memory_space<vmem>>, %arg6: memref<56x128xbf16, #tpu.memory_space<vmem>>, %arg7: memref<56x128xf32, #tpu.memory_space<vmem>>) attributes {dimension_semantics = [#tpu.dimension_semantics<parallel>, #tpu.dimension_semantics<parallel>, #tpu.dimension_semantics<arbitrary>], iteration_bounds = array<i64: 1, 1, 4>, scalar_prefetch = 0 : i64, scratch_operands = 1 : i64, tpu.core_type = #tpu.core_type<tc>, window_params = [{transform_indices = @transform_0, window_bounds = array<i64: 56, 2048>}, {transform_indices = @transform_1, window_bounds = array<i64: 2048, 128>}, {transform_indices = @transform_2, window_bounds = array<i64: 1, 128>}, {transform_indices = @transform_3, window_bounds = array<i64: 56, 128>}]} {
    %c0_i32 = arith.constant 0 : i32
    %0 = arith.cmpi eq, %arg2, %c0_i32 : i32
    %1 = arith.extui %0 : i1 to i32
    %c0_i32_0 = arith.constant 0 : i32
    %2 = arith.cmpi ne, %1, %c0_i32_0 : i32
    scf.if %2 {
      %cst_9 = arith.constant 0.000000e+00 : f32
      %12 = vector.broadcast %cst_9 : f32 to vector<56x128xf32>
      %c0_10 = arith.constant 0 : index
      %c0_11 = arith.constant 0 : index
      %13 = vector.load %arg7[%c0_10, %c0_11] : memref<56x128xf32, #tpu.memory_space<vmem>>, vector<56x128xf32>
      tpu.vector_store %arg7[%c0_10, %c0_11], %12 {strides = array<i32>} : memref<56x128xf32, #tpu.memory_space<vmem>>, vector<56x128xf32>,
    } else {
    }
    %c0 = arith.constant 0 : index
    %c0_1 = arith.constant 0 : index
    %3 = vector.load %arg7[%c0, %c0_1] : memref<56x128xf32, #tpu.memory_space<vmem>>, vector<56x128xf32>
    %c0_2 = arith.constant 0 : index
    %c0_3 = arith.constant 0 : index
    %4 = vector.load %arg3[%c0_2, %c0_3] : memref<56x2048xbf16, #tpu.memory_space<vmem>>, vector<56x2048xbf16>
    %c0_4 = arith.constant 0 : index
    %c0_5 = arith.constant 0 : index
    %5 = vector.load %arg4[%c0_4, %c0_5] : memref<2048x128xbf16, #tpu.memory_space<vmem>>, vector<2048x128xbf16>
    %cst = arith.constant dense<0.000000e+00> : vector<56x128xf32>
    %6 = tpu.matmul %4, %5, %cst {dimension_numbers = #tpu.dot_dimension_numbers<[1], [0], [0], [1], [0, 0, 1, 1], [], []>} : vector<56x2048xbf16>, vector<2048x128xbf16>, vector<56x128xf32> -> vector<56x128xf32>
    %7 = arith.addf %3, %6 : vector<56x128xf32>
    %c0_6 = arith.constant 0 : index
    %c0_7 = arith.constant 0 : index
    %8 = vector.load %arg7[%c0_6, %c0_7] : memref<56x128xf32, #tpu.memory_space<vmem>>, vector<56x128xf32>
    tpu.vector_store %arg7[%c0_6, %c0_7], %7 {strides = array<i32>} : memref<56x128xf32, #tpu.memory_space<vmem>>, vector<56x128xf32>,
    %c3_i32 = arith.constant 3 : i32
    %9 = arith.cmpi eq, %arg2, %c3_i32 : i32
    %10 = arith.extui %9 : i1 to i32
    %c0_i32_8 = arith.constant 0 : i32
    %11 = arith.cmpi ne, %10, %c0_i32_8 : i32
    scf.if %11 {
      %c0_9 = arith.constant 0 : index
      %c0_10 = arith.constant 0 : index
      %12 = vector.load %arg7[%c0_9, %c0_10] : memref<56x128xf32, #tpu.memory_space<vmem>>, vector<56x128xf32>
      %c0_11 = arith.constant 0 : index
      %c0_12 = arith.constant 0 : index
      %13 = vector.load %arg5[%c0_11, %c0_12] : memref<1x128xf32, #tpu.memory_space<vmem>>, vector<1x128xf32>
      %14 = vector.broadcast %13 : vector<1x128xf32> to vector<56x128xf32>
      %15 = arith.addf %12, %14 : vector<56x128xf32>
      %16 = arith.truncf %15 : vector<56x128xf32> to vector<56x128xbf16>
      %c0_13 = arith.constant 0 : index
      %c0_14 = arith.constant 0 : index
      %17 = vector.load %arg6[%c0_13, %c0_14] : memref<56x128xbf16, #tpu.memory_space<vmem>>, vector<56x128xbf16>
      tpu.vector_store %arg6[%c0_13, %c0_14], %16 {strides = array<i32>} : memref<56x128xbf16, #tpu.memory_space<vmem>>, vector<56x128xbf16>,
    } else {
    }
    return
  }
  func.func @transform_0(%arg0: i32, %arg1: i32, %arg2: i32) -> (i32, i32) {
    %c0_i32 = arith.constant 0 : i32
    return %arg0, %arg2 : i32, i32
  }
  func.func @transform_1(%arg0: i32, %arg1: i32, %arg2: i32) -> (i32, i32) {
    %c0_i32 = arith.constant 0 : i32
    return %arg2, %arg1 : i32, i32
  }
  func.func @transform_2(%arg0: i32, %arg1: i32, %arg2: i32) -> (i32, i32) {
    %c0_i32 = arith.constant 0 : i32
    %c0_i32_0 = arith.constant 0 : i32
    return %c0_i32, %arg1 : i32, i32
  }
  func.func @transform_3(%arg0: i32, %arg1: i32, %arg2: i32) -> (i32, i32) {
    %c0_i32 = arith.constant 0 : i32
    return %arg0, %arg1 : i32, i32
  }
}

</mosaic_0001>

<bundles_post_ra>
// kernel: _lambda_.8
= control target key start
LH: loop header
LB: loop body
LE: loop exit
PB: predicated region body
PF: predicated region fallthrough
CT: control target
= control target key end

     0   :  { %v834_v0 = vmov 0.0   ;;  %vm835_vm0 = vmmov 0   ;;  %s1010_s1 = inlined_call_operand.vmem [shape: bf16[128,128], index: 1, kind: input, shape index: {}]   ;;  %s1011_s0 = inlined_call_operand.vmem [shape: bf16[168,128], index: 0, kind: input, shape index: {}]   ;;  %s1012_s2 = inlined_call_operand.vmem [shape: f32[1,128], index: 2, kind: input, shape index: {}]   ;;  %s1013_s3 = inlined_call_operand.vmem [shape: bf16[168,128], index: 3, kind: output, shape index: {}]  }
   0x1   :  { %737 = vmatprep.subr.bf16.mxu0 %v834_v0  ;;  %v815_v1 = vld [vmem:[%s1010_s1] sm:$0xff]   ;;  %797 = vmatprep.subr.bf16.mxu1 %v834_v0  ;;  %v816_v2 = vld [vmem:[%s1010_s1 + $0x8] sm:$0xff]   ;;  %v817_v3 = vld [vmem:[%s1010_s1 + $0x10] sm:$0xff]  }
   0x2   :  { %753 = vmatprep.mubr.msk.bf16.mxu0 %vm835_vm0, %v834_v0  ;;  %777 = vmatprep.mubr.msk.bf16.mxu1 %vm835_vm0, %v834_v0  ;;  %v818_v4 = vld [vmem:[%s1010_s1 + $0x18] sm:$0xff]   ;;  %v819_v5 = vld [vmem:[%s1010_s1 + $0x20] sm:$0xff]   ;;  %v820_v6 = vld [vmem:[%s1010_s1 + $0x28] sm:$0xff]  }
   0x3   :  { %738 = vmatpush3.bf16.msra.mxu0 %v815_v1  ;;  %805 = vmatpush3.bf16.msra.mxu1 %v815_v1  ;;  %v821_v7 = vld [vmem:[%s1010_s1 + $0x30] sm:$0xff]   ;;  %v822_v8 = vld [vmem:[%s1010_s1 + $0x38] sm:$0xff]   ;;  %v823_v9 = vld [vmem:[%s1011_s0] sm:$0xff]  }
   0x4   :  { %739 = vmatprep.subr.bf16.mxu0 %v834_v0  ;;  %798 = vmatprep.subr.bf16.mxu1 %v834_v0  ;;  %v824_v10 = vld [vmem:[%s1011_s0 + $0x30] sm:$0xff]   ;;  %v825_v11 = vld [vmem:[%s1011_s0 + $0x8] sm:$0xff]   ;;  %v826_v12 = vld [vmem:[%s1011_s0 + $0x38] sm:$0xff]  }
   0x5   :  { %v827_v13 = vld [vmem:[%s1011_s0 + $0x10] sm:$0xff]   ;;  %v828_v14 = vld [vmem:[%s1011_s0 + $0x40] sm:$0xff]   ;;  %v829_v15 = vld [vmem:[%s1011_s0 + $0x18] sm:$0xff]  }
   0x6   :  { %v830_v16 = vld [vmem:[%s1011_s0 + $0x48] sm:$0xff]   ;;  %v831_v17 = vld [vmem:[%s1011_s0 + $0x20] sm:$0xff]   ;;  %v832_v18 = vld [vmem:[%s1011_s0 + $0x50] ss:$0 sps:$4 sm:$0xff]  }
   0x7   :  { %740 = vmatpush3.bf16.msra.mxu0 %v816_v2  ;;  %806 = vmatpush3.bf16.msra.mxu1 %v816_v2  ;;  %v833_v19 = vld [vmem:[%s1011_s0 + $0x28] sm:$0xff]   ;;  %v954_v20 = vld [vmem:[%s1012_s2] ss:$0 sm:$0xff] }
   0x8   :  { %741 = vmatprep.subr.bf16.mxu0 %v834_v0  ;;  %799 = vmatprep.subr.bf16.mxu1 %v834_v0 }
   0xb   :  { %742 = vmatpush3.bf16.msra.mxu0 %v817_v3  ;;  %807 = vmatpush3.bf16.msra.mxu1 %v817_v3 }
   0xc   :  { %743 = vmatprep.subr.bf16.mxu0 %v834_v0  ;;  %800 = vmatprep.subr.bf16.mxu1 %v834_v0 }
   0xf   :  { %744 = vmatpush3.bf16.msra.mxu0 %v818_v4  ;;  %808 = vmatpush3.bf16.msra.mxu1 %v818_v4 }
  0x10   :  { %745 = vmatprep.subr.bf16.mxu0 %v834_v0  ;;  %801 = vmatprep.subr.bf16.mxu1 %v834_v0 }
  0x13   :  { %746 = vmatpush3.bf16.msra.mxu0 %v819_v5  ;;  %809 = vmatpush3.bf16.msra.mxu1 %v819_v5 }
  0x14   :  { %747 = vmatprep.subr.bf16.mxu0 %v834_v0  ;;  %802 = vmatprep.subr.bf16.mxu1 %v834_v0 }
  0x17   :  { %748 = vmatpush3.bf16.msra.mxu0 %v820_v6  ;;  %810 = vmatpush3.bf16.msra.mxu1 %v820_v6 }
  0x18   :  { %749 = vmatprep.subr.bf16.mxu0 %v834_v0  ;;  %803 = vmatprep.subr.bf16.mxu1 %v834_v0 }
  0x1b   :  { %750 = vmatpush3.bf16.msra.mxu0 %v821_v7  ;;  %811 = vmatpush3.bf16.msra.mxu1 %v821_v7 }
  0x1c   :  { %751 = vmatprep.subr.bf16.mxu0 %v834_v0  ;;  %804 = vmatprep.subr.bf16.mxu1 %v834_v0 }
  0x1f   :  { %752 = vmatpush3.bf16.msra.mxu0 %v822_v8  ;;  %812 = vmatpush3.bf16.msra.mxu1 %v822_v8 }
  0x22   :  { %754 = vmatmul.mubr.bf16.vlgmr.msra.gmra.mrb[0].mxu0 %v823_v9  ;;  %778 = vmatmul.mubr.bf16.vlgmr.msra.gmra.mrb[0].mxu1 %v824_v10 }
  0x23   :  { %757 = vmatprep.mubr.msk.bf16.mxu0 %vm835_vm0, %v834_v0  ;;  %781 = vmatprep.mubr.msk.bf16.mxu1 %vm835_vm0, %v834_v0 }
  0x2a   :  { %758 = vmatmul.mubr.bf16.gmra.mrb[4].mxu0 %v825_v11  ;;  %782 = vmatmul.mubr.bf16.gmra.mrb[4].mxu1 %v826_v12 }
  0x2b   :  { %761 = vmatprep.mubr.msk.bf16.mxu0 %vm835_vm0, %v834_v0  ;;  %785 = vmatprep.mubr.msk.bf16.mxu1 %vm835_vm0, %v834_v0 }
  0x32   :  { %762 = vmatmul.mubr.bf16.gmra.mrb[8].mxu0 %v827_v13  ;;  %786 = vmatmul.mubr.bf16.gmra.mrb[8].mxu1 %v828_v14 }
  0x33   :  { %765 = vmatprep.mubr.msk.bf16.mxu0 %vm835_vm0, %v834_v0  ;;  %789 = vmatprep.mubr.msk.bf16.mxu1 %vm835_vm0, %v834_v0 }
  0x3a   :  { %766 = vmatmul.mubr.bf16.gmra.mrb[12].mxu0 %v829_v15  ;;  %790 = vmatmul.mubr.bf16.gmra.mrb[12].mxu1 %v830_v16 }
  0x3b   :  { %769 = vmatprep.mubr.msk.bf16.mxu0 %vm835_vm0, %v834_v0  ;;  %793 = vmatprep.mubr.msk.bf16.mxu1 %vm835_vm0, %v834_v0 }
  0x42   :  { %770 = vmatmul.mubr.bf16.gmra.mrb[16].mxu0 %v831_v17  ;;  %794 = vmatmul.mubr.bf16.gmra.mrb[16].mxu1 %v832_v18 }
  0x43   :  { %773 = vmatprep.mubr.msk.bf16.mxu0 %vm835_vm0, %v834_v0 }
  0x4a   :  { %774 = vmatmul.mubr.bf16.gmra.mrb[20].mxu0 %v833_v19 }
  0xf5   :  { %v244_v21 = vpop.f32.mrb[0].mxu0  ;;  %v292_v22 = vpop.f32.mrb[0].mxu1 }
  0xf6   :  { %v403_v23 = vadd.f32 %v954_v20, %v244_v21  ;;  %v755_v24 = vpop.f32.mrb[1].mxu0  ;;  %v415_v25 = vadd.f32 %v954_v20, %v292_v22  ;;  %v779_v26 = vpop.f32.mrb[1].mxu1 }
  0xf7   :  { %v247_v27 = vpop.f32.mrb[2].mxu0  ;;  %v295_v28 = vpop.f32.mrb[2].mxu1 }
  0xf8   :  { %v445_v29 = vmul.f32 0.2, %v403_v23  ;;  %v404_v30 = vadd.f32 %v954_v20, %v247_v27  ;;  %v756_v31 = vpop.f32.mrb[3].mxu0  ;;  %vm436_vm1 = vcmp.ge.f32.partialorder %v415_v25, 0.0  ;;  %v780_v32 = vpop.f32.mrb[3].mxu1  ;;  %vm424_vm2 = vcmp.ge.f32.partialorder %v403_v23, 0.0 }
  0xf9   :  { %v457_v33 = vmul.f32 0.2, %v415_v25  ;;  %v416_v34 = vadd.f32 %v954_v20, %v295_v28 }
  0xfa   :  { %vm425_vm3 = vcmp.ge.f32.partialorder %v404_v30, 0.0  ;;  %v446_v35 = vmul.f32 0.2, %v404_v30  ;;  %v466_v38 = vsel %vm424_vm2, %v403_v23, %v445_v29 }
  0xfb   :  { %v478_v36 = vsel %vm436_vm1, %v415_v25, %v457_v33  ;;  %vm437_vm4 = vcmp.ge.f32.partialorder %v416_v34, 0.0  ;;  %v458_v37 = vmul.f32 0.2, %v416_v34 }
  0xfc   :  { %v467_v39 = vsel %vm425_vm3, %v404_v30, %v446_v35 }
  0xfd   :  { %v662_v40 = vpack.c.bf16 %v467_v39, %v466_v38  ;;  %v252_v41 = vpop.f32.mrb[4].mxu0  ;;  %v479_v42 = vsel %vm437_vm4, %v416_v34, %v458_v37  ;;  %v300_v43 = vpop.f32.mrb[4].mxu1 }
  0xfe   :  { %v405_v44 = vadd.f32 %v954_v20, %v252_v41  ;;  %v692_v45 = vpack.c.bf16 %v479_v42, %v478_v36  ;;  %v759_v46 = vpop.f32.mrb[5].mxu0  ;;  %v417_v47 = vadd.f32 %v954_v20, %v300_v43  ;;  %v783_v48 = vpop.f32.mrb[5].mxu1 }
  0xff   :  { %663 = vst [vmem:[%s1013_s3] sm:$0xff] %v662_v40   ;;  %v255_v49 = vpop.f32.mrb[6].mxu0  ;;  %v303_v50 = vpop.f32.mrb[6].mxu1 }
 0x100   :  { %v447_v51 = vmul.f32 0.2, %v405_v44  ;;  %714 = vst [vmem:[%s1013_s3 + $0x30] sm:$0xff] %v692_v45   ;;  %v406_v52 = vadd.f32 %v954_v20, %v255_v49  ;;  %v760_v53 = vpop.f32.mrb[7].mxu0  ;;  %vm438_vm5 = vcmp.ge.f32.partialorder %v417_v47, 0.0  ;;  %v784_v54 = vpop.f32.mrb[7].mxu1  ;;  %v418_v56 = vadd.f32 %v954_v20, %v303_v50 }
 0x101   :  { %vm426_vm6 = vcmp.ge.f32.partialorder %v405_v44, 0.0  ;;  %v459_v55 = vmul.f32 0.2, %v417_v47 }
 0x102   :  { %vm427_vm7 = vcmp.ge.f32.partialorder %v406_v52, 0.0  ;;  %v448_v57 = vmul.f32 0.2, %v406_v52  ;;  %vm439_vm8 = vcmp.ge.f32.partialorder %v418_v56, 0.0  ;;  %v460_v59 = vmul.f32 0.2, %v418_v56 }
 0x103   :  { %v480_v58 = vsel %vm438_vm5, %v417_v47, %v459_v55  ;;  %v468_v60 = vsel %vm426_vm6, %v405_v44, %v447_v51 }
 0x104   :  { %v469_v61 = vsel %vm427_vm7, %v406_v52, %v448_v57  ;;  %v481_v0 = vsel %vm439_vm8, %v418_v56, %v460_v59 }
 0x105   :  { %v667_v62 = vpack.c.bf16 %v469_v61, %v468_v60  ;;  %v260_v63 = vpop.f32.mrb[8].mxu0  ;;  %v308_v1 = vpop.f32.mrb[8].mxu1  ;;  %v697_v3 = vpack.c.bf16 %v481_v0, %v480_v58 }
 0x106   :  { %v407_v2 = vadd.f32 %v954_v20, %v260_v63  ;;  %v763_v4 = vpop.f32.mrb[9].mxu0  ;;  %v419_v5 = vadd.f32 %v954_v20, %v308_v1  ;;  %v787_v6 = vpop.f32.mrb[9].mxu1 }
 0x107   :  { %709 = vst [vmem:[%s1013_s3 + $0x8] sm:$0xff] %v667_v62   ;;  %v263_v7 = vpop.f32.mrb[10].mxu0  ;;  %v311_v8 = vpop.f32.mrb[10].mxu1  ;;  %715 = vst [vmem:[%s1013_s3 + $0x38] sm:$0xff] %v697_v3  }
 0x108   :  { %v449_v9 = vmul.f32 0.2, %v407_v2  ;;  %v408_v10 = vadd.f32 %v954_v20, %v263_v7  ;;  %v764_v11 = vpop.f32.mrb[11].mxu0  ;;  %vm440_vm9 = vcmp.ge.f32.partialorder %v419_v5, 0.0  ;;  %v788_v12 = vpop.f32.mrb[11].mxu1  ;;  %vm428_vm10 = vcmp.ge.f32.partialorder %v407_v2, 0.0 }
 0x109   :  { %v461_v13 = vmul.f32 0.2, %v419_v5  ;;  %v420_v14 = vadd.f32 %v954_v20, %v311_v8 }
 0x10a   :  { %vm429_vm11 = vcmp.ge.f32.partialorder %v408_v10, 0.0  ;;  %v450_v15 = vmul.f32 0.2, %v408_v10  ;;  %v470_v18 = vsel %vm428_vm10, %v407_v2, %v449_v9 }
 0x10b   :  { %v482_v16 = vsel %vm440_vm9, %v419_v5, %v461_v13  ;;  %vm441_vm12 = vcmp.ge.f32.partialorder %v420_v14, 0.0  ;;  %v462_v17 = vmul.f32 0.2, %v420_v14 }
 0x10c   :  { %v471_v19 = vsel %vm429_vm11, %v408_v10, %v450_v15 }
 0x10d   :  { %v672_v21 = vpack.c.bf16 %v471_v19, %v470_v18  ;;  %v268_v22 = vpop.f32.mrb[12].mxu0  ;;  %v483_v23 = vsel %vm441_vm12, %v420_v14, %v462_v17  ;;  %v316_v24 = vpop.f32.mrb[12].mxu1 }
 0x10e   :  { %v409_v25 = vadd.f32 %v954_v20, %v268_v22  ;;  %v702_v26 = vpack.c.bf16 %v483_v23, %v482_v16  ;;  %v767_v27 = vpop.f32.mrb[13].mxu0  ;;  %v421_v28 = vadd.f32 %v954_v20, %v316_v24  ;;  %v791_v29 = vpop.f32.mrb[13].mxu1 }
 0x10f   :  { %710 = vst [vmem:[%s1013_s3 + $0x10] sm:$0xff] %v672_v21   ;;  %v271_v30 = vpop.f32.mrb[14].mxu0  ;;  %v319_v31 = vpop.f32.mrb[14].mxu1 }
 0x110   :  { %v451_v32 = vmul.f32 0.2, %v409_v25  ;;  %716 = vst [vmem:[%s1013_s3 + $0x40] sm:$0xff] %v702_v26   ;;  %v410_v33 = vadd.f32 %v954_v20, %v271_v30  ;;  %v768_v34 = vpop.f32.mrb[15].mxu0  ;;  %vm442_vm13 = vcmp.ge.f32.partialorder %v421_v28, 0.0  ;;  %v792_v35 = vpop.f32.mrb[15].mxu1  ;;  %v422_v37 = vadd.f32 %v954_v20, %v319_v31 }
 0x111   :  { %vm430_vm14 = vcmp.ge.f32.partialorder %v409_v25, 0.0  ;;  %v463_v36 = vmul.f32 0.2, %v421_v28 }
 0x112   :  { %vm431_vm15 = vcmp.ge.f32.partialorder %v410_v33, 0.0  ;;  %v452_v38 = vmul.f32 0.2, %v410_v33  ;;  %vm443_vm0 = vcmp.ge.f32.partialorder %v422_v37, 0.0  ;;  %v464_v40 = vmul.f32 0.2, %v422_v37 }
 0x113   :  { %v484_v39 = vsel %vm442_vm13, %v421_v28, %v463_v36  ;;  %v472_v41 = vsel %vm430_vm14, %v409_v25, %v451_v32 }
 0x114   :  { %v473_v42 = vsel %vm431_vm15, %v410_v33, %v452_v38  ;;  %v485_v45 = vsel %vm443_vm0, %v422_v37, %v464_v40 }
 0x115   :  { %v677_v43 = vpack.c.bf16 %v473_v42, %v472_v41  ;;  %v276_v44 = vpop.f32.mrb[16].mxu0  ;;  %v324_v46 = vpop.f32.mrb[16].mxu1  ;;  %v707_v48 = vpack.c.bf16 %v485_v45, %v484_v39 }
 0x116   :  { %v411_v47 = vadd.f32 %v954_v20, %v276_v44  ;;  %v771_v49 = vpop.f32.mrb[17].mxu0  ;;  %v423_v50 = vadd.f32 %v954_v20, %v324_v46  ;;  %v795_v51 = vpop.f32.mrb[17].mxu1 }
 0x117   :  { %711 = vst [vmem:[%s1013_s3 + $0x18] sm:$0xff] %v677_v43   ;;  %v279_v52 = vpop.f32.mrb[18].mxu0  ;;  %v327_v53 = vpop.f32.mrb[18].mxu1  ;;  %717 = vst [vmem:[%s1013_s3 + $0x48] sm:$0xff] %v707_v48  }
 0x118   :  { %v453_v54 = vmul.f32 0.2, %v411_v47  ;;  %v412_v55 = vadd.f32 %v954_v20, %v279_v52  ;;  %v772_v56 = vpop.f32.mrb[19].mxu0  ;;  %vm444_vm1 = vcmp.ge.f32.partialorder %v423_v50, 0.0  ;;  %v796_v57 = vpop.f32.mrb[19].mxu1  ;;  %vm432_vm2 = vcmp.ge.f32.partialorder %v411_v47, 0.0 }
 0x119   :  { %v465_v58 = vmul.f32 0.2, %v423_v50 }
 0x11a   :  { %vm433_vm3 = vcmp.ge.f32.partialorder %v412_v55, 0.0  ;;  %v454_v59 = vmul.f32 0.2, %v412_v55  ;;  %v474_v61 = vsel %vm432_vm2, %v411_v47, %v453_v54 }
 0x11b   :  { %v486_v60 = vsel %vm444_vm1, %v423_v50, %v465_v58 }
 0x11c   :  { %v475_v62 = vsel %vm433_vm3, %v412_v55, %v454_v59  ;;  %v658_v63 = vpack.c.bf16 %v486_v60, %v486_v60 }
 0x11d   :  { %v682_v0 = vpack.c.bf16 %v475_v62, %v474_v61  ;;  %v284_v1 = vpop.f32.mrb[20].mxu0 }
 0x11e   :  { %592 = vst [vmem:[%s1013_s3 + $0x50] sm:$0xf] %v658_v63  ;;  %v413_v2 = vadd.f32 %v954_v20, %v284_v1  ;;  %v775_v3 = vpop.f32.mrb[21].mxu0 }
 0x11f   :  { %712 = vst [vmem:[%s1013_s3 + $0x20] sm:$0xff] %v682_v0   ;;  %v287_v4 = vpop.f32.mrb[22].mxu0 }
 0x120   :  { %v455_v5 = vmul.f32 0.2, %v413_v2  ;;  %v414_v6 = vadd.f32 %v954_v20, %v287_v4  ;;  %v776_v7 = vpop.f32.mrb[23].mxu0  ;;  %vm434_vm4 = vcmp.ge.f32.partialorder %v413_v2, 0.0 }
 0x122   :  { %vm435_vm5 = vcmp.ge.f32.partialorder %v414_v6, 0.0  ;;  %v456_v8 = vmul.f32 0.2, %v414_v6  ;;  %v476_v9 = vsel %vm434_vm4, %v413_v2, %v455_v5 }
 0x124   :  { %v477_v10 = vsel %vm435_vm5, %v414_v6, %v456_v8 }
 0x125   :  { %v687_v11 = vpack.c.bf16 %v477_v10, %v476_v9 }
 0x127   :  { %713 = vst [vmem:[%s1013_s3 + $0x28] sm:$0xff] %v687_v11  }

// kernel: _lambda_.10
= control target key start
LH: loop header
LB: loop body
LE: loop exit
PB: predicated region body
PF: predicated region fallthrough
CT: control target
= control target key end

     0   :  { %s214_s0 = inlined_call_operand.vmem [shape: bf16[56,128], index: 0, kind: input, shape index: {}]   ;;  %s215_s1 = inlined_call_operand.vmem [shape: f32[1,128], index: 1, kind: input, shape index: {}]   ;;  %s216_s2 = inlined_call_operand.vmem [shape: f32[1,128], index: 2, kind: input, shape index: {}]   ;;  %s217_s3 = inlined_call_operand.vmem [shape: bf16[56,128], index: 3, kind: output, shape index: {}]  }
   0x1   :  { %v134_v0 = vld [vmem:[%s214_s0] sm:$0xff]   ;;  %v160_v4 = vld [vmem:[%s214_s0 + $0x8] sm:$0xff]   ;;  %v161_v5 = vld [vmem:[%s214_s0 + $0x10] sm:$0xff]  }
   0x2   :  { %v117_v1 = vld [vmem:[%s215_s1] ss:$0 sm:$0xff]  ;;  %v135_v2 = vunpack.c.l.bf16 %v134_v0  ;;  %v136_v3 = vunpack.c.h.bf16 %v134_v0  ;;  %v20_v6 = vld [vmem:[%s214_s0 + $0x18] sm:$0xf]  ;;  %v139_v8 = vunpack.c.l.bf16 %v160_v4  ;;  %v140_v9 = vunpack.c.h.bf16 %v160_v4 }
   0x3   :  { %v118_v7 = vld [vmem:[%s216_s2] ss:$0 sm:$0xff]  ;;  %v143_v10 = vunpack.c.l.bf16 %v161_v5  ;;  %v144_v11 = vunpack.c.h.bf16 %v161_v5  ;;  %v27_v14 = vunpack.c.l.bf16 %v20_v6 }
   0x4   :  { %v35_v12 = vmul.f32 %v135_v2, %v117_v1  ;;  %v36_v13 = vmul.f32 %v136_v3, %v117_v1  ;;  %v37_v15 = vmul.f32 %v139_v8, %v117_v1  ;;  %v38_v16 = vmul.f32 %v140_v9, %v117_v1 }
   0x5   :  { %v39_v17 = vmul.f32 %v143_v10, %v117_v1  ;;  %v40_v18 = vmul.f32 %v144_v11, %v117_v1  ;;  %v41_v21 = vmul.f32 %v117_v1, %v27_v14 }
   0x6   :  { %v49_v19 = vadd.f32 %v118_v7, %v35_v12  ;;  %v50_v20 = vadd.f32 %v118_v7, %v36_v13  ;;  %v51_v22 = vadd.f32 %v118_v7, %v37_v15  ;;  %v52_v23 = vadd.f32 %v118_v7, %v38_v16 }
   0x7   :  { %v53_v24 = vadd.f32 %v118_v7, %v39_v17  ;;  %v54_v25 = vadd.f32 %v118_v7, %v40_v18  ;;  %v55_v38 = vadd.f32 %v118_v7, %v41_v21 }
   0x8   :  { %vm56_vm0 = vcmp.ge.f32.partialorder %v49_v19, 0.0  ;;  %vm57_vm1 = vcmp.ge.f32.partialorder %v50_v20, 0.0  ;;  %v63_v26 = vmul.f32 0.2, %v49_v19  ;;  %v64_v27 = vmul.f32 0.2, %v50_v20 }
   0x9   :  { %vm58_vm2 = vcmp.ge.f32.partialorder %v51_v22, 0.0  ;;  %vm59_vm3 = vcmp.ge.f32.partialorder %v52_v23, 0.0  ;;  %v65_v28 = vmul.f32 0.2, %v51_v22  ;;  %v66_v29 = vmul.f32 0.2, %v52_v23 }
   0xa   :  { %v70_v30 = vsel %vm56_vm0, %v49_v19, %v63_v26  ;;  %v71_v31 = vsel %vm57_vm1, %v50_v20, %v64_v27  ;;  %vm60_vm4 = vcmp.ge.f32.partialorder %v53_v24, 0.0  ;;  %vm61_vm5 = vcmp.ge.f32.partialorder %v54_v25, 0.0 }
   0xb   :  { %v148_v32 = vpack.c.bf16 %v71_v31, %v70_v30  ;;  %v72_v33 = vsel %vm58_vm2, %v51_v22, %v65_v28  ;;  %v73_v34 = vsel %vm59_vm3, %v52_v23, %v66_v29  ;;  %v67_v35 = vmul.f32 0.2, %v53_v24 }
   0xc   :  { %v153_v36 = vpack.c.bf16 %v73_v34, %v72_v33  ;;  %v68_v37 = vmul.f32 0.2, %v54_v25  ;;  %vm62_vm6 = vcmp.ge.f32.partialorder %v55_v38, 0.0  ;;  %v69_v41 = vmul.f32 0.2, %v55_v38 }
   0xd   :  { %149 = vst [vmem:[%s217_s3] sm:$0xff] %v148_v32   ;;  %v74_v39 = vsel %vm60_vm4, %v53_v24, %v67_v35 }
   0xe   :  { %162 = vst [vmem:[%s217_s3 + $0x8] sm:$0xff] %v153_v36   ;;  %v75_v40 = vsel %vm61_vm5, %v54_v25, %v68_v37  ;;  %v76_v43 = vsel %vm62_vm6, %v55_v38, %v69_v41 }
   0xf   :  { %v158_v42 = vpack.c.bf16 %v75_v40, %v74_v39  ;;  %v132_v44 = vpack.c.bf16 %v76_v43, %v76_v43 }
  0x11   :  { %163 = vst [vmem:[%s217_s3 + $0x10] sm:$0xff] %v158_v42   ;;  %112 = vst [vmem:[%s217_s3 + $0x18] sm:$0xf] %v132_v44 }

// kernel: _lambda_.9
= control target key start
LH: loop header
LB: loop body
LE: loop exit
PB: predicated region body
PF: predicated region fallthrough
CT: control target
= control target key end

     0   :  { %vm1662_vm0 = vmmov 0   ;;  %vm1062_vm2 = vcmask 457728   ;;  %s2023_s1 = inlined_call_operand.vmem [shape: bf16[1024,128], index: 1, kind: input, shape index: {}]   ;;  %s2024_s0 = inlined_call_operand.vmem [shape: bf16[56,1024], index: 0, kind: input, shape index: {}]   ;;  %s2025_s2 = inlined_call_operand.vmem [shape: f32[1,128], index: 2, kind: input, shape index: {}]   ;;  %s2026_s3 = inlined_call_operand.vmem [shape: bf16[56,128], index: 3, kind: output, shape index: {0}]   ;;  %s2027_s4 = inlined_call_operand.vmem [shape: f32[1,1,128], index: 4, kind: output, shape index: {1}]   ;;  %s2028_s5 = inlined_call_operand.vmem [shape: f32[1,1,128], index: 5, kind: output, shape index: {2}]  }
   0x1   :  { %v1589_v0 = vld [vmem:[%s2023_s1 + $0x40] sm:$0xff]   ;;  %v1593_v4 = vld [vmem:[%s2023_s1 + $0x48] sm:$0xff]   ;;  %v1597_v8 = vld [vmem:[%s2023_s1 + $0x50] sm:$0xff]  }
   0x2   :  { %v1590_v1 = vld [vmem:[%s2023_s1 + $0xc0] sm:$0xff]   ;;  %1358 = vmatprep.subr.bf16.mxu0 %v1589_v0  ;;  %v1594_v5 = vld [vmem:[%s2023_s1 + $0xc8] sm:$0xff]   ;;  %v1598_v9 = vld [vmem:[%s2023_s1 + $0xd0] sm:$0xff]  }
   0x3   :  { %v1591_v2 = vld [vmem:[%s2023_s1] sm:$0xff]   ;;  %1398 = vmatprep.subr.bf16.mxu1 %v1590_v1  ;;  %v1595_v6 = vld [vmem:[%s2023_s1 + $0x8] sm:$0xff]   ;;  %v1599_v10 = vld [vmem:[%s2023_s1 + $0x10] sm:$0xff]  }
   0x4   :  { %v1592_v3 = vld [vmem:[%s2023_s1 + $0x80] sm:$0xff]   ;;  %1359 = vmatpush3.bf16.msra.mxu0 %v1591_v2  ;;  %v1596_v7 = vld [vmem:[%s2023_s1 + $0x88] sm:$0xff]   ;;  %v1600_v11 = vld [vmem:[%s2023_s1 + $0x90] sm:$0xff]  }
   0x5   :  { %1399 = vmatpush3.bf16.msra.mxu1 %v1592_v3  ;;  %1360 = vmatprep.subr.bf16.mxu0 %v1593_v4  ;;  %v1601_v12 = vld [vmem:[%s2023_s1 + $0x58] sm:$0xff]   ;;  %v1605_v16 = vld [vmem:[%s2023_s1 + $0x60] sm:$0xff]   ;;  %v1609_v20 = vld [vmem:[%s2023_s1 + $0x68] sm:$0xff]  }
   0x6   :  { %1400 = vmatprep.subr.bf16.mxu1 %v1594_v5  ;;  %v1602_v13 = vld [vmem:[%s2023_s1 + $0xd8] sm:$0xff]   ;;  %v1606_v17 = vld [vmem:[%s2023_s1 + $0xe0] sm:$0xff]   ;;  %v1610_v21 = vld [vmem:[%s2023_s1 + $0xe8] sm:$0xff]  }
   0x7   :  { %v1603_v14 = vld [vmem:[%s2023_s1 + $0x18] sm:$0xff]   ;;  %v1607_v18 = vld [vmem:[%s2023_s1 + $0x20] sm:$0xff]   ;;  %v1611_v22 = vld [vmem:[%s2023_s1 + $0x28] sm:$0xff]  }
   0x8   :  { %1361 = vmatpush3.bf16.msra.mxu0 %v1595_v6  ;;  %v1604_v15 = vld [vmem:[%s2023_s1 + $0x98] sm:$0xff]   ;;  %v1608_v19 = vld [vmem:[%s2023_s1 + $0xa0] sm:$0xff]   ;;  %v1612_v23 = vld [vmem:[%s2023_s1 + $0xa8] sm:$0xff]  }
   0x9   :  { %1401 = vmatpush3.bf16.msra.mxu1 %v1596_v7  ;;  %1362 = vmatprep.subr.bf16.mxu0 %v1597_v8  ;;  %v1613_v24 = vld [vmem:[%s2023_s1 + $0x70] sm:$0xff]   ;;  %v1617_v28 = vld [vmem:[%s2023_s1 + $0x78] sm:$0xff]   ;;  %v36_v32 = vld [vmem:[%s2024_s0] sm:$0xff] }
   0xa   :  { %1402 = vmatprep.subr.bf16.mxu1 %v1598_v9  ;;  %v1614_v25 = vld [vmem:[%s2023_s1 + $0xf0] sm:$0xff]   ;;  %v1618_v29 = vld [vmem:[%s2023_s1 + $0xf8] sm:$0xff]   ;;  %v40_v33 = vld [vmem:[%s2024_s0 + $0x20] sm:$0xff] }
   0xb   :  { %v1615_v26 = vld [vmem:[%s2023_s1 + $0x30] sm:$0xff]   ;;  %v1619_v30 = vld [vmem:[%s2023_s1 + $0x38] sm:$0xff]   ;;  %v37_v34 = vld [vmem:[%s2024_s0 + $0x8] sm:$0xff]  ;;  %v1227_v35 = vcombine.low %v36_v32, %v40_v33  ;;  %v1228_v36 = vcombine.high %v36_v32, %v40_v33 }
   0xc   :  { %1363 = vmatpush3.bf16.msra.mxu0 %v1599_v10  ;;  %v1616_v27 = vld [vmem:[%s2023_s1 + $0xb0] sm:$0xff]   ;;  %v1620_v31 = vld [vmem:[%s2023_s1 + $0xb8] sm:$0xff]   ;;  %v41_v37 = vld [vmem:[%s2024_s0 + $0x28] sm:$0xff] }
   0xd   :  { %1403 = vmatpush3.bf16.msra.mxu1 %v1600_v11  ;;  %1364 = vmatprep.subr.bf16.mxu0 %v1601_v12  ;;  %v1229_v38 = vcombine.low %v37_v34, %v41_v37  ;;  %v1230_v39 = vcombine.high %v37_v34, %v41_v37  ;;  %v1621_v40 = vld [vmem:[%s2023_s1 + $0x140] sm:$0xff]   ;;  %v1625_v44 = vld [vmem:[%s2023_s1 + $0x148] sm:$0xff]   ;;  %v1629_v56 = vld [vmem:[%s2023_s1 + $0x150] sm:$0xff]  }
   0xe   :  { %1404 = vmatprep.subr.bf16.mxu1 %v1602_v13  ;;  %756 = vmatprep.mubr.bf16.mxu0 %v1228_v36  ;;  %v1622_v41 = vld [vmem:[%s2023_s1 + $0x1c0] sm:$0xff]   ;;  %v1626_v45 = vld [vmem:[%s2023_s1 + $0x1c8] sm:$0xff]   ;;  %v1630_v57 = vld [vmem:[%s2023_s1 + $0x1d0] sm:$0xff]  }
   0xf   :  { %820 = vmatprep.mubr.bf16.mxu1 %v1230_v39  ;;  %v1623_v42 = vld [vmem:[%s2023_s1 + $0x100] sm:$0xff]   ;;  %v1627_v46 = vld [vmem:[%s2023_s1 + $0x108] sm:$0xff]   ;;  %v1631_v58 = vld [vmem:[%s2023_s1 + $0x110] sm:$0xff]  }
  0x10   :  { %1365 = vmatpush3.bf16.msra.mxu0 %v1603_v14  ;;  %v1624_v43 = vld [vmem:[%s2023_s1 + $0x180] sm:$0xff]   ;;  %v1628_v47 = vld [vmem:[%s2023_s1 + $0x188] sm:$0xff]   ;;  %v1632_v59 = vld [vmem:[%s2023_s1 + $0x190] sm:$0xff]  }
  0x11   :  { %1405 = vmatpush3.bf16.msra.mxu1 %v1604_v15  ;;  %1366 = vmatprep.subr.bf16.mxu0 %v1605_v16  ;;  %v44_v48 = vld [vmem:[%s2024_s0 + $0x40] sm:$0xff]  ;;  %v45_v51 = vld [vmem:[%s2024_s0 + $0x48] sm:$0xff]  ;;  %v1633_v60 = vld [vmem:[%s2023_s1 + $0x158] sm:$0xff]  }
  0x12   :  { %1406 = vmatprep.subr.bf16.mxu1 %v1606_v17  ;;  %v48_v49 = vld [vmem:[%s2024_s0 + $0x60] sm:$0xff]  ;;  %v49_v52 = vld [vmem:[%s2024_s0 + $0x68] sm:$0xff]  ;;  %v1634_v61 = vld [vmem:[%s2023_s1 + $0x1d8] sm:$0xff]  }
  0x13   :  { %v1236_v50 = vcombine.high %v44_v48, %v48_v49  ;;  %v1235_v53 = vcombine.low %v44_v48, %v48_v49  ;;  %v1238_v54 = vcombine.high %v45_v51, %v49_v52  ;;  %v1237_v55 = vcombine.low %v45_v51, %v49_v52  ;;  %v1635_v62 = vld [vmem:[%s2023_s1 + $0x118] sm:$0xff]   ;;  %v52_v0 = vld [vmem:[%s2024_s0 + $0x80] sm:$0xff]  ;;  %v53_v2 = vld [vmem:[%s2024_s0 + $0x88] sm:$0xff] }
  0x14   :  { %1367 = vmatpush3.bf16.msra.mxu0 %v1607_v18  ;;  %v1636_v63 = vld [vmem:[%s2023_s1 + $0x198] sm:$0xff]   ;;  %v56_v1 = vld [vmem:[%s2024_s0 + $0xa0] sm:$0xff]  ;;  %v57_v3 = vld [vmem:[%s2024_s0 + $0xa8] sm:$0xff] }
  0x15   :  { %1407 = vmatpush3.bf16.msra.mxu1 %v1608_v19  ;;  %1368 = vmatprep.subr.bf16.mxu0 %v1609_v20  ;;  %v1244_v4 = vcombine.high %v52_v0, %v56_v1  ;;  %v1246_v5 = vcombine.high %v53_v2, %v57_v3  ;;  %v1243_v6 = vcombine.low %v52_v0, %v56_v1  ;;  %v1637_v8 = vld [vmem:[%s2023_s1 + $0x160] sm:$0xff]   ;;  %v1641_v12 = vld [vmem:[%s2023_s1 + $0x168] sm:$0xff]   ;;  %v39_v32 = vld [vmem:[%s2024_s0 + $0x18] sm:$0xff] }
  0x16   :  { %1408 = vmatprep.subr.bf16.mxu1 %v1610_v21  ;;  %v1245_v7 = vcombine.low %v53_v2, %v57_v3  ;;  %v1638_v9 = vld [vmem:[%s2023_s1 + $0x1e0] sm:$0xff]   ;;  %v1642_v13 = vld [vmem:[%s2023_s1 + $0x1e8] sm:$0xff]   ;;  %v1649_v21 = vld [vmem:[%s2023_s1 + $0x170] sm:$0xff]  }
  0x17   :  { %v1639_v10 = vld [vmem:[%s2023_s1 + $0x120] sm:$0xff]   ;;  %v1643_v14 = vld [vmem:[%s2023_s1 + $0x128] sm:$0xff]   ;;  %v43_v33 = vld [vmem:[%s2024_s0 + $0x38] sm:$0xff] }
  0x18   :  { %1369 = vmatpush3.bf16.msra.mxu0 %v1611_v22  ;;  %v1640_v11 = vld [vmem:[%s2023_s1 + $0x1a0] sm:$0xff]   ;;  %v1644_v15 = vld [vmem:[%s2023_s1 + $0x1a8] sm:$0xff]   ;;  %v1233_v36 = vcombine.low %v39_v32, %v43_v33  ;;  %v46_v37 = vld [vmem:[%s2024_s0 + $0x50] sm:$0xff] }
  0x19   :  { %1409 = vmatpush3.bf16.msra.mxu1 %v1612_v23  ;;  %1370 = vmatprep.subr.bf16.mxu0 %v1613_v24  ;;  %v60_v16 = vld [vmem:[%s2024_s0 + $0xc0] sm:$0xff]  ;;  %v61_v17 = vld [vmem:[%s2024_s0 + $0xc8] sm:$0xff]  ;;  %v1650_v23 = vld [vmem:[%s2023_s1 + $0x1f0] sm:$0xff]  }
  0x1a   :  { %1410 = vmatprep.subr.bf16.mxu1 %v1614_v25  ;;  %v1252_v18 = vcombine.high %v60_v16, %v60_v16  ;;  %v1254_v19 = vcombine.high %v61_v17, %v61_v17  ;;  %v1251_v20 = vcombine.low %v60_v16, %v60_v16  ;;  %v1253_v22 = vcombine.low %v61_v17, %v61_v17  ;;  %v1651_v24 = vld [vmem:[%s2023_s1 + $0x130] sm:$0xff]   ;;  %v47_v39 = vld [vmem:[%s2024_s0 + $0x58] sm:$0xff] }
  0x1b   :  { %v1652_v25 = vld [vmem:[%s2023_s1 + $0x1b0] sm:$0xff]  }
  0x1c   :  { %1371 = vmatpush3.bf16.msra.mxu0 %v1615_v26  ;;  %v1653_v26 = vld [vmem:[%s2023_s1 + $0x178] sm:$0xff]   ;;  %v62_v52 = vld [vmem:[%s2024_s0 + $0xd0] sm:$0xff] }
  0x1d   :  { %1411 = vmatpush3.bf16.msra.mxu1 %v1616_v27  ;;  %1372 = vmatprep.subr.bf16.mxu0 %v1617_v28  ;;  %v1654_v27 = vld [vmem:[%s2023_s1 + $0x1f8] sm:$0xff]  }
  0x1e   :  { %1412 = vmatprep.subr.bf16.mxu1 %v1618_v29  ;;  %v1655_v28 = vld [vmem:[%s2023_s1 + $0x138] sm:$0xff]  }
  0x1f   :  { %v1656_v29 = vld [vmem:[%s2023_s1 + $0x1b8] sm:$0xff]  }
  0x20   :  { %1373 = vmatpush3.bf16.msra.mxu0 %v1619_v30  ;;  %v38_v30 = vld [vmem:[%s2024_s0 + $0x10] sm:$0xff] }
  0x21   :  { %1413 = vmatpush3.bf16.msra.mxu1 %v1620_v31  ;;  %1438 = vmatprep.subr.bf16.mxu0 %v1621_v40  ;;  %v42_v31 = vld [vmem:[%s2024_s0 + $0x30] sm:$0xff]  ;;  %v1234_v40 = vcombine.high %v39_v32, %v43_v33 }
  0x22   :  { %1478 = vmatprep.subr.bf16.mxu1 %v1622_v41  ;;  %v1231_v34 = vcombine.low %v38_v30, %v42_v31 }
  0x23   :  { %757 = vmatmul.mubr.bf16.vlgmr.msra.gmra.mrb[0].mxu0 %v1227_v35  ;;  %v1232_v35 = vcombine.high %v38_v30, %v42_v31 }
  0x24   :  { %821 = vmatmul.mubr.bf16.vlgmr.msra.gmra.mrb[0].mxu1 %v1229_v38  ;;  %1439 = vmatpush3.bf16.msra.mxu0 %v1623_v42  ;;  %v50_v38 = vld [vmem:[%s2024_s0 + $0x70] sm:$0xff]  ;;  %v51_v42 = vld [vmem:[%s2024_s0 + $0x78] sm:$0xff] }
  0x25   :  { %1479 = vmatpush3.bf16.msra.mxu1 %v1624_v43  ;;  %1440 = vmatprep.subr.bf16.mxu0 %v1625_v44  ;;  %v1240_v41 = vcombine.high %v46_v37, %v50_v38  ;;  %v1242_v43 = vcombine.high %v47_v39, %v51_v42  ;;  %v54_v44 = vld [vmem:[%s2024_s0 + $0x90] sm:$0xff]  ;;  %v1239_v48 = vcombine.low %v46_v37, %v50_v38 }
  0x26   :  { %1480 = vmatprep.subr.bf16.mxu1 %v1626_v45  ;;  %764 = vmatprep.mubr.bf16.mxu0 %v1236_v50  ;;  %v58_v45 = vld [vmem:[%s2024_s0 + $0xb0] sm:$0xff]  ;;  %v1241_v49 = vcombine.low %v47_v39, %v51_v42 }
  0x27   :  { %828 = vmatprep.mubr.bf16.mxu1 %v1238_v54  ;;  %v1248_v50 = vcombine.high %v54_v44, %v58_v45  ;;  %v1247_v54 = vcombine.low %v54_v44, %v58_v45 }
  0x28   :  { %1441 = vmatpush3.bf16.msra.mxu0 %v1627_v46  ;;  %v55_v46 = vld [vmem:[%s2024_s0 + $0x98] sm:$0xff] }
  0x29   :  { %1481 = vmatpush3.bf16.msra.mxu1 %v1628_v47  ;;  %1442 = vmatprep.subr.bf16.mxu0 %v1629_v56  ;;  %v59_v47 = vld [vmem:[%s2024_s0 + $0xb8] sm:$0xff]  ;;  %v1256_v56 = vcombine.high %v62_v52, %v62_v52 }
  0x2a   :  { %1482 = vmatprep.subr.bf16.mxu1 %v1630_v57  ;;  %v1250_v51 = vcombine.high %v55_v46, %v59_v47 }
  0x2b   :  { %765 = vmatmul.mubr.bf16.gmra.mrb[4].mxu0 %v1235_v53  ;;  %v63_v53 = vld [vmem:[%s2024_s0 + $0xd8] sm:$0xff] }
  0x2c   :  { %829 = vmatmul.mubr.bf16.gmra.mrb[4].mxu1 %v1237_v55  ;;  %1443 = vmatpush3.bf16.msra.mxu0 %v1631_v58  ;;  %v1249_v55 = vcombine.low %v55_v46, %v59_v47  ;;  %v1258_v57 = vcombine.high %v63_v53, %v63_v53  ;;  %v1255_v58 = vcombine.low %v62_v52, %v62_v52 }
  0x2d   :  { %1483 = vmatpush3.bf16.msra.mxu1 %v1632_v59  ;;  %1444 = vmatprep.subr.bf16.mxu0 %v1633_v60  ;;  %v1257_v59 = vcombine.low %v63_v53, %v63_v53  ;;  %v1661_v60 = vmov 0.0|0.0  }
  0x2e   :  { %1484 = vmatprep.subr.bf16.mxu1 %v1634_v61  ;;  %772 = vmatprep.mubr.bf16.mxu0 %v1244_v4  ;;  %v1663_v61 = vmov 0.0  }
  0x2f   :  { %836 = vmatprep.mubr.bf16.mxu1 %v1246_v5 }
  0x30   :  { %1445 = vmatpush3.bf16.msra.mxu0 %v1635_v62 }
  0x31   :  { %1485 = vmatpush3.bf16.msra.mxu1 %v1636_v63  ;;  %1446 = vmatprep.subr.bf16.mxu0 %v1637_v8 }
  0x32   :  { %1486 = vmatprep.subr.bf16.mxu1 %v1638_v9 }
  0x33   :  { %773 = vmatmul.mubr.bf16.gmra.mrb[8].mxu0 %v1243_v6 }
  0x34   :  { %837 = vmatmul.mubr.bf16.gmra.mrb[8].mxu1 %v1245_v7  ;;  %1447 = vmatpush3.bf16.msra.mxu0 %v1639_v10 }
  0x35   :  { %1487 = vmatpush3.bf16.msra.mxu1 %v1640_v11  ;;  %1448 = vmatprep.subr.bf16.mxu0 %v1641_v12 }
  0x36   :  { %1488 = vmatprep.subr.bf16.mxu1 %v1642_v13  ;;  %780 = vmatprep.mubr.bf16.mxu0 %v1252_v18 }
  0x37   :  { %844 = vmatprep.mubr.bf16.mxu1 %v1254_v19 }
  0x38   :  { %1449 = vmatpush3.bf16.msra.mxu0 %v1643_v14 }
  0x39   :  { %1489 = vmatpush3.bf16.msra.mxu1 %v1644_v15  ;;  %1450 = vmatprep.subr.bf16.mxu0 %v1649_v21 }
  0x3a   :  { %1490 = vmatprep.subr.bf16.mxu1 %v1650_v23 }
  0x3b   :  { %781 = vmatmul.mubr.bf16.gmra.mrb[12].mxu0 %v1251_v20 }
  0x3c   :  { %845 = vmatmul.mubr.bf16.gmra.mrb[12].mxu1 %v1253_v22  ;;  %1451 = vmatpush3.bf16.msra.mxu0 %v1651_v24 }
  0x3d   :  { %1491 = vmatpush3.bf16.msra.mxu1 %v1652_v25  ;;  %1452 = vmatprep.subr.bf16.mxu0 %v1653_v26 }
  0x3e   :  { %1492 = vmatprep.subr.bf16.mxu1 %v1654_v27  ;;  %884 = vmatprep.mubr.bf16.mxu0 %v1232_v35 }
  0x3f   :  { %948 = vmatprep.mubr.bf16.mxu1 %v1234_v40 }
  0x40   :  { %1453 = vmatpush3.bf16.msra.mxu0 %v1655_v28 }
  0x41   :  { %1493 = vmatpush3.bf16.msra.mxu1 %v1656_v29  ;;  %1568 = vmatprep.subr.bf16.mxu0 %v1661_v60 }
  0x42   :  { %1577 = vmatprep.subr.bf16.mxu1 %v1661_v60 }
  0x43   :  { %885 = vmatmul.mubr.bf16.vlgmr.msra.gmra.mrb[16].mxu0 %v1231_v34 }
  0x44   :  { %949 = vmatmul.mubr.bf16.vlgmr.msra.gmra.mrb[16].mxu1 %v1233_v36  ;;  %892 = vmatprep.mubr.bf16.mxu0 %v1240_v41 }
  0x45   :  { %956 = vmatprep.mubr.bf16.mxu1 %v1242_v43 }
  0x4b   :  { %893 = vmatmul.mubr.bf16.gmra.mrb[20].mxu0 %v1239_v48 }
  0x4c   :  { %957 = vmatmul.mubr.bf16.gmra.mrb[20].mxu1 %v1241_v49  ;;  %900 = vmatprep.mubr.bf16.mxu0 %v1248_v50 }
  0x4d   :  { %964 = vmatprep.mubr.bf16.mxu1 %v1250_v51 }
  0x53   :  { %901 = vmatmul.mubr.bf16.gmra.mrb[24].mxu0 %v1247_v54 }
  0x54   :  { %965 = vmatmul.mubr.bf16.gmra.mrb[24].mxu1 %v1249_v55  ;;  %908 = vmatprep.mubr.bf16.mxu0 %v1256_v56 }
  0x55   :  { %972 = vmatprep.mubr.bf16.mxu1 %v1258_v57 }
  0x5b   :  { %909 = vmatmul.mubr.bf16.gmra.mrb[28].mxu0 %v1255_v58 }
  0x5c   :  { %973 = vmatmul.mubr.bf16.gmra.mrb[28].mxu1 %v1257_v59  ;;  %1548 = vmatprep.mubr.msk.f32.mxu0 %vm1662_vm0, %v1663_v61 }
  0x5d   :  { %1565 = vmatprep.mubr.msk.f32.mxu1 %vm1662_vm0, %v1663_v61 }
  0xf6   :  { %v1374_v62 = vpop.f32.mrb[0].mxu0 }
  0xf7   :  { %v1414_v63 = vpop.f32.mrb[0].mxu1  ;;  %v1375_v0 = vpop.f32.mrb[1].mxu0 }
  0xf8   :  { %v1376_v1 = vadd.f32 %v1375_v0, %v1374_v62  ;;  %v1415_v2 = vpop.f32.mrb[1].mxu1  ;;  %v1377_v3 = vpop.f32.mrb[2].mxu0 }
  0xf9   :  { %v1416_v4 = vadd.f32 %v1415_v2, %v1414_v63  ;;  %v1417_v5 = vpop.f32.mrb[2].mxu1  ;;  %v1378_v6 = vpop.f32.mrb[3].mxu0 }
  0xfa   :  { %v1379_v7 = vadd.f32 %v1378_v6, %v1377_v3  ;;  %v1418_v8 = vpop.f32.mrb[3].mxu1 }
  0xfb   :  { %v823_v9 = vadd.f32 %v1416_v4, %v1376_v1  ;;  %v1419_v10 = vadd.f32 %v1418_v8, %v1417_v5  ;;  %v1985_v1 = vld [vmem:[%s2025_s2] ss:$0 sm:$0xff] }
  0xfd   :  { %v826_v11 = vadd.f32 %v1419_v10, %v1379_v7 }
  0xfe   :  { %v1380_v12 = vpop.f32.mrb[4].mxu0 }
  0xff   :  { %v1420_v13 = vpop.f32.mrb[4].mxu1  ;;  %v1381_v14 = vpop.f32.mrb[5].mxu0 }
 0x100   :  { %v1382_v15 = vadd.f32 %v1381_v14, %v1380_v12  ;;  %v1421_v16 = vpop.f32.mrb[5].mxu1  ;;  %v1383_v17 = vpop.f32.mrb[6].mxu0 }
 0x101   :  { %v1422_v18 = vadd.f32 %v1421_v16, %v1420_v13  ;;  %v1423_v19 = vpop.f32.mrb[6].mxu1  ;;  %v1384_v20 = vpop.f32.mrb[7].mxu0 }
 0x102   :  { %v1385_v21 = vadd.f32 %v1384_v20, %v1383_v17  ;;  %v1424_v22 = vpop.f32.mrb[7].mxu1 }
 0x103   :  { %v831_v23 = vadd.f32 %v1422_v18, %v1382_v15  ;;  %v1425_v24 = vadd.f32 %v1424_v22, %v1423_v19 }
 0x105   :  { %v1974_v25 = vadd.f32 %v1425_v24, %v1385_v21 }
 0x106   :  { %v1386_v26 = vpop.f32.mrb[8].mxu0 }
 0x107   :  { %v1426_v27 = vpop.f32.mrb[8].mxu1  ;;  %v1387_v28 = vpop.f32.mrb[9].mxu0 }
 0x108   :  { %v1427_v29 = vpop.f32.mrb[9].mxu1  ;;  %v1388_v30 = vadd.f32 %v1387_v28, %v1386_v26  ;;  %v1389_v32 = vpop.f32.mrb[10].mxu0 }
 0x109   :  { %v1428_v31 = vadd.f32 %v1427_v29, %v1426_v27  ;;  %v1429_v33 = vpop.f32.mrb[10].mxu1  ;;  %v1390_v34 = vpop.f32.mrb[11].mxu0 }
 0x10a   :  { %v1430_v35 = vpop.f32.mrb[11].mxu1  ;;  %v1391_v37 = vadd.f32 %v1390_v34, %v1389_v32 }
 0x10b   :  { %v1976_v36 = vadd.f32 %v1428_v31, %v1388_v30  ;;  %v1431_v38 = vadd.f32 %v1430_v35, %v1429_v33 }
 0x10d   :  { %v1978_v39 = vadd.f32 %v1431_v38, %v1391_v37 }
 0x10e   :  { %v1392_v40 = vpop.f32.mrb[12].mxu0 }
 0x10f   :  { %v1432_v41 = vpop.f32.mrb[12].mxu1  ;;  %v1393_v42 = vpop.f32.mrb[13].mxu0 }
 0x110   :  { %v1433_v43 = vpop.f32.mrb[13].mxu1  ;;  %v1394_v44 = vadd.f32 %v1393_v42, %v1392_v40  ;;  %v1395_v46 = vpop.f32.mrb[14].mxu0 }
 0x111   :  { %v1434_v45 = vadd.f32 %v1433_v43, %v1432_v41  ;;  %v1435_v47 = vpop.f32.mrb[14].mxu1  ;;  %v1396_v48 = vpop.f32.mrb[15].mxu0 }
 0x112   :  { %v1436_v49 = vpop.f32.mrb[15].mxu1  ;;  %v1054_v48 = vlaneseq }
 0x113   :  { %v1980_v50 = vadd.f32 %v1434_v45, %v1394_v44 }
 0x116   :  { %v1454_v51 = vpop.f32.mrb[16].mxu0 }
 0x117   :  { %v1494_v52 = vpop.f32.mrb[16].mxu1  ;;  %v1455_v53 = vpop.f32.mrb[17].mxu0 }
 0x118   :  { %v1456_v54 = vadd.f32 %v1455_v53, %v1454_v51  ;;  %v1495_v55 = vpop.f32.mrb[17].mxu1  ;;  %v1457_v56 = vpop.f32.mrb[18].mxu0 }
 0x119   :  { %v1496_v57 = vadd.f32 %v1495_v55, %v1494_v52  ;;  %v1497_v58 = vpop.f32.mrb[18].mxu1  ;;  %v1458_v59 = vpop.f32.mrb[19].mxu0 }
 0x11a   :  { %v887_v62 = vadd.f32 %v1456_v54, %v823_v9  ;;  %v1459_v63 = vadd.f32 %v1458_v59, %v1457_v56  ;;  %v1498_v0 = vpop.f32.mrb[19].mxu1 }
 0x11b   :  { %v1499_v2 = vadd.f32 %v1498_v0, %v1497_v58 }
 0x11c   :  { %v951_v3 = vadd.f32 %v1496_v57, %v887_v62  ;;  %v890_v4 = vadd.f32 %v1459_v63, %v826_v11  ;;  %v1055_v57 = vand.u32 127, %v1054_v48 }
 0x11e   :  { %v1011_v5 = vadd.f32 %v1985_v1, %v951_v3  ;;  %v954_v6 = vadd.f32 %v1499_v2, %v890_v4  ;;  %v1460_v7 = vpop.f32.mrb[20].mxu0  ;;  %vm1059_vm1 = vcmp.lt.s32.totalorder %v1055_v57, 50 }
 0x11f   :  { %v1500_v8 = vpop.f32.mrb[20].mxu1  ;;  %v1461_v10 = vpop.f32.mrb[21].mxu0 }
 0x120   :  { %v1012_v12 = vadd.f32 %v1985_v1, %v954_v6  ;;  %v1462_v13 = vadd.f32 %v1461_v10, %v1460_v7  ;;  %v1501_v9 = vpop.f32.mrb[21].mxu1  ;;  %v1463_v14 = vpop.f32.mrb[22].mxu0  ;;  %v1137_v15 = vmul.f32 %v1011_v5, %v1011_v5 }
 0x121   :  { %v1502_v16 = vadd.f32 %v1501_v9, %v1500_v8  ;;  %v1503_v17 = vpop.f32.mrb[22].mxu1  ;;  %v1464_v18 = vpop.f32.mrb[23].mxu0 }
 0x122   :  { %v1344_v19 = vpack.c.bf16 %v1012_v12, %v1011_v5  ;;  %v1138_v20 = vmul.f32 %v1012_v12, %v1012_v12  ;;  %v895_v21 = vadd.f32 %v1462_v13, %v831_v23  ;;  %v1465_v22 = vadd.f32 %v1464_v18, %v1463_v14  ;;  %v1504_v11 = vpop.f32.mrb[23].mxu1 }
 0x123   :  { %v1505_v24 = vadd.f32 %v1504_v11, %v1503_v17  ;;  %v1331_v12 = vsel %vm1059_vm1, 1.0, %v1663_v61 }
 0x124   :  { %1345 = vst [vmem:[%s2026_s3] sm:$0xff] %v1344_v19   ;;  %v959_v26 = vadd.f32 %v1502_v16, %v895_v21  ;;  %v898_v27 = vadd.f32 %v1465_v22, %v1974_v25  ;;  %1570 = vmatpush3.bf16.msra.mxu0 %v1344_v19  ;;  %v1578_v28 = vpack.c.bf16 %v1138_v20, %v1137_v15 }
 0x125   :  { %1571 = vmatprep.subr.bf16.mxu0 %v1661_v60 }
 0x126   :  { %v1013_v29 = vadd.f32 %v1985_v1, %v959_v26  ;;  %v962_v30 = vadd.f32 %v1505_v24, %v898_v27  ;;  %v1466_v31 = vpop.f32.mrb[24].mxu0  ;;  %1579 = vmatpush3.bf16.msra.mxu1 %v1578_v28 }
 0x127   :  { %v1506_v23 = vpop.f32.mrb[24].mxu1  ;;  %v1467_v32 = vpop.f32.mrb[25].mxu0  ;;  %1580 = vmatprep.subr.bf16.mxu1 %v1661_v60 }
 0x128   :  { %v1014_v33 = vadd.f32 %v1985_v1, %v962_v30  ;;  %v1468_v34 = vadd.f32 %v1467_v32, %v1466_v31  ;;  %v1507_v35 = vpop.f32.mrb[25].mxu1  ;;  %v1469_v37 = vpop.f32.mrb[26].mxu0  ;;  %v1139_v38 = vmul.f32 %v1013_v29, %v1013_v29 }
 0x129   :  { %v1508_v25 = vadd.f32 %v1507_v35, %v1506_v23  ;;  %v1509_v40 = vpop.f32.mrb[26].mxu1  ;;  %v1470_v41 = vpop.f32.mrb[27].mxu0 }
 0x12a   :  { %v1349_v42 = vpack.c.bf16 %v1014_v33, %v1013_v29  ;;  %v1140_v43 = vmul.f32 %v1014_v33, %v1014_v33  ;;  %v903_v44 = vadd.f32 %v1468_v34, %v1976_v36  ;;  %v1471_v45 = vadd.f32 %v1470_v41, %v1469_v37  ;;  %v1510_v46 = vpop.f32.mrb[27].mxu1 }
 0x12b   :  { %v1511_v47 = vadd.f32 %v1510_v46, %v1509_v40 }
 0x12c   :  { %1356 = vst [vmem:[%s2026_s3 + $0x8] sm:$0xff] %v1349_v42   ;;  %v967_v49 = vadd.f32 %v1508_v25, %v903_v44  ;;  %v906_v51 = vadd.f32 %v1471_v45, %v1978_v39  ;;  %1573 = vmatpush3.bf16.msra.mxu0 %v1349_v42  ;;  %v1581_v52 = vpack.c.bf16 %v1140_v43, %v1139_v38 }
 0x12d   :  { %1574 = vmatprep.subr.bf16.mxu0 %v1661_v60 }
 0x12e   :  { %v1015_v53 = vadd.f32 %v1985_v1, %v967_v49  ;;  %v970_v54 = vadd.f32 %v1511_v47, %v906_v51  ;;  %v1472_v55 = vpop.f32.mrb[28].mxu0  ;;  %1582 = vmatpush3.bf16.msra.mxu1 %v1581_v52 }
 0x12f   :  { %v1473_v36 = vpop.f32.mrb[29].mxu0  ;;  %v1512_v56 = vpop.f32.mrb[28].mxu1  ;;  %1583 = vmatprep.subr.bf16.mxu1 %v1661_v60 }
 0x130   :  { %v1016_v58 = vadd.f32 %v1985_v1, %v970_v54  ;;  %v1474_v59 = vadd.f32 %v1473_v36, %v1472_v55  ;;  %v1475_v62 = vpop.f32.mrb[30].mxu0  ;;  %v1513_v63 = vpop.f32.mrb[29].mxu1  ;;  %v1141_v3 = vmul.f32 %v1015_v53, %v1015_v53 }
 0x131   :  { %v1514_v39 = vadd.f32 %v1513_v63, %v1512_v56  ;;  %v1476_v0 = vpop.f32.mrb[31].mxu0  ;;  %v1515_v2 = vpop.f32.mrb[30].mxu1 }
 0x132   :  { %v1354_v4 = vpack.c.bf16 %v1016_v58, %v1015_v53  ;;  %v1142_v5 = vmul.f32 %v1016_v58, %v1016_v58  ;;  %v911_v6 = vadd.f32 %v1474_v59, %v1980_v50  ;;  %v1516_v7 = vpop.f32.mrb[31].mxu1 }
 0x134   :  { %1357 = vst [vmem:[%s2026_s3 + $0x10] sm:$0xff] %v1354_v4   ;;  %v975_v60 = vadd.f32 %v1514_v39, %v911_v6  ;;  %1576 = vmatpush3.bf16.msra.mxu0 %v1354_v4  ;;  %v1584_v8 = vpack.c.bf16 %v1142_v5, %v1141_v3 }
 0x135   :  { %1546 = vmatprep.subr.mxu0 %v1663_v61 }
 0x136   :  { %v1017_v10 = vadd.f32 %v1985_v1, %v975_v60  ;;  %1585 = vmatpush3.bf16.msra.mxu1 %v1584_v8 }
 0x137   :  { %1563 = vmatprep.subr.mxu1 %v1663_v61 }
 0x138   :  { %v1340_v50 = vpack.c.bf16 %v1017_v10, %v1017_v10  ;;  %1547 = vmatpush3.msra.mxu0 %v1017_v10  ;;  %v1143_v13 = vmul.f32 %v1017_v10, %v1017_v10 }
 0x139   :  { %1549 = vmatmul.mubr.msk.f32.vlgmr.msra.gmra.mrb[32].mxu0 %vm1062_vm2, %v1331_v12 }
 0x13a   :  { %1053 = vst [vmem:[%s2026_s3 + $0x18] sm:$0xf] %v1340_v50  ;;  %1564 = vmatpush3.msra.mxu1 %v1143_v13 }
 0x13b   :  { %1566 = vmatmul.mubr.msk.f32.vlgmr.msra.gmra.mrb[32].mxu1 %vm1062_vm2, %v1331_v12 }
 0x20c   :  { %v1132_v9 = vpop.f32.mrb[32].mxu0 }
 0x20d   :  { %1136 = vst [vmem:[%s2027_s4] sm:$0x1] %v1132_v9  ;;  %v1550_v1 = vpop.f32.mrb[33].mxu0 }
 0x20e   :  { %v1210_v14 = vpop.f32.mrb[32].mxu1 }
 0x20f   :  { %1214 = vst [vmem:[%s2028_s5] sm:$0x1] %v1210_v14  ;;  %v1567_v61 = vpop.f32.mrb[33].mxu1 }

// kernel: _lambda_.12
= control target key start
LH: loop header
LB: loop body
LE: loop exit
PB: predicated region body
PF: predicated region fallthrough
CT: control target
= control target key end

     0   :  { %v25_v0 = vlaneseq  ;;  %s154_s0 = inlined_call_operand.vmem [shape: bf16[24,256], index: 0, kind: input, shape index: {}]   ;;  %s155_s1 = inlined_call_operand.vmem [shape: f32[1,256], index: 1, kind: input, shape index: {}]   ;;  %s156_s2 = inlined_call_operand.vmem [shape: f32[1,256], index: 2, kind: input, shape index: {}]   ;;  %s157_s3 = inlined_call_operand.vmem [shape: bf16[24,256], index: 3, kind: output, shape index: {}]  }
   0x1   :  { %v14_v1 = vld [vmem:[%s154_s0] sm:$0xff]  ;;  %v15_v3 = vld [vmem:[%s154_s0 + $0x8] sm:$0xff]  ;;  %v16_v4 = vld [vmem:[%s154_s0 + $0x10] sm:$0xff] }
   0x2   :  { %v26_v2 = vshrl.u32 %v25_v0, 7  ;;  %v17_v5 = vunpack.c.l.bf16 %v14_v1  ;;  %v18_v6 = vunpack.c.h.bf16 %v14_v1  ;;  %v23_v7 = vld [vmem:[%s155_s1] sm:$0x3]  ;;  %v19_v11 = vunpack.c.l.bf16 %v15_v3 }
   0x3   :  { %v41_v8 = vld [vmem:[%s156_s2] sm:$0x3]  ;;  %v20_v12 = vunpack.c.h.bf16 %v15_v3  ;;  %v21_v13 = vunpack.c.l.bf16 %v16_v4  ;;  %v22_v14 = vunpack.c.h.bf16 %v16_v4 }
   0x4   :  { %v27_v9 = vsub.s32 0, %v26_v2  ;;  %v31_v10 = vsub.s32 1, %v26_v2 }
   0x6   :  { %v28_v15 = vrot.slane %v23_v7, %v27_v9  ;;  %v32_v16 = vrot.slane %v23_v7, %v31_v10  ;;  %v46_v17 = vrot.slane %v41_v8, %v27_v9  ;;  %v50_v18 = vrot.slane %v41_v8, %v31_v10 }
   0x8   :  { %v35_v19 = vmul.f32 %v28_v15, %v17_v5  ;;  %v36_v20 = vmul.f32 %v32_v16, %v18_v6  ;;  %v37_v21 = vmul.f32 %v28_v15, %v19_v11  ;;  %v38_v22 = vmul.f32 %v32_v16, %v20_v12 }
   0x9   :  { %v39_v23 = vmul.f32 %v28_v15, %v21_v13  ;;  %v40_v24 = vmul.f32 %v32_v16, %v22_v14 }
   0xa   :  { %v53_v25 = vadd.f32 %v46_v17, %v35_v19  ;;  %v54_v26 = vadd.f32 %v50_v18, %v36_v20  ;;  %v55_v27 = vadd.f32 %v46_v17, %v37_v21  ;;  %v56_v28 = vadd.f32 %v50_v18, %v38_v22 }
   0xb   :  { %v57_v29 = vadd.f32 %v46_v17, %v39_v23  ;;  %v58_v30 = vadd.f32 %v50_v18, %v40_v24 }
   0xc   :  { %vm59_vm0 = vcmp.ge.f32.partialorder %v53_v25, 0.0  ;;  %vm60_vm1 = vcmp.ge.f32.partialorder %v54_v26, 0.0  ;;  %v65_v31 = vmul.f32 0.2, %v53_v25  ;;  %v66_v32 = vmul.f32 0.2, %v54_v26 }
   0xd   :  { %vm61_vm2 = vcmp.ge.f32.partialorder %v55_v27, 0.0  ;;  %vm62_vm3 = vcmp.ge.f32.partialorder %v56_v28, 0.0  ;;  %v67_v33 = vmul.f32 0.2, %v55_v27  ;;  %v68_v34 = vmul.f32 0.2, %v56_v28 }
   0xe   :  { %v71_v35 = vsel %vm59_vm0, %v53_v25, %v65_v31  ;;  %v72_v36 = vsel %vm60_vm1, %v54_v26, %v66_v32  ;;  %vm63_vm4 = vcmp.ge.f32.partialorder %v57_v29, 0.0  ;;  %vm64_vm5 = vcmp.ge.f32.partialorder %v58_v30, 0.0 }
   0xf   :  { %v107_v37 = vpack.c.bf16 %v72_v36, %v71_v35  ;;  %v73_v38 = vsel %vm61_vm2, %v55_v27, %v67_v33  ;;  %v74_v39 = vsel %vm62_vm3, %v56_v28, %v68_v34  ;;  %v69_v40 = vmul.f32 0.2, %v57_v29 }
  0x10   :  { %v108_v41 = vpack.c.bf16 %v74_v39, %v73_v38  ;;  %v70_v42 = vmul.f32 0.2, %v58_v30 }
  0x11   :  { %97 = vst [vmem:[%s157_s3] sm:$0xff] %v107_v37  ;;  %v75_v43 = vsel %vm63_vm4, %v57_v29, %v69_v40 }
  0x12   :  { %98 = vst [vmem:[%s157_s3 + $0x8] sm:$0xff] %v108_v41  ;;  %v76_v44 = vsel %vm64_vm5, %v58_v30, %v70_v42 }
  0x13   :  { %v109_v45 = vpack.c.bf16 %v76_v44, %v75_v43 }
  0x15   :  { %99 = vst [vmem:[%s157_s3 + $0x10] sm:$0xff] %v109_v45 }

// kernel: _lambda_.11
= control target key start
LH: loop header
LB: loop body
LE: loop exit
PB: predicated region body
PF: predicated region fallthrough
CT: control target
= control target key end

     0   :  { %vm2207_vm1 = vcmask 195584   ;;  %s4115_s1 = inlined_call_operand.vmem [shape: bf16[2048,256], index: 1, kind: input, shape index: {}]   ;;  %s4116_s0 = inlined_call_operand.vmem [shape: bf16[24,2048], index: 0, kind: input, shape index: {}]   ;;  %s4117_s2 = inlined_call_operand.vmem [shape: f32[1,256], index: 2, kind: input, shape index: {}]   ;;  %s4118_s3 = inlined_call_operand.vmem [shape: bf16[24,256], index: 3, kind: output, shape index: {0}]   ;;  %s4119_s4 = inlined_call_operand.vmem [shape: f32[1,1,256], index: 4, kind: output, shape index: {1}]   ;;  %s4120_s5 = inlined_call_operand.vmem [shape: f32[1,1,256], index: 5, kind: output, shape index: {2}]  }
   0x1   :  { %v2748_v0 = vld [vmem:[%s4115_s1 + $0x4] ss:$8 sps:$4 sm:$0xff]   ;;  %v2752_v2 = vld [vmem:[%s4115_s1] ss:$8 sps:$4 sm:$0xff]   ;;  %v2754_v4 = vld [vmem:[%s4115_s1 + $0x14] ss:$8 sps:$4 sm:$0xff]  }
   0x2   :  { %v2750_v1 = vld [vmem:[%s4115_s1 + $0x404] ss:$8 sps:$4 sm:$0xff]   ;;  %1729 = vmatprep.subr.bf16.mxu1 %v2748_v0  ;;  %v2753_v3 = vld [vmem:[%s4115_s1 + $0x400] ss:$8 sps:$4 sm:$0xff]   ;;  %v2756_v5 = vld [vmem:[%s4115_s1 + $0x414] ss:$8 sps:$4 sm:$0xff]  }
   0x3   :  { %1933 = vmatprep.subr.bf16.mxu0 %v2750_v1  ;;  %1730 = vmatpush1.bf16.msra.mxu1 %v2752_v2  ;;  %v2758_v6 = vld [vmem:[%s4115_s1 + $0x10] ss:$8 sps:$4 sm:$0xff]   ;;  %v2760_v8 = vld [vmem:[%s4115_s1 + $0x24] ss:$8 sps:$4 sm:$0xff]   ;;  %v2764_v10 = vld [vmem:[%s4115_s1 + $0x20] ss:$8 sps:$4 sm:$0xff]  }
   0x4   :  { %1934 = vmatpush1.bf16.msra.mxu0 %v2753_v3  ;;  %1731 = vmatprep.subr.bf16.mxu1 %v2754_v4  ;;  %v2759_v7 = vld [vmem:[%s4115_s1 + $0x410] ss:$8 sps:$4 sm:$0xff]   ;;  %v2762_v9 = vld [vmem:[%s4115_s1 + $0x424] ss:$8 sps:$4 sm:$0xff]   ;;  %v2765_v11 = vld [vmem:[%s4115_s1 + $0x420] ss:$8 sps:$4 sm:$0xff]  }
   0x5   :  { %1935 = vmatprep.subr.bf16.mxu0 %v2756_v5  ;;  %v2766_v12 = vld [vmem:[%s4115_s1 + $0x34] ss:$8 sps:$4 sm:$0xff]   ;;  %v2770_v14 = vld [vmem:[%s4115_s1 + $0x30] ss:$8 sps:$4 sm:$0xff]   ;;  %v2772_v16 = vld [vmem:[%s4115_s1 + $0x44] ss:$8 sps:$4 sm:$0xff]  }
   0x6   :  { %v2768_v13 = vld [vmem:[%s4115_s1 + $0x434] ss:$8 sps:$4 sm:$0xff]   ;;  %v2771_v15 = vld [vmem:[%s4115_s1 + $0x430] ss:$8 sps:$4 sm:$0xff]   ;;  %v2774_v17 = vld [vmem:[%s4115_s1 + $0x444] ss:$8 sps:$4 sm:$0xff]  }
   0x7   :  { %1732 = vmatpush1.bf16.msra.mxu1 %v2758_v6  ;;  %v2776_v18 = vld [vmem:[%s4115_s1 + $0x40] ss:$8 sps:$4 sm:$0xff]   ;;  %v2778_v20 = vld [vmem:[%s4115_s1 + $0x54] ss:$8 sps:$4 sm:$0xff]   ;;  %v2782_v22 = vld [vmem:[%s4115_s1 + $0x50] ss:$8 sps:$4 sm:$0xff]  }
   0x8   :  { %1936 = vmatpush1.bf16.msra.mxu0 %v2759_v7  ;;  %1733 = vmatprep.subr.bf16.mxu1 %v2760_v8  ;;  %v2777_v19 = vld [vmem:[%s4115_s1 + $0x440] ss:$8 sps:$4 sm:$0xff]   ;;  %v2780_v21 = vld [vmem:[%s4115_s1 + $0x454] ss:$8 sps:$4 sm:$0xff]   ;;  %v2783_v23 = vld [vmem:[%s4115_s1 + $0x450] ss:$8 sps:$4 sm:$0xff]  }
   0x9   :  { %1937 = vmatprep.subr.bf16.mxu0 %v2762_v9  ;;  %v2784_v24 = vld [vmem:[%s4115_s1 + $0x64] ss:$8 sps:$4 sm:$0xff]   ;;  %v2788_v26 = vld [vmem:[%s4115_s1 + $0x60] ss:$8 sps:$4 sm:$0xff]   ;;  %v2790_v28 = vld [vmem:[%s4115_s1 + $0x74] ss:$8 sps:$4 sm:$0xff]  }
   0xa   :  { %v2786_v25 = vld [vmem:[%s4115_s1 + $0x464] ss:$8 sps:$4 sm:$0xff]   ;;  %v2789_v27 = vld [vmem:[%s4115_s1 + $0x460] ss:$8 sps:$4 sm:$0xff]   ;;  %v2792_v29 = vld [vmem:[%s4115_s1 + $0x474] ss:$8 sps:$4 sm:$0xff]  }
   0xb   :  { %1734 = vmatpush1.bf16.msra.mxu1 %v2764_v10  ;;  %v2794_v30 = vld [vmem:[%s4115_s1 + $0x70] ss:$8 sps:$4 sm:$0xff]   ;;  %v2796_v32 = vld [vmem:[%s4115_s1 + $0x84] ss:$8 sps:$4 sm:$0xff]   ;;  %v2800_v34 = vld [vmem:[%s4115_s1 + $0x80] ss:$8 sps:$4 sm:$0xff]  }
   0xc   :  { %1938 = vmatpush1.bf16.msra.mxu0 %v2765_v11  ;;  %1735 = vmatprep.subr.bf16.mxu1 %v2766_v12  ;;  %v2795_v31 = vld [vmem:[%s4115_s1 + $0x470] ss:$8 sps:$4 sm:$0xff]   ;;  %v2798_v33 = vld [vmem:[%s4115_s1 + $0x484] ss:$8 sps:$4 sm:$0xff]   ;;  %v2801_v35 = vld [vmem:[%s4115_s1 + $0x480] ss:$8 sps:$4 sm:$0xff]  }
   0xd   :  { %1939 = vmatprep.subr.bf16.mxu0 %v2768_v13  ;;  %v2802_v36 = vld [vmem:[%s4115_s1 + $0x94] ss:$8 sps:$4 sm:$0xff]   ;;  %v2806_v38 = vld [vmem:[%s4115_s1 + $0x90] ss:$8 sps:$4 sm:$0xff]   ;;  %v2808_v40 = vld [vmem:[%s4115_s1 + $0xa4] ss:$8 sps:$4 sm:$0xff]  }
   0xe   :  { %v2804_v37 = vld [vmem:[%s4115_s1 + $0x494] ss:$8 sps:$4 sm:$0xff]   ;;  %v2807_v39 = vld [vmem:[%s4115_s1 + $0x490] ss:$8 sps:$4 sm:$0xff]   ;;  %v2810_v41 = vld [vmem:[%s4115_s1 + $0x4a4] ss:$8 sps:$4 sm:$0xff]  }
   0xf   :  { %1736 = vmatpush1.bf16.msra.mxu1 %v2770_v14  ;;  %v2812_v42 = vld [vmem:[%s4115_s1 + $0xa0] ss:$8 sps:$4 sm:$0xff]   ;;  %v2814_v44 = vld [vmem:[%s4115_s1 + $0xb4] ss:$8 sps:$4 sm:$0xff]   ;;  %v2818_v46 = vld [vmem:[%s4115_s1 + $0xb0] ss:$8 sps:$4 sm:$0xff]  }
  0x10   :  { %1940 = vmatpush1.bf16.msra.mxu0 %v2771_v15  ;;  %1737 = vmatprep.subr.bf16.mxu1 %v2772_v16  ;;  %v2813_v43 = vld [vmem:[%s4115_s1 + $0x4a0] ss:$8 sps:$4 sm:$0xff]   ;;  %v2816_v45 = vld [vmem:[%s4115_s1 + $0x4b4] ss:$8 sps:$4 sm:$0xff]   ;;  %v2819_v47 = vld [vmem:[%s4115_s1 + $0x4b0] ss:$8 sps:$4 sm:$0xff]  }
  0x11   :  { %1941 = vmatprep.subr.bf16.mxu0 %v2774_v17  ;;  %v33_v48 = vld [vmem:[%s4116_s0] sm:$0xff]  ;;  %v2826_v58 = vld [vmem:[%s4115_s1 + $0xd4] ss:$8 sps:$4 sm:$0xff]   ;;  %v2830_v60 = vld [vmem:[%s4115_s1 + $0xd0] ss:$8 sps:$4 sm:$0xff]  }
  0x12   :  { %v41_v49 = vld [vmem:[%s4116_s0 + $0x40] sm:$0xff]  ;;  %v2828_v59 = vld [vmem:[%s4115_s1 + $0x4d4] ss:$8 sps:$4 sm:$0xff]   ;;  %v2831_v61 = vld [vmem:[%s4115_s1 + $0x4d0] ss:$8 sps:$4 sm:$0xff]  }
  0x13   :  { %1738 = vmatpush1.bf16.msra.mxu1 %v2776_v18  ;;  %v2820_v50 = vld [vmem:[%s4115_s1 + $0xc4] ss:$8 sps:$4 sm:$0xff]   ;;  %v2414_v52 = vcombine.high %v33_v48, %v41_v49  ;;  %v2824_v56 = vld [vmem:[%s4115_s1 + $0xc0] ss:$8 sps:$4 sm:$0xff]   ;;  %v2838_v2 = vld [vmem:[%s4115_s1 + $0xf4] ss:$8 sps:$4 sm:$0xff]   ;;  %v2413_v8 = vcombine.low %v33_v48, %v41_v49 }
  0x14   :  { %1942 = vmatpush1.bf16.msra.mxu0 %v2777_v19  ;;  %1739 = vmatprep.subr.bf16.mxu1 %v2778_v20  ;;  %v2822_v51 = vld [vmem:[%s4115_s1 + $0x4c4] ss:$8 sps:$4 sm:$0xff]   ;;  %v2825_v57 = vld [vmem:[%s4115_s1 + $0x4c0] ss:$8 sps:$4 sm:$0xff]   ;;  %v2840_v3 = vld [vmem:[%s4115_s1 + $0x4f4] ss:$8 sps:$4 sm:$0xff]  }
  0x15   :  { %1943 = vmatprep.subr.bf16.mxu0 %v2780_v21  ;;  %v37_v53 = vld [vmem:[%s4116_s0 + $0x20] sm:$0xff]  ;;  %1761 = vmatprep.mubr.bf16.mxu1 %v2414_v52  ;;  %v2842_v4 = vld [vmem:[%s4115_s1 + $0xf0] ss:$8 sps:$4 sm:$0xff]   ;;  %v2852_v12 = vld [vmem:[%s4115_s1 + $0x114] ss:$8 sps:$4 sm:$0xff]  }
  0x16   :  { %v45_v54 = vld [vmem:[%s4116_s0 + $0x60] sm:$0xff]  ;;  %v2843_v5 = vld [vmem:[%s4115_s1 + $0x4f0] ss:$8 sps:$4 sm:$0xff]   ;;  %v2855_v13 = vld [vmem:[%s4115_s1 + $0x514] ss:$8 sps:$4 sm:$0xff]  }
  0x17   :  { %1740 = vmatpush1.bf16.msra.mxu1 %v2782_v22  ;;  %v2422_v55 = vcombine.high %v37_v53, %v45_v54  ;;  %v2832_v62 = vld [vmem:[%s4115_s1 + $0xe4] ss:$8 sps:$4 sm:$0xff]   ;;  %v2836_v0 = vld [vmem:[%s4115_s1 + $0xe0] ss:$8 sps:$4 sm:$0xff]   ;;  %v2421_v10 = vcombine.low %v37_v53, %v45_v54  ;;  %v2850_v14 = vld [vmem:[%s4115_s1 + $0x110] ss:$8 sps:$4 sm:$0xff]  }
  0x18   :  { %1944 = vmatpush1.bf16.msra.mxu0 %v2783_v23  ;;  %1741 = vmatprep.subr.bf16.mxu1 %v2784_v24  ;;  %v2834_v63 = vld [vmem:[%s4115_s1 + $0x4e4] ss:$8 sps:$4 sm:$0xff]   ;;  %v2837_v1 = vld [vmem:[%s4115_s1 + $0x4e0] ss:$8 sps:$4 sm:$0xff]   ;;  %v2853_v15 = vld [vmem:[%s4115_s1 + $0x510] ss:$8 sps:$4 sm:$0xff]  }
  0x19   :  { %1945 = vmatprep.subr.bf16.mxu0 %v2786_v25  ;;  %1965 = vmatprep.mubr.bf16.mxu0 %v2422_v55  ;;  %v2846_v6 = vld [vmem:[%s4115_s1 + $0x104] ss:$8 sps:$4 sm:$0xff]   ;;  %v2844_v9 = vld [vmem:[%s4115_s1 + $0x100] ss:$8 sps:$4 sm:$0xff]   ;;  %v2864_v20 = vld [vmem:[%s4115_s1 + $0x134] ss:$8 sps:$4 sm:$0xff]  }
  0x1a   :  { %v2849_v7 = vld [vmem:[%s4115_s1 + $0x504] ss:$8 sps:$4 sm:$0xff]   ;;  %v2847_v11 = vld [vmem:[%s4115_s1 + $0x500] ss:$8 sps:$4 sm:$0xff]   ;;  %v2867_v21 = vld [vmem:[%s4115_s1 + $0x534] ss:$8 sps:$4 sm:$0xff]  }
  0x1b   :  { %1742 = vmatpush1.bf16.msra.mxu1 %v2788_v26  ;;  %v2858_v16 = vld [vmem:[%s4115_s1 + $0x124] ss:$8 sps:$4 sm:$0xff]   ;;  %v2856_v18 = vld [vmem:[%s4115_s1 + $0x120] ss:$8 sps:$4 sm:$0xff]   ;;  %v2862_v22 = vld [vmem:[%s4115_s1 + $0x130] ss:$8 sps:$4 sm:$0xff]  }
  0x1c   :  { %1946 = vmatpush1.bf16.msra.mxu0 %v2789_v27  ;;  %1743 = vmatprep.subr.bf16.mxu1 %v2790_v28  ;;  %v2861_v17 = vld [vmem:[%s4115_s1 + $0x524] ss:$8 sps:$4 sm:$0xff]   ;;  %v2859_v19 = vld [vmem:[%s4115_s1 + $0x520] ss:$8 sps:$4 sm:$0xff]   ;;  %v2865_v23 = vld [vmem:[%s4115_s1 + $0x530] ss:$8 sps:$4 sm:$0xff]  }
  0x1d   :  { %1947 = vmatprep.subr.bf16.mxu0 %v2792_v29  ;;  %v2870_v24 = vld [vmem:[%s4115_s1 + $0x144] ss:$8 sps:$4 sm:$0xff]   ;;  %v2868_v26 = vld [vmem:[%s4115_s1 + $0x140] ss:$8 sps:$4 sm:$0xff]   ;;  %v2876_v28 = vld [vmem:[%s4115_s1 + $0x154] ss:$8 sps:$4 sm:$0xff]  }
  0x1e   :  { %v2873_v25 = vld [vmem:[%s4115_s1 + $0x544] ss:$8 sps:$4 sm:$0xff]   ;;  %v2871_v27 = vld [vmem:[%s4115_s1 + $0x540] ss:$8 sps:$4 sm:$0xff]   ;;  %v2879_v29 = vld [vmem:[%s4115_s1 + $0x554] ss:$8 sps:$4 sm:$0xff]  }
  0x1f   :  { %1744 = vmatpush1.bf16.msra.mxu1 %v2794_v30  ;;  %v49_v30 = vld [vmem:[%s4116_s0 + $0x80] sm:$0xff]  ;;  %v3500_v48 = vld [vmem:[%s4116_s0 + $0x68] sm:$0xff] }
  0x20   :  { %1948 = vmatpush1.bf16.msra.mxu0 %v2795_v31  ;;  %1745 = vmatprep.subr.bf16.mxu1 %v2796_v32  ;;  %v2430_v31 = vcombine.high %v49_v30, %v49_v30  ;;  %v2429_v32 = vcombine.low %v49_v30, %v49_v30  ;;  %v2894_v52 = vld [vmem:[%s4115_s1 + $0x184] ss:$8 sps:$4 sm:$0xff]   ;;  %v2892_v54 = vld [vmem:[%s4115_s1 + $0x180] ss:$8 sps:$4 sm:$0xff]  }
  0x21   :  { %1949 = vmatprep.subr.bf16.mxu0 %v2798_v33  ;;  %v53_v33 = vld [vmem:[%s4116_s0 + $0xa0] sm:$0xff] }
  0x22   :  { %v2897_v53 = vld [vmem:[%s4115_s1 + $0x584] ss:$8 sps:$4 sm:$0xff]   ;;  %v2895_v55 = vld [vmem:[%s4115_s1 + $0x580] ss:$8 sps:$4 sm:$0xff]  }
  0x23   :  { %1746 = vmatpush1.bf16.msra.mxu1 %v2800_v34  ;;  %v2874_v34 = vld [vmem:[%s4115_s1 + $0x150] ss:$8 sps:$4 sm:$0xff]  }
  0x24   :  { %1950 = vmatpush1.bf16.msra.mxu0 %v2801_v35  ;;  %1747 = vmatprep.subr.bf16.mxu1 %v2802_v36  ;;  %v2877_v35 = vld [vmem:[%s4115_s1 + $0x550] ss:$8 sps:$4 sm:$0xff]   ;;  %v2438_v36 = vcombine.high %v53_v33, %v53_v33 }
  0x25   :  { %1951 = vmatprep.subr.bf16.mxu0 %v2804_v37  ;;  %v2437_v37 = vcombine.low %v53_v33, %v53_v33  ;;  %v2953_v33 = vld [vmem:[%s4115_s1 + $0x610] ss:$8 sps:$4 sm:$0xff]  }
  0x27   :  { %1748 = vmatpush1.bf16.msra.mxu1 %v2806_v38  ;;  %v2882_v38 = vld [vmem:[%s4115_s1 + $0x164] ss:$8 sps:$4 sm:$0xff]  }
  0x28   :  { %1952 = vmatpush1.bf16.msra.mxu0 %v2807_v39  ;;  %1749 = vmatprep.subr.bf16.mxu1 %v2808_v40  ;;  %v2885_v39 = vld [vmem:[%s4115_s1 + $0x564] ss:$8 sps:$4 sm:$0xff]   ;;  %v2880_v40 = vld [vmem:[%s4115_s1 + $0x160] ss:$8 sps:$4 sm:$0xff]  }
  0x29   :  { %1953 = vmatprep.subr.bf16.mxu0 %v2810_v41  ;;  %v2883_v41 = vld [vmem:[%s4115_s1 + $0x560] ss:$8 sps:$4 sm:$0xff]  }
  0x2b   :  { %1750 = vmatpush1.bf16.msra.mxu1 %v2812_v42  ;;  %v3477_v42 = vld [vmem:[%s4116_s0 + $0x8] sm:$0xff] }
  0x2c   :  { %1954 = vmatpush1.bf16.msra.mxu0 %v2813_v43  ;;  %1751 = vmatprep.subr.bf16.mxu1 %v2814_v44  ;;  %v3482_v43 = vld [vmem:[%s4116_s0 + $0x48] sm:$0xff]  ;;  %v2888_v44 = vld [vmem:[%s4115_s1 + $0x174] ss:$8 sps:$4 sm:$0xff]  }
  0x2d   :  { %1955 = vmatprep.subr.bf16.mxu0 %v2816_v45  ;;  %v2416_v45 = vcombine.high %v3477_v42, %v3482_v43 }
  0x2f   :  { %1752 = vmatpush1.bf16.msra.mxu1 %v2818_v46  ;;  %v2891_v46 = vld [vmem:[%s4115_s1 + $0x574] ss:$8 sps:$4 sm:$0xff]  }
  0x30   :  { %1956 = vmatpush1.bf16.msra.mxu0 %v2819_v47  ;;  %1753 = vmatprep.subr.bf16.mxu1 %v2820_v50  ;;  %v3495_v47 = vld [vmem:[%s4116_s0 + $0x28] sm:$0xff]  ;;  %v2886_v50 = vld [vmem:[%s4115_s1 + $0x170] ss:$8 sps:$4 sm:$0xff]  }
  0x31   :  { %1957 = vmatprep.subr.bf16.mxu0 %v2822_v51  ;;  %v2424_v49 = vcombine.high %v3495_v47, %v3500_v48  ;;  %v2889_v51 = vld [vmem:[%s4115_s1 + $0x570] ss:$8 sps:$4 sm:$0xff]  }
  0x33   :  { %1754 = vmatpush1.bf16.msra.mxu1 %v2824_v56  ;;  %v2900_v56 = vld [vmem:[%s4115_s1 + $0x194] ss:$8 sps:$4 sm:$0xff]  }
  0x34   :  { %1958 = vmatpush1.bf16.msra.mxu0 %v2825_v57  ;;  %1755 = vmatprep.subr.bf16.mxu1 %v2826_v58  ;;  %v2903_v57 = vld [vmem:[%s4115_s1 + $0x594] ss:$8 sps:$4 sm:$0xff]   ;;  %v2898_v58 = vld [vmem:[%s4115_s1 + $0x190] ss:$8 sps:$4 sm:$0xff]  }
  0x35   :  { %1959 = vmatprep.subr.bf16.mxu0 %v2828_v59  ;;  %v2901_v59 = vld [vmem:[%s4115_s1 + $0x590] ss:$8 sps:$4 sm:$0xff]  }
  0x37   :  { %1756 = vmatpush1.bf16.msra.mxu1 %v2830_v60  ;;  %v2906_v60 = vld [vmem:[%s4115_s1 + $0x1a4] ss:$8 sps:$4 sm:$0xff]  }
  0x38   :  { %1960 = vmatpush1.bf16.msra.mxu0 %v2831_v61  ;;  %1757 = vmatprep.subr.bf16.mxu1 %v2832_v62  ;;  %v2909_v61 = vld [vmem:[%s4115_s1 + $0x5a4] ss:$8 sps:$4 sm:$0xff]   ;;  %v2904_v62 = vld [vmem:[%s4115_s1 + $0x1a0] ss:$8 sps:$4 sm:$0xff]  }
  0x39   :  { %1961 = vmatprep.subr.bf16.mxu0 %v2834_v63  ;;  %v2907_v63 = vld [vmem:[%s4115_s1 + $0x5a0] ss:$8 sps:$4 sm:$0xff]  }
  0x3b   :  { %1758 = vmatpush1.bf16.msra.mxu1 %v2836_v0  ;;  %v2912_v0 = vld [vmem:[%s4115_s1 + $0x1b4] ss:$8 sps:$4 sm:$0xff]  }
  0x3c   :  { %1962 = vmatpush1.bf16.msra.mxu0 %v2837_v1  ;;  %1759 = vmatprep.subr.bf16.mxu1 %v2838_v2  ;;  %v2915_v1 = vld [vmem:[%s4115_s1 + $0x5b4] ss:$8 sps:$4 sm:$0xff]   ;;  %v2910_v2 = vld [vmem:[%s4115_s1 + $0x1b0] ss:$8 sps:$4 sm:$0xff]  }
  0x3d   :  { %1963 = vmatprep.subr.bf16.mxu0 %v2840_v3  ;;  %v2913_v3 = vld [vmem:[%s4115_s1 + $0x5b0] ss:$8 sps:$4 sm:$0xff]  }
  0x3f   :  { %1760 = vmatpush1.bf16.msra.mxu1 %v2842_v4  ;;  %v2918_v4 = vld [vmem:[%s4115_s1 + $0x1c4] ss:$8 sps:$4 sm:$0xff]  }
  0x40   :  { %1964 = vmatpush1.bf16.msra.mxu0 %v2843_v5  ;;  %1780 = vmatprep.subr.bf16.mxu1 %v2846_v6  ;;  %v2921_v5 = vld [vmem:[%s4115_s1 + $0x5c4] ss:$8 sps:$4 sm:$0xff]   ;;  %v2916_v6 = vld [vmem:[%s4115_s1 + $0x1c0] ss:$8 sps:$4 sm:$0xff]  }
  0x41   :  { %1984 = vmatprep.subr.bf16.mxu0 %v2849_v7  ;;  %v2919_v7 = vld [vmem:[%s4115_s1 + $0x5c0] ss:$8 sps:$4 sm:$0xff]  }
  0x42   :  { %1762 = vmatmul.mubr.bf16.vlgmr.msra.gmra.mrb[0].mxu1 %v2413_v8  ;;  %v2924_v8 = vld [vmem:[%s4115_s1 + $0x1d4] ss:$8 sps:$4 sm:$0xff]  }
  0x43   :  { %1966 = vmatmul.mubr.bf16.vlgmr.msra.gmra.mrb[0].mxu0 %v2421_v10  ;;  %1781 = vmatpush1.bf16.msra.mxu1 %v2844_v9  ;;  %v2927_v9 = vld [vmem:[%s4115_s1 + $0x5d4] ss:$8 sps:$4 sm:$0xff]   ;;  %v2922_v10 = vld [vmem:[%s4115_s1 + $0x1d0] ss:$8 sps:$4 sm:$0xff]  }
  0x44   :  { %1985 = vmatpush1.bf16.msra.mxu0 %v2847_v11  ;;  %1782 = vmatprep.subr.bf16.mxu1 %v2852_v12  ;;  %v2925_v11 = vld [vmem:[%s4115_s1 + $0x5d0] ss:$8 sps:$4 sm:$0xff]   ;;  %v2932_v12 = vld [vmem:[%s4115_s1 + $0x1e4] ss:$8 sps:$4 sm:$0xff]  }
  0x45   :  { %1986 = vmatprep.subr.bf16.mxu0 %v2855_v13  ;;  %1771 = vmatprep.mubr.bf16.mxu1 %v2430_v31  ;;  %v2936_v13 = vld [vmem:[%s4115_s1 + $0x5e4] ss:$8 sps:$4 sm:$0xff]  }
  0x46   :  { %1975 = vmatprep.mubr.bf16.mxu0 %v2438_v36  ;;  %v2958_v36 = vld [vmem:[%s4115_s1 + $0x220] ss:$8 sps:$4 sm:$0xff]  }
  0x47   :  { %1783 = vmatpush1.bf16.msra.mxu1 %v2850_v14  ;;  %v2930_v14 = vld [vmem:[%s4115_s1 + $0x1e0] ss:$8 sps:$4 sm:$0xff]  }
  0x48   :  { %1987 = vmatpush1.bf16.msra.mxu0 %v2853_v15  ;;  %1784 = vmatprep.subr.bf16.mxu1 %v2858_v16  ;;  %v2934_v15 = vld [vmem:[%s4115_s1 + $0x5e0] ss:$8 sps:$4 sm:$0xff]   ;;  %v2940_v16 = vld [vmem:[%s4115_s1 + $0x1f4] ss:$8 sps:$4 sm:$0xff]  }
  0x49   :  { %1988 = vmatprep.subr.bf16.mxu0 %v2861_v17  ;;  %v2943_v17 = vld [vmem:[%s4115_s1 + $0x5f4] ss:$8 sps:$4 sm:$0xff]  }
  0x4a   :  { %1772 = vmatmul.mubr.bf16.gmra.mrb[4].mxu1 %v2429_v32  ;;  %v2950_v32 = vld [vmem:[%s4115_s1 + $0x210] ss:$8 sps:$4 sm:$0xff]  }
  0x4b   :  { %1785 = vmatpush1.bf16.msra.mxu1 %v2856_v18  ;;  %1976 = vmatmul.mubr.bf16.gmra.mrb[4].mxu0 %v2437_v37  ;;  %v2938_v18 = vld [vmem:[%s4115_s1 + $0x1f0] ss:$8 sps:$4 sm:$0xff]   ;;  %v2961_v37 = vld [vmem:[%s4115_s1 + $0x620] ss:$8 sps:$4 sm:$0xff]  }
  0x4c   :  { %1989 = vmatpush1.bf16.msra.mxu0 %v2859_v19  ;;  %1786 = vmatprep.subr.bf16.mxu1 %v2864_v20  ;;  %v2941_v19 = vld [vmem:[%s4115_s1 + $0x5f0] ss:$8 sps:$4 sm:$0xff]   ;;  %v2946_v20 = vld [vmem:[%s4115_s1 + $0x204] ss:$8 sps:$4 sm:$0xff]  }
  0x4d   :  { %1990 = vmatprep.subr.bf16.mxu0 %v2867_v21  ;;  %1812 = vmatprep.mubr.bf16.mxu1 %v2416_v45  ;;  %v2949_v21 = vld [vmem:[%s4115_s1 + $0x604] ss:$8 sps:$4 sm:$0xff]   ;;  %v2969_v45 = vld [vmem:[%s4115_s1 + $0x634] ss:$8 sps:$4 sm:$0xff]  }
  0x4e   :  { %2016 = vmatprep.mubr.bf16.mxu0 %v2424_v49  ;;  %v2967_v49 = vld [vmem:[%s4115_s1 + $0x630] ss:$8 sps:$4 sm:$0xff]  }
  0x4f   :  { %1787 = vmatpush1.bf16.msra.mxu1 %v2862_v22  ;;  %v2944_v22 = vld [vmem:[%s4115_s1 + $0x200] ss:$8 sps:$4 sm:$0xff]  }
  0x50   :  { %1991 = vmatpush1.bf16.msra.mxu0 %v2865_v23  ;;  %1788 = vmatprep.subr.bf16.mxu1 %v2870_v24  ;;  %v2415_v23 = vcombine.low %v3477_v42, %v3482_v43  ;;  %v2423_v24 = vcombine.low %v3495_v47, %v3500_v48  ;;  %v3665_v42 = vld [vmem:[%s4116_s0 + $0x30] sm:$0xff] }
  0x51   :  { %1992 = vmatprep.subr.bf16.mxu0 %v2873_v25  ;;  %v2947_v25 = vld [vmem:[%s4115_s1 + $0x600] ss:$8 sps:$4 sm:$0xff]   ;;  %v3670_v43 = vld [vmem:[%s4116_s0 + $0x70] sm:$0xff] }
  0x52   :  { %v2426_v47 = vcombine.high %v3665_v42, %v3670_v43  ;;  %v2964_v48 = vld [vmem:[%s4115_s1 + $0x230] ss:$8 sps:$4 sm:$0xff]  }
  0x53   :  { %1789 = vmatpush1.bf16.msra.mxu1 %v2868_v26  ;;  %v50_v26 = vld [vmem:[%s4116_s0 + $0x88] sm:$0xff] }
  0x54   :  { %1993 = vmatpush1.bf16.msra.mxu0 %v2871_v27  ;;  %1790 = vmatprep.subr.bf16.mxu1 %v2876_v28  ;;  %v54_v27 = vld [vmem:[%s4116_s0 + $0xa8] sm:$0xff]  ;;  %v2952_v28 = vld [vmem:[%s4115_s1 + $0x214] ss:$8 sps:$4 sm:$0xff]   ;;  %v2432_v30 = vcombine.high %v50_v26, %v50_v26 }
  0x55   :  { %1994 = vmatprep.subr.bf16.mxu0 %v2879_v29  ;;  %v2955_v29 = vld [vmem:[%s4115_s1 + $0x614] ss:$8 sps:$4 sm:$0xff]   ;;  %v2440_v31 = vcombine.high %v54_v27, %v54_v27 }
  0x57   :  { %1791 = vmatpush1.bf16.msra.mxu1 %v2874_v34  ;;  %v2960_v34 = vld [vmem:[%s4115_s1 + $0x224] ss:$8 sps:$4 sm:$0xff]  }
  0x58   :  { %1995 = vmatpush1.bf16.msra.mxu0 %v2877_v35  ;;  %1792 = vmatprep.subr.bf16.mxu1 %v2882_v38  ;;  %v2963_v35 = vld [vmem:[%s4115_s1 + $0x624] ss:$8 sps:$4 sm:$0xff]   ;;  %v3655_v38 = vld [vmem:[%s4116_s0 + $0x10] sm:$0xff] }
  0x59   :  { %1996 = vmatprep.subr.bf16.mxu0 %v2885_v39  ;;  %v3660_v39 = vld [vmem:[%s4116_s0 + $0x50] sm:$0xff] }
  0x5b   :  { %1793 = vmatpush1.bf16.msra.mxu1 %v2880_v40  ;;  %v2431_v40 = vcombine.low %v50_v26, %v50_v26  ;;  %v3032_v26 = vld [vmem:[%s4115_s1 + $0x2e4] ss:$8 sps:$4 sm:$0xff]  }
  0x5c   :  { %1997 = vmatpush1.bf16.msra.mxu0 %v2883_v41  ;;  %1794 = vmatprep.subr.bf16.mxu1 %v2888_v44  ;;  %v2439_v41 = vcombine.low %v54_v27, %v54_v27  ;;  %v2966_v44 = vld [vmem:[%s4115_s1 + $0x234] ss:$8 sps:$4 sm:$0xff]   ;;  %v3036_v27 = vld [vmem:[%s4115_s1 + $0x6e4] ss:$8 sps:$4 sm:$0xff]  }
  0x5d   :  { %1998 = vmatprep.subr.bf16.mxu0 %v2891_v46  ;;  %v2418_v46 = vcombine.high %v3655_v38, %v3660_v39 }
  0x5f   :  { %1795 = vmatpush1.bf16.msra.mxu1 %v2886_v50  ;;  %v2972_v50 = vld [vmem:[%s4115_s1 + $0x244] ss:$8 sps:$4 sm:$0xff]  }
  0x60   :  { %1999 = vmatpush1.bf16.msra.mxu0 %v2889_v51  ;;  %1796 = vmatprep.subr.bf16.mxu1 %v2894_v52  ;;  %v2975_v51 = vld [vmem:[%s4115_s1 + $0x644] ss:$8 sps:$4 sm:$0xff]   ;;  %v2970_v52 = vld [vmem:[%s4115_s1 + $0x240] ss:$8 sps:$4 sm:$0xff]  }
  0x61   :  { %2000 = vmatprep.subr.bf16.mxu0 %v2897_v53  ;;  %v2973_v53 = vld [vmem:[%s4115_s1 + $0x640] ss:$8 sps:$4 sm:$0xff]  }
  0x63   :  { %1797 = vmatpush1.bf16.msra.mxu1 %v2892_v54  ;;  %v2978_v54 = vld [vmem:[%s4115_s1 + $0x254] ss:$8 sps:$4 sm:$0xff]  }
  0x64   :  { %2001 = vmatpush1.bf16.msra.mxu0 %v2895_v55  ;;  %1798 = vmatprep.subr.bf16.mxu1 %v2900_v56  ;;  %v2981_v55 = vld [vmem:[%s4115_s1 + $0x654] ss:$8 sps:$4 sm:$0xff]   ;;  %v2976_v56 = vld [vmem:[%s4115_s1 + $0x250] ss:$8 sps:$4 sm:$0xff]  }
  0x65   :  { %2002 = vmatprep.subr.bf16.mxu0 %v2903_v57  ;;  %v2979_v57 = vld [vmem:[%s4115_s1 + $0x650] ss:$8 sps:$4 sm:$0xff]  }
  0x67   :  { %1799 = vmatpush1.bf16.msra.mxu1 %v2898_v58  ;;  %v2984_v58 = vld [vmem:[%s4115_s1 + $0x264] ss:$8 sps:$4 sm:$0xff]  }
  0x68   :  { %2003 = vmatpush1.bf16.msra.mxu0 %v2901_v59  ;;  %1800 = vmatprep.subr.bf16.mxu1 %v2906_v60  ;;  %v2987_v59 = vld [vmem:[%s4115_s1 + $0x664] ss:$8 sps:$4 sm:$0xff]   ;;  %v2982_v60 = vld [vmem:[%s4115_s1 + $0x260] ss:$8 sps:$4 sm:$0xff]  }
  0x69   :  { %2004 = vmatprep.subr.bf16.mxu0 %v2909_v61  ;;  %v2985_v61 = vld [vmem:[%s4115_s1 + $0x660] ss:$8 sps:$4 sm:$0xff]  }
  0x6b   :  { %1801 = vmatpush1.bf16.msra.mxu1 %v2904_v62  ;;  %v2990_v62 = vld [vmem:[%s4115_s1 + $0x274] ss:$8 sps:$4 sm:$0xff]  }
  0x6c   :  { %2005 = vmatpush1.bf16.msra.mxu0 %v2907_v63  ;;  %1802 = vmatprep.subr.bf16.mxu1 %v2912_v0  ;;  %v2993_v63 = vld [vmem:[%s4115_s1 + $0x674] ss:$8 sps:$4 sm:$0xff]   ;;  %v2988_v0 = vld [vmem:[%s4115_s1 + $0x270] ss:$8 sps:$4 sm:$0xff]  }
  0x6d   :  { %2006 = vmatprep.subr.bf16.mxu0 %v2915_v1  ;;  %v2991_v1 = vld [vmem:[%s4115_s1 + $0x670] ss:$8 sps:$4 sm:$0xff]  }
  0x6f   :  { %1803 = vmatpush1.bf16.msra.mxu1 %v2910_v2  ;;  %v2996_v2 = vld [vmem:[%s4115_s1 + $0x284] ss:$8 sps:$4 sm:$0xff]  }
  0x70   :  { %2007 = vmatpush1.bf16.msra.mxu0 %v2913_v3  ;;  %1804 = vmatprep.subr.bf16.mxu1 %v2918_v4  ;;  %v2999_v3 = vld [vmem:[%s4115_s1 + $0x684] ss:$8 sps:$4 sm:$0xff]   ;;  %v2994_v4 = vld [vmem:[%s4115_s1 + $0x280] ss:$8 sps:$4 sm:$0xff]  }
  0x71   :  { %2008 = vmatprep.subr.bf16.mxu0 %v2921_v5  ;;  %v2997_v5 = vld [vmem:[%s4115_s1 + $0x680] ss:$8 sps:$4 sm:$0xff]  }
  0x73   :  { %1805 = vmatpush1.bf16.msra.mxu1 %v2916_v6  ;;  %v3002_v6 = vld [vmem:[%s4115_s1 + $0x294] ss:$8 sps:$4 sm:$0xff]  }
  0x74   :  { %2009 = vmatpush1.bf16.msra.mxu0 %v2919_v7  ;;  %1806 = vmatprep.subr.bf16.mxu1 %v2924_v8  ;;  %v3005_v7 = vld [vmem:[%s4115_s1 + $0x694] ss:$8 sps:$4 sm:$0xff]   ;;  %v3000_v8 = vld [vmem:[%s4115_s1 + $0x290] ss:$8 sps:$4 sm:$0xff]  }
  0x75   :  { %2010 = vmatprep.subr.bf16.mxu0 %v2927_v9  ;;  %v3003_v9 = vld [vmem:[%s4115_s1 + $0x690] ss:$8 sps:$4 sm:$0xff]  }
  0x77   :  { %1807 = vmatpush1.bf16.msra.mxu1 %v2922_v10  ;;  %v3008_v10 = vld [vmem:[%s4115_s1 + $0x2a4] ss:$8 sps:$4 sm:$0xff]  }
  0x78   :  { %2011 = vmatpush1.bf16.msra.mxu0 %v2925_v11  ;;  %1808 = vmatprep.subr.bf16.mxu1 %v2932_v12  ;;  %v3011_v11 = vld [vmem:[%s4115_s1 + $0x6a4] ss:$8 sps:$4 sm:$0xff]   ;;  %v3006_v12 = vld [vmem:[%s4115_s1 + $0x2a0] ss:$8 sps:$4 sm:$0xff]  }
  0x79   :  { %2012 = vmatprep.subr.bf16.mxu0 %v2936_v13  ;;  %v3009_v13 = vld [vmem:[%s4115_s1 + $0x6a0] ss:$8 sps:$4 sm:$0xff]  }
  0x7b   :  { %1809 = vmatpush1.bf16.msra.mxu1 %v2930_v14  ;;  %v3014_v14 = vld [vmem:[%s4115_s1 + $0x2b4] ss:$8 sps:$4 sm:$0xff]  }
  0x7c   :  { %2013 = vmatpush1.bf16.msra.mxu0 %v2934_v15  ;;  %1810 = vmatprep.subr.bf16.mxu1 %v2940_v16  ;;  %v3017_v15 = vld [vmem:[%s4115_s1 + $0x6b4] ss:$8 sps:$4 sm:$0xff]   ;;  %v3012_v16 = vld [vmem:[%s4115_s1 + $0x2b0] ss:$8 sps:$4 sm:$0xff]  }
  0x7d   :  { %2014 = vmatprep.subr.bf16.mxu0 %v2943_v17  ;;  %v3015_v17 = vld [vmem:[%s4115_s1 + $0x6b0] ss:$8 sps:$4 sm:$0xff]  }
  0x7f   :  { %1811 = vmatpush1.bf16.msra.mxu1 %v2938_v18  ;;  %v3020_v18 = vld [vmem:[%s4115_s1 + $0x2c4] ss:$8 sps:$4 sm:$0xff]  }
  0x80   :  { %2015 = vmatpush1.bf16.msra.mxu0 %v2941_v19  ;;  %1831 = vmatprep.subr.bf16.mxu1 %v2946_v20  ;;  %v3023_v19 = vld [vmem:[%s4115_s1 + $0x6c4] ss:$8 sps:$4 sm:$0xff]   ;;  %v3018_v20 = vld [vmem:[%s4115_s1 + $0x2c0] ss:$8 sps:$4 sm:$0xff]  }
  0x81   :  { %2035 = vmatprep.subr.bf16.mxu0 %v2949_v21  ;;  %v3021_v21 = vld [vmem:[%s4115_s1 + $0x6c0] ss:$8 sps:$4 sm:$0xff]  }
  0x82   :  { %1813 = vmatmul.mubr.bf16.vlgmr.msra.gmra.mrb[0].mxu1 %v2415_v23  ;;  %v3029_v23 = vld [vmem:[%s4115_s1 + $0x6d4] ss:$8 sps:$4 sm:$0xff]  }
  0x83   :  { %2017 = vmatmul.mubr.bf16.vlgmr.msra.gmra.mrb[0].mxu0 %v2423_v24  ;;  %1832 = vmatpush1.bf16.msra.mxu1 %v2944_v22  ;;  %v3026_v22 = vld [vmem:[%s4115_s1 + $0x2d4] ss:$8 sps:$4 sm:$0xff]   ;;  %v3024_v24 = vld [vmem:[%s4115_s1 + $0x2d0] ss:$8 sps:$4 sm:$0xff]  }
  0x84   :  { %2036 = vmatpush1.bf16.msra.mxu0 %v2947_v25  ;;  %1833 = vmatprep.subr.bf16.mxu1 %v2952_v28  ;;  %v3027_v25 = vld [vmem:[%s4115_s1 + $0x6d0] ss:$8 sps:$4 sm:$0xff]   ;;  %v3030_v28 = vld [vmem:[%s4115_s1 + $0x2e0] ss:$8 sps:$4 sm:$0xff]  }
  0x85   :  { %2037 = vmatprep.subr.bf16.mxu0 %v2955_v29  ;;  %1822 = vmatprep.mubr.bf16.mxu1 %v2432_v30  ;;  %v3034_v29 = vld [vmem:[%s4115_s1 + $0x6e0] ss:$8 sps:$4 sm:$0xff]   ;;  %v3040_v30 = vld [vmem:[%s4115_s1 + $0x2f4] ss:$8 sps:$4 sm:$0xff]  }
  0x86   :  { %2026 = vmatprep.mubr.bf16.mxu0 %v2440_v31  ;;  %v3043_v31 = vld [vmem:[%s4115_s1 + $0x6f4] ss:$8 sps:$4 sm:$0xff]  }
  0x87   :  { %1834 = vmatpush1.bf16.msra.mxu1 %v2950_v32  ;;  %v3038_v32 = vld [vmem:[%s4115_s1 + $0x2f0] ss:$8 sps:$4 sm:$0xff]  }
  0x88   :  { %2038 = vmatpush1.bf16.msra.mxu0 %v2953_v33  ;;  %1835 = vmatprep.subr.bf16.mxu1 %v2960_v34  ;;  %v3041_v33 = vld [vmem:[%s4115_s1 + $0x6f0] ss:$8 sps:$4 sm:$0xff]   ;;  %v3046_v34 = vld [vmem:[%s4115_s1 + $0x304] ss:$8 sps:$4 sm:$0xff]  }
  0x89   :  { %2039 = vmatprep.subr.bf16.mxu0 %v2963_v35  ;;  %v3049_v35 = vld [vmem:[%s4115_s1 + $0x704] ss:$8 sps:$4 sm:$0xff]  }
  0x8a   :  { %1823 = vmatmul.mubr.bf16.gmra.mrb[8].mxu1 %v2431_v40  ;;  %v51_v40 = vld [vmem:[%s4116_s0 + $0x90] sm:$0xff] }
  0x8b   :  { %2027 = vmatmul.mubr.bf16.gmra.mrb[8].mxu0 %v2439_v41  ;;  %1836 = vmatpush1.bf16.msra.mxu1 %v2958_v36  ;;  %v2417_v36 = vcombine.low %v3655_v38, %v3660_v39  ;;  %v55_v41 = vld [vmem:[%s4116_s0 + $0xb0] sm:$0xff]  ;;  %v3047_v38 = vld [vmem:[%s4115_s1 + $0x700] ss:$8 sps:$4 sm:$0xff]  }
  0x8c   :  { %2040 = vmatpush1.bf16.msra.mxu0 %v2961_v37  ;;  %1837 = vmatprep.subr.bf16.mxu1 %v2966_v44  ;;  %v2425_v37 = vcombine.low %v3665_v42, %v3670_v43  ;;  %v3044_v44 = vld [vmem:[%s4115_s1 + $0x300] ss:$8 sps:$4 sm:$0xff]   ;;  %v3052_v39 = vld [vmem:[%s4115_s1 + $0x314] ss:$8 sps:$4 sm:$0xff]   ;;  %v2434_v43 = vcombine.high %v51_v40, %v51_v40 }
  0x8d   :  { %2041 = vmatprep.subr.bf16.mxu0 %v2969_v45  ;;  %1863 = vmatprep.mubr.bf16.mxu1 %v2418_v46  ;;  %v3055_v42 = vld [vmem:[%s4115_s1 + $0x714] ss:$8 sps:$4 sm:$0xff]   ;;  %v2442_v45 = vcombine.high %v55_v41, %v55_v41  ;;  %v3050_v46 = vld [vmem:[%s4115_s1 + $0x310] ss:$8 sps:$4 sm:$0xff]  }
  0x8e   :  { %2067 = vmatprep.mubr.bf16.mxu0 %v2426_v47  ;;  %v3053_v47 = vld [vmem:[%s4115_s1 + $0x710] ss:$8 sps:$4 sm:$0xff]  }
  0x8f   :  { %1838 = vmatpush1.bf16.msra.mxu1 %v2964_v48  ;;  %v3060_v48 = vld [vmem:[%s4115_s1 + $0x324] ss:$8 sps:$4 sm:$0xff]  }
  0x90   :  { %2042 = vmatpush1.bf16.msra.mxu0 %v2967_v49  ;;  %1839 = vmatprep.subr.bf16.mxu1 %v2972_v50  ;;  %v3063_v49 = vld [vmem:[%s4115_s1 + $0x724] ss:$8 sps:$4 sm:$0xff]   ;;  %v3875_v50 = vld [vmem:[%s4116_s0 + $0x18] sm:$0xff] }
  0x91   :  { %2043 = vmatprep.subr.bf16.mxu0 %v2975_v51  ;;  %v2433_v51 = vcombine.low %v51_v40, %v51_v40  ;;  %v3124_v40 = vld [vmem:[%s4115_s1 + $0x3d0] ss:$8 sps:$4 sm:$0xff]  }
  0x93   :  { %1840 = vmatpush1.bf16.msra.mxu1 %v2970_v52  ;;  %v2441_v52 = vcombine.low %v55_v41, %v55_v41  ;;  %v3127_v41 = vld [vmem:[%s4115_s1 + $0x7d0] ss:$8 sps:$4 sm:$0xff]  }
  0x94   :  { %2044 = vmatpush1.bf16.msra.mxu0 %v2973_v53  ;;  %1841 = vmatprep.subr.bf16.mxu1 %v2978_v54  ;;  %v3880_v53 = vld [vmem:[%s4116_s0 + $0x58] sm:$0xff] }
  0x95   :  { %2045 = vmatprep.subr.bf16.mxu0 %v2981_v55  ;;  %v3885_v54 = vld [vmem:[%s4116_s0 + $0x38] sm:$0xff] }
  0x96   :  { %v3890_v55 = vld [vmem:[%s4116_s0 + $0x78] sm:$0xff] }
  0x97   :  { %1842 = vmatpush1.bf16.msra.mxu1 %v2976_v56  ;;  %v3058_v56 = vld [vmem:[%s4115_s1 + $0x320] ss:$8 sps:$4 sm:$0xff]  }
  0x98   :  { %2046 = vmatpush1.bf16.msra.mxu0 %v2979_v57  ;;  %1843 = vmatprep.subr.bf16.mxu1 %v2984_v58  ;;  %v3061_v57 = vld [vmem:[%s4115_s1 + $0x720] ss:$8 sps:$4 sm:$0xff]   ;;  %v3066_v58 = vld [vmem:[%s4115_s1 + $0x334] ss:$8 sps:$4 sm:$0xff]  }
  0x99   :  { %2047 = vmatprep.subr.bf16.mxu0 %v2987_v59  ;;  %v3069_v59 = vld [vmem:[%s4115_s1 + $0x734] ss:$8 sps:$4 sm:$0xff]  }
  0x9b   :  { %1844 = vmatpush1.bf16.msra.mxu1 %v2982_v60  ;;  %v2420_v60 = vcombine.high %v3875_v50, %v3880_v53 }
  0x9c   :  { %2048 = vmatpush1.bf16.msra.mxu0 %v2985_v61  ;;  %1845 = vmatprep.subr.bf16.mxu1 %v2990_v62  ;;  %v2428_v61 = vcombine.high %v3885_v54, %v3890_v55  ;;  %v3064_v62 = vld [vmem:[%s4115_s1 + $0x330] ss:$8 sps:$4 sm:$0xff]  }
  0x9d   :  { %2049 = vmatprep.subr.bf16.mxu0 %v2993_v63  ;;  %v3067_v63 = vld [vmem:[%s4115_s1 + $0x730] ss:$8 sps:$4 sm:$0xff]  }
  0x9f   :  { %1846 = vmatpush1.bf16.msra.mxu1 %v2988_v0  ;;  %v3072_v0 = vld [vmem:[%s4115_s1 + $0x344] ss:$8 sps:$4 sm:$0xff]  }
  0xa0   :  { %2050 = vmatpush1.bf16.msra.mxu0 %v2991_v1  ;;  %1847 = vmatprep.subr.bf16.mxu1 %v2996_v2  ;;  %v3075_v1 = vld [vmem:[%s4115_s1 + $0x744] ss:$8 sps:$4 sm:$0xff]   ;;  %v3070_v2 = vld [vmem:[%s4115_s1 + $0x340] ss:$8 sps:$4 sm:$0xff]  }
  0xa1   :  { %2051 = vmatprep.subr.bf16.mxu0 %v2999_v3  ;;  %v3073_v3 = vld [vmem:[%s4115_s1 + $0x740] ss:$8 sps:$4 sm:$0xff]  }
  0xa3   :  { %1848 = vmatpush1.bf16.msra.mxu1 %v2994_v4  ;;  %v3078_v4 = vld [vmem:[%s4115_s1 + $0x354] ss:$8 sps:$4 sm:$0xff]  }
  0xa4   :  { %2052 = vmatpush1.bf16.msra.mxu0 %v2997_v5  ;;  %1849 = vmatprep.subr.bf16.mxu1 %v3002_v6  ;;  %v3081_v5 = vld [vmem:[%s4115_s1 + $0x754] ss:$8 sps:$4 sm:$0xff]   ;;  %v3076_v6 = vld [vmem:[%s4115_s1 + $0x350] ss:$8 sps:$4 sm:$0xff]  }
  0xa5   :  { %2053 = vmatprep.subr.bf16.mxu0 %v3005_v7  ;;  %v3079_v7 = vld [vmem:[%s4115_s1 + $0x750] ss:$8 sps:$4 sm:$0xff]  }
  0xa7   :  { %1850 = vmatpush1.bf16.msra.mxu1 %v3000_v8  ;;  %v3084_v8 = vld [vmem:[%s4115_s1 + $0x364] ss:$8 sps:$4 sm:$0xff]  }
  0xa8   :  { %2054 = vmatpush1.bf16.msra.mxu0 %v3003_v9  ;;  %1851 = vmatprep.subr.bf16.mxu1 %v3008_v10  ;;  %v3087_v9 = vld [vmem:[%s4115_s1 + $0x764] ss:$8 sps:$4 sm:$0xff]   ;;  %v3082_v10 = vld [vmem:[%s4115_s1 + $0x360] ss:$8 sps:$4 sm:$0xff]  }
  0xa9   :  { %2055 = vmatprep.subr.bf16.mxu0 %v3011_v11  ;;  %v3085_v11 = vld [vmem:[%s4115_s1 + $0x760] ss:$8 sps:$4 sm:$0xff]  }
  0xab   :  { %1852 = vmatpush1.bf16.msra.mxu1 %v3006_v12  ;;  %v3090_v12 = vld [vmem:[%s4115_s1 + $0x374] ss:$8 sps:$4 sm:$0xff]  }
  0xac   :  { %2056 = vmatpush1.bf16.msra.mxu0 %v3009_v13  ;;  %1853 = vmatprep.subr.bf16.mxu1 %v3014_v14  ;;  %v3093_v13 = vld [vmem:[%s4115_s1 + $0x774] ss:$8 sps:$4 sm:$0xff]   ;;  %v3088_v14 = vld [vmem:[%s4115_s1 + $0x370] ss:$8 sps:$4 sm:$0xff]  }
  0xad   :  { %2057 = vmatprep.subr.bf16.mxu0 %v3017_v15  ;;  %v3091_v15 = vld [vmem:[%s4115_s1 + $0x770] ss:$8 sps:$4 sm:$0xff]  }
  0xaf   :  { %1854 = vmatpush1.bf16.msra.mxu1 %v3012_v16  ;;  %v3096_v16 = vld [vmem:[%s4115_s1 + $0x384] ss:$8 sps:$4 sm:$0xff]  }
  0xb0   :  { %2058 = vmatpush1.bf16.msra.mxu0 %v3015_v17  ;;  %1855 = vmatprep.subr.bf16.mxu1 %v3020_v18  ;;  %v3099_v17 = vld [vmem:[%s4115_s1 + $0x784] ss:$8 sps:$4 sm:$0xff]   ;;  %v3094_v18 = vld [vmem:[%s4115_s1 + $0x380] ss:$8 sps:$4 sm:$0xff]  }
  0xb1   :  { %2059 = vmatprep.subr.bf16.mxu0 %v3023_v19  ;;  %v3097_v19 = vld [vmem:[%s4115_s1 + $0x780] ss:$8 sps:$4 sm:$0xff]  }
  0xb3   :  { %1856 = vmatpush1.bf16.msra.mxu1 %v3018_v20  ;;  %v3102_v20 = vld [vmem:[%s4115_s1 + $0x394] ss:$8 sps:$4 sm:$0xff]  }
  0xb4   :  { %2060 = vmatpush1.bf16.msra.mxu0 %v3021_v21  ;;  %1857 = vmatprep.subr.bf16.mxu1 %v3026_v22  ;;  %v3105_v21 = vld [vmem:[%s4115_s1 + $0x794] ss:$8 sps:$4 sm:$0xff]   ;;  %v3100_v22 = vld [vmem:[%s4115_s1 + $0x390] ss:$8 sps:$4 sm:$0xff]  }
  0xb5   :  { %2061 = vmatprep.subr.bf16.mxu0 %v3029_v23  ;;  %v3103_v23 = vld [vmem:[%s4115_s1 + $0x790] ss:$8 sps:$4 sm:$0xff]  }
  0xb7   :  { %1858 = vmatpush1.bf16.msra.mxu1 %v3024_v24  ;;  %v3108_v24 = vld [vmem:[%s4115_s1 + $0x3a4] ss:$8 sps:$4 sm:$0xff]  }
  0xb8   :  { %2062 = vmatpush1.bf16.msra.mxu0 %v3027_v25  ;;  %1859 = vmatprep.subr.bf16.mxu1 %v3032_v26  ;;  %v3111_v25 = vld [vmem:[%s4115_s1 + $0x7a4] ss:$8 sps:$4 sm:$0xff]   ;;  %v3106_v26 = vld [vmem:[%s4115_s1 + $0x3a0] ss:$8 sps:$4 sm:$0xff]  }
  0xb9   :  { %2063 = vmatprep.subr.bf16.mxu0 %v3036_v27  ;;  %v3109_v27 = vld [vmem:[%s4115_s1 + $0x7a0] ss:$8 sps:$4 sm:$0xff]  }
  0xbb   :  { %1860 = vmatpush1.bf16.msra.mxu1 %v3030_v28  ;;  %v3114_v28 = vld [vmem:[%s4115_s1 + $0x3b4] ss:$8 sps:$4 sm:$0xff]  }
  0xbc   :  { %2064 = vmatpush1.bf16.msra.mxu0 %v3034_v29  ;;  %1861 = vmatprep.subr.bf16.mxu1 %v3040_v30  ;;  %v3117_v29 = vld [vmem:[%s4115_s1 + $0x7b4] ss:$8 sps:$4 sm:$0xff]   ;;  %v3112_v30 = vld [vmem:[%s4115_s1 + $0x3b0] ss:$8 sps:$4 sm:$0xff]  }
  0xbd   :  { %2065 = vmatprep.subr.bf16.mxu0 %v3043_v31  ;;  %v3115_v31 = vld [vmem:[%s4115_s1 + $0x7b0] ss:$8 sps:$4 sm:$0xff]  }
  0xbf   :  { %1862 = vmatpush1.bf16.msra.mxu1 %v3038_v32  ;;  %v3120_v32 = vld [vmem:[%s4115_s1 + $0x3c4] ss:$8 sps:$4 sm:$0xff]  }
  0xc0   :  { %2066 = vmatpush1.bf16.msra.mxu0 %v3041_v33  ;;  %1882 = vmatprep.subr.bf16.mxu1 %v3046_v34  ;;  %v3123_v33 = vld [vmem:[%s4115_s1 + $0x7c4] ss:$8 sps:$4 sm:$0xff]   ;;  %v3118_v34 = vld [vmem:[%s4115_s1 + $0x3c0] ss:$8 sps:$4 sm:$0xff]  }
  0xc1   :  { %2086 = vmatprep.subr.bf16.mxu0 %v3049_v35  ;;  %v3121_v35 = vld [vmem:[%s4115_s1 + $0x7c0] ss:$8 sps:$4 sm:$0xff]  }
  0xc2   :  { %1864 = vmatmul.mubr.bf16.vlgmr.msra.gmra.mrb[0].mxu1 %v2417_v36  ;;  %v3126_v36 = vld [vmem:[%s4115_s1 + $0x3d4] ss:$8 sps:$4 sm:$0xff]  }
  0xc3   :  { %2068 = vmatmul.mubr.bf16.vlgmr.msra.gmra.mrb[0].mxu0 %v2425_v37  ;;  %1883 = vmatpush1.bf16.msra.mxu1 %v3044_v44  ;;  %v3129_v37 = vld [vmem:[%s4115_s1 + $0x7d4] ss:$8 sps:$4 sm:$0xff]   ;;  %v3133_v44 = vld [vmem:[%s4115_s1 + $0x3e4] ss:$8 sps:$4 sm:$0xff]  }
  0xc4   :  { %2087 = vmatpush1.bf16.msra.mxu0 %v3047_v38  ;;  %1884 = vmatprep.subr.bf16.mxu1 %v3052_v39  ;;  %v3137_v38 = vld [vmem:[%s4115_s1 + $0x7e4] ss:$8 sps:$4 sm:$0xff]   ;;  %v3131_v39 = vld [vmem:[%s4115_s1 + $0x3e0] ss:$8 sps:$4 sm:$0xff]  }
  0xc5   :  { %2088 = vmatprep.subr.bf16.mxu0 %v3055_v42  ;;  %1873 = vmatprep.mubr.bf16.mxu1 %v2434_v43  ;;  %v3135_v42 = vld [vmem:[%s4115_s1 + $0x7e0] ss:$8 sps:$4 sm:$0xff]   ;;  %v3140_v43 = vld [vmem:[%s4115_s1 + $0x3f4] ss:$8 sps:$4 sm:$0xff]  }
  0xc6   :  { %2077 = vmatprep.mubr.bf16.mxu0 %v2442_v45  ;;  %v3143_v45 = vld [vmem:[%s4115_s1 + $0x7f4] ss:$8 sps:$4 sm:$0xff]  }
  0xc7   :  { %1885 = vmatpush1.bf16.msra.mxu1 %v3050_v46  ;;  %v3138_v46 = vld [vmem:[%s4115_s1 + $0x3f0] ss:$8 sps:$4 sm:$0xff]  }
  0xc8   :  { %2089 = vmatpush1.bf16.msra.mxu0 %v3053_v47  ;;  %1886 = vmatprep.subr.bf16.mxu1 %v3060_v48  ;;  %v3141_v47 = vld [vmem:[%s4115_s1 + $0x7f0] ss:$8 sps:$4 sm:$0xff]  }
  0xc9   :  { %2090 = vmatprep.subr.bf16.mxu0 %v3063_v49  ;;  %v52_v48 = vld [vmem:[%s4116_s0 + $0x98] sm:$0xff] }
  0xca   :  { %1874 = vmatmul.mubr.bf16.gmra.mrb[12].mxu1 %v2433_v51  ;;  %v56_v49 = vld [vmem:[%s4116_s0 + $0xb8] sm:$0xff]  ;;  %v2419_v51 = vcombine.low %v3875_v50, %v3880_v53 }
  0xcb   :  { %2078 = vmatmul.mubr.bf16.gmra.mrb[12].mxu0 %v2441_v52  ;;  %1887 = vmatpush1.bf16.msra.mxu1 %v3058_v56  ;;  %v2427_v52 = vcombine.low %v3885_v54, %v3890_v55  ;;  %v2436_v56 = vcombine.high %v52_v48, %v52_v48 }
  0xcc   :  { %2091 = vmatpush1.bf16.msra.mxu0 %v3061_v57  ;;  %1888 = vmatprep.subr.bf16.mxu1 %v3066_v58  ;;  %v2444_v57 = vcombine.high %v56_v49, %v56_v49  ;;  %v2435_v58 = vcombine.low %v52_v48, %v52_v48 }
  0xcd   :  { %2092 = vmatprep.subr.bf16.mxu0 %v3069_v59  ;;  %1914 = vmatprep.mubr.bf16.mxu1 %v2420_v60  ;;  %v2443_v59 = vcombine.low %v56_v49, %v56_v49 }
  0xce   :  { %2118 = vmatprep.mubr.bf16.mxu0 %v2428_v61 }
  0xcf   :  { %1889 = vmatpush1.bf16.msra.mxu1 %v3064_v62 }
  0xd0   :  { %2093 = vmatpush1.bf16.msra.mxu0 %v3067_v63  ;;  %1890 = vmatprep.subr.bf16.mxu1 %v3072_v0 }
  0xd1   :  { %2094 = vmatprep.subr.bf16.mxu0 %v3075_v1 }
  0xd3   :  { %1891 = vmatpush1.bf16.msra.mxu1 %v3070_v2 }
  0xd4   :  { %2095 = vmatpush1.bf16.msra.mxu0 %v3073_v3  ;;  %1892 = vmatprep.subr.bf16.mxu1 %v3078_v4 }
  0xd5   :  { %2096 = vmatprep.subr.bf16.mxu0 %v3081_v5 }
  0xd7   :  { %1893 = vmatpush1.bf16.msra.mxu1 %v3076_v6 }
  0xd8   :  { %2097 = vmatpush1.bf16.msra.mxu0 %v3079_v7  ;;  %1894 = vmatprep.subr.bf16.mxu1 %v3084_v8 }
  0xd9   :  { %2098 = vmatprep.subr.bf16.mxu0 %v3087_v9 }
  0xdb   :  { %1895 = vmatpush1.bf16.msra.mxu1 %v3082_v10  ;;  %v3148_v10 = vmov 0.0  }
  0xdc   :  { %2099 = vmatpush1.bf16.msra.mxu0 %v3085_v11  ;;  %1896 = vmatprep.subr.bf16.mxu1 %v3090_v12 }
  0xdd   :  { %2100 = vmatprep.subr.bf16.mxu0 %v3093_v13 }
  0xdf   :  { %1897 = vmatpush1.bf16.msra.mxu1 %v3088_v14 }
  0xe0   :  { %2101 = vmatpush1.bf16.msra.mxu0 %v3091_v15  ;;  %1898 = vmatprep.subr.bf16.mxu1 %v3096_v16 }
  0xe1   :  { %2102 = vmatprep.subr.bf16.mxu0 %v3099_v17 }
  0xe3   :  { %1899 = vmatpush1.bf16.msra.mxu1 %v3094_v18 }
  0xe4   :  { %2103 = vmatpush1.bf16.msra.mxu0 %v3097_v19  ;;  %1900 = vmatprep.subr.bf16.mxu1 %v3102_v20 }
  0xe5   :  { %2104 = vmatprep.subr.bf16.mxu0 %v3105_v21  ;;  %v2160_v21 = vlaneseq }
  0xe7   :  { %1901 = vmatpush1.bf16.msra.mxu1 %v3100_v22  ;;  %v4083_v22 = vshrl.u32 %v2160_v21, 7  ;;  %vm2302_vm2 = vcmp.lt.s32.totalorder %v2160_v21, 256 }
  0xe8   :  { %2105 = vmatpush1.bf16.msra.mxu0 %v3103_v23  ;;  %1902 = vmatprep.subr.bf16.mxu1 %v3108_v24  ;;  %v2158_v24 = vld [vmem:[%s4117_s2] sm:$0x3] }
  0xe9   :  { %2106 = vmatprep.subr.bf16.mxu0 %v3111_v25  ;;  %v2162_v23 = vsub.s32 0, %v4083_v22  ;;  %v2166_v25 = vsub.s32 1, %v4083_v22 }
  0xeb   :  { %1903 = vmatpush1.bf16.msra.mxu1 %v3106_v26  ;;  %v2163_v26 = vrot.slane %v2158_v24, %v2162_v23 }
  0xec   :  { %2107 = vmatpush1.bf16.msra.mxu0 %v3109_v27  ;;  %1904 = vmatprep.subr.bf16.mxu1 %v3114_v28 }
  0xed   :  { %2108 = vmatprep.subr.bf16.mxu0 %v3117_v29  ;;  %v2167_v29 = vrot.slane %v2158_v24, %v2166_v25 }
  0xef   :  { %1905 = vmatpush1.bf16.msra.mxu1 %v3112_v30 }
  0xf0   :  { %2109 = vmatpush1.bf16.msra.mxu0 %v3115_v31  ;;  %1906 = vmatprep.subr.bf16.mxu1 %v3120_v32 }
  0xf1   :  { %2110 = vmatprep.subr.bf16.mxu0 %v3123_v33 }
  0xf3   :  { %1907 = vmatpush1.bf16.msra.mxu1 %v3118_v34 }
  0xf4   :  { %2111 = vmatpush1.bf16.msra.mxu0 %v3121_v35  ;;  %1908 = vmatprep.subr.bf16.mxu1 %v3126_v36 }
  0xf5   :  { %2112 = vmatprep.subr.bf16.mxu0 %v3129_v37 }
  0xf7   :  { %1909 = vmatpush1.bf16.msra.mxu1 %v3124_v40 }
  0xf8   :  { %2113 = vmatpush1.bf16.msra.mxu0 %v3127_v41  ;;  %1910 = vmatprep.subr.bf16.mxu1 %v3133_v44 }
  0xf9   :  { %2114 = vmatprep.subr.bf16.mxu0 %v3137_v38 }
  0xfb   :  { %1911 = vmatpush1.bf16.msra.mxu1 %v3131_v39 }
  0xfc   :  { %2115 = vmatpush1.bf16.msra.mxu0 %v3135_v42  ;;  %1912 = vmatprep.subr.bf16.mxu1 %v3140_v43 }
  0xfd   :  { %2116 = vmatprep.subr.bf16.mxu0 %v3143_v45 }
  0xff   :  { %1913 = vmatpush1.bf16.msra.mxu1 %v3138_v46 }
 0x100   :  { %2117 = vmatpush1.bf16.msra.mxu0 %v3141_v47 }
 0x102   :  { %1915 = vmatmul.mubr.bf16.vlgmr.msra.gmra.mrb[0].mxu1 %v2419_v51 }
 0x103   :  { %2119 = vmatmul.mubr.bf16.vlgmr.msra.gmra.mrb[0].mxu0 %v2427_v52  ;;  %1924 = vmatprep.mubr.bf16.mxu1 %v2436_v56 }
 0x104   :  { %2128 = vmatprep.mubr.bf16.mxu0 %v2444_v57 }
 0x10a   :  { %1925 = vmatmul.mubr.bf16.gmra.mrb[16].mxu1 %v2435_v58 }
 0x10b   :  { %2129 = vmatmul.mubr.bf16.gmra.mrb[16].mxu0 %v2443_v59  ;;  %2375 = vmatprep.mubr.f32.mxu1 %v3148_v10 }
 0x10c   :  { %2275 = vmatprep.mubr.f32.mxu0 %v3148_v10 }
 0x11d   :  { %v1773_v60 = vpop.f32.mrb[4].mxu1 }
 0x11e   :  { %v4068_v61 = vpop.f32.mrb[4].mxu0  ;;  %v1775_v62 = vpop.f32.mrb[5].mxu1 }
 0x11f   :  { %v4070_v50 = vpop.f32.mrb[5].mxu0  ;;  %v1777_v53 = vpop.f32.mrb[6].mxu1 }
 0x120   :  { %v1981_v54 = vpop.f32.mrb[6].mxu0  ;;  %v1778_v55 = vpop.f32.mrb[7].mxu1 }
 0x121   :  { %v1982_v63 = vpop.f32.mrb[7].mxu0 }
 0x15d   :  { %v1824_v0 = vpop.f32.mrb[8].mxu1 }
 0x15e   :  { %v4072_v1 = vpop.f32.mrb[8].mxu0  ;;  %v1825_v2 = vadd.f32 %v1824_v0, %v1773_v60  ;;  %v1826_v3 = vpop.f32.mrb[9].mxu1 }
 0x15f   :  { %v4074_v4 = vpop.f32.mrb[9].mxu0  ;;  %v1827_v5 = vadd.f32 %v1826_v3, %v1775_v62  ;;  %v1828_v6 = vpop.f32.mrb[10].mxu1 }
 0x160   :  { %v2032_v7 = vpop.f32.mrb[10].mxu0  ;;  %v1829_v8 = vpop.f32.mrb[11].mxu1 }
 0x161   :  { %v2033_v9 = vpop.f32.mrb[11].mxu0  ;;  %v2200_v8 = vand.u32 127, %v2160_v21 }
 0x163   :  { %vm2204_vm0 = vcmp.lt.s32.totalorder %v2200_v8, 18 }
 0x19d   :  { %v1875_v11 = vpop.f32.mrb[12].mxu1 }
 0x19e   :  { %v4078_v12 = vpop.f32.mrb[12].mxu0  ;;  %v1876_v13 = vadd.f32 %v1875_v11, %v1825_v2  ;;  %v1877_v14 = vpop.f32.mrb[13].mxu1 }
 0x19f   :  { %v4080_v15 = vpop.f32.mrb[13].mxu0  ;;  %v1878_v16 = vadd.f32 %v1877_v14, %v1827_v5  ;;  %v1879_v17 = vpop.f32.mrb[14].mxu1 }
 0x1a0   :  { %v2083_v18 = vpop.f32.mrb[14].mxu0  ;;  %v1880_v19 = vpop.f32.mrb[15].mxu1  ;;  %v2704_v17 = vsel %vm2204_vm0, 1.0, %v3148_v10 }
 0x1a1   :  { %v2084_v20 = vpop.f32.mrb[15].mxu0 }
 0x1d5   :  { %v1916_v27 = vpop.f32.mrb[0].mxu1 }
 0x1d6   :  { %v2120_v28 = vpop.f32.mrb[0].mxu0  ;;  %v1918_v31 = vpop.f32.mrb[1].mxu1 }
 0x1d7   :  { %v2718_v30 = vadd.f32 %v2120_v28, %v1916_v27  ;;  %v2122_v32 = vpop.f32.mrb[1].mxu0  ;;  %v1920_v34 = vpop.f32.mrb[2].mxu1 }
 0x1d8   :  { %v2719_v33 = vadd.f32 %v2122_v32, %v1918_v31  ;;  %v2124_v35 = vpop.f32.mrb[2].mxu0  ;;  %v1922_v40 = vpop.f32.mrb[3].mxu1 }
 0x1d9   :  { %v2170_v36 = vadd.f32 %v2718_v30, %v2163_v26  ;;  %v2720_v37 = vadd.f32 %v2124_v35, %v1920_v34  ;;  %v2126_v41 = vpop.f32.mrb[3].mxu0 }
 0x1da   :  { %v2171_v44 = vadd.f32 %v2719_v33, %v2167_v29  ;;  %v2721_v38 = vadd.f32 %v2126_v41, %v1922_v40 }
 0x1db   :  { %v2172_v39 = vadd.f32 %v2720_v37, %v2163_v26  ;;  %v2305_v45 = vmul.f32 %v2170_v36, %v2170_v36 }
 0x1dc   :  { %v2707_v42 = vpack.c.bf16 %v2171_v44, %v2170_v36  ;;  %v2173_v43 = vadd.f32 %v2721_v38, %v2167_v29  ;;  %v2306_v52 = vmul.f32 %v2171_v44, %v2171_v44 }
 0x1dd   :  { %v2712_v46 = vpack.c.bf16 %v2172_v39, %v2170_v36  ;;  %v2307_v47 = vmul.f32 %v2172_v39, %v2172_v39  ;;  %v1926_v49 = vpop.f32.mrb[16].mxu1 }
 0x1de   :  { %2196 = vst [vmem:[%s4118_s3] sm:$0xff] %v2707_v42  ;;  %v2708_v48 = vpack.c.bf16 %v2173_v43, %v2172_v39  ;;  %v2710_v51 = vpack.c.bf16 %v2173_v43, %v2171_v44  ;;  %v2308_v56 = vmul.f32 %v2173_v43, %v2173_v43  ;;  %v2130_v57 = vpop.f32.mrb[16].mxu0  ;;  %v1927_v58 = vadd.f32 %v1926_v49, %v1876_v13  ;;  %v1928_v59 = vpop.f32.mrb[17].mxu1 }
 0x1df   :  { %v2716_v60 = vpack.c.bf16 %v2307_v47, %v2305_v45  ;;  %v2132_v62 = vpop.f32.mrb[17].mxu0  ;;  %v1929_v53 = vadd.f32 %v1928_v59, %v1878_v16  ;;  %v1930_v54 = vpop.f32.mrb[18].mxu1 }
 0x1e0   :  { %2197 = vst [vmem:[%s4118_s3 + $0x8] sm:$0xff] %v2708_v48  ;;  %2711 = vmatprep.subr.bf16.mxu0 %v2710_v51  ;;  %v2714_v55 = vpack.c.bf16 %v2308_v56, %v2306_v52  ;;  %v2134_v63 = vpop.f32.mrb[18].mxu0  ;;  %v1978_v0 = vadd.f32 %v4068_v61, %v1927_v58  ;;  %v1931_v2 = vpop.f32.mrb[19].mxu1 }
 0x1e1   :  { %2713 = vmatpush1.bf16.msra.mxu0 %v2712_v46  ;;  %v2135_v3 = vpop.f32.mrb[19].mxu0  ;;  %v1980_v5 = vadd.f32 %v4070_v50, %v1929_v53 }
 0x1e2   :  { %2715 = vmatprep.subr.bf16.mxu1 %v2714_v55  ;;  %v2029_v6 = vadd.f32 %v4072_v1, %v1978_v0 }
 0x1e3   :  { %2717 = vmatpush1.bf16.msra.mxu1 %v2716_v60  ;;  %v2031_v7 = vadd.f32 %v4074_v4, %v1980_v5  ;;  %v3149_v4 = vmov 1966171168  }
 0x1e4   :  { %v2080_v9 = vadd.f32 %v4078_v12, %v2029_v6  ;;  %v2286_v12 = vunpack.c.l.s4 %v3149_v4 }
 0x1e5   :  { %v2082_v11 = vadd.f32 %v4080_v15, %v2031_v7 }
 0x1e6   :  { %v2131_v13 = vadd.f32 %v2130_v57, %v2080_v9  ;;  %v2287_v15 = vunpack.c.0.s8 %v2286_v12 }
 0x1e7   :  { %v2133_v14 = vadd.f32 %v2132_v62, %v2082_v11 }
 0x1e8   :  { %v2174_v61 = vadd.f32 %v2163_v26, %v2131_v13  ;;  %v2290_v10 = vsub.s32 %v2287_v15, %v4083_v22 }
 0x1e9   :  { %v2175_v16 = vadd.f32 %v2167_v29, %v2133_v14 }
 0x1ea   :  { %v2309_v18 = vmul.f32 %v2174_v61, %v2174_v61 }
 0x1eb   :  { %v2709_v50 = vpack.c.bf16 %v2175_v16, %v2174_v61  ;;  %2215 = vmatprep.subr.mxu0 %v2175_v16  ;;  %v2310_v1 = vmul.f32 %v2175_v16, %v2175_v16 }
 0x1ec   :  { %2216 = vmatpush1.msra.mxu0 %v2174_v61 }
 0x1ed   :  { %2198 = vst [vmem:[%s4118_s3 + $0x10] sm:$0xff] %v2709_v50  ;;  %2315 = vmatprep.subr.mxu1 %v2310_v1  ;;  %2705 = vmatmul.mubr.msk.f32.vlgmr.msra.gmra.mrb[20].mxu0 %vm2207_vm1, %v2704_v17 }
 0x1ee   :  { %2316 = vmatpush1.msra.mxu1 %v2309_v18 }
 0x1ef   :  { %2706 = vmatmul.mubr.msk.f32.vlgmr.msra.gmra.mrb[20].mxu1 %vm2207_vm1, %v2704_v17 }
 0x2c0   :  { %v2277_v19 = vpop.f32.mrb[20].mxu0 }
 0x2c1   :  { %v2279_v20 = vpop.f32.mrb[21].mxu0 }
 0x2c2   :  { %v2377_v23 = vpop.f32.mrb[20].mxu1  ;;  %v2284_v24 = vcombine.low %v2277_v19, %v2279_v20 }
 0x2c3   :  { %v2379_v25 = vpop.f32.mrb[21].mxu1 }
 0x2c4   :  { %v2291_v26 = vrot.slane %v2284_v24, %v2290_v10  ;;  %v2384_v27 = vcombine.low %v2377_v23, %v2379_v25 }
 0x2c6   :  { %v2298_v28 = vrot.slane %v2291_v26, %v2290_v10  ;;  %v2391_v29 = vrot.slane %v2384_v27, %v2290_v10 }
 0x2c8   :  { %2304 = vst.msk [vmem:[%s4119_s4] sm:$0x3] %vm2302_vm2, %v2298_v28  ;;  %v2398_v30 = vrot.slane %v2391_v29, %v2290_v10 }
 0x2ca   :  { %2400 = vst.msk [vmem:[%s4120_s5] sm:$0x3] %vm2302_vm2, %v2398_v30 }

// kernel: _lambda_.14
= control target key start
LH: loop header
LB: loop body
LE: loop exit
PB: predicated region body
PF: predicated region fallthrough
CT: control target
= control target key end

     0   :  { %v40_v0 = vlaneseq  ;;  %s365_s0 = inlined_call_operand.vmem [shape: bf16[32,512], index: 0, kind: input, shape index: {}]   ;;  %s366_s1 = inlined_call_operand.vmem [shape: f32[1,512], index: 1, kind: input, shape index: {}]   ;;  %s367_s2 = inlined_call_operand.vmem [shape: f32[1,512], index: 2, kind: input, shape index: {}]   ;;  %s368_s3 = inlined_call_operand.vmem [shape: bf16[32,512], index: 3, kind: output, shape index: {}]  }
   0x1   :  { %v14_v1 = vld [vmem:[%s365_s0] sm:$0xff]  ;;  %v15_v5 = vld [vmem:[%s365_s0 + $0x8] sm:$0xff]  ;;  %v16_v6 = vld [vmem:[%s365_s0 + $0x10] sm:$0xff] }
   0x2   :  { %v22_v2 = vunpack.c.l.bf16 %v14_v1  ;;  %v23_v3 = vunpack.c.h.bf16 %v14_v1  ;;  %v41_v4 = vshrl.u32 %v40_v0, 7  ;;  %v17_v7 = vld [vmem:[%s365_s0 + $0x18] sm:$0xff]  ;;  %v38_v8 = vld [vmem:[%s366_s1] sm:$0xf]  ;;  %v24_v10 = vunpack.c.l.bf16 %v15_v5  ;;  %v19_v57 = vld [vmem:[%s365_s0 + $0x28] sm:$0xff] }
   0x3   :  { %v76_v9 = vld [vmem:[%s367_s2] sm:$0xf]  ;;  %v25_v11 = vunpack.c.h.bf16 %v15_v5  ;;  %v26_v12 = vunpack.c.l.bf16 %v16_v6  ;;  %v27_v13 = vunpack.c.h.bf16 %v16_v6  ;;  %v28_v19 = vunpack.c.l.bf16 %v17_v7 }
   0x4   :  { %v279_v14 = vld [vmem:[%s365_s0 + $0x20] sm:$0xff]  ;;  %v42_v15 = vsub.s32 0, %v41_v4  ;;  %v46_v16 = vsub.s32 1, %v41_v4  ;;  %v50_v17 = vsub.s32 2, %v41_v4  ;;  %v54_v18 = vsub.s32 3, %v41_v4  ;;  %v20_v4 = vld [vmem:[%s365_s0 + $0x30] sm:$0xff] }
   0x5   :  { %v29_v20 = vunpack.c.h.bf16 %v17_v7  ;;  %v30_v21 = vunpack.c.l.bf16 %v279_v14  ;;  %v31_v22 = vunpack.c.h.bf16 %v279_v14 }
   0x6   :  { %v283_v23 = vrot.slane %v38_v8, %v42_v15  ;;  %v285_v24 = vrot.slane %v38_v8, %v46_v16  ;;  %v287_v25 = vrot.slane %v76_v9, %v42_v15  ;;  %v289_v26 = vrot.slane %v76_v9, %v46_v16 }
   0x7   :  { %v291_v27 = vrot.slane %v38_v8, %v50_v17  ;;  %v293_v28 = vrot.slane %v38_v8, %v54_v18  ;;  %v295_v29 = vrot.slane %v76_v9, %v50_v17  ;;  %v297_v30 = vrot.slane %v76_v9, %v54_v18 }
   0x8   :  { %v60_v31 = vmul.f32 %v283_v23, %v22_v2  ;;  %v61_v32 = vmul.f32 %v285_v24, %v23_v3  ;;  %v64_v33 = vmul.f32 %v283_v23, %v26_v12  ;;  %v65_v34 = vmul.f32 %v285_v24, %v27_v13  ;;  %v21_v13 = vld [vmem:[%s365_s0 + $0x38] sm:$0xff] }
   0x9   :  { %v62_v35 = vmul.f32 %v291_v27, %v24_v10  ;;  %v63_v36 = vmul.f32 %v293_v28, %v25_v11  ;;  %v66_v37 = vmul.f32 %v291_v27, %v28_v19  ;;  %v67_v38 = vmul.f32 %v293_v28, %v29_v20 }
   0xa   :  { %v98_v39 = vadd.f32 %v287_v25, %v60_v31  ;;  %v99_v40 = vadd.f32 %v289_v26, %v61_v32  ;;  %v102_v41 = vadd.f32 %v287_v25, %v64_v33  ;;  %v103_v42 = vadd.f32 %v289_v26, %v65_v34 }
   0xb   :  { %v100_v43 = vadd.f32 %v295_v29, %v62_v35  ;;  %v101_v44 = vadd.f32 %v297_v30, %v63_v36  ;;  %v104_v45 = vadd.f32 %v295_v29, %v66_v37  ;;  %v105_v46 = vadd.f32 %v297_v30, %v67_v38 }
   0xc   :  { %vm114_vm0 = vcmp.ge.f32.partialorder %v98_v39, 0.0  ;;  %vm115_vm1 = vcmp.ge.f32.partialorder %v99_v40, 0.0  ;;  %v130_v47 = vmul.f32 0.2, %v98_v39  ;;  %v131_v48 = vmul.f32 0.2, %v99_v40 }
   0xd   :  { %vm116_vm2 = vcmp.ge.f32.partialorder %v100_v43, 0.0  ;;  %vm117_vm3 = vcmp.ge.f32.partialorder %v101_v44, 0.0  ;;  %v132_v49 = vmul.f32 0.2, %v100_v43  ;;  %v133_v50 = vmul.f32 0.2, %v101_v44 }
   0xe   :  { %v146_v51 = vsel %vm114_vm0, %v98_v39, %v130_v47  ;;  %v147_v52 = vsel %vm115_vm1, %v99_v40, %v131_v48  ;;  %vm118_vm4 = vcmp.ge.f32.partialorder %v102_v41, 0.0  ;;  %vm119_vm5 = vcmp.ge.f32.partialorder %v103_v42, 0.0 }
   0xf   :  { %v230_v53 = vpack.c.bf16 %v147_v52, %v146_v51  ;;  %v148_v54 = vsel %vm116_vm2, %v100_v43, %v132_v49  ;;  %v149_v55 = vsel %vm117_vm3, %v101_v44, %v133_v50  ;;  %v134_v56 = vmul.f32 0.2, %v102_v41 }
  0x10   :  { %v231_v58 = vpack.c.bf16 %v149_v55, %v148_v54  ;;  %v135_v59 = vmul.f32 0.2, %v103_v42  ;;  %vm120_vm6 = vcmp.ge.f32.partialorder %v104_v45, 0.0  ;;  %vm121_vm7 = vcmp.ge.f32.partialorder %v105_v46, 0.0 }
  0x11   :  { %210 = vst [vmem:[%s368_s3] sm:$0xff] %v230_v53  ;;  %v150_v60 = vsel %vm118_vm4, %v102_v41, %v134_v56  ;;  %v136_v61 = vmul.f32 0.2, %v104_v45  ;;  %v137_v62 = vmul.f32 0.2, %v105_v46  ;;  %v68_v63 = vmul.f32 %v283_v23, %v30_v21 }
  0x12   :  { %211 = vst [vmem:[%s368_s3 + $0x8] sm:$0xff] %v231_v58  ;;  %v151_v0 = vsel %vm119_vm5, %v103_v42, %v135_v59  ;;  %v69_v1 = vmul.f32 %v285_v24, %v31_v22  ;;  %v32_v2 = vunpack.c.l.bf16 %v19_v57  ;;  %v33_v3 = vunpack.c.h.bf16 %v19_v57 }
  0x13   :  { %v232_v5 = vpack.c.bf16 %v151_v0, %v150_v60  ;;  %v152_v6 = vsel %vm120_vm6, %v104_v45, %v136_v61  ;;  %v153_v7 = vsel %vm121_vm7, %v105_v46, %v137_v62  ;;  %v106_v8 = vadd.f32 %v287_v25, %v68_v63 }
  0x14   :  { %v233_v9 = vpack.c.bf16 %v153_v7, %v152_v6  ;;  %v107_v10 = vadd.f32 %v289_v26, %v69_v1  ;;  %v70_v11 = vmul.f32 %v291_v27, %v32_v2  ;;  %v71_v12 = vmul.f32 %v293_v28, %v33_v3 }
  0x15   :  { %212 = vst [vmem:[%s368_s3 + $0x10] sm:$0xff] %v232_v5  ;;  %vm122_vm8 = vcmp.ge.f32.partialorder %v106_v8, 0.0  ;;  %v138_v14 = vmul.f32 0.2, %v106_v8  ;;  %v34_v15 = vunpack.c.l.bf16 %v20_v4  ;;  %v35_v16 = vunpack.c.h.bf16 %v20_v4 }
  0x16   :  { %213 = vst [vmem:[%s368_s3 + $0x18] sm:$0xff] %v233_v9  ;;  %vm123_vm9 = vcmp.ge.f32.partialorder %v107_v10, 0.0  ;;  %v139_v17 = vmul.f32 0.2, %v107_v10  ;;  %v108_v18 = vadd.f32 %v295_v29, %v70_v11  ;;  %v109_v19 = vadd.f32 %v297_v30, %v71_v12 }
  0x17   :  { %v154_v20 = vsel %vm122_vm8, %v106_v8, %v138_v14  ;;  %v72_v21 = vmul.f32 %v283_v23, %v34_v15  ;;  %v73_v22 = vmul.f32 %v285_v24, %v35_v16  ;;  %v36_v31 = vunpack.c.l.bf16 %v21_v13 }
  0x18   :  { %v155_v32 = vsel %vm123_vm9, %v107_v10, %v139_v17  ;;  %vm124_vm10 = vcmp.ge.f32.partialorder %v108_v18, 0.0  ;;  %vm125_vm11 = vcmp.ge.f32.partialorder %v109_v19, 0.0  ;;  %v140_v33 = vmul.f32 0.2, %v108_v18 }
  0x19   :  { %v234_v34 = vpack.c.bf16 %v155_v32, %v154_v20  ;;  %v141_v35 = vmul.f32 0.2, %v109_v19  ;;  %v110_v36 = vadd.f32 %v287_v25, %v72_v21  ;;  %v111_v37 = vadd.f32 %v289_v26, %v73_v22 }
  0x1a   :  { %v156_v38 = vsel %vm124_vm10, %v108_v18, %v140_v33  ;;  %v37_v39 = vunpack.c.h.bf16 %v21_v13  ;;  %v74_v40 = vmul.f32 %v291_v27, %v36_v31 }
  0x1b   :  { %214 = vst [vmem:[%s368_s3 + $0x20] sm:$0xff] %v234_v34  ;;  %v157_v23 = vsel %vm125_vm11, %v109_v19, %v141_v35  ;;  %vm126_vm12 = vcmp.ge.f32.partialorder %v110_v36, 0.0  ;;  %vm127_vm13 = vcmp.ge.f32.partialorder %v111_v37, 0.0  ;;  %v142_v24 = vmul.f32 0.2, %v110_v36 }
  0x1c   :  { %v235_v41 = vpack.c.bf16 %v157_v23, %v156_v38  ;;  %v143_v42 = vmul.f32 0.2, %v111_v37  ;;  %v75_v43 = vmul.f32 %v293_v28, %v37_v39  ;;  %v112_v25 = vadd.f32 %v295_v29, %v74_v40 }
  0x1d   :  { %v158_v44 = vsel %vm126_vm12, %v110_v36, %v142_v24 }
  0x1e   :  { %215 = vst [vmem:[%s368_s3 + $0x28] sm:$0xff] %v235_v41  ;;  %v159_v26 = vsel %vm127_vm13, %v111_v37, %v143_v42  ;;  %v113_v27 = vadd.f32 %v297_v30, %v75_v43  ;;  %vm128_vm14 = vcmp.ge.f32.partialorder %v112_v25, 0.0  ;;  %v144_v45 = vmul.f32 0.2, %v112_v25 }
  0x1f   :  { %v236_v46 = vpack.c.bf16 %v159_v26, %v158_v44 }
  0x20   :  { %vm129_vm15 = vcmp.ge.f32.partialorder %v113_v27, 0.0  ;;  %v145_v47 = vmul.f32 0.2, %v113_v27  ;;  %v160_v48 = vsel %vm128_vm14, %v112_v25, %v144_v45 }
  0x21   :  { %216 = vst [vmem:[%s368_s3 + $0x30] sm:$0xff] %v236_v46 }
  0x22   :  { %v161_v28 = vsel %vm129_vm15, %v113_v27, %v145_v47 }
  0x23   :  { %v237_v29 = vpack.c.bf16 %v161_v28, %v160_v48 }
  0x25   :  { %217 = vst [vmem:[%s368_s3 + $0x38] sm:$0xff] %v237_v29 }

// kernel: _lambda_.13
= control target key start
LH: loop header
LB: loop body
LE: loop exit
PB: predicated region body
PF: predicated region fallthrough
CT: control target
= control target key end

     0   :  { %s6942_s18 = smov 0   ;;  %s6944_s19 = smov 0   ;;  %s7733_s0 = inlined_call_operand.vmem [shape: bf16[32,4096], index: 0, kind: input, shape index: {}]   ;;  %s7734_s1 = inlined_call_operand.vmem [shape: bf16[4096,512], index: 1, kind: input, shape index: {}]   ;;  %s7735_s2 = inlined_call_operand.vmem [shape: f32[1,512], index: 2, kind: input, shape index: {}]   ;;  %s7736_s3 = inlined_call_operand.vmem [shape: bf16[32,512], index: 3, kind: output, shape index: {0}]   ;;  %s7737_s4 = inlined_call_operand.vmem [shape: f32[1,1,512], index: 4, kind: output, shape index: {1}]   ;;  %s7738_s5 = inlined_call_operand.vmem [shape: f32[1,1,512], index: 5, kind: output, shape index: {2}]  }
   0x1   :  { %s6946_s20 = smov 0   ;;  %s6948_s21 = smov 0  }
   0x2   :  { %s6950_s22 = smov 0  }
   0x3 LB: > { %s28_s23 = sadd.s32 1, %s6903_s21  ;;  %p51_p1 = scmp.ne.s32.totalorder %s6895_s19, %s6891_s18  ;;  %s6907_s22 = sphi %s6950_s22, %s16_s22   ;;  %s6903_s21 = sphi %s6948_s21, %s7742_s21   ;;  %s6899_s20 = sphi %s6946_s20, %s7741_s20   ;;  %s6895_s19 = sphi %s6944_s19, %s7740_s19   ;;  %s6891_s18 = sphi %s6942_s18, %s7739_s18  }
   0x4   : > { %p29_p0 = scmp.ge.s32.totalorder %s28_s23, 2  ;;  %p52_p2 = scmp.eq.s32.totalorder %s6907_s22, 0 }
   0x5   : > { %s44_s25 = sadd.s32 1, %s6895_s19  ;;  %p5328_p5 = scmp.ge.s32.totalorder %s6907_s22, 2 }
   0x6   : > { %s7744_s23 = smov (%p29_p0, %s28_s23), 0  ;;  %p53_p3 = por %p52_p2, %p51_p1 }
   0x7   : > { %s40_s24 = ssub.s32 %s6903_s21, %s7744_s23  ;;  %223 = sbr.rel (%p5328_p5) target bundleno = 34 (0x22), region = 20 }
   0x8   : > { %p42_p4 = scmp.eq.s32.totalorder %s40_s24, 0 }
   0xa   : > { %s6977_s26 = scalar_select %p42_p4, %s6895_s19, %s44_s25  }
   0xe   : > { %226 = sbr.rel (!%p53_p3) target bundleno = 34 (0x22), region = 24  ;;  %s228_s27 = sand.u32 (%p53_p3), 1, %s6895_s19  }
   0xf   : > { %s5904_s28 = sshll.u32 (%p53_p3), %s6903_s21, 6  ;;  %s5329_s29 = sshll.u32 (%p53_p3), %s228_s27, 8 }
  0x10   : > { %s6985_s7 = scalar_lea.vmem (%p53_p3), %s7733_s0, %s5904_s28  ;;  %s6990_s8 = scalar_lea.vmem (%p53_p3), [#allocation3], %s5329_s29 }
  0x11   : > { %v249_v0 = vld [vmem:[%s6985_s7] sm:$0xff] (%p53_p3)  ;;  %v251_v1 = vld [vmem:[%s6985_s7 + $0x8] sm:$0xff] (%p53_p3)  ;;  %v253_v2 = vld [vmem:[%s6985_s7 + $0x10] sm:$0xff] (%p53_p3) }
  0x12   : > { %250 = vst [vmem:[%s6990_s8] sm:$0xff] (%p53_p3), %v249_v0  ;;  %252 = vst [vmem:[%s6990_s8 + $0x8] sm:$0xff] (%p53_p3), %v251_v1  ;;  %v255_v3 = vld [vmem:[%s6985_s7 + $0x18] sm:$0xff] (%p53_p3)  ;;  %v257_v4 = vld [vmem:[%s6985_s7 + $0x20] sm:$0xff] (%p53_p3) }
  0x13   : > { %254 = vst [vmem:[%s6990_s8 + $0x10] sm:$0xff] (%p53_p3), %v253_v2  ;;  %v259_v5 = vld [vmem:[%s6985_s7 + $0x28] sm:$0xff] (%p53_p3)  ;;  %256 = vst [vmem:[%s6990_s8 + $0x18] sm:$0xff] (%p53_p3), %v255_v3  ;;  %v261_v6 = vld [vmem:[%s6985_s7 + $0x30] sm:$0xff] (%p53_p3) }
  0x14   : > { %258 = vst [vmem:[%s6990_s8 + $0x20] sm:$0xff] (%p53_p3), %v257_v4  ;;  %260 = vst [vmem:[%s6990_s8 + $0x28] sm:$0xff] (%p53_p3), %v259_v5  ;;  %v263_v7 = vld [vmem:[%s6985_s7 + $0x38] sm:$0xff] (%p53_p3)  ;;  %v265_v8 = vld [vmem:[%s6985_s7 + $0x80] sm:$0xff] (%p53_p3) }
  0x15   : > { %262 = vst [vmem:[%s6990_s8 + $0x30] sm:$0xff] %v261_v6  ;;  %264 = vst [vmem:[%s6990_s8 + $0x38] sm:$0xff] %v263_v7  ;;  %v267_v9 = vld [vmem:[%s6985_s7 + $0x88] sm:$0xff]  ;;  %v269_v10 = vld [vmem:[%s6985_s7 + $0x90] sm:$0xff] }
  0x16   : > { %266 = vst [vmem:[%s6990_s8 + $0x40] sm:$0xff] %v265_v8  ;;  %v271_v11 = vld [vmem:[%s6985_s7 + $0x98] sm:$0xff]  ;;  %268 = vst [vmem:[%s6990_s8 + $0x48] sm:$0xff] %v267_v9  ;;  %v273_v12 = vld [vmem:[%s6985_s7 + $0xa0] sm:$0xff] }
  0x17   : > { %270 = vst [vmem:[%s6990_s8 + $0x50] sm:$0xff] %v269_v10  ;;  %272 = vst [vmem:[%s6990_s8 + $0x58] sm:$0xff] %v271_v11  ;;  %v275_v13 = vld [vmem:[%s6985_s7 + $0xa8] sm:$0xff]  ;;  %v277_v14 = vld [vmem:[%s6985_s7 + $0xb0] sm:$0xff] }
  0x18   : > { %274 = vst [vmem:[%s6990_s8 + $0x60] sm:$0xff] %v273_v12  ;;  %276 = vst [vmem:[%s6990_s8 + $0x68] sm:$0xff] %v275_v13  ;;  %v279_v15 = vld [vmem:[%s6985_s7 + $0xb8] sm:$0xff]  ;;  %v281_v16 = vld [vmem:[%s6985_s7 + $0x100] sm:$0xff] }
  0x19   : > { %278 = vst [vmem:[%s6990_s8 + $0x70] sm:$0xff] %v277_v14  ;;  %v283_v17 = vld [vmem:[%s6985_s7 + $0x108] sm:$0xff]  ;;  %280 = vst [vmem:[%s6990_s8 + $0x78] sm:$0xff] %v279_v15  ;;  %v285_v18 = vld [vmem:[%s6985_s7 + $0x110] sm:$0xff] }
  0x1a   : > { %282 = vst [vmem:[%s6990_s8 + $0x80] sm:$0xff] %v281_v16  ;;  %284 = vst [vmem:[%s6990_s8 + $0x88] sm:$0xff] %v283_v17  ;;  %v287_v19 = vld [vmem:[%s6985_s7 + $0x118] sm:$0xff]  ;;  %v289_v20 = vld [vmem:[%s6985_s7 + $0x120] sm:$0xff] }
  0x1b   : > { %286 = vst [vmem:[%s6990_s8 + $0x90] sm:$0xff] %v285_v18  ;;  %288 = vst [vmem:[%s6990_s8 + $0x98] sm:$0xff] %v287_v19  ;;  %v291_v21 = vld [vmem:[%s6985_s7 + $0x128] sm:$0xff]  ;;  %v293_v22 = vld [vmem:[%s6985_s7 + $0x130] sm:$0xff] }
  0x1c   : > { %290 = vst [vmem:[%s6990_s8 + $0xa0] sm:$0xff] %v289_v20  ;;  %v295_v23 = vld [vmem:[%s6985_s7 + $0x138] sm:$0xff]  ;;  %292 = vst [vmem:[%s6990_s8 + $0xa8] sm:$0xff] %v291_v21  ;;  %v297_v24 = vld [vmem:[%s6985_s7 + $0x180] sm:$0xff] }
  0x1d   : > { %294 = vst [vmem:[%s6990_s8 + $0xb0] sm:$0xff] %v293_v22  ;;  %296 = vst [vmem:[%s6990_s8 + $0xb8] sm:$0xff] %v295_v23  ;;  %v299_v25 = vld [vmem:[%s6985_s7 + $0x188] sm:$0xff]  ;;  %v301_v26 = vld [vmem:[%s6985_s7 + $0x190] sm:$0xff] }
  0x1e   : > { %298 = vst [vmem:[%s6990_s8 + $0xc0] sm:$0xff] %v297_v24  ;;  %300 = vst [vmem:[%s6990_s8 + $0xc8] sm:$0xff] %v299_v25  ;;  %v303_v27 = vld [vmem:[%s6985_s7 + $0x198] sm:$0xff]  ;;  %v305_v28 = vld [vmem:[%s6985_s7 + $0x1a0] sm:$0xff] }
  0x1f   : > { %302 = vst [vmem:[%s6990_s8 + $0xd0] sm:$0xff] %v301_v26  ;;  %v307_v29 = vld [vmem:[%s6985_s7 + $0x1a8] sm:$0xff]  ;;  %304 = vst [vmem:[%s6990_s8 + $0xd8] sm:$0xff] %v303_v27  ;;  %v309_v30 = vld [vmem:[%s6985_s7 + $0x1b0] sm:$0xff] }
  0x20   : > { %306 = vst [vmem:[%s6990_s8 + $0xe0] sm:$0xff] %v305_v28  ;;  %308 = vst [vmem:[%s6990_s8 + $0xe8] sm:$0xff] %v307_v29  ;;  %v311_v31 = vld [vmem:[%s6985_s7 + $0x1b8] sm:$0xff] }
  0x21   : > { %310 = vst [vmem:[%s6990_s8 + $0xf0] sm:$0xff] %v309_v30  ;;  %312 = vst [vmem:[%s6990_s8 + $0xf8] sm:$0xff] %v311_v31 }
  0x22 PF: > { %p5332_p6 = scmp.ge.s32.totalorder %s6907_s22, 1  ;;  %p332_p7 = scmp.lt.s32.totalorder %s6907_s22, 3 }
  0x24   : > { %p333_p8 = pnand %p5332_p6, %p332_p7 }
  0x25   : > { %s339_s9 = sand.u32 (!%p333_p8), 1, %s6891_s18   ;;  %s5334_s10 = sshll.u32 (!%p333_p8), %s6899_s20, 8 }
  0x26   : > { %336 = sbr.rel (%p333_p8) target bundleno = 1039 (0x40f), region = 51  ;;  %s5333_s11 = sshll.u32 (!%p333_p8), %s339_s9, 8 }
  0x27   : > { %p405_p9 = scmp.lt.s32.totalorder (!%p333_p8), %s5334_s10, 511  ;;  %s7062_s16 = scalar_lea.vmem (!%p333_p8), [#allocation3], %s5333_s11 }
  0x28   : > { %p5337_p10 = scmp.ne.s32.totalorder (!%p333_p8), %s6899_s20, 0 }
  0x2d   : > { %s7746_s10 = smov (!%p405_p9, %s5334_s10), 511  ;;  %453 = sbr.rel (%p5337_p10) target bundleno = 55 (0x37), region = 59 }
  0x2e   : > { %s5905_s12 = sshll.u32 %s7746_s10, 4  ;;  %v6909_v32 = vmov (!%p5337_p10), 0.0  }
  0x2f   : > { %s7060_s15 = scalar_lea.vmem %s7734_s1, %s5905_s12  ;;  %454 = vst [vmem:[#allocation2] sm:$0xff] (!%p5337_p10), %v6909_v32  ;;  %455 = vst [vmem:[#allocation2 + $0x8] sm:$0xff] (!%p5337_p10), %v6909_v32 }
  0x30   : > { %456 = vst [vmem:[#allocation2 + $0x10] sm:$0xff] (!%p5337_p10), %v6909_v32  ;;  %457 = vst [vmem:[#allocation2 + $0x18] sm:$0xff] (!%p5337_p10), %v6909_v32 }
  0x31   : > { %458 = vst [vmem:[#allocation2 + $0x20] sm:$0xff] (!%p5337_p10), %v6909_v32  ;;  %459 = vst [vmem:[#allocation2 + $0x28] sm:$0xff] (!%p5337_p10), %v6909_v32 }
  0x32   : > { %460 = vst [vmem:[#allocation2 + $0x30] sm:$0xff] (!%p5337_p10), %v6909_v32  ;;  %461 = vst [vmem:[#allocation2 + $0x38] sm:$0xff] (!%p5337_p10), %v6909_v32 }
  0x33   : > { %462 = vst [vmem:[#allocation2 + $0x40] sm:$0xff] (!%p5337_p10), %v6909_v32  ;;  %463 = vst [vmem:[#allocation2 + $0x48] sm:$0xff] (!%p5337_p10), %v6909_v32 }
  0x34   : > { %464 = vst [vmem:[#allocation2 + $0x50] sm:$0xff] %v6909_v32  ;;  %465 = vst [vmem:[#allocation2 + $0x58] sm:$0xff] %v6909_v32 }
  0x35   : > { %466 = vst [vmem:[#allocation2 + $0x60] sm:$0xff] %v6909_v32  ;;  %467 = vst [vmem:[#allocation2 + $0x68] sm:$0xff] %v6909_v32 }
  0x36   : > { %468 = vst [vmem:[#allocation2 + $0x70] sm:$0xff] %v6909_v32  ;;  %469 = vst [vmem:[#allocation2 + $0x78] sm:$0xff] %v6909_v32 }
  0x37 PF: > { %v6101_v33 = vld [vmem:[%s7060_s15 + $0x4] ss:$16 sps:$4 sm:$0xff]   ;;  %v6103_v34 = vld [vmem:[%s7060_s15 + $0xc] ss:$16 sps:$4 sm:$0xff]   ;;  %v6105_v35 = vld [vmem:[%s7060_s15] ss:$16 sps:$4 sm:$0xff]  }
  0x38   : > { %3750 = vmatprep.subr.bf16.mxu0 %v6101_v33  ;;  %v6106_v36 = vld [vmem:[%s7060_s15 + $0x8] ss:$16 sps:$4 sm:$0xff]   ;;  %4174 = vmatprep.subr.bf16.mxu1 %v6103_v34  ;;  %v6107_v37 = vld [vmem:[%s7060_s15 + $0x24] ss:$16 sps:$4 sm:$0xff]   ;;  %v6109_v38 = vld [vmem:[%s7060_s15 + $0x2c] ss:$16 sps:$4 sm:$0xff]  }
  0x39   : > { %3751 = vmatpush1.bf16.msra.mxu0 %v6105_v35  ;;  %4175 = vmatpush1.bf16.msra.mxu1 %v6106_v36  ;;  %v6111_v39 = vld [vmem:[%s7060_s15 + $0x20] ss:$16 sps:$4 sm:$0xff]   ;;  %v6112_v40 = vld [vmem:[%s7060_s15 + $0x28] ss:$16 sps:$4 sm:$0xff]   ;;  %v6113_v41 = vld [vmem:[%s7060_s15 + $0x44] ss:$16 sps:$4 sm:$0xff]  }
  0x3a   : > { %3752 = vmatprep.subr.bf16.mxu0 %v6107_v37  ;;  %4176 = vmatprep.subr.bf16.mxu1 %v6109_v38  ;;  %v6115_v42 = vld [vmem:[%s7060_s15 + $0x4c] ss:$16 sps:$4 sm:$0xff]   ;;  %v6117_v43 = vld [vmem:[%s7060_s15 + $0x40] ss:$16 sps:$4 sm:$0xff]   ;;  %v6118_v44 = vld [vmem:[%s7060_s15 + $0x48] ss:$16 sps:$4 sm:$0xff]  }
  0x3b   : > { %v6119_v45 = vld [vmem:[%s7060_s15 + $0x64] ss:$16 sps:$4 sm:$0xff]   ;;  %v6121_v46 = vld [vmem:[%s7060_s15 + $0x6c] ss:$16 sps:$4 sm:$0xff]   ;;  %v6123_v47 = vld [vmem:[%s7060_s15 + $0x60] ss:$16 sps:$4 sm:$0xff]  }
  0x3c   : > { %v6124_v48 = vld [vmem:[%s7060_s15 + $0x68] ss:$16 sps:$4 sm:$0xff]   ;;  %v6125_v49 = vld [vmem:[%s7060_s15 + $0x84] ss:$16 sps:$4 sm:$0xff]   ;;  %v6127_v50 = vld [vmem:[%s7060_s15 + $0x8c] ss:$16 sps:$4 sm:$0xff]  }
  0x3d   : > { %3753 = vmatpush1.bf16.msra.mxu0 %v6111_v39  ;;  %4177 = vmatpush1.bf16.msra.mxu1 %v6112_v40  ;;  %v6129_v51 = vld [vmem:[%s7060_s15 + $0x80] ss:$16 sps:$4 sm:$0xff]   ;;  %v6130_v52 = vld [vmem:[%s7060_s15 + $0x88] ss:$16 sps:$4 sm:$0xff]   ;;  %v6131_v53 = vld [vmem:[%s7060_s15 + $0xa4] ss:$16 sps:$4 sm:$0xff]  }
  0x3e   : > { %3754 = vmatprep.subr.bf16.mxu0 %v6113_v41  ;;  %4178 = vmatprep.subr.bf16.mxu1 %v6115_v42  ;;  %v6133_v54 = vld [vmem:[%s7060_s15 + $0xac] ss:$16 sps:$4 sm:$0xff]   ;;  %v6135_v55 = vld [vmem:[%s7060_s15 + $0xa0] ss:$16 sps:$4 sm:$0xff]   ;;  %v6136_v56 = vld [vmem:[%s7060_s15 + $0xa8] ss:$16 sps:$4 sm:$0xff]  }
  0x3f   : > { %v6137_v57 = vld [vmem:[%s7060_s15 + $0xc4] ss:$16 sps:$4 sm:$0xff]   ;;  %v6139_v58 = vld [vmem:[%s7060_s15 + $0xcc] ss:$16 sps:$4 sm:$0xff]   ;;  %v6141_v59 = vld [vmem:[%s7060_s15 + $0xc0] ss:$16 sps:$4 sm:$0xff]  }
  0x40   : > { %v6142_v60 = vld [vmem:[%s7060_s15 + $0xc8] ss:$16 sps:$4 sm:$0xff]   ;;  %v6143_v61 = vld [vmem:[%s7060_s15 + $0xe4] ss:$16 sps:$4 sm:$0xff]   ;;  %v6145_v62 = vld [vmem:[%s7060_s15 + $0xec] ss:$16 sps:$4 sm:$0xff]  }
  0x41   : > { %3755 = vmatpush1.bf16.msra.mxu0 %v6117_v43  ;;  %4179 = vmatpush1.bf16.msra.mxu1 %v6118_v44  ;;  %v6147_v63 = vld [vmem:[%s7060_s15 + $0xe0] ss:$16 sps:$4 sm:$0xff]   ;;  %v6148_v0 = vld [vmem:[%s7060_s15 + $0xe8] ss:$16 sps:$4 sm:$0xff]   ;;  %v6149_v1 = vld [vmem:[%s7060_s15 + $0x104] ss:$16 sps:$4 sm:$0xff]  }
  0x42   : > { %3756 = vmatprep.subr.bf16.mxu0 %v6119_v45  ;;  %4180 = vmatprep.subr.bf16.mxu1 %v6121_v46  ;;  %v6151_v2 = vld [vmem:[%s7060_s15 + $0x10c] ss:$16 sps:$4 sm:$0xff]   ;;  %v6153_v3 = vld [vmem:[%s7060_s15 + $0x100] ss:$16 sps:$4 sm:$0xff]   ;;  %v6154_v4 = vld [vmem:[%s7060_s15 + $0x108] ss:$16 sps:$4 sm:$0xff]  }
  0x43   : > { %v6155_v5 = vld [vmem:[%s7060_s15 + $0x124] ss:$16 sps:$4 sm:$0xff]   ;;  %v6157_v6 = vld [vmem:[%s7060_s15 + $0x12c] ss:$16 sps:$4 sm:$0xff]   ;;  %v6159_v7 = vld [vmem:[%s7060_s15 + $0x120] ss:$16 sps:$4 sm:$0xff]  }
  0x44   : > { %v6160_v8 = vld [vmem:[%s7060_s15 + $0x128] ss:$16 sps:$4 sm:$0xff]   ;;  %v6161_v9 = vld [vmem:[%s7060_s15 + $0x144] ss:$16 sps:$4 sm:$0xff]   ;;  %v6163_v10 = vld [vmem:[%s7060_s15 + $0x14c] ss:$16 sps:$4 sm:$0xff]  }
  0x45   : > { %3757 = vmatpush1.bf16.msra.mxu0 %v6123_v47  ;;  %4181 = vmatpush1.bf16.msra.mxu1 %v6124_v48  ;;  %v6165_v11 = vld [vmem:[%s7060_s15 + $0x140] ss:$16 sps:$4 sm:$0xff]   ;;  %v6166_v12 = vld [vmem:[%s7060_s15 + $0x148] ss:$16 sps:$4 sm:$0xff]   ;;  %v6167_v13 = vld [vmem:[%s7060_s15 + $0x164] ss:$16 sps:$4 sm:$0xff]  }
  0x46   : > { %3758 = vmatprep.subr.bf16.mxu0 %v6125_v49  ;;  %4182 = vmatprep.subr.bf16.mxu1 %v6127_v50  ;;  %v6169_v14 = vld [vmem:[%s7060_s15 + $0x16c] ss:$16 sps:$4 sm:$0xff]   ;;  %v486_v15 = vld [vmem:[%s7062_s16] sm:$0xff]  ;;  %v6172_v18 = vld [vmem:[%s7060_s15 + $0x168] ss:$16 sps:$4 sm:$0xff]   ;;  %p5882_p11 = scmp.ne.s32.totalorder %s6899_s20, 1 }
  0x47   : > { %v494_v16 = vld [vmem:[%s7062_s16 + $0x40] sm:$0xff]  ;;  %v6175_v21 = vld [vmem:[%s7060_s15 + $0x18c] ss:$16 sps:$4 sm:$0xff]   ;;  %v6178_v23 = vld [vmem:[%s7060_s15 + $0x188] ss:$16 sps:$4 sm:$0xff]   ;;  %vm4752_vm0 = vcmask (!%p5882_p11), 261120  }
  0x48   : > { %v6171_v17 = vld [vmem:[%s7060_s15 + $0x160] ss:$16 sps:$4 sm:$0xff]   ;;  %v5339_v19 = vcombine.high %v486_v15, %v494_v16  ;;  %v6173_v20 = vld [vmem:[%s7060_s15 + $0x184] ss:$16 sps:$4 sm:$0xff]   ;;  %v6181_v25 = vld [vmem:[%s7060_s15 + $0x1ac] ss:$16 sps:$4 sm:$0xff]   ;;  %v5338_v38 = vcombine.low %v486_v15, %v494_v16 }
  0x49   : > { %3759 = vmatpush1.bf16.msra.mxu0 %v6129_v51  ;;  %4183 = vmatpush1.bf16.msra.mxu1 %v6130_v52  ;;  %v6177_v22 = vld [vmem:[%s7060_s15 + $0x180] ss:$16 sps:$4 sm:$0xff]   ;;  %v6179_v24 = vld [vmem:[%s7060_s15 + $0x1a4] ss:$16 sps:$4 sm:$0xff]   ;;  %v6184_v27 = vld [vmem:[%s7060_s15 + $0x1a8] ss:$16 sps:$4 sm:$0xff]  }
  0x4a   : > { %3760 = vmatprep.subr.bf16.mxu0 %v6131_v53  ;;  %4184 = vmatprep.subr.bf16.mxu1 %v6133_v54  ;;  %v6183_v26 = vld [vmem:[%s7060_s15 + $0x1a0] ss:$16 sps:$4 sm:$0xff]   ;;  %v6185_v28 = vld [vmem:[%s7060_s15 + $0x1c4] ss:$16 sps:$4 sm:$0xff]   ;;  %v6187_v29 = vld [vmem:[%s7060_s15 + $0x1cc] ss:$16 sps:$4 sm:$0xff]  }
  0x4b   : > { %3782 = vmatprep.mubr.bf16.mxu0 %v5339_v19  ;;  %4206 = vmatprep.mubr.bf16.mxu1 %v5339_v19  ;;  %v6189_v30 = vld [vmem:[%s7060_s15 + $0x1c0] ss:$16 sps:$4 sm:$0xff]   ;;  %v6190_v31 = vld [vmem:[%s7060_s15 + $0x1c8] ss:$16 sps:$4 sm:$0xff]   ;;  %v6191_v32 = vld [vmem:[%s7060_s15 + $0x1e4] ss:$16 sps:$4 sm:$0xff]  }
  0x4c   : > { %v6193_v33 = vld [vmem:[%s7060_s15 + $0x1ec] ss:$16 sps:$4 sm:$0xff]   ;;  %v6195_v34 = vld [vmem:[%s7060_s15 + $0x1e0] ss:$16 sps:$4 sm:$0xff]   ;;  %v6196_v35 = vld [vmem:[%s7060_s15 + $0x1e8] ss:$16 sps:$4 sm:$0xff]  }
  0x4d   : > { %3761 = vmatpush1.bf16.msra.mxu0 %v6135_v55  ;;  %4185 = vmatpush1.bf16.msra.mxu1 %v6136_v56  ;;  %v6199_v36 = vld [vmem:[%s7060_s15 + $0x204] ss:$16 sps:$4 sm:$0xff]   ;;  %v6202_v37 = vld [vmem:[%s7060_s15 + $0x20c] ss:$16 sps:$4 sm:$0xff]   ;;  %v6197_v39 = vld [vmem:[%s7060_s15 + $0x200] ss:$16 sps:$4 sm:$0xff]  }
  0x4e   : > { %3762 = vmatprep.subr.bf16.mxu0 %v6137_v57  ;;  %4186 = vmatprep.subr.bf16.mxu1 %v6139_v58  ;;  %v6200_v40 = vld [vmem:[%s7060_s15 + $0x208] ss:$16 sps:$4 sm:$0xff]   ;;  %v6205_v41 = vld [vmem:[%s7060_s15 + $0x224] ss:$16 sps:$4 sm:$0xff]   ;;  %v6208_v42 = vld [vmem:[%s7060_s15 + $0x22c] ss:$16 sps:$4 sm:$0xff]  }
  0x4f   : > { %v6203_v43 = vld [vmem:[%s7060_s15 + $0x220] ss:$16 sps:$4 sm:$0xff]   ;;  %v6206_v44 = vld [vmem:[%s7060_s15 + $0x228] ss:$16 sps:$4 sm:$0xff]   ;;  %v6211_v45 = vld [vmem:[%s7060_s15 + $0x244] ss:$16 sps:$4 sm:$0xff]  }
  0x50   : > { %v6214_v46 = vld [vmem:[%s7060_s15 + $0x24c] ss:$16 sps:$4 sm:$0xff]   ;;  %v6209_v47 = vld [vmem:[%s7060_s15 + $0x240] ss:$16 sps:$4 sm:$0xff]   ;;  %v6212_v48 = vld [vmem:[%s7060_s15 + $0x248] ss:$16 sps:$4 sm:$0xff]  }
  0x51   : > { %3763 = vmatpush1.bf16.msra.mxu0 %v6141_v59  ;;  %4187 = vmatpush1.bf16.msra.mxu1 %v6142_v60  ;;  %v6217_v49 = vld [vmem:[%s7060_s15 + $0x264] ss:$16 sps:$4 sm:$0xff]   ;;  %v6220_v50 = vld [vmem:[%s7060_s15 + $0x26c] ss:$16 sps:$4 sm:$0xff]   ;;  %v6215_v51 = vld [vmem:[%s7060_s15 + $0x260] ss:$16 sps:$4 sm:$0xff]  }
  0x52   : > { %3764 = vmatprep.subr.bf16.mxu0 %v6143_v61  ;;  %4188 = vmatprep.subr.bf16.mxu1 %v6145_v62  ;;  %v6218_v52 = vld [vmem:[%s7060_s15 + $0x268] ss:$16 sps:$4 sm:$0xff]   ;;  %v6223_v53 = vld [vmem:[%s7060_s15 + $0x284] ss:$16 sps:$4 sm:$0xff]   ;;  %v6226_v54 = vld [vmem:[%s7060_s15 + $0x28c] ss:$16 sps:$4 sm:$0xff]  }
  0x53   : > { %v6221_v55 = vld [vmem:[%s7060_s15 + $0x280] ss:$16 sps:$4 sm:$0xff]   ;;  %v6224_v56 = vld [vmem:[%s7060_s15 + $0x288] ss:$16 sps:$4 sm:$0xff]   ;;  %v6229_v57 = vld [vmem:[%s7060_s15 + $0x2a4] ss:$16 sps:$4 sm:$0xff]  }
  0x54   : > { %v6232_v58 = vld [vmem:[%s7060_s15 + $0x2ac] ss:$16 sps:$4 sm:$0xff]   ;;  %v502_v59 = vld [vmem:[%s7062_s16 + $0x80] sm:$0xff]  ;;  %v6248_v15 = vld [vmem:[%s7060_s15 + $0x308] ss:$16 sps:$4 sm:$0xff]  }
  0x55   : > { %3765 = vmatpush1.bf16.msra.mxu0 %v6147_v63  ;;  %4189 = vmatpush1.bf16.msra.mxu1 %v6148_v0  ;;  %v510_v60 = vld [vmem:[%s7062_s16 + $0xc0] sm:$0xff]  ;;  %v6230_v63 = vld [vmem:[%s7060_s15 + $0x2a8] ss:$16 sps:$4 sm:$0xff]  }
  0x56   : > { %3766 = vmatprep.subr.bf16.mxu0 %v6149_v1  ;;  %4190 = vmatprep.subr.bf16.mxu1 %v6151_v2  ;;  %v5355_v61 = vcombine.high %v502_v59, %v510_v60  ;;  %v6227_v62 = vld [vmem:[%s7060_s15 + $0x2a0] ss:$16 sps:$4 sm:$0xff]   ;;  %v5354_v0 = vcombine.low %v502_v59, %v510_v60  ;;  %v6235_v1 = vld [vmem:[%s7060_s15 + $0x2c4] ss:$16 sps:$4 sm:$0xff]   ;;  %v6238_v2 = vld [vmem:[%s7060_s15 + $0x2cc] ss:$16 sps:$4 sm:$0xff]  }
  0x57   : > { %v6253_v16 = vld [vmem:[%s7060_s15 + $0x324] ss:$16 sps:$4 sm:$0xff]   ;;  %v6254_v19 = vld [vmem:[%s7060_s15 + $0x328] ss:$16 sps:$4 sm:$0xff]  }
  0x58   : > { %v7223_v60 = vld [vmem:[%s7062_s16 + $0x50] sm:$0xff] }
  0x59   : > { %3767 = vmatpush1.bf16.msra.mxu0 %v6153_v3  ;;  %4191 = vmatpush1.bf16.msra.mxu1 %v6154_v4  ;;  %v7160_v3 = vld [vmem:[%s7062_s16 + $0x8] sm:$0xff] }
  0x5a   : > { %3768 = vmatprep.subr.bf16.mxu0 %v6155_v5  ;;  %4192 = vmatprep.subr.bf16.mxu1 %v6157_v6  ;;  %v7163_v4 = vld [vmem:[%s7062_s16 + $0x48] sm:$0xff]  ;;  %v6233_v5 = vld [vmem:[%s7060_s15 + $0x2c0] ss:$16 sps:$4 sm:$0xff]  }
  0x5b   : > { %v6236_v6 = vld [vmem:[%s7060_s15 + $0x2c8] ss:$16 sps:$4 sm:$0xff]  }
  0x5d   : > { %3769 = vmatpush1.bf16.msra.mxu0 %v6159_v7  ;;  %4193 = vmatpush1.bf16.msra.mxu1 %v6160_v8  ;;  %v5341_v7 = vcombine.high %v7160_v3, %v7163_v4  ;;  %v6241_v8 = vld [vmem:[%s7060_s15 + $0x2e4] ss:$16 sps:$4 sm:$0xff]  }
  0x5e   : > { %3770 = vmatprep.subr.bf16.mxu0 %v6161_v9  ;;  %4194 = vmatprep.subr.bf16.mxu1 %v6163_v10  ;;  %v6244_v9 = vld [vmem:[%s7060_s15 + $0x2ec] ss:$16 sps:$4 sm:$0xff]   ;;  %v6239_v10 = vld [vmem:[%s7060_s15 + $0x2e0] ss:$16 sps:$4 sm:$0xff]  }
  0x61   : > { %3771 = vmatpush1.bf16.msra.mxu0 %v6165_v11  ;;  %4195 = vmatpush1.bf16.msra.mxu1 %v6166_v12  ;;  %v6242_v11 = vld [vmem:[%s7060_s15 + $0x2e8] ss:$16 sps:$4 sm:$0xff]   ;;  %v6247_v12 = vld [vmem:[%s7060_s15 + $0x304] ss:$16 sps:$4 sm:$0xff]  }
  0x62   : > { %3772 = vmatprep.subr.bf16.mxu0 %v6167_v13  ;;  %4196 = vmatprep.subr.bf16.mxu1 %v6169_v14  ;;  %v6250_v13 = vld [vmem:[%s7060_s15 + $0x30c] ss:$16 sps:$4 sm:$0xff]   ;;  %v6245_v14 = vld [vmem:[%s7060_s15 + $0x300] ss:$16 sps:$4 sm:$0xff]  }
  0x65   : > { %3773 = vmatpush1.bf16.msra.mxu0 %v6171_v17  ;;  %4197 = vmatpush1.bf16.msra.mxu1 %v6172_v18  ;;  %v6256_v17 = vld [vmem:[%s7060_s15 + $0x32c] ss:$16 sps:$4 sm:$0xff]   ;;  %v6251_v18 = vld [vmem:[%s7060_s15 + $0x320] ss:$16 sps:$4 sm:$0xff]  }
  0x66   : > { %3774 = vmatprep.subr.bf16.mxu0 %v6173_v20  ;;  %4198 = vmatprep.subr.bf16.mxu1 %v6175_v21  ;;  %v6259_v20 = vld [vmem:[%s7060_s15 + $0x344] ss:$16 sps:$4 sm:$0xff]   ;;  %v6262_v21 = vld [vmem:[%s7060_s15 + $0x34c] ss:$16 sps:$4 sm:$0xff]  }
  0x69   : > { %3775 = vmatpush1.bf16.msra.mxu0 %v6177_v22  ;;  %4199 = vmatpush1.bf16.msra.mxu1 %v6178_v23  ;;  %v6257_v22 = vld [vmem:[%s7060_s15 + $0x340] ss:$16 sps:$4 sm:$0xff]   ;;  %v6260_v23 = vld [vmem:[%s7060_s15 + $0x348] ss:$16 sps:$4 sm:$0xff]  }
  0x6a   : > { %3776 = vmatprep.subr.bf16.mxu0 %v6179_v24  ;;  %4200 = vmatprep.subr.bf16.mxu1 %v6181_v25  ;;  %v6265_v24 = vld [vmem:[%s7060_s15 + $0x364] ss:$16 sps:$4 sm:$0xff]   ;;  %v6268_v25 = vld [vmem:[%s7060_s15 + $0x36c] ss:$16 sps:$4 sm:$0xff]  }
  0x6d   : > { %3777 = vmatpush1.bf16.msra.mxu0 %v6183_v26  ;;  %4201 = vmatpush1.bf16.msra.mxu1 %v6184_v27  ;;  %v6263_v26 = vld [vmem:[%s7060_s15 + $0x360] ss:$16 sps:$4 sm:$0xff]   ;;  %v6266_v27 = vld [vmem:[%s7060_s15 + $0x368] ss:$16 sps:$4 sm:$0xff]  }
  0x6e   : > { %3778 = vmatprep.subr.bf16.mxu0 %v6185_v28  ;;  %4202 = vmatprep.subr.bf16.mxu1 %v6187_v29  ;;  %v6271_v28 = vld [vmem:[%s7060_s15 + $0x384] ss:$16 sps:$4 sm:$0xff]   ;;  %v6274_v29 = vld [vmem:[%s7060_s15 + $0x38c] ss:$16 sps:$4 sm:$0xff]  }
  0x71   : > { %3779 = vmatpush1.bf16.msra.mxu0 %v6189_v30  ;;  %4203 = vmatpush1.bf16.msra.mxu1 %v6190_v31  ;;  %v6269_v30 = vld [vmem:[%s7060_s15 + $0x380] ss:$16 sps:$4 sm:$0xff]   ;;  %v6272_v31 = vld [vmem:[%s7060_s15 + $0x388] ss:$16 sps:$4 sm:$0xff]  }
  0x72   : > { %3780 = vmatprep.subr.bf16.mxu0 %v6191_v32  ;;  %4204 = vmatprep.subr.bf16.mxu1 %v6193_v33  ;;  %v6277_v32 = vld [vmem:[%s7060_s15 + $0x3a4] ss:$16 sps:$4 sm:$0xff]   ;;  %v6280_v33 = vld [vmem:[%s7060_s15 + $0x3ac] ss:$16 sps:$4 sm:$0xff]  }
  0x75   : > { %3781 = vmatpush1.bf16.msra.mxu0 %v6195_v34  ;;  %4205 = vmatpush1.bf16.msra.mxu1 %v6196_v35  ;;  %v6275_v34 = vld [vmem:[%s7060_s15 + $0x3a0] ss:$16 sps:$4 sm:$0xff]   ;;  %v6278_v35 = vld [vmem:[%s7060_s15 + $0x3a8] ss:$16 sps:$4 sm:$0xff]  }
  0x76   : > { %3803 = vmatprep.subr.bf16.mxu0 %v6199_v36  ;;  %4227 = vmatprep.subr.bf16.mxu1 %v6202_v37  ;;  %v6283_v36 = vld [vmem:[%s7060_s15 + $0x3c4] ss:$16 sps:$4 sm:$0xff]   ;;  %v6286_v37 = vld [vmem:[%s7060_s15 + $0x3cc] ss:$16 sps:$4 sm:$0xff]  }
  0x78   : > { %3783 = vmatmul.mubr.bf16.vlgmr.msra.gmra.mrb[0].mxu0 %v5338_v38  ;;  %4207 = vmatmul.mubr.bf16.vlgmr.msra.gmra.mrb[0].mxu1 %v5338_v38  ;;  %v6281_v38 = vld [vmem:[%s7060_s15 + $0x3c0] ss:$16 sps:$4 sm:$0xff]  }
  0x79   : > { %3804 = vmatpush1.bf16.msra.mxu0 %v6197_v39  ;;  %4228 = vmatpush1.bf16.msra.mxu1 %v6200_v40  ;;  %v6284_v39 = vld [vmem:[%s7060_s15 + $0x3c8] ss:$16 sps:$4 sm:$0xff]   ;;  %v6289_v40 = vld [vmem:[%s7060_s15 + $0x3e4] ss:$16 sps:$4 sm:$0xff]  }
  0x7a   : > { %3805 = vmatprep.subr.bf16.mxu0 %v6205_v41  ;;  %4229 = vmatprep.subr.bf16.mxu1 %v6208_v42  ;;  %v6292_v41 = vld [vmem:[%s7060_s15 + $0x3ec] ss:$16 sps:$4 sm:$0xff]   ;;  %v6287_v42 = vld [vmem:[%s7060_s15 + $0x3e0] ss:$16 sps:$4 sm:$0xff]  }
  0x7b   : > { %3792 = vmatprep.mubr.bf16.mxu0 %v5355_v61  ;;  %4216 = vmatprep.mubr.bf16.mxu1 %v5355_v61  ;;  %v6305_v61 = vld [vmem:[%s7060_s15 + $0x440] ss:$16 sps:$4 sm:$0xff]  }
  0x7d   : > { %3806 = vmatpush1.bf16.msra.mxu0 %v6203_v43  ;;  %4230 = vmatpush1.bf16.msra.mxu1 %v6206_v44  ;;  %v6290_v43 = vld [vmem:[%s7060_s15 + $0x3e8] ss:$16 sps:$4 sm:$0xff]   ;;  %v6295_v44 = vld [vmem:[%s7060_s15 + $0x404] ss:$16 sps:$4 sm:$0xff]  }
  0x7e   : > { %3807 = vmatprep.subr.bf16.mxu0 %v6211_v45  ;;  %4231 = vmatprep.subr.bf16.mxu1 %v6214_v46  ;;  %v6298_v45 = vld [vmem:[%s7060_s15 + $0x40c] ss:$16 sps:$4 sm:$0xff]   ;;  %v6293_v46 = vld [vmem:[%s7060_s15 + $0x400] ss:$16 sps:$4 sm:$0xff]  }
  0x80   : > { %3793 = vmatmul.mubr.bf16.gmra.mrb[4].mxu0 %v5354_v0  ;;  %4217 = vmatmul.mubr.bf16.gmra.mrb[4].mxu1 %v5354_v0  ;;  %v6316_v0 = vld [vmem:[%s7060_s15 + $0x46c] ss:$16 sps:$4 sm:$0xff]  }
  0x81   : > { %3808 = vmatpush1.bf16.msra.mxu0 %v6209_v47  ;;  %4232 = vmatpush1.bf16.msra.mxu1 %v6212_v48  ;;  %v6296_v47 = vld [vmem:[%s7060_s15 + $0x408] ss:$16 sps:$4 sm:$0xff]   ;;  %v5340_v48 = vcombine.low %v7160_v3, %v7163_v4  ;;  %v6319_v4 = vld [vmem:[%s7060_s15 + $0x484] ss:$16 sps:$4 sm:$0xff]  }
  0x82   : > { %3809 = vmatprep.subr.bf16.mxu0 %v6217_v49  ;;  %4233 = vmatprep.subr.bf16.mxu1 %v6220_v50  ;;  %v503_v49 = vld [vmem:[%s7062_s16 + $0x88] sm:$0xff] }
  0x83   : > { %3835 = vmatprep.mubr.bf16.mxu0 %v5341_v7  ;;  %4259 = vmatprep.mubr.bf16.mxu1 %v5341_v7  ;;  %v511_v50 = vld [vmem:[%s7062_s16 + $0xc8] sm:$0xff] }
  0x84   : > { %v5356_v59 = vcombine.low %v503_v49, %v511_v50  ;;  %v6314_v3 = vld [vmem:[%s7060_s15 + $0x468] ss:$16 sps:$4 sm:$0xff]  }
  0x85   : > { %3810 = vmatpush1.bf16.msra.mxu0 %v6215_v51  ;;  %4234 = vmatpush1.bf16.msra.mxu1 %v6218_v52  ;;  %v6301_v51 = vld [vmem:[%s7060_s15 + $0x424] ss:$16 sps:$4 sm:$0xff]   ;;  %v6304_v52 = vld [vmem:[%s7060_s15 + $0x42c] ss:$16 sps:$4 sm:$0xff]   ;;  %v6320_v7 = vld [vmem:[%s7060_s15 + $0x488] ss:$16 sps:$4 sm:$0xff]  }
  0x86   : > { %3811 = vmatprep.subr.bf16.mxu0 %v6223_v53  ;;  %4235 = vmatprep.subr.bf16.mxu1 %v6226_v54  ;;  %v5357_v53 = vcombine.high %v503_v49, %v511_v50  ;;  %v6299_v54 = vld [vmem:[%s7060_s15 + $0x420] ss:$16 sps:$4 sm:$0xff]   ;;  %v6388_v49 = vld [vmem:[%s7060_s15 + $0x5ec] ss:$16 sps:$4 sm:$0xff]  }
  0x87   : > { %v6383_v50 = vld [vmem:[%s7060_s15 + $0x5e0] ss:$16 sps:$4 sm:$0xff]  }
  0x89   : > { %3812 = vmatpush1.bf16.msra.mxu0 %v6221_v55  ;;  %4236 = vmatpush1.bf16.msra.mxu1 %v6224_v56  ;;  %v6302_v55 = vld [vmem:[%s7060_s15 + $0x428] ss:$16 sps:$4 sm:$0xff]   ;;  %v6307_v56 = vld [vmem:[%s7060_s15 + $0x444] ss:$16 sps:$4 sm:$0xff]  }
  0x8a   : > { %3813 = vmatprep.subr.bf16.mxu0 %v6229_v57  ;;  %4237 = vmatprep.subr.bf16.mxu1 %v6232_v58  ;;  %v6310_v57 = vld [vmem:[%s7060_s15 + $0x44c] ss:$16 sps:$4 sm:$0xff]   ;;  %v7220_v58 = vld [vmem:[%s7062_s16 + $0x10] sm:$0xff] }
  0x8d   : > { %3814 = vmatpush1.bf16.msra.mxu0 %v6227_v62  ;;  %4238 = vmatpush1.bf16.msra.mxu1 %v6230_v63  ;;  %v6308_v62 = vld [vmem:[%s7060_s15 + $0x448] ss:$16 sps:$4 sm:$0xff]   ;;  %v6313_v63 = vld [vmem:[%s7060_s15 + $0x464] ss:$16 sps:$4 sm:$0xff]  }
  0x8e   : > { %3815 = vmatprep.subr.bf16.mxu0 %v6235_v1  ;;  %4239 = vmatprep.subr.bf16.mxu1 %v6238_v2  ;;  %v5343_v1 = vcombine.high %v7220_v58, %v7223_v60  ;;  %v6311_v2 = vld [vmem:[%s7060_s15 + $0x460] ss:$16 sps:$4 sm:$0xff]  }
  0x91   : > { %3816 = vmatpush1.bf16.msra.mxu0 %v6233_v5  ;;  %4240 = vmatpush1.bf16.msra.mxu1 %v6236_v6  ;;  %v6322_v5 = vld [vmem:[%s7060_s15 + $0x48c] ss:$16 sps:$4 sm:$0xff]   ;;  %v6317_v6 = vld [vmem:[%s7060_s15 + $0x480] ss:$16 sps:$4 sm:$0xff]  }
  0x92   : > { %3817 = vmatprep.subr.bf16.mxu0 %v6241_v8  ;;  %4241 = vmatprep.subr.bf16.mxu1 %v6244_v9  ;;  %v6325_v8 = vld [vmem:[%s7060_s15 + $0x4a4] ss:$16 sps:$4 sm:$0xff]   ;;  %v6328_v9 = vld [vmem:[%s7060_s15 + $0x4ac] ss:$16 sps:$4 sm:$0xff]  }
  0x95   : > { %3818 = vmatpush1.bf16.msra.mxu0 %v6239_v10  ;;  %4242 = vmatpush1.bf16.msra.mxu1 %v6242_v11  ;;  %v6323_v10 = vld [vmem:[%s7060_s15 + $0x4a0] ss:$16 sps:$4 sm:$0xff]   ;;  %v6326_v11 = vld [vmem:[%s7060_s15 + $0x4a8] ss:$16 sps:$4 sm:$0xff]  }
  0x96   : > { %3819 = vmatprep.subr.bf16.mxu0 %v6247_v12  ;;  %4243 = vmatprep.subr.bf16.mxu1 %v6250_v13  ;;  %v6331_v12 = vld [vmem:[%s7060_s15 + $0x4c4] ss:$16 sps:$4 sm:$0xff]   ;;  %v6334_v13 = vld [vmem:[%s7060_s15 + $0x4cc] ss:$16 sps:$4 sm:$0xff]  }
  0x99   : > { %3820 = vmatpush1.bf16.msra.mxu0 %v6245_v14  ;;  %4244 = vmatpush1.bf16.msra.mxu1 %v6248_v15  ;;  %v6329_v14 = vld [vmem:[%s7060_s15 + $0x4c0] ss:$16 sps:$4 sm:$0xff]   ;;  %v6332_v15 = vld [vmem:[%s7060_s15 + $0x4c8] ss:$16 sps:$4 sm:$0xff]  }
  0x9a   : > { %3821 = vmatprep.subr.bf16.mxu0 %v6253_v16  ;;  %4245 = vmatprep.subr.bf16.mxu1 %v6256_v17  ;;  %v6337_v16 = vld [vmem:[%s7060_s15 + $0x4e4] ss:$16 sps:$4 sm:$0xff]   ;;  %v6340_v17 = vld [vmem:[%s7060_s15 + $0x4ec] ss:$16 sps:$4 sm:$0xff]  }
  0x9d   : > { %3822 = vmatpush1.bf16.msra.mxu0 %v6251_v18  ;;  %4246 = vmatpush1.bf16.msra.mxu1 %v6254_v19  ;;  %v6335_v18 = vld [vmem:[%s7060_s15 + $0x4e0] ss:$16 sps:$4 sm:$0xff]   ;;  %v6338_v19 = vld [vmem:[%s7060_s15 + $0x4e8] ss:$16 sps:$4 sm:$0xff]  }
  0x9e   : > { %3823 = vmatprep.subr.bf16.mxu0 %v6259_v20  ;;  %4247 = vmatprep.subr.bf16.mxu1 %v6262_v21  ;;  %v6343_v20 = vld [vmem:[%s7060_s15 + $0x504] ss:$16 sps:$4 sm:$0xff]   ;;  %v6346_v21 = vld [vmem:[%s7060_s15 + $0x50c] ss:$16 sps:$4 sm:$0xff]  }
  0xa1   : > { %3824 = vmatpush1.bf16.msra.mxu0 %v6257_v22  ;;  %4248 = vmatpush1.bf16.msra.mxu1 %v6260_v23  ;;  %v6341_v22 = vld [vmem:[%s7060_s15 + $0x500] ss:$16 sps:$4 sm:$0xff]   ;;  %v6344_v23 = vld [vmem:[%s7060_s15 + $0x508] ss:$16 sps:$4 sm:$0xff]  }
  0xa2   : > { %3825 = vmatprep.subr.bf16.mxu0 %v6265_v24  ;;  %4249 = vmatprep.subr.bf16.mxu1 %v6268_v25  ;;  %v6349_v24 = vld [vmem:[%s7060_s15 + $0x524] ss:$16 sps:$4 sm:$0xff]   ;;  %v6352_v25 = vld [vmem:[%s7060_s15 + $0x52c] ss:$16 sps:$4 sm:$0xff]  }
  0xa5   : > { %3826 = vmatpush1.bf16.msra.mxu0 %v6263_v26  ;;  %4250 = vmatpush1.bf16.msra.mxu1 %v6266_v27  ;;  %v6347_v26 = vld [vmem:[%s7060_s15 + $0x520] ss:$16 sps:$4 sm:$0xff]   ;;  %v6350_v27 = vld [vmem:[%s7060_s15 + $0x528] ss:$16 sps:$4 sm:$0xff]  }
  0xa6   : > { %3827 = vmatprep.subr.bf16.mxu0 %v6271_v28  ;;  %4251 = vmatprep.subr.bf16.mxu1 %v6274_v29  ;;  %v6355_v28 = vld [vmem:[%s7060_s15 + $0x544] ss:$16 sps:$4 sm:$0xff]   ;;  %v6358_v29 = vld [vmem:[%s7060_s15 + $0x54c] ss:$16 sps:$4 sm:$0xff]  }
  0xa9   : > { %3828 = vmatpush1.bf16.msra.mxu0 %v6269_v30  ;;  %4252 = vmatpush1.bf16.msra.mxu1 %v6272_v31  ;;  %v6353_v30 = vld [vmem:[%s7060_s15 + $0x540] ss:$16 sps:$4 sm:$0xff]   ;;  %v6356_v31 = vld [vmem:[%s7060_s15 + $0x548] ss:$16 sps:$4 sm:$0xff]  }
  0xaa   : > { %3829 = vmatprep.subr.bf16.mxu0 %v6277_v32  ;;  %4253 = vmatprep.subr.bf16.mxu1 %v6280_v33  ;;  %v6361_v32 = vld [vmem:[%s7060_s15 + $0x564] ss:$16 sps:$4 sm:$0xff]   ;;  %v6364_v33 = vld [vmem:[%s7060_s15 + $0x56c] ss:$16 sps:$4 sm:$0xff]  }
  0xad   : > { %3830 = vmatpush1.bf16.msra.mxu0 %v6275_v34  ;;  %4254 = vmatpush1.bf16.msra.mxu1 %v6278_v35  ;;  %v6359_v34 = vld [vmem:[%s7060_s15 + $0x560] ss:$16 sps:$4 sm:$0xff]   ;;  %v6362_v35 = vld [vmem:[%s7060_s15 + $0x568] ss:$16 sps:$4 sm:$0xff]  }
  0xae   : > { %3831 = vmatprep.subr.bf16.mxu0 %v6283_v36  ;;  %4255 = vmatprep.subr.bf16.mxu1 %v6286_v37  ;;  %v6367_v36 = vld [vmem:[%s7060_s15 + $0x584] ss:$16 sps:$4 sm:$0xff]   ;;  %v6370_v37 = vld [vmem:[%s7060_s15 + $0x58c] ss:$16 sps:$4 sm:$0xff]  }
  0xb1   : > { %3832 = vmatpush1.bf16.msra.mxu0 %v6281_v38  ;;  %4256 = vmatpush1.bf16.msra.mxu1 %v6284_v39  ;;  %v6365_v38 = vld [vmem:[%s7060_s15 + $0x580] ss:$16 sps:$4 sm:$0xff]   ;;  %v6368_v39 = vld [vmem:[%s7060_s15 + $0x588] ss:$16 sps:$4 sm:$0xff]  }
  0xb2   : > { %3833 = vmatprep.subr.bf16.mxu0 %v6289_v40  ;;  %4257 = vmatprep.subr.bf16.mxu1 %v6292_v41  ;;  %v6373_v40 = vld [vmem:[%s7060_s15 + $0x5a4] ss:$16 sps:$4 sm:$0xff]   ;;  %v6376_v41 = vld [vmem:[%s7060_s15 + $0x5ac] ss:$16 sps:$4 sm:$0xff]  }
  0xb5   : > { %3834 = vmatpush1.bf16.msra.mxu0 %v6287_v42  ;;  %4258 = vmatpush1.bf16.msra.mxu1 %v6290_v43  ;;  %v6371_v42 = vld [vmem:[%s7060_s15 + $0x5a0] ss:$16 sps:$4 sm:$0xff]   ;;  %v6374_v43 = vld [vmem:[%s7060_s15 + $0x5a8] ss:$16 sps:$4 sm:$0xff]  }
  0xb6   : > { %3856 = vmatprep.subr.bf16.mxu0 %v6295_v44  ;;  %4280 = vmatprep.subr.bf16.mxu1 %v6298_v45  ;;  %v6379_v44 = vld [vmem:[%s7060_s15 + $0x5c4] ss:$16 sps:$4 sm:$0xff]   ;;  %v6382_v45 = vld [vmem:[%s7060_s15 + $0x5cc] ss:$16 sps:$4 sm:$0xff]  }
  0xb8   : > { %3836 = vmatmul.mubr.bf16.vlgmr.msra.gmra.mrb[0].mxu0 %v5340_v48  ;;  %4260 = vmatmul.mubr.bf16.vlgmr.msra.gmra.mrb[0].mxu1 %v5340_v48  ;;  %v6385_v48 = vld [vmem:[%s7060_s15 + $0x5e4] ss:$16 sps:$4 sm:$0xff]  }
  0xb9   : > { %3857 = vmatpush1.bf16.msra.mxu0 %v6293_v46  ;;  %4281 = vmatpush1.bf16.msra.mxu1 %v6296_v47  ;;  %v6377_v46 = vld [vmem:[%s7060_s15 + $0x5c0] ss:$16 sps:$4 sm:$0xff]   ;;  %v6380_v47 = vld [vmem:[%s7060_s15 + $0x5c8] ss:$16 sps:$4 sm:$0xff]  }
  0xba   : > { %3858 = vmatprep.subr.bf16.mxu0 %v6301_v51  ;;  %4282 = vmatprep.subr.bf16.mxu1 %v6304_v52  ;;  %v6386_v51 = vld [vmem:[%s7060_s15 + $0x5e8] ss:$16 sps:$4 sm:$0xff]   ;;  %v6391_v52 = vld [vmem:[%s7060_s15 + $0x604] ss:$16 sps:$4 sm:$0xff]  }
  0xbb   : > { %3845 = vmatprep.mubr.bf16.mxu0 %v5357_v53  ;;  %4269 = vmatprep.mubr.bf16.mxu1 %v5357_v53  ;;  %v6394_v53 = vld [vmem:[%s7060_s15 + $0x60c] ss:$16 sps:$4 sm:$0xff]  }
  0xbd   : > { %3859 = vmatpush1.bf16.msra.mxu0 %v6299_v54  ;;  %4283 = vmatpush1.bf16.msra.mxu1 %v6302_v55  ;;  %v504_v54 = vld [vmem:[%s7062_s16 + $0x90] sm:$0xff]  ;;  %v5342_v55 = vcombine.low %v7220_v58, %v7223_v60  ;;  %v6398_v60 = vld [vmem:[%s7060_s15 + $0x628] ss:$16 sps:$4 sm:$0xff]  }
  0xbe   : > { %3860 = vmatprep.subr.bf16.mxu0 %v6307_v56  ;;  %4284 = vmatprep.subr.bf16.mxu1 %v6310_v57  ;;  %v512_v56 = vld [vmem:[%s7062_s16 + $0xd0] sm:$0xff] }
  0xbf   : > { %v6389_v57 = vld [vmem:[%s7060_s15 + $0x600] ss:$16 sps:$4 sm:$0xff]  }
  0xc0   : > { %3846 = vmatmul.mubr.bf16.gmra.mrb[4].mxu0 %v5356_v59  ;;  %4270 = vmatmul.mubr.bf16.gmra.mrb[4].mxu1 %v5356_v59  ;;  %v6392_v59 = vld [vmem:[%s7060_s15 + $0x608] ss:$16 sps:$4 sm:$0xff]   ;;  %v6395_v58 = vld [vmem:[%s7060_s15 + $0x620] ss:$16 sps:$4 sm:$0xff]  }
  0xc1   : > { %3861 = vmatpush1.bf16.msra.mxu0 %v6305_v61  ;;  %4285 = vmatpush1.bf16.msra.mxu1 %v6308_v62  ;;  %v6397_v61 = vld [vmem:[%s7060_s15 + $0x624] ss:$16 sps:$4 sm:$0xff]   ;;  %v6400_v62 = vld [vmem:[%s7060_s15 + $0x62c] ss:$16 sps:$4 sm:$0xff]  }
  0xc2   : > { %3862 = vmatprep.subr.bf16.mxu0 %v6313_v63  ;;  %4286 = vmatprep.subr.bf16.mxu1 %v6316_v0  ;;  %v5359_v63 = vcombine.high %v504_v54, %v512_v56  ;;  %v6403_v0 = vld [vmem:[%s7060_s15 + $0x644] ss:$16 sps:$4 sm:$0xff]  }
  0xc3   : > { %3888 = vmatprep.mubr.bf16.mxu0 %v5343_v1  ;;  %4312 = vmatprep.mubr.bf16.mxu1 %v5343_v1  ;;  %v6406_v1 = vld [vmem:[%s7060_s15 + $0x64c] ss:$16 sps:$4 sm:$0xff]  }
  0xc5   : > { %3863 = vmatpush1.bf16.msra.mxu0 %v6311_v2  ;;  %4287 = vmatpush1.bf16.msra.mxu1 %v6314_v3  ;;  %v7296_v2 = vld [vmem:[%s7062_s16 + $0x18] sm:$0xff]  ;;  %v5358_v3 = vcombine.low %v504_v54, %v512_v56  ;;  %v6473_v54 = vld [vmem:[%s7060_s15 + $0x7c0] ss:$16 sps:$4 sm:$0xff]   ;;  %v6481_v56 = vld [vmem:[%s7060_s15 + $0x7e4] ss:$16 sps:$4 sm:$0xff]  }
  0xc6   : > { %3864 = vmatprep.subr.bf16.mxu0 %v6319_v4  ;;  %4288 = vmatprep.subr.bf16.mxu1 %v6322_v5  ;;  %v7299_v4 = vld [vmem:[%s7062_s16 + $0x58] sm:$0xff]  ;;  %v6401_v5 = vld [vmem:[%s7060_s15 + $0x640] ss:$16 sps:$4 sm:$0xff]  }
  0xc9   : > { %3865 = vmatpush1.bf16.msra.mxu0 %v6317_v6  ;;  %4289 = vmatpush1.bf16.msra.mxu1 %v6320_v7  ;;  %v6404_v6 = vld [vmem:[%s7060_s15 + $0x648] ss:$16 sps:$4 sm:$0xff]   ;;  %v6409_v7 = vld [vmem:[%s7060_s15 + $0x664] ss:$16 sps:$4 sm:$0xff]  }
  0xca   : > { %3866 = vmatprep.subr.bf16.mxu0 %v6325_v8  ;;  %4290 = vmatprep.subr.bf16.mxu1 %v6328_v9  ;;  %v6412_v8 = vld [vmem:[%s7060_s15 + $0x66c] ss:$16 sps:$4 sm:$0xff]   ;;  %v5345_v9 = vcombine.high %v7296_v2, %v7299_v4 }
  0xcd   : > { %3867 = vmatpush1.bf16.msra.mxu0 %v6323_v10  ;;  %4291 = vmatpush1.bf16.msra.mxu1 %v6326_v11  ;;  %v6407_v10 = vld [vmem:[%s7060_s15 + $0x660] ss:$16 sps:$4 sm:$0xff]   ;;  %v6410_v11 = vld [vmem:[%s7060_s15 + $0x668] ss:$16 sps:$4 sm:$0xff]  }
  0xce   : > { %3868 = vmatprep.subr.bf16.mxu0 %v6331_v12  ;;  %4292 = vmatprep.subr.bf16.mxu1 %v6334_v13  ;;  %v6415_v12 = vld [vmem:[%s7060_s15 + $0x684] ss:$16 sps:$4 sm:$0xff]   ;;  %v6418_v13 = vld [vmem:[%s7060_s15 + $0x68c] ss:$16 sps:$4 sm:$0xff]  }
  0xd1   : > { %3869 = vmatpush1.bf16.msra.mxu0 %v6329_v14  ;;  %4293 = vmatpush1.bf16.msra.mxu1 %v6332_v15  ;;  %v6413_v14 = vld [vmem:[%s7060_s15 + $0x680] ss:$16 sps:$4 sm:$0xff]   ;;  %v6416_v15 = vld [vmem:[%s7060_s15 + $0x688] ss:$16 sps:$4 sm:$0xff]  }
  0xd2   : > { %3870 = vmatprep.subr.bf16.mxu0 %v6337_v16  ;;  %4294 = vmatprep.subr.bf16.mxu1 %v6340_v17  ;;  %v6421_v16 = vld [vmem:[%s7060_s15 + $0x6a4] ss:$16 sps:$4 sm:$0xff]   ;;  %v6424_v17 = vld [vmem:[%s7060_s15 + $0x6ac] ss:$16 sps:$4 sm:$0xff]  }
  0xd5   : > { %3871 = vmatpush1.bf16.msra.mxu0 %v6335_v18  ;;  %4295 = vmatpush1.bf16.msra.mxu1 %v6338_v19  ;;  %v6419_v18 = vld [vmem:[%s7060_s15 + $0x6a0] ss:$16 sps:$4 sm:$0xff]   ;;  %v6422_v19 = vld [vmem:[%s7060_s15 + $0x6a8] ss:$16 sps:$4 sm:$0xff]  }
  0xd6   : > { %3872 = vmatprep.subr.bf16.mxu0 %v6343_v20  ;;  %4296 = vmatprep.subr.bf16.mxu1 %v6346_v21  ;;  %v6427_v20 = vld [vmem:[%s7060_s15 + $0x6c4] ss:$16 sps:$4 sm:$0xff]   ;;  %v6430_v21 = vld [vmem:[%s7060_s15 + $0x6cc] ss:$16 sps:$4 sm:$0xff]  }
  0xd9   : > { %3873 = vmatpush1.bf16.msra.mxu0 %v6341_v22  ;;  %4297 = vmatpush1.bf16.msra.mxu1 %v6344_v23  ;;  %v6425_v22 = vld [vmem:[%s7060_s15 + $0x6c0] ss:$16 sps:$4 sm:$0xff]   ;;  %v6428_v23 = vld [vmem:[%s7060_s15 + $0x6c8] ss:$16 sps:$4 sm:$0xff]  }
  0xda   : > { %3874 = vmatprep.subr.bf16.mxu0 %v6349_v24  ;;  %4298 = vmatprep.subr.bf16.mxu1 %v6352_v25  ;;  %v6433_v24 = vld [vmem:[%s7060_s15 + $0x6e4] ss:$16 sps:$4 sm:$0xff]   ;;  %v6436_v25 = vld [vmem:[%s7060_s15 + $0x6ec] ss:$16 sps:$4 sm:$0xff]  }
  0xdd   : > { %3875 = vmatpush1.bf16.msra.mxu0 %v6347_v26  ;;  %4299 = vmatpush1.bf16.msra.mxu1 %v6350_v27  ;;  %v6431_v26 = vld [vmem:[%s7060_s15 + $0x6e0] ss:$16 sps:$4 sm:$0xff]   ;;  %v6434_v27 = vld [vmem:[%s7060_s15 + $0x6e8] ss:$16 sps:$4 sm:$0xff]  }
  0xde   : > { %3876 = vmatprep.subr.bf16.mxu0 %v6355_v28  ;;  %4300 = vmatprep.subr.bf16.mxu1 %v6358_v29  ;;  %v6439_v28 = vld [vmem:[%s7060_s15 + $0x704] ss:$16 sps:$4 sm:$0xff]   ;;  %v6442_v29 = vld [vmem:[%s7060_s15 + $0x70c] ss:$16 sps:$4 sm:$0xff]  }
  0xe1   : > { %3877 = vmatpush1.bf16.msra.mxu0 %v6353_v30  ;;  %4301 = vmatpush1.bf16.msra.mxu1 %v6356_v31  ;;  %v6437_v30 = vld [vmem:[%s7060_s15 + $0x700] ss:$16 sps:$4 sm:$0xff]   ;;  %v6440_v31 = vld [vmem:[%s7060_s15 + $0x708] ss:$16 sps:$4 sm:$0xff]  }
  0xe2   : > { %3878 = vmatprep.subr.bf16.mxu0 %v6361_v32  ;;  %4302 = vmatprep.subr.bf16.mxu1 %v6364_v33  ;;  %v6445_v32 = vld [vmem:[%s7060_s15 + $0x724] ss:$16 sps:$4 sm:$0xff]   ;;  %v6448_v33 = vld [vmem:[%s7060_s15 + $0x72c] ss:$16 sps:$4 sm:$0xff]  }
  0xe5   : > { %3879 = vmatpush1.bf16.msra.mxu0 %v6359_v34  ;;  %4303 = vmatpush1.bf16.msra.mxu1 %v6362_v35  ;;  %v6443_v34 = vld [vmem:[%s7060_s15 + $0x720] ss:$16 sps:$4 sm:$0xff]   ;;  %v6446_v35 = vld [vmem:[%s7060_s15 + $0x728] ss:$16 sps:$4 sm:$0xff]  }
  0xe6   : > { %3880 = vmatprep.subr.bf16.mxu0 %v6367_v36  ;;  %4304 = vmatprep.subr.bf16.mxu1 %v6370_v37  ;;  %v6451_v36 = vld [vmem:[%s7060_s15 + $0x744] ss:$16 sps:$4 sm:$0xff]   ;;  %v6454_v37 = vld [vmem:[%s7060_s15 + $0x74c] ss:$16 sps:$4 sm:$0xff]  }
  0xe9   : > { %3881 = vmatpush1.bf16.msra.mxu0 %v6365_v38  ;;  %4305 = vmatpush1.bf16.msra.mxu1 %v6368_v39  ;;  %v6449_v38 = vld [vmem:[%s7060_s15 + $0x740] ss:$16 sps:$4 sm:$0xff]   ;;  %v6452_v39 = vld [vmem:[%s7060_s15 + $0x748] ss:$16 sps:$4 sm:$0xff]  }
  0xea   : > { %3882 = vmatprep.subr.bf16.mxu0 %v6373_v40  ;;  %4306 = vmatprep.subr.bf16.mxu1 %v6376_v41  ;;  %v6457_v40 = vld [vmem:[%s7060_s15 + $0x764] ss:$16 sps:$4 sm:$0xff]   ;;  %v6460_v41 = vld [vmem:[%s7060_s15 + $0x76c] ss:$16 sps:$4 sm:$0xff]  }
  0xed   : > { %3883 = vmatpush1.bf16.msra.mxu0 %v6371_v42  ;;  %4307 = vmatpush1.bf16.msra.mxu1 %v6374_v43  ;;  %v6455_v42 = vld [vmem:[%s7060_s15 + $0x760] ss:$16 sps:$4 sm:$0xff]   ;;  %v6458_v43 = vld [vmem:[%s7060_s15 + $0x768] ss:$16 sps:$4 sm:$0xff]  }
  0xee   : > { %3884 = vmatprep.subr.bf16.mxu0 %v6379_v44  ;;  %4308 = vmatprep.subr.bf16.mxu1 %v6382_v45  ;;  %v6463_v44 = vld [vmem:[%s7060_s15 + $0x784] ss:$16 sps:$4 sm:$0xff]   ;;  %v6466_v45 = vld [vmem:[%s7060_s15 + $0x78c] ss:$16 sps:$4 sm:$0xff]  }
  0xf1   : > { %3885 = vmatpush1.bf16.msra.mxu0 %v6377_v46  ;;  %4309 = vmatpush1.bf16.msra.mxu1 %v6380_v47  ;;  %v6461_v46 = vld [vmem:[%s7060_s15 + $0x780] ss:$16 sps:$4 sm:$0xff]   ;;  %v6464_v47 = vld [vmem:[%s7060_s15 + $0x788] ss:$16 sps:$4 sm:$0xff]  }
  0xf2   : > { %3886 = vmatprep.subr.bf16.mxu0 %v6385_v48  ;;  %4310 = vmatprep.subr.bf16.mxu1 %v6388_v49  ;;  %v6469_v48 = vld [vmem:[%s7060_s15 + $0x7a4] ss:$16 sps:$4 sm:$0xff]   ;;  %v6472_v49 = vld [vmem:[%s7060_s15 + $0x7ac] ss:$16 sps:$4 sm:$0xff]  }
  0xf5   : > { %3887 = vmatpush1.bf16.msra.mxu0 %v6383_v50  ;;  %4311 = vmatpush1.bf16.msra.mxu1 %v6386_v51  ;;  %v6467_v50 = vld [vmem:[%s7060_s15 + $0x7a0] ss:$16 sps:$4 sm:$0xff]   ;;  %v6470_v51 = vld [vmem:[%s7060_s15 + $0x7a8] ss:$16 sps:$4 sm:$0xff]  }
  0xf6   : > { %3909 = vmatprep.subr.bf16.mxu0 %v6391_v52  ;;  %4333 = vmatprep.subr.bf16.mxu1 %v6394_v53  ;;  %v6475_v52 = vld [vmem:[%s7060_s15 + $0x7c4] ss:$16 sps:$4 sm:$0xff]   ;;  %v6478_v53 = vld [vmem:[%s7060_s15 + $0x7cc] ss:$16 sps:$4 sm:$0xff]  }
  0xf8   : > { %3889 = vmatmul.mubr.bf16.vlgmr.msra.gmra.mrb[0].mxu0 %v5342_v55  ;;  %4313 = vmatmul.mubr.bf16.vlgmr.msra.gmra.mrb[0].mxu1 %v5342_v55  ;;  %v6476_v55 = vld [vmem:[%s7060_s15 + $0x7c8] ss:$16 sps:$4 sm:$0xff]  }
  0xf9   : > { %3910 = vmatpush1.bf16.msra.mxu0 %v6389_v57  ;;  %4334 = vmatpush1.bf16.msra.mxu1 %v6392_v59  ;;  %v6484_v57 = vld [vmem:[%s7060_s15 + $0x7ec] ss:$16 sps:$4 sm:$0xff]   ;;  %v6479_v59 = vld [vmem:[%s7060_s15 + $0x7e0] ss:$16 sps:$4 sm:$0xff]  }
  0xfa   : > { %3911 = vmatprep.subr.bf16.mxu0 %v6397_v61  ;;  %4335 = vmatprep.subr.bf16.mxu1 %v6400_v62  ;;  %v6482_v61 = vld [vmem:[%s7060_s15 + $0x7e8] ss:$16 sps:$4 sm:$0xff]   ;;  %v6487_v62 = vld [vmem:[%s7060_s15 + $0x804] ss:$16 sps:$4 sm:$0xff]  }
  0xfb   : > { %3898 = vmatprep.mubr.bf16.mxu0 %v5359_v63  ;;  %4322 = vmatprep.mubr.bf16.mxu1 %v5359_v63  ;;  %v6490_v63 = vld [vmem:[%s7060_s15 + $0x80c] ss:$16 sps:$4 sm:$0xff]  }
  0xfd   : > { %3912 = vmatpush1.bf16.msra.mxu0 %v6395_v58  ;;  %4336 = vmatpush1.bf16.msra.mxu1 %v6398_v60  ;;  %v505_v58 = vld [vmem:[%s7062_s16 + $0x98] sm:$0xff]  ;;  %v5344_v60 = vcombine.low %v7296_v2, %v7299_v4  ;;  %v6499_v4 = vld [vmem:[%s7060_s15 + $0x844] ss:$16 sps:$4 sm:$0xff]  }
  0xfe   : > { %3913 = vmatprep.subr.bf16.mxu0 %v6403_v0  ;;  %4337 = vmatprep.subr.bf16.mxu1 %v6406_v1  ;;  %v513_v0 = vld [vmem:[%s7062_s16 + $0xd8] sm:$0xff]  ;;  %v6485_v1 = vld [vmem:[%s7060_s15 + $0x800] ss:$16 sps:$4 sm:$0xff]  }
  0xff   : > { %v6494_v2 = vld [vmem:[%s7060_s15 + $0x828] ss:$16 sps:$4 sm:$0xff]  }
 0x100   : > { %3899 = vmatmul.mubr.bf16.gmra.mrb[4].mxu0 %v5358_v3  ;;  %4323 = vmatmul.mubr.bf16.gmra.mrb[4].mxu1 %v5358_v3  ;;  %v6488_v3 = vld [vmem:[%s7060_s15 + $0x808] ss:$16 sps:$4 sm:$0xff]  }
 0x101   : > { %3914 = vmatpush1.bf16.msra.mxu0 %v6401_v5  ;;  %4338 = vmatpush1.bf16.msra.mxu1 %v6404_v6  ;;  %v6493_v5 = vld [vmem:[%s7060_s15 + $0x824] ss:$16 sps:$4 sm:$0xff]   ;;  %v6496_v6 = vld [vmem:[%s7060_s15 + $0x82c] ss:$16 sps:$4 sm:$0xff]  }
 0x102   : > { %3915 = vmatprep.subr.bf16.mxu0 %v6409_v7  ;;  %4339 = vmatprep.subr.bf16.mxu1 %v6412_v8  ;;  %v5361_v7 = vcombine.high %v505_v58, %v513_v0  ;;  %v6491_v8 = vld [vmem:[%s7060_s15 + $0x820] ss:$16 sps:$4 sm:$0xff]  }
 0x103   : > { %3941 = vmatprep.mubr.bf16.mxu0 %v5345_v9  ;;  %4365 = vmatprep.mubr.bf16.mxu1 %v5345_v9  ;;  %v6502_v9 = vld [vmem:[%s7060_s15 + $0x84c] ss:$16 sps:$4 sm:$0xff]  }
 0x105   : > { %3916 = vmatpush1.bf16.msra.mxu0 %v6407_v10  ;;  %4340 = vmatpush1.bf16.msra.mxu1 %v6410_v11  ;;  %v7372_v10 = vld [vmem:[%s7062_s16 + $0x20] sm:$0xff]  ;;  %v5360_v11 = vcombine.low %v505_v58, %v513_v0 }
 0x106   : > { %3917 = vmatprep.subr.bf16.mxu0 %v6415_v12  ;;  %4341 = vmatprep.subr.bf16.mxu1 %v6418_v13  ;;  %v7375_v12 = vld [vmem:[%s7062_s16 + $0x60] sm:$0xff] }
 0x107   : > { %v6497_v13 = vld [vmem:[%s7060_s15 + $0x840] ss:$16 sps:$4 sm:$0xff]   ;;  %v6577_v0 = vld [vmem:[%s7060_s15 + $0x9e4] ss:$16 sps:$4 sm:$0xff]  }
 0x108   : > { %v6569_v58 = vld [vmem:[%s7060_s15 + $0x9c0] ss:$16 sps:$4 sm:$0xff]  }
 0x109   : > { %3918 = vmatpush1.bf16.msra.mxu0 %v6413_v14  ;;  %4342 = vmatpush1.bf16.msra.mxu1 %v6416_v15  ;;  %v6500_v14 = vld [vmem:[%s7060_s15 + $0x848] ss:$16 sps:$4 sm:$0xff]   ;;  %v6505_v15 = vld [vmem:[%s7060_s15 + $0x864] ss:$16 sps:$4 sm:$0xff]  }
 0x10a   : > { %3919 = vmatprep.subr.bf16.mxu0 %v6421_v16  ;;  %4343 = vmatprep.subr.bf16.mxu1 %v6424_v17  ;;  %v6508_v16 = vld [vmem:[%s7060_s15 + $0x86c] ss:$16 sps:$4 sm:$0xff]   ;;  %v5347_v17 = vcombine.high %v7372_v10, %v7375_v12 }
 0x10d   : > { %3920 = vmatpush1.bf16.msra.mxu0 %v6419_v18  ;;  %4344 = vmatpush1.bf16.msra.mxu1 %v6422_v19  ;;  %v6503_v18 = vld [vmem:[%s7060_s15 + $0x860] ss:$16 sps:$4 sm:$0xff]   ;;  %v6506_v19 = vld [vmem:[%s7060_s15 + $0x868] ss:$16 sps:$4 sm:$0xff]  }
 0x10e   : > { %3921 = vmatprep.subr.bf16.mxu0 %v6427_v20  ;;  %4345 = vmatprep.subr.bf16.mxu1 %v6430_v21  ;;  %v6511_v20 = vld [vmem:[%s7060_s15 + $0x884] ss:$16 sps:$4 sm:$0xff]   ;;  %v6514_v21 = vld [vmem:[%s7060_s15 + $0x88c] ss:$16 sps:$4 sm:$0xff]  }
 0x111   : > { %3922 = vmatpush1.bf16.msra.mxu0 %v6425_v22  ;;  %4346 = vmatpush1.bf16.msra.mxu1 %v6428_v23  ;;  %v6509_v22 = vld [vmem:[%s7060_s15 + $0x880] ss:$16 sps:$4 sm:$0xff]   ;;  %v6512_v23 = vld [vmem:[%s7060_s15 + $0x888] ss:$16 sps:$4 sm:$0xff]  }
 0x112   : > { %3923 = vmatprep.subr.bf16.mxu0 %v6433_v24  ;;  %4347 = vmatprep.subr.bf16.mxu1 %v6436_v25  ;;  %v6517_v24 = vld [vmem:[%s7060_s15 + $0x8a4] ss:$16 sps:$4 sm:$0xff]   ;;  %v6520_v25 = vld [vmem:[%s7060_s15 + $0x8ac] ss:$16 sps:$4 sm:$0xff]  }
 0x115   : > { %3924 = vmatpush1.bf16.msra.mxu0 %v6431_v26  ;;  %4348 = vmatpush1.bf16.msra.mxu1 %v6434_v27  ;;  %v6515_v26 = vld [vmem:[%s7060_s15 + $0x8a0] ss:$16 sps:$4 sm:$0xff]   ;;  %v6518_v27 = vld [vmem:[%s7060_s15 + $0x8a8] ss:$16 sps:$4 sm:$0xff]  }
 0x116   : > { %3925 = vmatprep.subr.bf16.mxu0 %v6439_v28  ;;  %4349 = vmatprep.subr.bf16.mxu1 %v6442_v29  ;;  %v6523_v28 = vld [vmem:[%s7060_s15 + $0x8c4] ss:$16 sps:$4 sm:$0xff]   ;;  %v6526_v29 = vld [vmem:[%s7060_s15 + $0x8cc] ss:$16 sps:$4 sm:$0xff]  }
 0x119   : > { %3926 = vmatpush1.bf16.msra.mxu0 %v6437_v30  ;;  %4350 = vmatpush1.bf16.msra.mxu1 %v6440_v31  ;;  %v6521_v30 = vld [vmem:[%s7060_s15 + $0x8c0] ss:$16 sps:$4 sm:$0xff]   ;;  %v6524_v31 = vld [vmem:[%s7060_s15 + $0x8c8] ss:$16 sps:$4 sm:$0xff]  }
 0x11a   : > { %3927 = vmatprep.subr.bf16.mxu0 %v6445_v32  ;;  %4351 = vmatprep.subr.bf16.mxu1 %v6448_v33  ;;  %v6529_v32 = vld [vmem:[%s7060_s15 + $0x8e4] ss:$16 sps:$4 sm:$0xff]   ;;  %v6532_v33 = vld [vmem:[%s7060_s15 + $0x8ec] ss:$16 sps:$4 sm:$0xff]  }
 0x11d   : > { %3928 = vmatpush1.bf16.msra.mxu0 %v6443_v34  ;;  %4352 = vmatpush1.bf16.msra.mxu1 %v6446_v35  ;;  %v6527_v34 = vld [vmem:[%s7060_s15 + $0x8e0] ss:$16 sps:$4 sm:$0xff]   ;;  %v6530_v35 = vld [vmem:[%s7060_s15 + $0x8e8] ss:$16 sps:$4 sm:$0xff]  }
 0x11e   : > { %3929 = vmatprep.subr.bf16.mxu0 %v6451_v36  ;;  %4353 = vmatprep.subr.bf16.mxu1 %v6454_v37  ;;  %v6535_v36 = vld [vmem:[%s7060_s15 + $0x904] ss:$16 sps:$4 sm:$0xff]   ;;  %v6538_v37 = vld [vmem:[%s7060_s15 + $0x90c] ss:$16 sps:$4 sm:$0xff]  }
 0x121   : > { %3930 = vmatpush1.bf16.msra.mxu0 %v6449_v38  ;;  %4354 = vmatpush1.bf16.msra.mxu1 %v6452_v39  ;;  %v6533_v38 = vld [vmem:[%s7060_s15 + $0x900] ss:$16 sps:$4 sm:$0xff]   ;;  %v6536_v39 = vld [vmem:[%s7060_s15 + $0x908] ss:$16 sps:$4 sm:$0xff]  }
 0x122   : > { %3931 = vmatprep.subr.bf16.mxu0 %v6457_v40  ;;  %4355 = vmatprep.subr.bf16.mxu1 %v6460_v41  ;;  %v6541_v40 = vld [vmem:[%s7060_s15 + $0x924] ss:$16 sps:$4 sm:$0xff]   ;;  %v6544_v41 = vld [vmem:[%s7060_s15 + $0x92c] ss:$16 sps:$4 sm:$0xff]  }
 0x125   : > { %3932 = vmatpush1.bf16.msra.mxu0 %v6455_v42  ;;  %4356 = vmatpush1.bf16.msra.mxu1 %v6458_v43  ;;  %v6539_v42 = vld [vmem:[%s7060_s15 + $0x920] ss:$16 sps:$4 sm:$0xff]   ;;  %v6542_v43 = vld [vmem:[%s7060_s15 + $0x928] ss:$16 sps:$4 sm:$0xff]  }
 0x126   : > { %3933 = vmatprep.subr.bf16.mxu0 %v6463_v44  ;;  %4357 = vmatprep.subr.bf16.mxu1 %v6466_v45  ;;  %v6547_v44 = vld [vmem:[%s7060_s15 + $0x944] ss:$16 sps:$4 sm:$0xff]   ;;  %v6550_v45 = vld [vmem:[%s7060_s15 + $0x94c] ss:$16 sps:$4 sm:$0xff]  }
 0x129   : > { %3934 = vmatpush1.bf16.msra.mxu0 %v6461_v46  ;;  %4358 = vmatpush1.bf16.msra.mxu1 %v6464_v47  ;;  %v6545_v46 = vld [vmem:[%s7060_s15 + $0x940] ss:$16 sps:$4 sm:$0xff]   ;;  %v6548_v47 = vld [vmem:[%s7060_s15 + $0x948] ss:$16 sps:$4 sm:$0xff]  }
 0x12a   : > { %3935 = vmatprep.subr.bf16.mxu0 %v6469_v48  ;;  %4359 = vmatprep.subr.bf16.mxu1 %v6472_v49  ;;  %v6553_v48 = vld [vmem:[%s7060_s15 + $0x964] ss:$16 sps:$4 sm:$0xff]   ;;  %v6556_v49 = vld [vmem:[%s7060_s15 + $0x96c] ss:$16 sps:$4 sm:$0xff]  }
 0x12d   : > { %3936 = vmatpush1.bf16.msra.mxu0 %v6467_v50  ;;  %4360 = vmatpush1.bf16.msra.mxu1 %v6470_v51  ;;  %v6551_v50 = vld [vmem:[%s7060_s15 + $0x960] ss:$16 sps:$4 sm:$0xff]   ;;  %v6554_v51 = vld [vmem:[%s7060_s15 + $0x968] ss:$16 sps:$4 sm:$0xff]  }
 0x12e   : > { %3937 = vmatprep.subr.bf16.mxu0 %v6475_v52  ;;  %4361 = vmatprep.subr.bf16.mxu1 %v6478_v53  ;;  %v6559_v52 = vld [vmem:[%s7060_s15 + $0x984] ss:$16 sps:$4 sm:$0xff]   ;;  %v6562_v53 = vld [vmem:[%s7060_s15 + $0x98c] ss:$16 sps:$4 sm:$0xff]  }
 0x131   : > { %3938 = vmatpush1.bf16.msra.mxu0 %v6473_v54  ;;  %4362 = vmatpush1.bf16.msra.mxu1 %v6476_v55  ;;  %v6557_v54 = vld [vmem:[%s7060_s15 + $0x980] ss:$16 sps:$4 sm:$0xff]   ;;  %v6560_v55 = vld [vmem:[%s7060_s15 + $0x988] ss:$16 sps:$4 sm:$0xff]  }
 0x132   : > { %3939 = vmatprep.subr.bf16.mxu0 %v6481_v56  ;;  %4363 = vmatprep.subr.bf16.mxu1 %v6484_v57  ;;  %v6565_v56 = vld [vmem:[%s7060_s15 + $0x9a4] ss:$16 sps:$4 sm:$0xff]   ;;  %v6568_v57 = vld [vmem:[%s7060_s15 + $0x9ac] ss:$16 sps:$4 sm:$0xff]  }
 0x135   : > { %3940 = vmatpush1.bf16.msra.mxu0 %v6479_v59  ;;  %4364 = vmatpush1.bf16.msra.mxu1 %v6482_v61  ;;  %v6563_v59 = vld [vmem:[%s7060_s15 + $0x9a0] ss:$16 sps:$4 sm:$0xff]   ;;  %v6566_v61 = vld [vmem:[%s7060_s15 + $0x9a8] ss:$16 sps:$4 sm:$0xff]  }
 0x136   : > { %3962 = vmatprep.subr.bf16.mxu0 %v6487_v62  ;;  %4386 = vmatprep.subr.bf16.mxu1 %v6490_v63  ;;  %v6571_v62 = vld [vmem:[%s7060_s15 + $0x9c4] ss:$16 sps:$4 sm:$0xff]   ;;  %v6574_v63 = vld [vmem:[%s7060_s15 + $0x9cc] ss:$16 sps:$4 sm:$0xff]  }
 0x138   : > { %3942 = vmatmul.mubr.bf16.vlgmr.msra.gmra.mrb[0].mxu0 %v5344_v60  ;;  %4366 = vmatmul.mubr.bf16.vlgmr.msra.gmra.mrb[0].mxu1 %v5344_v60  ;;  %v6572_v60 = vld [vmem:[%s7060_s15 + $0x9c8] ss:$16 sps:$4 sm:$0xff]  }
 0x139   : > { %3963 = vmatpush1.bf16.msra.mxu0 %v6485_v1  ;;  %4387 = vmatpush1.bf16.msra.mxu1 %v6488_v3  ;;  %v6580_v1 = vld [vmem:[%s7060_s15 + $0x9ec] ss:$16 sps:$4 sm:$0xff]   ;;  %v6575_v3 = vld [vmem:[%s7060_s15 + $0x9e0] ss:$16 sps:$4 sm:$0xff]  }
 0x13a   : > { %3964 = vmatprep.subr.bf16.mxu0 %v6493_v5  ;;  %4388 = vmatprep.subr.bf16.mxu1 %v6496_v6  ;;  %v6578_v5 = vld [vmem:[%s7060_s15 + $0x9e8] ss:$16 sps:$4 sm:$0xff]   ;;  %v6583_v6 = vld [vmem:[%s7060_s15 + $0xa04] ss:$16 sps:$4 sm:$0xff]  }
 0x13b   : > { %3951 = vmatprep.mubr.bf16.mxu0 %v5361_v7  ;;  %4375 = vmatprep.mubr.bf16.mxu1 %v5361_v7  ;;  %v6586_v7 = vld [vmem:[%s7060_s15 + $0xa0c] ss:$16 sps:$4 sm:$0xff]  }
 0x13d   : > { %3965 = vmatpush1.bf16.msra.mxu0 %v6491_v8  ;;  %4389 = vmatpush1.bf16.msra.mxu1 %v6494_v2  ;;  %v506_v8 = vld [vmem:[%s7062_s16 + $0xa0] sm:$0xff] }
 0x13e   : > { %3966 = vmatprep.subr.bf16.mxu0 %v6499_v4  ;;  %4390 = vmatprep.subr.bf16.mxu1 %v6502_v9  ;;  %v514_v2 = vld [vmem:[%s7062_s16 + $0xe0] sm:$0xff]  ;;  %v5346_v4 = vcombine.low %v7372_v10, %v7375_v12  ;;  %v6598_v12 = vld [vmem:[%s7060_s15 + $0xa4c] ss:$16 sps:$4 sm:$0xff]  }
 0x13f   : > { %v6581_v9 = vld [vmem:[%s7060_s15 + $0xa00] ss:$16 sps:$4 sm:$0xff]   ;;  %v6595_v10 = vld [vmem:[%s7060_s15 + $0xa44] ss:$16 sps:$4 sm:$0xff]  }
 0x140   : > { %3952 = vmatmul.mubr.bf16.gmra.mrb[4].mxu0 %v5360_v11  ;;  %4376 = vmatmul.mubr.bf16.gmra.mrb[4].mxu1 %v5360_v11  ;;  %v6584_v11 = vld [vmem:[%s7060_s15 + $0xa08] ss:$16 sps:$4 sm:$0xff]  }
 0x141   : > { %3967 = vmatpush1.bf16.msra.mxu0 %v6497_v13  ;;  %4391 = vmatpush1.bf16.msra.mxu1 %v6500_v14  ;;  %v6589_v13 = vld [vmem:[%s7060_s15 + $0xa24] ss:$16 sps:$4 sm:$0xff]   ;;  %v6592_v14 = vld [vmem:[%s7060_s15 + $0xa2c] ss:$16 sps:$4 sm:$0xff]  }
 0x142   : > { %3968 = vmatprep.subr.bf16.mxu0 %v6505_v15  ;;  %4392 = vmatprep.subr.bf16.mxu1 %v6508_v16  ;;  %v6587_v15 = vld [vmem:[%s7060_s15 + $0xa20] ss:$16 sps:$4 sm:$0xff]   ;;  %v6590_v16 = vld [vmem:[%s7060_s15 + $0xa28] ss:$16 sps:$4 sm:$0xff]  }
 0x143   : > { %3994 = vmatprep.mubr.bf16.mxu0 %v5347_v17  ;;  %4418 = vmatprep.mubr.bf16.mxu1 %v5347_v17  ;;  %v5363_v17 = vcombine.high %v506_v8, %v514_v2 }
 0x145   : > { %3969 = vmatpush1.bf16.msra.mxu0 %v6503_v18  ;;  %4393 = vmatpush1.bf16.msra.mxu1 %v6506_v19  ;;  %v7448_v18 = vld [vmem:[%s7062_s16 + $0x28] sm:$0xff] }
 0x146   : > { %3970 = vmatprep.subr.bf16.mxu0 %v6511_v20  ;;  %4394 = vmatprep.subr.bf16.mxu1 %v6514_v21  ;;  %v7451_v19 = vld [vmem:[%s7062_s16 + $0x68] sm:$0xff]  ;;  %v5362_v20 = vcombine.low %v506_v8, %v514_v2  ;;  %v6593_v21 = vld [vmem:[%s7060_s15 + $0xa40] ss:$16 sps:$4 sm:$0xff]  }
 0x147   : > { %v6665_v8 = vld [vmem:[%s7060_s15 + $0xbc0] ss:$16 sps:$4 sm:$0xff]   ;;  %v6668_v2 = vld [vmem:[%s7060_s15 + $0xbc8] ss:$16 sps:$4 sm:$0xff]  }
 0x149   : > { %3971 = vmatpush1.bf16.msra.mxu0 %v6509_v22  ;;  %4395 = vmatpush1.bf16.msra.mxu1 %v6512_v23  ;;  %v6596_v22 = vld [vmem:[%s7060_s15 + $0xa48] ss:$16 sps:$4 sm:$0xff]   ;;  %v6601_v23 = vld [vmem:[%s7060_s15 + $0xa64] ss:$16 sps:$4 sm:$0xff]  }
 0x14a   : > { %3972 = vmatprep.subr.bf16.mxu0 %v6517_v24  ;;  %4396 = vmatprep.subr.bf16.mxu1 %v6520_v25  ;;  %v6604_v24 = vld [vmem:[%s7060_s15 + $0xa6c] ss:$16 sps:$4 sm:$0xff]   ;;  %v5349_v25 = vcombine.high %v7448_v18, %v7451_v19 }
 0x14d   : > { %3973 = vmatpush1.bf16.msra.mxu0 %v6515_v26  ;;  %4397 = vmatpush1.bf16.msra.mxu1 %v6518_v27  ;;  %v6599_v26 = vld [vmem:[%s7060_s15 + $0xa60] ss:$16 sps:$4 sm:$0xff]   ;;  %v6602_v27 = vld [vmem:[%s7060_s15 + $0xa68] ss:$16 sps:$4 sm:$0xff]  }
 0x14e   : > { %3974 = vmatprep.subr.bf16.mxu0 %v6523_v28  ;;  %4398 = vmatprep.subr.bf16.mxu1 %v6526_v29  ;;  %v6607_v28 = vld [vmem:[%s7060_s15 + $0xa84] ss:$16 sps:$4 sm:$0xff]   ;;  %v6610_v29 = vld [vmem:[%s7060_s15 + $0xa8c] ss:$16 sps:$4 sm:$0xff]  }
 0x151   : > { %3975 = vmatpush1.bf16.msra.mxu0 %v6521_v30  ;;  %4399 = vmatpush1.bf16.msra.mxu1 %v6524_v31  ;;  %v6605_v30 = vld [vmem:[%s7060_s15 + $0xa80] ss:$16 sps:$4 sm:$0xff]   ;;  %v6608_v31 = vld [vmem:[%s7060_s15 + $0xa88] ss:$16 sps:$4 sm:$0xff]  }
 0x152   : > { %3976 = vmatprep.subr.bf16.mxu0 %v6529_v32  ;;  %4400 = vmatprep.subr.bf16.mxu1 %v6532_v33  ;;  %v6613_v32 = vld [vmem:[%s7060_s15 + $0xaa4] ss:$16 sps:$4 sm:$0xff]   ;;  %v6616_v33 = vld [vmem:[%s7060_s15 + $0xaac] ss:$16 sps:$4 sm:$0xff]  }
 0x155   : > { %3977 = vmatpush1.bf16.msra.mxu0 %v6527_v34  ;;  %4401 = vmatpush1.bf16.msra.mxu1 %v6530_v35  ;;  %v6611_v34 = vld [vmem:[%s7060_s15 + $0xaa0] ss:$16 sps:$4 sm:$0xff]   ;;  %v6614_v35 = vld [vmem:[%s7060_s15 + $0xaa8] ss:$16 sps:$4 sm:$0xff]  }
 0x156   : > { %3978 = vmatprep.subr.bf16.mxu0 %v6535_v36  ;;  %4402 = vmatprep.subr.bf16.mxu1 %v6538_v37  ;;  %v6619_v36 = vld [vmem:[%s7060_s15 + $0xac4] ss:$16 sps:$4 sm:$0xff]   ;;  %v6622_v37 = vld [vmem:[%s7060_s15 + $0xacc] ss:$16 sps:$4 sm:$0xff]  }
 0x159   : > { %3979 = vmatpush1.bf16.msra.mxu0 %v6533_v38  ;;  %4403 = vmatpush1.bf16.msra.mxu1 %v6536_v39  ;;  %v6617_v38 = vld [vmem:[%s7060_s15 + $0xac0] ss:$16 sps:$4 sm:$0xff]   ;;  %v6620_v39 = vld [vmem:[%s7060_s15 + $0xac8] ss:$16 sps:$4 sm:$0xff]  }
 0x15a   : > { %3980 = vmatprep.subr.bf16.mxu0 %v6541_v40  ;;  %4404 = vmatprep.subr.bf16.mxu1 %v6544_v41  ;;  %v6625_v40 = vld [vmem:[%s7060_s15 + $0xae4] ss:$16 sps:$4 sm:$0xff]   ;;  %v6628_v41 = vld [vmem:[%s7060_s15 + $0xaec] ss:$16 sps:$4 sm:$0xff]  }
 0x15d   : > { %3981 = vmatpush1.bf16.msra.mxu0 %v6539_v42  ;;  %4405 = vmatpush1.bf16.msra.mxu1 %v6542_v43  ;;  %v6623_v42 = vld [vmem:[%s7060_s15 + $0xae0] ss:$16 sps:$4 sm:$0xff]   ;;  %v6626_v43 = vld [vmem:[%s7060_s15 + $0xae8] ss:$16 sps:$4 sm:$0xff]  }
 0x15e   : > { %3982 = vmatprep.subr.bf16.mxu0 %v6547_v44  ;;  %4406 = vmatprep.subr.bf16.mxu1 %v6550_v45  ;;  %v6631_v44 = vld [vmem:[%s7060_s15 + $0xb04] ss:$16 sps:$4 sm:$0xff]   ;;  %v6634_v45 = vld [vmem:[%s7060_s15 + $0xb0c] ss:$16 sps:$4 sm:$0xff]  }
 0x161   : > { %3983 = vmatpush1.bf16.msra.mxu0 %v6545_v46  ;;  %4407 = vmatpush1.bf16.msra.mxu1 %v6548_v47  ;;  %v6629_v46 = vld [vmem:[%s7060_s15 + $0xb00] ss:$16 sps:$4 sm:$0xff]   ;;  %v6632_v47 = vld [vmem:[%s7060_s15 + $0xb08] ss:$16 sps:$4 sm:$0xff]  }
 0x162   : > { %3984 = vmatprep.subr.bf16.mxu0 %v6553_v48  ;;  %4408 = vmatprep.subr.bf16.mxu1 %v6556_v49  ;;  %v6637_v48 = vld [vmem:[%s7060_s15 + $0xb24] ss:$16 sps:$4 sm:$0xff]   ;;  %v6640_v49 = vld [vmem:[%s7060_s15 + $0xb2c] ss:$16 sps:$4 sm:$0xff]  }
 0x165   : > { %3985 = vmatpush1.bf16.msra.mxu0 %v6551_v50  ;;  %4409 = vmatpush1.bf16.msra.mxu1 %v6554_v51  ;;  %v6635_v50 = vld [vmem:[%s7060_s15 + $0xb20] ss:$16 sps:$4 sm:$0xff]   ;;  %v6638_v51 = vld [vmem:[%s7060_s15 + $0xb28] ss:$16 sps:$4 sm:$0xff]  }
 0x166   : > { %3986 = vmatprep.subr.bf16.mxu0 %v6559_v52  ;;  %4410 = vmatprep.subr.bf16.mxu1 %v6562_v53  ;;  %v6643_v52 = vld [vmem:[%s7060_s15 + $0xb44] ss:$16 sps:$4 sm:$0xff]   ;;  %v6646_v53 = vld [vmem:[%s7060_s15 + $0xb4c] ss:$16 sps:$4 sm:$0xff]  }
 0x169   : > { %3987 = vmatpush1.bf16.msra.mxu0 %v6557_v54  ;;  %4411 = vmatpush1.bf16.msra.mxu1 %v6560_v55  ;;  %v6641_v54 = vld [vmem:[%s7060_s15 + $0xb40] ss:$16 sps:$4 sm:$0xff]   ;;  %v6644_v55 = vld [vmem:[%s7060_s15 + $0xb48] ss:$16 sps:$4 sm:$0xff]  }
 0x16a   : > { %3988 = vmatprep.subr.bf16.mxu0 %v6565_v56  ;;  %4412 = vmatprep.subr.bf16.mxu1 %v6568_v57  ;;  %v6649_v56 = vld [vmem:[%s7060_s15 + $0xb64] ss:$16 sps:$4 sm:$0xff]   ;;  %v6652_v57 = vld [vmem:[%s7060_s15 + $0xb6c] ss:$16 sps:$4 sm:$0xff]  }
 0x16d   : > { %3989 = vmatpush1.bf16.msra.mxu0 %v6563_v59  ;;  %4413 = vmatpush1.bf16.msra.mxu1 %v6566_v61  ;;  %v6647_v59 = vld [vmem:[%s7060_s15 + $0xb60] ss:$16 sps:$4 sm:$0xff]   ;;  %v6650_v61 = vld [vmem:[%s7060_s15 + $0xb68] ss:$16 sps:$4 sm:$0xff]  }
 0x16e   : > { %3990 = vmatprep.subr.bf16.mxu0 %v6571_v62  ;;  %4414 = vmatprep.subr.bf16.mxu1 %v6574_v63  ;;  %v6655_v62 = vld [vmem:[%s7060_s15 + $0xb84] ss:$16 sps:$4 sm:$0xff]   ;;  %v6658_v63 = vld [vmem:[%s7060_s15 + $0xb8c] ss:$16 sps:$4 sm:$0xff]  }
 0x171   : > { %3991 = vmatpush1.bf16.msra.mxu0 %v6569_v58  ;;  %4415 = vmatpush1.bf16.msra.mxu1 %v6572_v60  ;;  %v6653_v58 = vld [vmem:[%s7060_s15 + $0xb80] ss:$16 sps:$4 sm:$0xff]   ;;  %v6656_v60 = vld [vmem:[%s7060_s15 + $0xb88] ss:$16 sps:$4 sm:$0xff]  }
 0x172   : > { %3992 = vmatprep.subr.bf16.mxu0 %v6577_v0  ;;  %4416 = vmatprep.subr.bf16.mxu1 %v6580_v1  ;;  %v6661_v0 = vld [vmem:[%s7060_s15 + $0xba4] ss:$16 sps:$4 sm:$0xff]   ;;  %v6664_v1 = vld [vmem:[%s7060_s15 + $0xbac] ss:$16 sps:$4 sm:$0xff]  }
 0x175   : > { %3993 = vmatpush1.bf16.msra.mxu0 %v6575_v3  ;;  %4417 = vmatpush1.bf16.msra.mxu1 %v6578_v5  ;;  %v6659_v3 = vld [vmem:[%s7060_s15 + $0xba0] ss:$16 sps:$4 sm:$0xff]   ;;  %v6662_v5 = vld [vmem:[%s7060_s15 + $0xba8] ss:$16 sps:$4 sm:$0xff]  }
 0x176   : > { %4015 = vmatprep.subr.bf16.mxu0 %v6583_v6  ;;  %4439 = vmatprep.subr.bf16.mxu1 %v6586_v7  ;;  %v6667_v6 = vld [vmem:[%s7060_s15 + $0xbc4] ss:$16 sps:$4 sm:$0xff]   ;;  %v6670_v7 = vld [vmem:[%s7060_s15 + $0xbcc] ss:$16 sps:$4 sm:$0xff]  }
 0x178   : > { %3995 = vmatmul.mubr.bf16.vlgmr.msra.gmra.mrb[0].mxu0 %v5346_v4  ;;  %4419 = vmatmul.mubr.bf16.vlgmr.msra.gmra.mrb[0].mxu1 %v5346_v4  ;;  %v6673_v4 = vld [vmem:[%s7060_s15 + $0xbe4] ss:$16 sps:$4 sm:$0xff]  }
 0x179   : > { %4016 = vmatpush1.bf16.msra.mxu0 %v6581_v9  ;;  %4440 = vmatpush1.bf16.msra.mxu1 %v6584_v11  ;;  %v6676_v9 = vld [vmem:[%s7060_s15 + $0xbec] ss:$16 sps:$4 sm:$0xff]   ;;  %v6671_v11 = vld [vmem:[%s7060_s15 + $0xbe0] ss:$16 sps:$4 sm:$0xff]  }
 0x17a   : > { %4017 = vmatprep.subr.bf16.mxu0 %v6589_v13  ;;  %4441 = vmatprep.subr.bf16.mxu1 %v6592_v14  ;;  %v6674_v13 = vld [vmem:[%s7060_s15 + $0xbe8] ss:$16 sps:$4 sm:$0xff]   ;;  %v6679_v14 = vld [vmem:[%s7060_s15 + $0xc04] ss:$16 sps:$4 sm:$0xff]  }
 0x17b   : > { %4004 = vmatprep.mubr.bf16.mxu0 %v5363_v17  ;;  %4428 = vmatprep.mubr.bf16.mxu1 %v5363_v17  ;;  %v507_v17 = vld [vmem:[%s7062_s16 + $0xa8] sm:$0xff] }
 0x17d   : > { %4018 = vmatpush1.bf16.msra.mxu0 %v6587_v15  ;;  %4442 = vmatpush1.bf16.msra.mxu1 %v6590_v16  ;;  %v6682_v15 = vld [vmem:[%s7060_s15 + $0xc0c] ss:$16 sps:$4 sm:$0xff]   ;;  %v5348_v16 = vcombine.low %v7448_v18, %v7451_v19  ;;  %v6683_v18 = vld [vmem:[%s7060_s15 + $0xc20] ss:$16 sps:$4 sm:$0xff]   ;;  %v6686_v19 = vld [vmem:[%s7060_s15 + $0xc28] ss:$16 sps:$4 sm:$0xff]  }
 0x17e   : > { %4019 = vmatprep.subr.bf16.mxu0 %v6595_v10  ;;  %4443 = vmatprep.subr.bf16.mxu1 %v6598_v12  ;;  %v515_v10 = vld [vmem:[%s7062_s16 + $0xe8] sm:$0xff]  ;;  %v6677_v12 = vld [vmem:[%s7060_s15 + $0xc00] ss:$16 sps:$4 sm:$0xff]  }
 0x180   : > { %4005 = vmatmul.mubr.bf16.gmra.mrb[4].mxu0 %v5362_v20  ;;  %4429 = vmatmul.mubr.bf16.gmra.mrb[4].mxu1 %v5362_v20  ;;  %v6680_v20 = vld [vmem:[%s7060_s15 + $0xc08] ss:$16 sps:$4 sm:$0xff]  }
 0x181   : > { %4020 = vmatpush1.bf16.msra.mxu0 %v6593_v21  ;;  %4444 = vmatpush1.bf16.msra.mxu1 %v6596_v22  ;;  %v6685_v21 = vld [vmem:[%s7060_s15 + $0xc24] ss:$16 sps:$4 sm:$0xff]   ;;  %v6688_v22 = vld [vmem:[%s7060_s15 + $0xc2c] ss:$16 sps:$4 sm:$0xff]  }
 0x182   : > { %4021 = vmatprep.subr.bf16.mxu0 %v6601_v23  ;;  %4445 = vmatprep.subr.bf16.mxu1 %v6604_v24  ;;  %v5365_v23 = vcombine.high %v507_v17, %v515_v10  ;;  %v6691_v24 = vld [vmem:[%s7060_s15 + $0xc44] ss:$16 sps:$4 sm:$0xff]  }
 0x183   : > { %4047 = vmatprep.mubr.bf16.mxu0 %v5349_v25  ;;  %4471 = vmatprep.mubr.bf16.mxu1 %v5349_v25  ;;  %v6694_v25 = vld [vmem:[%s7060_s15 + $0xc4c] ss:$16 sps:$4 sm:$0xff]  }
 0x185   : > { %4022 = vmatpush1.bf16.msra.mxu0 %v6599_v26  ;;  %4446 = vmatpush1.bf16.msra.mxu1 %v6602_v27  ;;  %v5364_v26 = vcombine.low %v507_v17, %v515_v10  ;;  %v7524_v27 = vld [vmem:[%s7062_s16 + $0x30] sm:$0xff]  ;;  %v6764_v17 = vld [vmem:[%s7060_s15 + $0xdc8] ss:$16 sps:$4 sm:$0xff]  }
 0x186   : > { %4023 = vmatprep.subr.bf16.mxu0 %v6607_v28  ;;  %4447 = vmatprep.subr.bf16.mxu1 %v6610_v29  ;;  %v7527_v28 = vld [vmem:[%s7062_s16 + $0x70] sm:$0xff] }
 0x187   : > { %v6689_v29 = vld [vmem:[%s7060_s15 + $0xc40] ss:$16 sps:$4 sm:$0xff]   ;;  %v6769_v10 = vld [vmem:[%s7060_s15 + $0xde4] ss:$16 sps:$4 sm:$0xff]  }
 0x189   : > { %4024 = vmatpush1.bf16.msra.mxu0 %v6605_v30  ;;  %4448 = vmatpush1.bf16.msra.mxu1 %v6608_v31  ;;  %v6692_v30 = vld [vmem:[%s7060_s15 + $0xc48] ss:$16 sps:$4 sm:$0xff]   ;;  %v6697_v31 = vld [vmem:[%s7060_s15 + $0xc64] ss:$16 sps:$4 sm:$0xff]  }
 0x18a   : > { %4025 = vmatprep.subr.bf16.mxu0 %v6613_v32  ;;  %4449 = vmatprep.subr.bf16.mxu1 %v6616_v33  ;;  %v6700_v32 = vld [vmem:[%s7060_s15 + $0xc6c] ss:$16 sps:$4 sm:$0xff]   ;;  %v5351_v33 = vcombine.high %v7524_v27, %v7527_v28 }
 0x18d   : > { %4026 = vmatpush1.bf16.msra.mxu0 %v6611_v34  ;;  %4450 = vmatpush1.bf16.msra.mxu1 %v6614_v35  ;;  %v6695_v34 = vld [vmem:[%s7060_s15 + $0xc60] ss:$16 sps:$4 sm:$0xff]   ;;  %v6698_v35 = vld [vmem:[%s7060_s15 + $0xc68] ss:$16 sps:$4 sm:$0xff]  }
 0x18e   : > { %4027 = vmatprep.subr.bf16.mxu0 %v6619_v36  ;;  %4451 = vmatprep.subr.bf16.mxu1 %v6622_v37  ;;  %v6703_v36 = vld [vmem:[%s7060_s15 + $0xc84] ss:$16 sps:$4 sm:$0xff]   ;;  %v6706_v37 = vld [vmem:[%s7060_s15 + $0xc8c] ss:$16 sps:$4 sm:$0xff]  }
 0x191   : > { %4028 = vmatpush1.bf16.msra.mxu0 %v6617_v38  ;;  %4452 = vmatpush1.bf16.msra.mxu1 %v6620_v39  ;;  %v6701_v38 = vld [vmem:[%s7060_s15 + $0xc80] ss:$16 sps:$4 sm:$0xff]   ;;  %v6704_v39 = vld [vmem:[%s7060_s15 + $0xc88] ss:$16 sps:$4 sm:$0xff]  }
 0x192   : > { %4029 = vmatprep.subr.bf16.mxu0 %v6625_v40  ;;  %4453 = vmatprep.subr.bf16.mxu1 %v6628_v41  ;;  %v6709_v40 = vld [vmem:[%s7060_s15 + $0xca4] ss:$16 sps:$4 sm:$0xff]   ;;  %v6712_v41 = vld [vmem:[%s7060_s15 + $0xcac] ss:$16 sps:$4 sm:$0xff]  }
 0x195   : > { %4030 = vmatpush1.bf16.msra.mxu0 %v6623_v42  ;;  %4454 = vmatpush1.bf16.msra.mxu1 %v6626_v43  ;;  %v6707_v42 = vld [vmem:[%s7060_s15 + $0xca0] ss:$16 sps:$4 sm:$0xff]   ;;  %v6710_v43 = vld [vmem:[%s7060_s15 + $0xca8] ss:$16 sps:$4 sm:$0xff]  }
 0x196   : > { %4031 = vmatprep.subr.bf16.mxu0 %v6631_v44  ;;  %4455 = vmatprep.subr.bf16.mxu1 %v6634_v45  ;;  %v6715_v44 = vld [vmem:[%s7060_s15 + $0xcc4] ss:$16 sps:$4 sm:$0xff]   ;;  %v6718_v45 = vld [vmem:[%s7060_s15 + $0xccc] ss:$16 sps:$4 sm:$0xff]  }
 0x199   : > { %4032 = vmatpush1.bf16.msra.mxu0 %v6629_v46  ;;  %4456 = vmatpush1.bf16.msra.mxu1 %v6632_v47  ;;  %v6713_v46 = vld [vmem:[%s7060_s15 + $0xcc0] ss:$16 sps:$4 sm:$0xff]   ;;  %v6716_v47 = vld [vmem:[%s7060_s15 + $0xcc8] ss:$16 sps:$4 sm:$0xff]  }
 0x19a   : > { %4033 = vmatprep.subr.bf16.mxu0 %v6637_v48  ;;  %4457 = vmatprep.subr.bf16.mxu1 %v6640_v49  ;;  %v6721_v48 = vld [vmem:[%s7060_s15 + $0xce4] ss:$16 sps:$4 sm:$0xff]   ;;  %v6724_v49 = vld [vmem:[%s7060_s15 + $0xcec] ss:$16 sps:$4 sm:$0xff]  }
 0x19d   : > { %4034 = vmatpush1.bf16.msra.mxu0 %v6635_v50  ;;  %4458 = vmatpush1.bf16.msra.mxu1 %v6638_v51  ;;  %v6719_v50 = vld [vmem:[%s7060_s15 + $0xce0] ss:$16 sps:$4 sm:$0xff]   ;;  %v6722_v51 = vld [vmem:[%s7060_s15 + $0xce8] ss:$16 sps:$4 sm:$0xff]  }
 0x19e   : > { %4035 = vmatprep.subr.bf16.mxu0 %v6643_v52  ;;  %4459 = vmatprep.subr.bf16.mxu1 %v6646_v53  ;;  %v6727_v52 = vld [vmem:[%s7060_s15 + $0xd04] ss:$16 sps:$4 sm:$0xff]   ;;  %v6730_v53 = vld [vmem:[%s7060_s15 + $0xd0c] ss:$16 sps:$4 sm:$0xff]  }
 0x1a1   : > { %4036 = vmatpush1.bf16.msra.mxu0 %v6641_v54  ;;  %4460 = vmatpush1.bf16.msra.mxu1 %v6644_v55  ;;  %v6725_v54 = vld [vmem:[%s7060_s15 + $0xd00] ss:$16 sps:$4 sm:$0xff]   ;;  %v6728_v55 = vld [vmem:[%s7060_s15 + $0xd08] ss:$16 sps:$4 sm:$0xff]  }
 0x1a2   : > { %4037 = vmatprep.subr.bf16.mxu0 %v6649_v56  ;;  %4461 = vmatprep.subr.bf16.mxu1 %v6652_v57  ;;  %v6733_v56 = vld [vmem:[%s7060_s15 + $0xd24] ss:$16 sps:$4 sm:$0xff]   ;;  %v6736_v57 = vld [vmem:[%s7060_s15 + $0xd2c] ss:$16 sps:$4 sm:$0xff]  }
 0x1a5   : > { %4038 = vmatpush1.bf16.msra.mxu0 %v6647_v59  ;;  %4462 = vmatpush1.bf16.msra.mxu1 %v6650_v61  ;;  %v6731_v59 = vld [vmem:[%s7060_s15 + $0xd20] ss:$16 sps:$4 sm:$0xff]   ;;  %v6734_v61 = vld [vmem:[%s7060_s15 + $0xd28] ss:$16 sps:$4 sm:$0xff]  }
 0x1a6   : > { %4039 = vmatprep.subr.bf16.mxu0 %v6655_v62  ;;  %4463 = vmatprep.subr.bf16.mxu1 %v6658_v63  ;;  %v6739_v62 = vld [vmem:[%s7060_s15 + $0xd44] ss:$16 sps:$4 sm:$0xff]   ;;  %v6742_v63 = vld [vmem:[%s7060_s15 + $0xd4c] ss:$16 sps:$4 sm:$0xff]  }
 0x1a9   : > { %4040 = vmatpush1.bf16.msra.mxu0 %v6653_v58  ;;  %4464 = vmatpush1.bf16.msra.mxu1 %v6656_v60  ;;  %v6737_v58 = vld [vmem:[%s7060_s15 + $0xd40] ss:$16 sps:$4 sm:$0xff]   ;;  %v6740_v60 = vld [vmem:[%s7060_s15 + $0xd48] ss:$16 sps:$4 sm:$0xff]  }
 0x1aa   : > { %4041 = vmatprep.subr.bf16.mxu0 %v6661_v0  ;;  %4465 = vmatprep.subr.bf16.mxu1 %v6664_v1  ;;  %v6745_v0 = vld [vmem:[%s7060_s15 + $0xd64] ss:$16 sps:$4 sm:$0xff]   ;;  %v6748_v1 = vld [vmem:[%s7060_s15 + $0xd6c] ss:$16 sps:$4 sm:$0xff]  }
 0x1ad   : > { %4042 = vmatpush1.bf16.msra.mxu0 %v6659_v3  ;;  %4466 = vmatpush1.bf16.msra.mxu1 %v6662_v5  ;;  %v6743_v3 = vld [vmem:[%s7060_s15 + $0xd60] ss:$16 sps:$4 sm:$0xff]   ;;  %v6746_v5 = vld [vmem:[%s7060_s15 + $0xd68] ss:$16 sps:$4 sm:$0xff]  }
 0x1ae   : > { %4043 = vmatprep.subr.bf16.mxu0 %v6667_v6  ;;  %4467 = vmatprep.subr.bf16.mxu1 %v6670_v7  ;;  %v6751_v6 = vld [vmem:[%s7060_s15 + $0xd84] ss:$16 sps:$4 sm:$0xff]   ;;  %v6754_v7 = vld [vmem:[%s7060_s15 + $0xd8c] ss:$16 sps:$4 sm:$0xff]  }
 0x1b1   : > { %4044 = vmatpush1.bf16.msra.mxu0 %v6665_v8  ;;  %4468 = vmatpush1.bf16.msra.mxu1 %v6668_v2  ;;  %v6749_v8 = vld [vmem:[%s7060_s15 + $0xd80] ss:$16 sps:$4 sm:$0xff]   ;;  %v6752_v2 = vld [vmem:[%s7060_s15 + $0xd88] ss:$16 sps:$4 sm:$0xff]  }
 0x1b2   : > { %4045 = vmatprep.subr.bf16.mxu0 %v6673_v4  ;;  %4469 = vmatprep.subr.bf16.mxu1 %v6676_v9  ;;  %v6757_v4 = vld [vmem:[%s7060_s15 + $0xda4] ss:$16 sps:$4 sm:$0xff]   ;;  %v6760_v9 = vld [vmem:[%s7060_s15 + $0xdac] ss:$16 sps:$4 sm:$0xff]  }
 0x1b5   : > { %4046 = vmatpush1.bf16.msra.mxu0 %v6671_v11  ;;  %4470 = vmatpush1.bf16.msra.mxu1 %v6674_v13  ;;  %v6755_v11 = vld [vmem:[%s7060_s15 + $0xda0] ss:$16 sps:$4 sm:$0xff]   ;;  %v6758_v13 = vld [vmem:[%s7060_s15 + $0xda8] ss:$16 sps:$4 sm:$0xff]  }
 0x1b6   : > { %4068 = vmatprep.subr.bf16.mxu0 %v6679_v14  ;;  %4492 = vmatprep.subr.bf16.mxu1 %v6682_v15  ;;  %v6763_v14 = vld [vmem:[%s7060_s15 + $0xdc4] ss:$16 sps:$4 sm:$0xff]   ;;  %v6766_v15 = vld [vmem:[%s7060_s15 + $0xdcc] ss:$16 sps:$4 sm:$0xff]  }
 0x1b8   : > { %4048 = vmatmul.mubr.bf16.vlgmr.msra.gmra.mrb[0].mxu0 %v5348_v16  ;;  %4472 = vmatmul.mubr.bf16.vlgmr.msra.gmra.mrb[0].mxu1 %v5348_v16  ;;  %v6761_v16 = vld [vmem:[%s7060_s15 + $0xdc0] ss:$16 sps:$4 sm:$0xff]  }
 0x1b9   : > { %4069 = vmatpush1.bf16.msra.mxu0 %v6677_v12  ;;  %4493 = vmatpush1.bf16.msra.mxu1 %v6680_v20  ;;  %v6772_v12 = vld [vmem:[%s7060_s15 + $0xdec] ss:$16 sps:$4 sm:$0xff]   ;;  %v6767_v20 = vld [vmem:[%s7060_s15 + $0xde0] ss:$16 sps:$4 sm:$0xff]  }
 0x1ba   : > { %4070 = vmatprep.subr.bf16.mxu0 %v6685_v21  ;;  %4494 = vmatprep.subr.bf16.mxu1 %v6688_v22  ;;  %v6770_v21 = vld [vmem:[%s7060_s15 + $0xde8] ss:$16 sps:$4 sm:$0xff]   ;;  %v6775_v22 = vld [vmem:[%s7060_s15 + $0xe04] ss:$16 sps:$4 sm:$0xff]  }
 0x1bb   : > { %4057 = vmatprep.mubr.bf16.mxu0 %v5365_v23  ;;  %4481 = vmatprep.mubr.bf16.mxu1 %v5365_v23  ;;  %v6778_v23 = vld [vmem:[%s7060_s15 + $0xe0c] ss:$16 sps:$4 sm:$0xff]  }
 0x1bd   : > { %4071 = vmatpush1.bf16.msra.mxu0 %v6683_v18  ;;  %4495 = vmatpush1.bf16.msra.mxu1 %v6686_v19  ;;  %v5350_v18 = vcombine.low %v7524_v27, %v7527_v28  ;;  %v508_v19 = vld [vmem:[%s7062_s16 + $0xb0] sm:$0xff]  ;;  %v6782_v28 = vld [vmem:[%s7060_s15 + $0xe28] ss:$16 sps:$4 sm:$0xff]  }
 0x1be   : > { %4072 = vmatprep.subr.bf16.mxu0 %v6691_v24  ;;  %4496 = vmatprep.subr.bf16.mxu1 %v6694_v25  ;;  %v516_v24 = vld [vmem:[%s7062_s16 + $0xf0] sm:$0xff] }
 0x1bf   : > { %v6773_v25 = vld [vmem:[%s7060_s15 + $0xe00] ss:$16 sps:$4 sm:$0xff]  }
 0x1c0   : > { %4058 = vmatmul.mubr.bf16.gmra.mrb[4].mxu0 %v5364_v26  ;;  %4482 = vmatmul.mubr.bf16.gmra.mrb[4].mxu1 %v5364_v26  ;;  %v6776_v26 = vld [vmem:[%s7060_s15 + $0xe08] ss:$16 sps:$4 sm:$0xff]   ;;  %v6779_v27 = vld [vmem:[%s7060_s15 + $0xe20] ss:$16 sps:$4 sm:$0xff]  }
 0x1c1   : > { %4073 = vmatpush1.bf16.msra.mxu0 %v6689_v29  ;;  %4497 = vmatpush1.bf16.msra.mxu1 %v6692_v30  ;;  %v6781_v29 = vld [vmem:[%s7060_s15 + $0xe24] ss:$16 sps:$4 sm:$0xff]   ;;  %v6784_v30 = vld [vmem:[%s7060_s15 + $0xe2c] ss:$16 sps:$4 sm:$0xff]  }
 0x1c2   : > { %4074 = vmatprep.subr.bf16.mxu0 %v6697_v31  ;;  %4498 = vmatprep.subr.bf16.mxu1 %v6700_v32  ;;  %v5367_v31 = vcombine.high %v508_v19, %v516_v24  ;;  %v6787_v32 = vld [vmem:[%s7060_s15 + $0xe44] ss:$16 sps:$4 sm:$0xff]  }
 0x1c3   : > { %4100 = vmatprep.mubr.bf16.mxu0 %v5351_v33  ;;  %4524 = vmatprep.mubr.bf16.mxu1 %v5351_v33  ;;  %v6790_v33 = vld [vmem:[%s7060_s15 + $0xe4c] ss:$16 sps:$4 sm:$0xff]  }
 0x1c5   : > { %4075 = vmatpush1.bf16.msra.mxu0 %v6695_v34  ;;  %4499 = vmatpush1.bf16.msra.mxu1 %v6698_v35  ;;  %v5366_v34 = vcombine.low %v508_v19, %v516_v24  ;;  %v7600_v35 = vld [vmem:[%s7062_s16 + $0x38] sm:$0xff]  ;;  %v6865_v24 = vld [vmem:[%s7060_s15 + $0xfe4] ss:$16 sps:$4 sm:$0xff]  }
 0x1c6   : > { %4076 = vmatprep.subr.bf16.mxu0 %v6703_v36  ;;  %4500 = vmatprep.subr.bf16.mxu1 %v6706_v37  ;;  %v7603_v36 = vld [vmem:[%s7062_s16 + $0x78] sm:$0xff]  ;;  %v6785_v37 = vld [vmem:[%s7060_s15 + $0xe40] ss:$16 sps:$4 sm:$0xff]  }
 0x1c7   : > { %v6860_v19 = vld [vmem:[%s7060_s15 + $0xfc8] ss:$16 sps:$4 sm:$0xff]  }
 0x1c9   : > { %4077 = vmatpush1.bf16.msra.mxu0 %v6701_v38  ;;  %4501 = vmatpush1.bf16.msra.mxu1 %v6704_v39  ;;  %v6788_v38 = vld [vmem:[%s7060_s15 + $0xe48] ss:$16 sps:$4 sm:$0xff]   ;;  %v6793_v39 = vld [vmem:[%s7060_s15 + $0xe64] ss:$16 sps:$4 sm:$0xff]  }
 0x1ca   : > { %4078 = vmatprep.subr.bf16.mxu0 %v6709_v40  ;;  %4502 = vmatprep.subr.bf16.mxu1 %v6712_v41  ;;  %v6796_v40 = vld [vmem:[%s7060_s15 + $0xe6c] ss:$16 sps:$4 sm:$0xff]   ;;  %v5353_v41 = vcombine.high %v7600_v35, %v7603_v36 }
 0x1cd   : > { %4079 = vmatpush1.bf16.msra.mxu0 %v6707_v42  ;;  %4503 = vmatpush1.bf16.msra.mxu1 %v6710_v43  ;;  %v6791_v42 = vld [vmem:[%s7060_s15 + $0xe60] ss:$16 sps:$4 sm:$0xff]   ;;  %v6794_v43 = vld [vmem:[%s7060_s15 + $0xe68] ss:$16 sps:$4 sm:$0xff]  }
 0x1ce   : > { %4080 = vmatprep.subr.bf16.mxu0 %v6715_v44  ;;  %4504 = vmatprep.subr.bf16.mxu1 %v6718_v45  ;;  %v6799_v44 = vld [vmem:[%s7060_s15 + $0xe84] ss:$16 sps:$4 sm:$0xff]   ;;  %v6802_v45 = vld [vmem:[%s7060_s15 + $0xe8c] ss:$16 sps:$4 sm:$0xff]  }
 0x1d1   : > { %4081 = vmatpush1.bf16.msra.mxu0 %v6713_v46  ;;  %4505 = vmatpush1.bf16.msra.mxu1 %v6716_v47  ;;  %v6797_v46 = vld [vmem:[%s7060_s15 + $0xe80] ss:$16 sps:$4 sm:$0xff]   ;;  %v6800_v47 = vld [vmem:[%s7060_s15 + $0xe88] ss:$16 sps:$4 sm:$0xff]  }
 0x1d2   : > { %4082 = vmatprep.subr.bf16.mxu0 %v6721_v48  ;;  %4506 = vmatprep.subr.bf16.mxu1 %v6724_v49  ;;  %v6805_v48 = vld [vmem:[%s7060_s15 + $0xea4] ss:$16 sps:$4 sm:$0xff]   ;;  %v6808_v49 = vld [vmem:[%s7060_s15 + $0xeac] ss:$16 sps:$4 sm:$0xff]  }
 0x1d5   : > { %4083 = vmatpush1.bf16.msra.mxu0 %v6719_v50  ;;  %4507 = vmatpush1.bf16.msra.mxu1 %v6722_v51  ;;  %v6803_v50 = vld [vmem:[%s7060_s15 + $0xea0] ss:$16 sps:$4 sm:$0xff]   ;;  %v6806_v51 = vld [vmem:[%s7060_s15 + $0xea8] ss:$16 sps:$4 sm:$0xff]  }
 0x1d6   : > { %4084 = vmatprep.subr.bf16.mxu0 %v6727_v52  ;;  %4508 = vmatprep.subr.bf16.mxu1 %v6730_v53  ;;  %v6811_v52 = vld [vmem:[%s7060_s15 + $0xec4] ss:$16 sps:$4 sm:$0xff]   ;;  %v6814_v53 = vld [vmem:[%s7060_s15 + $0xecc] ss:$16 sps:$4 sm:$0xff]  }
 0x1d9   : > { %4085 = vmatpush1.bf16.msra.mxu0 %v6725_v54  ;;  %4509 = vmatpush1.bf16.msra.mxu1 %v6728_v55  ;;  %v6809_v54 = vld [vmem:[%s7060_s15 + $0xec0] ss:$16 sps:$4 sm:$0xff]   ;;  %v6812_v55 = vld [vmem:[%s7060_s15 + $0xec8] ss:$16 sps:$4 sm:$0xff]  }
 0x1da   : > { %4086 = vmatprep.subr.bf16.mxu0 %v6733_v56  ;;  %4510 = vmatprep.subr.bf16.mxu1 %v6736_v57  ;;  %v6817_v56 = vld [vmem:[%s7060_s15 + $0xee4] ss:$16 sps:$4 sm:$0xff]   ;;  %v6820_v57 = vld [vmem:[%s7060_s15 + $0xeec] ss:$16 sps:$4 sm:$0xff]  }
 0x1dd   : > { %4087 = vmatpush1.bf16.msra.mxu0 %v6731_v59  ;;  %4511 = vmatpush1.bf16.msra.mxu1 %v6734_v61  ;;  %v6815_v59 = vld [vmem:[%s7060_s15 + $0xee0] ss:$16 sps:$4 sm:$0xff]   ;;  %v6818_v61 = vld [vmem:[%s7060_s15 + $0xee8] ss:$16 sps:$4 sm:$0xff]  }
 0x1de   : > { %4088 = vmatprep.subr.bf16.mxu0 %v6739_v62  ;;  %4512 = vmatprep.subr.bf16.mxu1 %v6742_v63  ;;  %v6823_v62 = vld [vmem:[%s7060_s15 + $0xf04] ss:$16 sps:$4 sm:$0xff]   ;;  %v6826_v63 = vld [vmem:[%s7060_s15 + $0xf0c] ss:$16 sps:$4 sm:$0xff]  }
 0x1e1   : > { %4089 = vmatpush1.bf16.msra.mxu0 %v6737_v58  ;;  %4513 = vmatpush1.bf16.msra.mxu1 %v6740_v60  ;;  %v6821_v58 = vld [vmem:[%s7060_s15 + $0xf00] ss:$16 sps:$4 sm:$0xff]   ;;  %v6824_v60 = vld [vmem:[%s7060_s15 + $0xf08] ss:$16 sps:$4 sm:$0xff]  }
 0x1e2   : > { %4090 = vmatprep.subr.bf16.mxu0 %v6745_v0  ;;  %4514 = vmatprep.subr.bf16.mxu1 %v6748_v1  ;;  %v6829_v0 = vld [vmem:[%s7060_s15 + $0xf24] ss:$16 sps:$4 sm:$0xff]   ;;  %v6832_v1 = vld [vmem:[%s7060_s15 + $0xf2c] ss:$16 sps:$4 sm:$0xff]  }
 0x1e5   : > { %4091 = vmatpush1.bf16.msra.mxu0 %v6743_v3  ;;  %4515 = vmatpush1.bf16.msra.mxu1 %v6746_v5  ;;  %v6827_v3 = vld [vmem:[%s7060_s15 + $0xf20] ss:$16 sps:$4 sm:$0xff]   ;;  %v6830_v5 = vld [vmem:[%s7060_s15 + $0xf28] ss:$16 sps:$4 sm:$0xff]  }
 0x1e6   : > { %4092 = vmatprep.subr.bf16.mxu0 %v6751_v6  ;;  %4516 = vmatprep.subr.bf16.mxu1 %v6754_v7  ;;  %v6835_v6 = vld [vmem:[%s7060_s15 + $0xf44] ss:$16 sps:$4 sm:$0xff]   ;;  %v6838_v7 = vld [vmem:[%s7060_s15 + $0xf4c] ss:$16 sps:$4 sm:$0xff]  }
 0x1e9   : > { %4093 = vmatpush1.bf16.msra.mxu0 %v6749_v8  ;;  %4517 = vmatpush1.bf16.msra.mxu1 %v6752_v2  ;;  %v6833_v8 = vld [vmem:[%s7060_s15 + $0xf40] ss:$16 sps:$4 sm:$0xff]   ;;  %v6836_v2 = vld [vmem:[%s7060_s15 + $0xf48] ss:$16 sps:$4 sm:$0xff]  }
 0x1ea   : > { %4094 = vmatprep.subr.bf16.mxu0 %v6757_v4  ;;  %4518 = vmatprep.subr.bf16.mxu1 %v6760_v9  ;;  %v6841_v4 = vld [vmem:[%s7060_s15 + $0xf64] ss:$16 sps:$4 sm:$0xff]   ;;  %v6844_v9 = vld [vmem:[%s7060_s15 + $0xf6c] ss:$16 sps:$4 sm:$0xff]  }
 0x1ed   : > { %4095 = vmatpush1.bf16.msra.mxu0 %v6755_v11  ;;  %4519 = vmatpush1.bf16.msra.mxu1 %v6758_v13  ;;  %v6839_v11 = vld [vmem:[%s7060_s15 + $0xf60] ss:$16 sps:$4 sm:$0xff]   ;;  %v6842_v13 = vld [vmem:[%s7060_s15 + $0xf68] ss:$16 sps:$4 sm:$0xff]  }
 0x1ee   : > { %4096 = vmatprep.subr.bf16.mxu0 %v6763_v14  ;;  %4520 = vmatprep.subr.bf16.mxu1 %v6766_v15  ;;  %v6847_v14 = vld [vmem:[%s7060_s15 + $0xf84] ss:$16 sps:$4 sm:$0xff]   ;;  %v6850_v15 = vld [vmem:[%s7060_s15 + $0xf8c] ss:$16 sps:$4 sm:$0xff]  }
 0x1f1   : > { %4097 = vmatpush1.bf16.msra.mxu0 %v6761_v16  ;;  %4521 = vmatpush1.bf16.msra.mxu1 %v6764_v17  ;;  %v6845_v16 = vld [vmem:[%s7060_s15 + $0xf80] ss:$16 sps:$4 sm:$0xff]   ;;  %v6848_v17 = vld [vmem:[%s7060_s15 + $0xf88] ss:$16 sps:$4 sm:$0xff]  }
 0x1f2   : > { %4098 = vmatprep.subr.bf16.mxu0 %v6769_v10  ;;  %4522 = vmatprep.subr.bf16.mxu1 %v6772_v12  ;;  %v6853_v10 = vld [vmem:[%s7060_s15 + $0xfa4] ss:$16 sps:$4 sm:$0xff]   ;;  %v6856_v12 = vld [vmem:[%s7060_s15 + $0xfac] ss:$16 sps:$4 sm:$0xff]  }
 0x1f5   : > { %4099 = vmatpush1.bf16.msra.mxu0 %v6767_v20  ;;  %4523 = vmatpush1.bf16.msra.mxu1 %v6770_v21  ;;  %v6851_v20 = vld [vmem:[%s7060_s15 + $0xfa0] ss:$16 sps:$4 sm:$0xff]   ;;  %v6854_v21 = vld [vmem:[%s7060_s15 + $0xfa8] ss:$16 sps:$4 sm:$0xff]  }
 0x1f6   : > { %4121 = vmatprep.subr.bf16.mxu0 %v6775_v22  ;;  %4545 = vmatprep.subr.bf16.mxu1 %v6778_v23  ;;  %v6859_v22 = vld [vmem:[%s7060_s15 + $0xfc4] ss:$16 sps:$4 sm:$0xff]   ;;  %v6862_v23 = vld [vmem:[%s7060_s15 + $0xfcc] ss:$16 sps:$4 sm:$0xff]  }
 0x1f8   : > { %4101 = vmatmul.mubr.bf16.vlgmr.msra.gmra.mrb[0].mxu0 %v5350_v18  ;;  %4525 = vmatmul.mubr.bf16.vlgmr.msra.gmra.mrb[0].mxu1 %v5350_v18  ;;  %v6857_v18 = vld [vmem:[%s7060_s15 + $0xfc0] ss:$16 sps:$4 sm:$0xff]  }
 0x1f9   : > { %4122 = vmatpush1.bf16.msra.mxu0 %v6773_v25  ;;  %4546 = vmatpush1.bf16.msra.mxu1 %v6776_v26  ;;  %v6868_v25 = vld [vmem:[%s7060_s15 + $0xfec] ss:$16 sps:$4 sm:$0xff]   ;;  %v6863_v26 = vld [vmem:[%s7060_s15 + $0xfe0] ss:$16 sps:$4 sm:$0xff]  }
 0x1fa   : > { %4123 = vmatprep.subr.bf16.mxu0 %v6781_v29  ;;  %4547 = vmatprep.subr.bf16.mxu1 %v6784_v30  ;;  %v6866_v29 = vld [vmem:[%s7060_s15 + $0xfe8] ss:$16 sps:$4 sm:$0xff]  }
 0x1fb   : > { %4110 = vmatprep.mubr.bf16.mxu0 %v5367_v31  ;;  %4534 = vmatprep.mubr.bf16.mxu1 %v5367_v31  ;;  %v509_v30 = vld [vmem:[%s7062_s16 + $0xb8] sm:$0xff] }
 0x1fc   : > { %v517_v31 = vld [vmem:[%s7062_s16 + $0xf8] sm:$0xff] }
 0x1fd   : > { %4124 = vmatpush1.bf16.msra.mxu0 %v6779_v27  ;;  %4548 = vmatpush1.bf16.msra.mxu1 %v6782_v28  ;;  %v5352_v27 = vcombine.low %v7600_v35, %v7603_v36  ;;  %v5369_v28 = vcombine.high %v509_v30, %v517_v31 }
 0x1fe   : > { %4125 = vmatprep.subr.bf16.mxu0 %v6787_v32  ;;  %4549 = vmatprep.subr.bf16.mxu1 %v6790_v33  ;;  %v5368_v32 = vcombine.low %v509_v30, %v517_v31  ;;  %v470_v33 = vld [vmem:[#allocation2] sm:$0xff] }
 0x200   : > { %4111 = vmatmul.mubr.bf16.gmra.mrb[4].mxu0 %v5366_v34  ;;  %4535 = vmatmul.mubr.bf16.gmra.mrb[4].mxu1 %v5366_v34  ;;  %v472_v34 = vld [vmem:[#allocation2 + $0x10] sm:$0xff] }
 0x201   : > { %4126 = vmatpush1.bf16.msra.mxu0 %v6785_v37  ;;  %4550 = vmatpush1.bf16.msra.mxu1 %v6788_v38  ;;  %v471_v37 = vld [vmem:[#allocation2 + $0x8] sm:$0xff]  ;;  %v473_v38 = vld [vmem:[#allocation2 + $0x18] sm:$0xff] }
 0x202   : > { %4127 = vmatprep.subr.bf16.mxu0 %v6793_v39  ;;  %4551 = vmatprep.subr.bf16.mxu1 %v6796_v40 }
 0x203   : > { %4153 = vmatprep.mubr.bf16.mxu0 %v5353_v41  ;;  %4577 = vmatprep.mubr.bf16.mxu1 %v5353_v41  ;;  %v474_v41 = vld [vmem:[#allocation2 + $0x20] sm:$0xff] }
 0x205   : > { %4128 = vmatpush1.bf16.msra.mxu0 %v6791_v42  ;;  %4552 = vmatpush1.bf16.msra.mxu1 %v6794_v43  ;;  %v476_v42 = vld [vmem:[#allocation2 + $0x30] sm:$0xff] }
 0x206   : > { %4129 = vmatprep.subr.bf16.mxu0 %v6799_v44  ;;  %4553 = vmatprep.subr.bf16.mxu1 %v6802_v45  ;;  %v475_v45 = vld [vmem:[#allocation2 + $0x28] sm:$0xff] }
 0x209   : > { %4130 = vmatpush1.bf16.msra.mxu0 %v6797_v46  ;;  %4554 = vmatpush1.bf16.msra.mxu1 %v6800_v47  ;;  %v477_v46 = vld [vmem:[#allocation2 + $0x38] sm:$0xff] }
 0x20a   : > { %4131 = vmatprep.subr.bf16.mxu0 %v6805_v48  ;;  %4555 = vmatprep.subr.bf16.mxu1 %v6808_v49 }
 0x20d   : > { %4132 = vmatpush1.bf16.msra.mxu0 %v6803_v50  ;;  %4556 = vmatpush1.bf16.msra.mxu1 %v6806_v51 }
 0x20e   : > { %4133 = vmatprep.subr.bf16.mxu0 %v6811_v52  ;;  %4557 = vmatprep.subr.bf16.mxu1 %v6814_v53 }
 0x211   : > { %4134 = vmatpush1.bf16.msra.mxu0 %v6809_v54  ;;  %4558 = vmatpush1.bf16.msra.mxu1 %v6812_v55 }
 0x212   : > { %4135 = vmatprep.subr.bf16.mxu0 %v6817_v56  ;;  %4559 = vmatprep.subr.bf16.mxu1 %v6820_v57  ;;  %v478_v57 = vld [vmem:[#allocation2 + $0x40] sm:$0xff] }
 0x215   : > { %4136 = vmatpush1.bf16.msra.mxu0 %v6815_v59  ;;  %4560 = vmatpush1.bf16.msra.mxu1 %v6818_v61  ;;  %v480_v59 = vld [vmem:[#allocation2 + $0x50] sm:$0xff]  ;;  %v479_v61 = vld [vmem:[#allocation2 + $0x48] sm:$0xff] }
 0x216   : > { %4137 = vmatprep.subr.bf16.mxu0 %v6823_v62  ;;  %4561 = vmatprep.subr.bf16.mxu1 %v6826_v63  ;;  %v481_v62 = vld [vmem:[#allocation2 + $0x58] sm:$0xff] }
 0x219   : > { %4138 = vmatpush1.bf16.msra.mxu0 %v6821_v58  ;;  %4562 = vmatpush1.bf16.msra.mxu1 %v6824_v60  ;;  %v482_v60 = vld [vmem:[#allocation2 + $0x60] sm:$0xff] }
 0x21a   : > { %4139 = vmatprep.subr.bf16.mxu0 %v6829_v0  ;;  %4563 = vmatprep.subr.bf16.mxu1 %v6832_v1  ;;  %v484_v0 = vld [vmem:[#allocation2 + $0x70] sm:$0xff] }
 0x21d   : > { %4140 = vmatpush1.bf16.msra.mxu0 %v6827_v3  ;;  %4564 = vmatpush1.bf16.msra.mxu1 %v6830_v5 }
 0x21e   : > { %4141 = vmatprep.subr.bf16.mxu0 %v6835_v6  ;;  %4565 = vmatprep.subr.bf16.mxu1 %v6838_v7  ;;  %v483_v7 = vld [vmem:[#allocation2 + $0x68] sm:$0xff] }
 0x221   : > { %4142 = vmatpush1.bf16.msra.mxu0 %v6833_v8  ;;  %4566 = vmatpush1.bf16.msra.mxu1 %v6836_v2  ;;  %v485_v8 = vld [vmem:[#allocation2 + $0x78] sm:$0xff] }
 0x222   : > { %4143 = vmatprep.subr.bf16.mxu0 %v6841_v4  ;;  %4567 = vmatprep.subr.bf16.mxu1 %v6844_v9 }
 0x225   : > { %4144 = vmatpush1.bf16.msra.mxu0 %v6839_v11  ;;  %4568 = vmatpush1.bf16.msra.mxu1 %v6842_v13 }
 0x226   : > { %4145 = vmatprep.subr.bf16.mxu0 %v6847_v14  ;;  %4569 = vmatprep.subr.bf16.mxu1 %v6850_v15 }
 0x229   : > { %4146 = vmatpush1.bf16.msra.mxu0 %v6845_v16  ;;  %4570 = vmatpush1.bf16.msra.mxu1 %v6848_v17 }
 0x22a   : > { %4147 = vmatprep.subr.bf16.mxu0 %v6853_v10  ;;  %4571 = vmatprep.subr.bf16.mxu1 %v6856_v12  ;;  %v4652_v12 = vlaneseq (!%p5882_p11) }
 0x22c   : > { %vm4929_vm2 = vcmp.lt.s32.totalorder (!%p5882_p11), %v4652_v12, 512 }
 0x22d   : > { %4148 = vmatpush1.bf16.msra.mxu0 %v6851_v20  ;;  %4572 = vmatpush1.bf16.msra.mxu1 %v6854_v21  ;;  %v6910_v20 = vmov (!%p5882_p11), 0.0   ;;  %v7669_v21 = vshrl.u32 (!%p5882_p11), %v4652_v12, 7 }
 0x22e   : > { %4149 = vmatprep.subr.bf16.mxu0 %v6859_v22  ;;  %4573 = vmatprep.subr.bf16.mxu1 %v6862_v23  ;;  %v4650_v22 = vld [vmem:[%s7735_s2] sm:$0xf] (!%p5882_p11) }
 0x231   : > { %4150 = vmatpush1.bf16.msra.mxu0 %v6857_v18  ;;  %4574 = vmatpush1.bf16.msra.mxu1 %v6860_v19  ;;  %v4658_v19 = vsub.s32 (!%p5882_p11), 1, %v7669_v21 }
 0x232   : > { %4151 = vmatprep.subr.bf16.mxu0 %v6865_v24  ;;  %4575 = vmatprep.subr.bf16.mxu1 %v6868_v25  ;;  %v4666_v24 = vsub.s32 (!%p5882_p11), 3, %v7669_v21  ;;  %v4654_v25 = vsub.s32 (!%p5882_p11), 0, %v7669_v21 }
 0x235   : > { %4152 = vmatpush1.bf16.msra.mxu0 %v6863_v26  ;;  %4576 = vmatpush1.bf16.msra.mxu1 %v6866_v29  ;;  %v4662_v26 = vsub.s32 (!%p5882_p11), 2, %v7669_v21 }
 0x238   : > { %4154 = vmatmul.mubr.bf16.vlgmr.msra.gmra.mrb[0].mxu0 %v5352_v27  ;;  %4578 = vmatmul.mubr.bf16.vlgmr.msra.gmra.mrb[0].mxu1 %v5352_v27  ;;  %v4659_v27 = vrot.slane (!%p5882_p11), %v4650_v22, %v4658_v19 }
 0x239   : > { %4163 = vmatprep.mubr.bf16.mxu0 %v5369_v28  ;;  %4587 = vmatprep.mubr.bf16.mxu1 %v5369_v28  ;;  %v4667_v28 = vrot.slane (!%p5882_p11), %v4650_v22, %v4666_v24 }
 0x240   : > { %4164 = vmatmul.mubr.bf16.gmra.mrb[4].mxu0 %v5368_v32  ;;  %4588 = vmatmul.mubr.bf16.gmra.mrb[4].mxu1 %v5368_v32 }
 0x241   : > { %4820 = vmatprep.mubr.f32.mxu0 (!%p5882_p11), %v6910_v20  ;;  %4891 = vmatprep.mubr.f32.mxu1 (!%p5882_p11), %v6910_v20 }
 0x30b   : > { %v4155_v39 = vpop.f32.mrb[0].mxu0  ;;  %v4579_v40 = vpop.f32.mrb[0].mxu1 }
 0x30c   : > { %v4598_v43 = vadd.f32 %v4155_v39, %v470_v33  ;;  %v4600_v35 = vadd.f32 %v4579_v40, %v472_v34  ;;  %v4157_v36 = vpop.f32.mrb[1].mxu0  ;;  %v4581_v44 = vpop.f32.mrb[1].mxu1  ;;  %v4655_v33 = vrot.slane (!%p5882_p11), %v4650_v22, %v4654_v25 }
 0x30d   : > { %v4599_v47 = vadd.f32 %v4157_v36, %v471_v37  ;;  %v4601_v48 = vadd.f32 %v4581_v44, %v473_v38  ;;  %v4159_v49 = vpop.f32.mrb[2].mxu0  ;;  %v4583_v50 = vpop.f32.mrb[2].mxu1  ;;  %v4663_v38 = vrot.slane (!%p5882_p11), %v4650_v22, %v4662_v26 }
 0x30e   : > { %4614 = vst [vmem:[#allocation2] sm:$0xff] %v4598_v43  ;;  %4616 = vst [vmem:[#allocation2 + $0x10] sm:$0xff] %v4600_v35  ;;  %v4602_v51 = vadd.f32 %v4159_v49, %v474_v41  ;;  %v4604_v52 = vadd.f32 %v4583_v50, %v476_v42  ;;  %v4161_v53 = vpop.f32.mrb[3].mxu0  ;;  %v4585_v54 = vpop.f32.mrb[3].mxu1  ;;  %v4745_v41 = vand.u32 (!%p5882_p11), 127, %v4652_v12 }
 0x30f   : > { %4615 = vst [vmem:[#allocation2 + $0x8] sm:$0xff] %v4599_v47  ;;  %4617 = vst [vmem:[#allocation2 + $0x18] sm:$0xff] %v4601_v48  ;;  %v4603_v55 = vadd.f32 %v4161_v53, %v475_v45  ;;  %v4605_v56 = vadd.f32 %v4585_v54, %v477_v46 }
 0x310   : > { %4618 = vst [vmem:[#allocation2 + $0x20] sm:$0xff] %v4602_v51  ;;  %4620 = vst [vmem:[#allocation2 + $0x30] sm:$0xff] %v4604_v52  ;;  %vm4749_vm1 = vcmp.lt.s32.totalorder (!%p5882_p11), %v4745_v41, 32 }
 0x311   : > { %4619 = vst [vmem:[#allocation2 + $0x28] sm:$0xff] %v4603_v55  ;;  %4621 = vst [vmem:[#allocation2 + $0x38] sm:$0xff] %v4605_v56 }
 0x313   : > { %v4165_v63 = vpop.f32.mrb[4].mxu0  ;;  %v4589_v58 = vpop.f32.mrb[4].mxu1  ;;  %4633 = sbr.rel (%p5882_p11) target bundleno = 1039 (0x40f), region = 63 }
 0x314   : > { %v4606_v1 = vadd.f32 %v4165_v63, %v478_v57  ;;  %v4608_v3 = vadd.f32 %v4589_v58, %v480_v59  ;;  %v4167_v5 = vpop.f32.mrb[5].mxu0  ;;  %v4591_v6 = vpop.f32.mrb[5].mxu1 }
 0x315   : > { %v4607_v2 = vadd.f32 %v4167_v5, %v479_v61  ;;  %v4609_v4 = vadd.f32 %v4591_v6, %v481_v62  ;;  %v4169_v9 = vpop.f32.mrb[6].mxu0  ;;  %v4593_v11 = vpop.f32.mrb[6].mxu1  ;;  %v4634_v31 = vld [vmem:[#allocation2] sm:$0xff] (!%p5882_p11)  ;;  %v4636_v34 = vld [vmem:[#allocation2 + $0x10] sm:$0xff] (!%p5882_p11) }
 0x316   : > { %4622 = vst [vmem:[#allocation2 + $0x40] sm:$0xff] %v4606_v1  ;;  %4624 = vst [vmem:[#allocation2 + $0x50] sm:$0xff] %v4608_v3  ;;  %v4610_v13 = vadd.f32 %v4169_v9, %v482_v60  ;;  %v4612_v14 = vadd.f32 %v4593_v11, %v484_v0  ;;  %v4171_v15 = vpop.f32.mrb[7].mxu0  ;;  %v4595_v16 = vpop.f32.mrb[7].mxu1  ;;  %v4635_v23 = vld [vmem:[#allocation2 + $0x8] sm:$0xff] (!%p5882_p11)  ;;  %v4637_v29 = vld [vmem:[#allocation2 + $0x18] sm:$0xff] (!%p5882_p11)  ;;  %v4672_v44 = vadd.f32 (!%p5882_p11), %v4655_v33, %v4634_v31 }
 0x317   : > { %4623 = vst [vmem:[#allocation2 + $0x48] sm:$0xff] %v4607_v2  ;;  %4625 = vst [vmem:[#allocation2 + $0x58] sm:$0xff] %v4609_v4  ;;  %v4611_v17 = vadd.f32 %v4171_v15, %v483_v7  ;;  %v4613_v10 = vadd.f32 %v4595_v16, %v485_v8  ;;  %v4638_v32 = vld [vmem:[#allocation2 + $0x20] sm:$0xff] (!%p5882_p11)  ;;  %v4640_v37 = vld [vmem:[#allocation2 + $0x30] sm:$0xff] (!%p5882_p11)  ;;  %v4673_v42 = vadd.f32 (!%p5882_p11), %v4659_v27, %v4635_v23 }
 0x318   : > { %4626 = vst [vmem:[#allocation2 + $0x60] sm:$0xff] %v4610_v13  ;;  %4628 = vst [vmem:[#allocation2 + $0x70] sm:$0xff] %v4612_v14  ;;  %v4639_v18 = vld [vmem:[#allocation2 + $0x28] sm:$0xff] (!%p5882_p11)  ;;  %v4641_v30 = vld [vmem:[#allocation2 + $0x38] sm:$0xff] (!%p5882_p11)  ;;  %v4675_v35 = vadd.f32 (!%p5882_p11), %v4667_v28, %v4637_v29  ;;  %v4676_v45 = vadd.f32 (!%p5882_p11), %v4655_v33, %v4638_v32  ;;  %v4674_v46 = vadd.f32 (!%p5882_p11), %v4663_v38, %v4636_v34 }
 0x319   : > { %4627 = vst [vmem:[#allocation2 + $0x68] sm:$0xff] %v4611_v17  ;;  %4629 = vst [vmem:[#allocation2 + $0x78] sm:$0xff] %v4613_v10  ;;  %v4677_v43 = vadd.f32 (!%p5882_p11), %v4659_v27, %v4639_v18  ;;  %v4679_v36 = vadd.f32 (!%p5882_p11), %v4667_v28, %v4641_v30  ;;  %v4678_v47 = vadd.f32 (!%p5882_p11), %v4663_v38, %v4640_v37  ;;  %v5891_v10 = vsel (!%p5882_p11), %vm4749_vm1, 1.0, %v6910_v20 }
 0x31a   : > { %v5906_v56 = vpack.c.bf16 %v4673_v42, %v4672_v44  ;;  %v5916_v59 = vpack.c.bf16 %v4676_v45, %v4672_v44  ;;  %v5907_v61 = vpack.c.bf16 %v4675_v35, %v4674_v46  ;;  %v4933_v2 = vmul.f32 %v4673_v42, %v4673_v42 }
 0x31b   : > { %v5914_v49 = vpack.c.bf16 %v4677_v43, %v4673_v42  ;;  %v5922_v50 = vpack.c.bf16 %v4679_v36, %v4675_v35  ;;  %v5908_v57 = vpack.c.bf16 %v4677_v43, %v4676_v45  ;;  %v5909_v58 = vpack.c.bf16 %v4679_v36, %v4678_v47 }
 0x31c   : > { %v5924_v60 = vpack.c.bf16 %v4678_v47, %v4674_v46  ;;  %4736 = vst [vmem:[%s7736_s3] sm:$0xff] %v5906_v56  ;;  %4737 = vst [vmem:[%s7736_s3 + $0x8] sm:$0xff] %v5907_v61  ;;  %v4937_v17 = vmul.f32 %v4677_v43, %v4677_v43  ;;  %v4935_v22 = vmul.f32 %v4675_v35, %v4675_v35  ;;  %v6911_v35 = vmov 1966171168  }
 0x31d   : > { %v4642_v54 = vld [vmem:[#allocation2 + $0x40] sm:$0xff]  ;;  %v4644_v62 = vld [vmem:[#allocation2 + $0x50] sm:$0xff]  ;;  %5915 = vmatprep.subr.bf16.mxu0 %v5914_v49  ;;  %5923 = vmatprep.subr.bf16.mxu1 %v5922_v50  ;;  %4738 = vst [vmem:[%s7736_s3 + $0x10] sm:$0xff] %v5908_v57  ;;  %4739 = vst [vmem:[%s7736_s3 + $0x18] sm:$0xff] %v5909_v58  ;;  %v4939_v23 = vmul.f32 %v4679_v36, %v4679_v36  ;;  %v4932_v18 = vmul.f32 %v4672_v44, %v4672_v44  ;;  %v4905_v36 = vunpack.c.l.s4 %v6911_v35 }
 0x31e   : > { %v4643_v39 = vld [vmem:[#allocation2 + $0x48] sm:$0xff]  ;;  %v4645_v48 = vld [vmem:[#allocation2 + $0x58] sm:$0xff]  ;;  %5917 = vmatpush1.bf16.msra.mxu0 %v5916_v59  ;;  %v4680_v5 = vadd.f32 %v4655_v33, %v4642_v54  ;;  %5925 = vmatpush1.bf16.msra.mxu1 %v5924_v60  ;;  %v4682_v7 = vadd.f32 %v4663_v38, %v4644_v62  ;;  %v5930_v19 = vpack.c.bf16 %v4937_v17, %v4933_v2 }
 0x31f   : > { %v4681_v51 = vadd.f32 %v4659_v27, %v4643_v39  ;;  %v4646_v55 = vld [vmem:[#allocation2 + $0x60] sm:$0xff]  ;;  %v4648_v63 = vld [vmem:[#allocation2 + $0x70] sm:$0xff]  ;;  %v4683_v1 = vadd.f32 %v4667_v28, %v4645_v48  ;;  %v4936_v24 = vmul.f32 %v4676_v45, %v4676_v45  ;;  %v4934_v25 = vmul.f32 %v4674_v46, %v4674_v46 }
 0x320   : > { %v4647_v40 = vld [vmem:[#allocation2 + $0x68] sm:$0xff]  ;;  %v4649_v53 = vld [vmem:[#allocation2 + $0x78] sm:$0xff]  ;;  %v4684_v6 = vadd.f32 %v4655_v33, %v4646_v55  ;;  %v4686_v8 = vadd.f32 %v4663_v38, %v4648_v63  ;;  %v4938_v26 = vmul.f32 %v4678_v47, %v4678_v47  ;;  %v5938_v29 = vpack.c.bf16 %v4939_v23, %v4935_v22 }
 0x321   : > { %v4685_v52 = vadd.f32 %v4659_v27, %v4647_v40  ;;  %v4687_v3 = vadd.f32 %v4667_v28, %v4649_v53  ;;  %v5910_v9 = vpack.c.bf16 %v4681_v51, %v4680_v5  ;;  %v5911_v14 = vpack.c.bf16 %v4683_v1, %v4682_v7 }
 0x322   : > { %v5920_v13 = vpack.c.bf16 %v4684_v6, %v4680_v5  ;;  %v5928_v16 = vpack.c.bf16 %v4686_v8, %v4682_v7  ;;  %v4941_v30 = vmul.f32 %v4681_v51, %v4681_v51  ;;  %v4943_v27 = vmul.f32 %v4683_v1, %v4683_v1 }
 0x323   : > { %v5918_v0 = vpack.c.bf16 %v4685_v52, %v4681_v51  ;;  %v5926_v4 = vpack.c.bf16 %v4687_v3, %v4683_v1  ;;  %v5912_v11 = vpack.c.bf16 %v4685_v52, %v4684_v6  ;;  %v5913_v15 = vpack.c.bf16 %v4687_v3, %v4686_v8  ;;  %4740 = vst [vmem:[%s7736_s3 + $0x20] sm:$0xff] %v5910_v9 }
 0x324   : > { %4741 = vst [vmem:[%s7736_s3 + $0x28] sm:$0xff] %v5911_v14  ;;  %v4945_v31 = vmul.f32 %v4685_v52, %v4685_v52  ;;  %v5932_v28 = vpack.c.bf16 %v4936_v24, %v4932_v18  ;;  %v5940_v32 = vpack.c.bf16 %v4938_v26, %v4934_v25  ;;  %v4947_v33 = vmul.f32 %v4687_v3, %v4687_v3 }
 0x325   : > { %5919 = vmatprep.subr.bf16.mxu0 %v5918_v0  ;;  %5927 = vmatprep.subr.bf16.mxu1 %v5926_v4  ;;  %4742 = vst [vmem:[%s7736_s3 + $0x30] sm:$0xff] %v5912_v11  ;;  %4743 = vst [vmem:[%s7736_s3 + $0x38] sm:$0xff] %v5913_v15  ;;  %v4940_v37 = vmul.f32 %v4680_v5, %v4680_v5  ;;  %v4944_v38 = vmul.f32 %v4684_v6, %v4684_v6  ;;  %v4906_v44 = vunpack.c.0.s8 %v4905_v36 }
 0x326   : > { %5921 = vmatpush1.bf16.msra.mxu0 %v5920_v13  ;;  %5929 = vmatpush1.bf16.msra.mxu1 %v5928_v16  ;;  %v5934_v34 = vpack.c.bf16 %v4945_v31, %v4941_v30  ;;  %v5942_v39 = vpack.c.bf16 %v4947_v33, %v4943_v27  ;;  %v4942_v40 = vmul.f32 %v4682_v7, %v4682_v7 }
 0x327   : > { %5931 = vmatprep.subr.bf16.mxu0 %v5930_v19  ;;  %5939 = vmatprep.subr.bf16.mxu1 %v5938_v29  ;;  %v4946_v41 = vmul.f32 %v4686_v8, %v4686_v8  ;;  %v5936_v42 = vpack.c.bf16 %v4944_v38, %v4940_v37  ;;  %v4909_v46 = vsub.s32 %v4906_v44, %v7669_v21 }
 0x329   : > { %5892 = vmatmul.mubr.msk.f32.vlgmr.msra.gmra.mrb[0].mxu0 %vm4752_vm0, %v5891_v10  ;;  %5893 = vmatmul.mubr.msk.f32.vlgmr.msra.gmra.mrb[0].mxu1 %vm4752_vm0, %v5891_v10  ;;  %v5944_v43 = vpack.c.bf16 %v4946_v41, %v4942_v40 }
 0x32a   : > { %5933 = vmatpush1.bf16.msra.mxu0 %v5932_v28  ;;  %5941 = vmatpush1.bf16.msra.mxu1 %v5940_v32 }
 0x32b   : > { %5935 = vmatprep.subr.bf16.mxu0 %v5934_v34  ;;  %5012 = vmatprep.mubr.f32.mxu0 %v6910_v20 }
 0x32c   : > { %5943 = vmatprep.subr.bf16.mxu1 %v5942_v39  ;;  %5083 = vmatprep.mubr.f32.mxu1 %v6910_v20 }
 0x32e   : > { %5937 = vmatpush1.bf16.msra.mxu0 %v5936_v42  ;;  %5945 = vmatpush1.bf16.msra.mxu1 %v5944_v43 }
 0x331   : > { %5894 = vmatmul.mubr.msk.f32.vlgmr.msra.gmra.mrb[2].mxu0 %vm4752_vm0, %v5891_v10  ;;  %5895 = vmatmul.mubr.msk.f32.vlgmr.msra.gmra.mrb[2].mxu1 %vm4752_vm0, %v5891_v10 }
 0x3fc   : > { %v4822_v45 = vpop.f32.mrb[0].mxu0  ;;  %v4893_v47 = vpop.f32.mrb[0].mxu1 }
 0x3fd   : > { %v4824_v48 = vpop.f32.mrb[1].mxu0  ;;  %v4895_v50 = vpop.f32.mrb[1].mxu1 }
 0x3fe   : > { %v4902_v49 = vcombine.low %v4822_v45, %v4824_v48  ;;  %v4903_v51 = vcombine.low %v4893_v47, %v4895_v50 }
 0x400   : > { %v4910_v52 = vrot.slane %v4902_v49, %v4909_v46  ;;  %v4917_v53 = vrot.slane %v4903_v51, %v4909_v46 }
 0x402   : > { %v4918_v20 = vcombine.low %v4910_v52, %v4917_v53 }
 0x404   : > { %v4925_v54 = vrot.slane %v4918_v20, %v4909_v46  ;;  %v5014_v55 = vpop.f32.mrb[2].mxu0  ;;  %v5085_v56 = vpop.f32.mrb[2].mxu1 }
 0x405   : > { %v5016_v57 = vpop.f32.mrb[3].mxu0  ;;  %v5087_v59 = vpop.f32.mrb[3].mxu1 }
 0x406   : > { %4931 = vst.msk [vmem:[%s7737_s4] sm:$0xf] %vm4929_vm2, %v4925_v54  ;;  %v5094_v21 = vcombine.low %v5014_v55, %v5016_v57  ;;  %v5095_v61 = vcombine.low %v5085_v56, %v5087_v59 }
 0x408   : > { %v5102_v62 = vrot.slane %v5094_v21, %v4909_v46  ;;  %v5109_v63 = vrot.slane %v5095_v61, %v4909_v46 }
 0x40a   : > { %v5110_v58 = vcombine.low %v5102_v62, %v5109_v63 }
 0x40c   : > { %v5117_v60 = vrot.slane %v5110_v58, %v4909_v46 }
 0x40e   : > { %5119 = vst.msk [vmem:[%s7738_s5] sm:$0xf] %vm4929_vm2, %v5117_v60 }
 0x40f PF: > { %s16_s22 = sadd.s32 1, %s6907_s22   ;;  %s7739_s18 = smov %s6895_s19 }
 0x410   : > { %p13_p12 = scmp.ge.s32.totalorder %s16_s22, 4   ;;  %s7740_s19 = smov %s6977_s26 }
 0x411   : > { %s7741_s20 = smov %s6903_s21  ;;  %s7742_s21 = smov %s7744_s23 }
 0x412   :  { %15 = sbr.rel (!%p13_p12) target bundleno = 3 (0x3), region = 128 }

// kernel: _lambda_.15
= control target key start
LH: loop header
LB: loop body
LE: loop exit
PB: predicated region body
PF: predicated region fallthrough
CT: control target
= control target key end

     0   :  { %s3284_s12 = smov 0   ;;  %s3286_s13 = smov 0   ;;  %s3682_s0 = inlined_call_operand.vmem [shape: bf16[56,8192], index: 0, kind: input, shape index: {}]   ;;  %s3683_s1 = inlined_call_operand.vmem [shape: bf16[8192,128], index: 1, kind: input, shape index: {}]   ;;  %s3684_s2 = inlined_call_operand.vmem [shape: f32[1,128], index: 2, kind: input, shape index: {}]   ;;  %s3685_s3 = inlined_call_operand.vmem [shape: bf16[56,128], index: 3, kind: output, shape index: {}]  }
   0x1   :  { %s3288_s14 = smov 0   ;;  %s3290_s15 = smov 0  }
   0x2   :  { %s3292_s16 = smov 0  }
   0x3 LB: > { %s25_s17 = sadd.s32 1, %s3257_s15  ;;  %p48_p1 = scmp.ne.s32.totalorder %s3249_s13, %s3245_s12  ;;  %s3261_s16 = sphi %s3292_s16, %s13_s16   ;;  %s3257_s15 = sphi %s3290_s15, %s3689_s15   ;;  %s3253_s14 = sphi %s3288_s14, %s3688_s14   ;;  %s3249_s13 = sphi %s3286_s13, %s3687_s13   ;;  %s3245_s12 = sphi %s3284_s12, %s3686_s12  }
   0x4   : > { %p26_p0 = scmp.ge.s32.totalorder %s25_s17, 4  ;;  %p49_p2 = scmp.eq.s32.totalorder %s3261_s16, 0 }
   0x5   : > { %s41_s19 = sadd.s32 1, %s3249_s13  ;;  %p2479_p5 = scmp.ge.s32.totalorder %s3261_s16, 4 }
   0x6   : > { %s3691_s17 = smov (%p26_p0, %s25_s17), 0  ;;  %p50_p3 = por %p49_p2, %p48_p1 }
   0x7   : > { %s37_s18 = ssub.s32 %s3257_s15, %s3691_s17  ;;  %162 = sbr.rel (%p2479_p5) target bundleno = 47 (0x2f), region = 20 }
   0x8   : > { %p39_p4 = scmp.eq.s32.totalorder %s37_s18, 0 }
   0xa   : > { %s3319_s20 = scalar_select %p39_p4, %s3249_s13, %s41_s19  }
   0xe   : > { %165 = sbr.rel (!%p50_p3) target bundleno = 47 (0x2f), region = 24  ;;  %s167_s21 = sand.u32 (%p50_p3), 1, %s3249_s13  }
   0xf   : > { %s2691_s22 = sshll.u32 (%p50_p3), %s3257_s15, 6  ;;  %s3036_s23 = smul.u32 (%p50_p3), 448, %s167_s21 }
  0x10   : > { %s3327_s26 = scalar_lea.vmem (%p50_p3), %s3682_s0, %s2691_s22 }
  0x11   : > { %v188_v0 = vld [vmem:[%s3327_s26] sm:$0xff] (%p50_p3)  ;;  %v190_v1 = vld [vmem:[%s3327_s26 + $0x8] sm:$0xff] (%p50_p3)  ;;  %v192_v2 = vld [vmem:[%s3327_s26 + $0x10] sm:$0xff] (%p50_p3)  ;;  %s3335_s27 = scalar_lea.vmem (%p50_p3), [#allocation3], %s3036_s23 }
  0x12   : > { %v194_v3 = vld [vmem:[%s3327_s26 + $0x18] sm:$0xff] (%p50_p3)  ;;  %v196_v4 = vld [vmem:[%s3327_s26 + $0x20] sm:$0xff] (%p50_p3)  ;;  %v198_v5 = vld [vmem:[%s3327_s26 + $0x28] sm:$0xff] (%p50_p3)  ;;  %189 = vst [vmem:[%s3335_s27] sm:$0xff] (%p50_p3), %v188_v0 }
  0x13   : > { %191 = vst [vmem:[%s3335_s27 + $0x8] sm:$0xff] (%p50_p3), %v190_v1  ;;  %193 = vst [vmem:[%s3335_s27 + $0x10] sm:$0xff] (%p50_p3), %v192_v2  ;;  %v200_v6 = vld [vmem:[%s3327_s26 + $0x30] sm:$0xff] (%p50_p3)  ;;  %v202_v7 = vld [vmem:[%s3327_s26 + $0x38] sm:$0xff] (%p50_p3) }
  0x14   : > { %195 = vst [vmem:[%s3335_s27 + $0x18] sm:$0xff] (%p50_p3), %v194_v3  ;;  %197 = vst [vmem:[%s3335_s27 + $0x20] sm:$0xff] (%p50_p3), %v196_v4  ;;  %v204_v8 = vld [vmem:[%s3327_s26 + $0x100] sm:$0xff] (%p50_p3)  ;;  %v206_v9 = vld [vmem:[%s3327_s26 + $0x108] sm:$0xff] (%p50_p3) }
  0x15   : > { %199 = vst [vmem:[%s3335_s27 + $0x28] sm:$0xff] %v198_v5  ;;  %201 = vst [vmem:[%s3335_s27 + $0x30] sm:$0xff] %v200_v6  ;;  %v208_v10 = vld [vmem:[%s3327_s26 + $0x110] sm:$0xff]  ;;  %v210_v11 = vld [vmem:[%s3327_s26 + $0x118] sm:$0xff] }
  0x16   : > { %203 = vst [vmem:[%s3335_s27 + $0x38] sm:$0xff] %v202_v7  ;;  %205 = vst [vmem:[%s3335_s27 + $0x40] sm:$0xff] %v204_v8  ;;  %v212_v12 = vld [vmem:[%s3327_s26 + $0x120] sm:$0xff]  ;;  %v214_v13 = vld [vmem:[%s3327_s26 + $0x128] sm:$0xff] }
  0x17   : > { %207 = vst [vmem:[%s3335_s27 + $0x48] sm:$0xff] %v206_v9  ;;  %209 = vst [vmem:[%s3335_s27 + $0x50] sm:$0xff] %v208_v10  ;;  %v216_v14 = vld [vmem:[%s3327_s26 + $0x130] sm:$0xff]  ;;  %v218_v15 = vld [vmem:[%s3327_s26 + $0x138] sm:$0xff] }
  0x18   : > { %211 = vst [vmem:[%s3335_s27 + $0x58] sm:$0xff] %v210_v11  ;;  %213 = vst [vmem:[%s3335_s27 + $0x60] sm:$0xff] %v212_v12  ;;  %v220_v16 = vld [vmem:[%s3327_s26 + $0x200] sm:$0xff]  ;;  %v222_v17 = vld [vmem:[%s3327_s26 + $0x208] sm:$0xff] }
  0x19   : > { %215 = vst [vmem:[%s3335_s27 + $0x68] sm:$0xff] %v214_v13  ;;  %217 = vst [vmem:[%s3335_s27 + $0x70] sm:$0xff] %v216_v14  ;;  %v224_v18 = vld [vmem:[%s3327_s26 + $0x210] sm:$0xff]  ;;  %v226_v19 = vld [vmem:[%s3327_s26 + $0x218] sm:$0xff] }
  0x1a   : > { %219 = vst [vmem:[%s3335_s27 + $0x78] sm:$0xff] %v218_v15  ;;  %221 = vst [vmem:[%s3335_s27 + $0x80] sm:$0xff] %v220_v16  ;;  %v228_v20 = vld [vmem:[%s3327_s26 + $0x220] sm:$0xff]  ;;  %v230_v21 = vld [vmem:[%s3327_s26 + $0x228] sm:$0xff] }
  0x1b   : > { %223 = vst [vmem:[%s3335_s27 + $0x88] sm:$0xff] %v222_v17  ;;  %225 = vst [vmem:[%s3335_s27 + $0x90] sm:$0xff] %v224_v18  ;;  %v232_v22 = vld [vmem:[%s3327_s26 + $0x230] sm:$0xff]  ;;  %v234_v23 = vld [vmem:[%s3327_s26 + $0x238] sm:$0xff] }
  0x1c   : > { %227 = vst [vmem:[%s3335_s27 + $0x98] sm:$0xff] %v226_v19  ;;  %229 = vst [vmem:[%s3335_s27 + $0xa0] sm:$0xff] %v228_v20  ;;  %v236_v24 = vld [vmem:[%s3327_s26 + $0x300] sm:$0xff]  ;;  %v238_v25 = vld [vmem:[%s3327_s26 + $0x308] sm:$0xff] }
  0x1d   : > { %231 = vst [vmem:[%s3335_s27 + $0xa8] sm:$0xff] %v230_v21  ;;  %233 = vst [vmem:[%s3335_s27 + $0xb0] sm:$0xff] %v232_v22  ;;  %v240_v26 = vld [vmem:[%s3327_s26 + $0x310] sm:$0xff]  ;;  %v242_v27 = vld [vmem:[%s3327_s26 + $0x318] sm:$0xff] }
  0x1e   : > { %235 = vst [vmem:[%s3335_s27 + $0xb8] sm:$0xff] %v234_v23  ;;  %237 = vst [vmem:[%s3335_s27 + $0xc0] sm:$0xff] %v236_v24  ;;  %v244_v28 = vld [vmem:[%s3327_s26 + $0x320] sm:$0xff]  ;;  %v246_v29 = vld [vmem:[%s3327_s26 + $0x328] sm:$0xff] }
  0x1f   : > { %239 = vst [vmem:[%s3335_s27 + $0xc8] sm:$0xff] %v238_v25  ;;  %241 = vst [vmem:[%s3335_s27 + $0xd0] sm:$0xff] %v240_v26  ;;  %v248_v30 = vld [vmem:[%s3327_s26 + $0x330] sm:$0xff]  ;;  %v250_v31 = vld [vmem:[%s3327_s26 + $0x338] sm:$0xff] }
  0x20   : > { %243 = vst [vmem:[%s3335_s27 + $0xd8] sm:$0xff] %v242_v27  ;;  %245 = vst [vmem:[%s3335_s27 + $0xe0] sm:$0xff] %v244_v28  ;;  %v252_v32 = vld [vmem:[%s3327_s26 + $0x400] sm:$0xff]  ;;  %v254_v33 = vld [vmem:[%s3327_s26 + $0x408] sm:$0xff] }
  0x21   : > { %247 = vst [vmem:[%s3335_s27 + $0xe8] sm:$0xff] %v246_v29  ;;  %249 = vst [vmem:[%s3335_s27 + $0xf0] sm:$0xff] %v248_v30  ;;  %v256_v34 = vld [vmem:[%s3327_s26 + $0x410] sm:$0xff]  ;;  %v258_v35 = vld [vmem:[%s3327_s26 + $0x418] sm:$0xff] }
  0x22   : > { %251 = vst [vmem:[%s3335_s27 + $0xf8] sm:$0xff] %v250_v31  ;;  %253 = vst [vmem:[%s3335_s27 + $0x100] sm:$0xff] %v252_v32  ;;  %v260_v36 = vld [vmem:[%s3327_s26 + $0x420] sm:$0xff]  ;;  %v262_v37 = vld [vmem:[%s3327_s26 + $0x428] sm:$0xff] }
  0x23   : > { %255 = vst [vmem:[%s3335_s27 + $0x108] sm:$0xff] %v254_v33  ;;  %257 = vst [vmem:[%s3335_s27 + $0x110] sm:$0xff] %v256_v34  ;;  %v264_v38 = vld [vmem:[%s3327_s26 + $0x430] sm:$0xff]  ;;  %v266_v39 = vld [vmem:[%s3327_s26 + $0x438] sm:$0xff] }
  0x24   : > { %259 = vst [vmem:[%s3335_s27 + $0x118] sm:$0xff] %v258_v35  ;;  %261 = vst [vmem:[%s3335_s27 + $0x120] sm:$0xff] %v260_v36  ;;  %v268_v40 = vld [vmem:[%s3327_s26 + $0x500] sm:$0xff]  ;;  %v270_v41 = vld [vmem:[%s3327_s26 + $0x508] sm:$0xff] }
  0x25   : > { %263 = vst [vmem:[%s3335_s27 + $0x128] sm:$0xff] %v262_v37  ;;  %265 = vst [vmem:[%s3335_s27 + $0x130] sm:$0xff] %v264_v38  ;;  %v272_v42 = vld [vmem:[%s3327_s26 + $0x510] sm:$0xff]  ;;  %v274_v43 = vld [vmem:[%s3327_s26 + $0x518] sm:$0xff] }
  0x26   : > { %267 = vst [vmem:[%s3335_s27 + $0x138] sm:$0xff] %v266_v39  ;;  %269 = vst [vmem:[%s3335_s27 + $0x140] sm:$0xff] %v268_v40  ;;  %v276_v44 = vld [vmem:[%s3327_s26 + $0x520] sm:$0xff]  ;;  %v278_v45 = vld [vmem:[%s3327_s26 + $0x528] sm:$0xff] }
  0x27   : > { %271 = vst [vmem:[%s3335_s27 + $0x148] sm:$0xff] %v270_v41  ;;  %273 = vst [vmem:[%s3335_s27 + $0x150] sm:$0xff] %v272_v42  ;;  %v280_v46 = vld [vmem:[%s3327_s26 + $0x530] sm:$0xff]  ;;  %v282_v47 = vld [vmem:[%s3327_s26 + $0x538] sm:$0xff] }
  0x28   : > { %275 = vst [vmem:[%s3335_s27 + $0x158] sm:$0xff] %v274_v43  ;;  %277 = vst [vmem:[%s3335_s27 + $0x160] sm:$0xff] %v276_v44  ;;  %v284_v48 = vld [vmem:[%s3327_s26 + $0x600] sm:$0xff]  ;;  %v286_v49 = vld [vmem:[%s3327_s26 + $0x608] sm:$0xff] }
  0x29   : > { %279 = vst [vmem:[%s3335_s27 + $0x168] sm:$0xff] %v278_v45  ;;  %281 = vst [vmem:[%s3335_s27 + $0x170] sm:$0xff] %v280_v46  ;;  %v288_v50 = vld [vmem:[%s3327_s26 + $0x610] sm:$0xff]  ;;  %v290_v51 = vld [vmem:[%s3327_s26 + $0x618] sm:$0xff] }
  0x2a   : > { %283 = vst [vmem:[%s3335_s27 + $0x178] sm:$0xff] %v282_v47  ;;  %285 = vst [vmem:[%s3335_s27 + $0x180] sm:$0xff] %v284_v48  ;;  %v292_v52 = vld [vmem:[%s3327_s26 + $0x620] sm:$0xff]  ;;  %v294_v53 = vld [vmem:[%s3327_s26 + $0x628] sm:$0xff] }
  0x2b   : > { %287 = vst [vmem:[%s3335_s27 + $0x188] sm:$0xff] %v286_v49  ;;  %289 = vst [vmem:[%s3335_s27 + $0x190] sm:$0xff] %v288_v50  ;;  %v296_v54 = vld [vmem:[%s3327_s26 + $0x630] sm:$0xff]  ;;  %v298_v55 = vld [vmem:[%s3327_s26 + $0x638] sm:$0xff] }
  0x2c   : > { %291 = vst [vmem:[%s3335_s27 + $0x198] sm:$0xff] %v290_v51  ;;  %293 = vst [vmem:[%s3335_s27 + $0x1a0] sm:$0xff] %v292_v52 }
  0x2d   : > { %295 = vst [vmem:[%s3335_s27 + $0x1a8] sm:$0xff] %v294_v53  ;;  %297 = vst [vmem:[%s3335_s27 + $0x1b0] sm:$0xff] %v296_v54 }
  0x2e   : > { %299 = vst [vmem:[%s3335_s27 + $0x1b8] sm:$0xff] %v298_v55 }
  0x2f PF: > { %p2482_p6 = scmp.ge.s32.totalorder %s3261_s16, 1  ;;  %p316_p7 = scmp.lt.s32.totalorder %s3261_s16, 5 }
  0x31   : > { %p317_p8 = pnand %p2482_p6, %p316_p7 }
  0x32   : > { %s323_s28 = sand.u32 (!%p317_p8), 1, %s3245_s12   ;;  %s2483_s29 = sshll.u32 (!%p317_p8), %s3253_s14, 8 }
  0x33   : > { %320 = sbr.rel (%p317_p8) target bundleno = 453 (0x1c5), region = 51  ;;  %p363_p9 = scmp.lt.s32.totalorder (!%p317_p8), %s2483_s29, 1023 }
  0x34   : > { %s3037_s30 = smul.u32 (!%p317_p8), 448, %s323_s28  ;;  %p2485_p10 = scmp.ne.s32.totalorder (!%p317_p8), %s3253_s14, 0 }
  0x36   : > { %s3452_s8 = scalar_lea.vmem (!%p317_p8), [#allocation3], %s3037_s30 }
  0x3a   : > { %s3693_s29 = smov (!%p363_p9, %s2483_s29), 1023  ;;  %387 = sbr.rel (%p2485_p10) target bundleno = 65 (0x41), region = 59 }
  0x3b   : > { %s2484_s4 = sshll.u32 %s3693_s29, 2  ;;  %v3263_v56 = vmov (!%p2485_p10), 0.0  }
  0x3c   : > { %s3450_s7 = scalar_lea.vmem %s3683_s1, %s2484_s4  ;;  %388 = vst [vmem:[#allocation2] sm:$0xff] (!%p2485_p10), %v3263_v56  ;;  %389 = vst [vmem:[#allocation2 + $0x8] sm:$0xff] (!%p2485_p10), %v3263_v56 }
  0x3d   : > { %390 = vst [vmem:[#allocation2 + $0x10] sm:$0xff] (!%p2485_p10), %v3263_v56  ;;  %391 = vst [vmem:[#allocation2 + $0x18] sm:$0xff] (!%p2485_p10), %v3263_v56 }
  0x3e   : > { %392 = vst [vmem:[#allocation2 + $0x20] sm:$0xff] (!%p2485_p10), %v3263_v56  ;;  %393 = vst [vmem:[#allocation2 + $0x28] sm:$0xff] (!%p2485_p10), %v3263_v56 }
  0x3f   : > { %394 = vst [vmem:[#allocation2 + $0x30] sm:$0xff] (!%p2485_p10), %v3263_v56 }
  0x41 PF: > { %v3079_v57 = vld [vmem:[%s3450_s7 + $0x40] sm:$0xff]   ;;  %v3083_v61 = vld [vmem:[%s3450_s7 + $0x48] sm:$0xff]   ;;  %v3087_v1 = vld [vmem:[%s3450_s7 + $0x50] sm:$0xff]   ;;  %p2678_p11 = scmp.ne.s32.totalorder %s3253_s14, 3 }
  0x42   : > { %v3080_v58 = vld [vmem:[%s3450_s7 + $0xc0] sm:$0xff]   ;;  %2716 = vmatprep.subr.bf16.mxu0 %v3079_v57  ;;  %v3084_v62 = vld [vmem:[%s3450_s7 + $0xc8] sm:$0xff]   ;;  %v3088_v2 = vld [vmem:[%s3450_s7 + $0xd0] sm:$0xff]  }
  0x43   : > { %v3081_v59 = vld [vmem:[%s3450_s7] sm:$0xff]   ;;  %2756 = vmatprep.subr.bf16.mxu1 %v3080_v58  ;;  %v3085_v63 = vld [vmem:[%s3450_s7 + $0x8] sm:$0xff]   ;;  %v3089_v3 = vld [vmem:[%s3450_s7 + $0x10] sm:$0xff]  }
  0x44   : > { %v3082_v60 = vld [vmem:[%s3450_s7 + $0x80] sm:$0xff]   ;;  %2717 = vmatpush3.bf16.msra.mxu0 %v3081_v59  ;;  %v3086_v0 = vld [vmem:[%s3450_s7 + $0x88] sm:$0xff]   ;;  %v3090_v4 = vld [vmem:[%s3450_s7 + $0x90] sm:$0xff]  }
  0x45   : > { %2757 = vmatpush3.bf16.msra.mxu1 %v3082_v60  ;;  %2718 = vmatprep.subr.bf16.mxu0 %v3083_v61  ;;  %v3091_v5 = vld [vmem:[%s3450_s7 + $0x58] sm:$0xff]   ;;  %v3095_v9 = vld [vmem:[%s3450_s7 + $0x60] sm:$0xff]   ;;  %v3099_v13 = vld [vmem:[%s3450_s7 + $0x68] sm:$0xff]  }
  0x46   : > { %2758 = vmatprep.subr.bf16.mxu1 %v3084_v62  ;;  %v3092_v6 = vld [vmem:[%s3450_s7 + $0xd8] sm:$0xff]   ;;  %v3096_v10 = vld [vmem:[%s3450_s7 + $0xe0] sm:$0xff]   ;;  %v3100_v14 = vld [vmem:[%s3450_s7 + $0xe8] sm:$0xff]  }
  0x47   : > { %v3093_v7 = vld [vmem:[%s3450_s7 + $0x18] sm:$0xff]   ;;  %v3097_v11 = vld [vmem:[%s3450_s7 + $0x20] sm:$0xff]   ;;  %v3101_v15 = vld [vmem:[%s3450_s7 + $0x28] sm:$0xff]  }
  0x48   : > { %2719 = vmatpush3.bf16.msra.mxu0 %v3085_v63  ;;  %v3094_v8 = vld [vmem:[%s3450_s7 + $0x98] sm:$0xff]   ;;  %v3098_v12 = vld [vmem:[%s3450_s7 + $0xa0] sm:$0xff]   ;;  %v3102_v16 = vld [vmem:[%s3450_s7 + $0xa8] sm:$0xff]  }
  0x49   : > { %2759 = vmatpush3.bf16.msra.mxu1 %v3086_v0  ;;  %2720 = vmatprep.subr.bf16.mxu0 %v3087_v1  ;;  %v3103_v17 = vld [vmem:[%s3450_s7 + $0x70] sm:$0xff]   ;;  %v3107_v21 = vld [vmem:[%s3450_s7 + $0x78] sm:$0xff]   ;;  %v403_v27 = vld [vmem:[%s3452_s8 + $0x8] sm:$0xff] }
  0x4a   : > { %2760 = vmatprep.subr.bf16.mxu1 %v3088_v2  ;;  %v3104_v18 = vld [vmem:[%s3450_s7 + $0xf0] sm:$0xff]   ;;  %v3108_v22 = vld [vmem:[%s3450_s7 + $0xf8] sm:$0xff]   ;;  %v411_v30 = vld [vmem:[%s3452_s8 + $0x48] sm:$0xff] }
  0x4b   : > { %v3105_v19 = vld [vmem:[%s3450_s7 + $0x30] sm:$0xff]   ;;  %v3109_v23 = vld [vmem:[%s3450_s7 + $0x38] sm:$0xff]   ;;  %v2488_v31 = vcombine.low %v403_v27, %v411_v30  ;;  %v2489_v32 = vcombine.high %v403_v27, %v411_v30  ;;  %v3111_v33 = vld [vmem:[%s3450_s7 + $0x140] sm:$0xff]  }
  0x4c   : > { %2721 = vmatpush3.bf16.msra.mxu0 %v3089_v3  ;;  %v3106_v20 = vld [vmem:[%s3450_s7 + $0xb0] sm:$0xff]   ;;  %v3110_v24 = vld [vmem:[%s3450_s7 + $0xb8] sm:$0xff]   ;;  %v3112_v34 = vld [vmem:[%s3450_s7 + $0x1c0] sm:$0xff]  }
  0x4d   : > { %2761 = vmatpush3.bf16.msra.mxu1 %v3090_v4  ;;  %2722 = vmatprep.subr.bf16.mxu0 %v3091_v5  ;;  %v402_v25 = vld [vmem:[%s3452_s8] sm:$0xff]  ;;  %v3113_v35 = vld [vmem:[%s3450_s7 + $0x100] sm:$0xff]   ;;  %v3115_v37 = vld [vmem:[%s3450_s7 + $0x148] sm:$0xff]  }
  0x4e   : > { %2762 = vmatprep.subr.bf16.mxu1 %v3092_v6  ;;  %v410_v26 = vld [vmem:[%s3452_s8 + $0x40] sm:$0xff]  ;;  %1874 = vmatprep.mubr.bf16.mxu1 %v2489_v32  ;;  %v3114_v36 = vld [vmem:[%s3450_s7 + $0x180] sm:$0xff]   ;;  %v3116_v38 = vld [vmem:[%s3450_s7 + $0x1c8] sm:$0xff]  }
  0x4f   : > { %v2486_v28 = vcombine.low %v402_v25, %v410_v26  ;;  %v2487_v29 = vcombine.high %v402_v25, %v410_v26  ;;  %v3117_v39 = vld [vmem:[%s3450_s7 + $0x108] sm:$0xff]   ;;  %v418_v41 = vld [vmem:[%s3452_s8 + $0x80] sm:$0xff]  ;;  %v419_v44 = vld [vmem:[%s3452_s8 + $0x88] sm:$0xff] }
  0x50   : > { %2723 = vmatpush3.bf16.msra.mxu0 %v3093_v7  ;;  %v3118_v40 = vld [vmem:[%s3450_s7 + $0x188] sm:$0xff]   ;;  %v426_v42 = vld [vmem:[%s3452_s8 + $0xc0] sm:$0xff]  ;;  %v427_v45 = vld [vmem:[%s3452_s8 + $0xc8] sm:$0xff] }
  0x51   : > { %2763 = vmatpush3.bf16.msra.mxu1 %v3094_v8  ;;  %2724 = vmatprep.subr.bf16.mxu0 %v3095_v9  ;;  %v2503_v43 = vcombine.high %v418_v41, %v426_v42  ;;  %v2502_v46 = vcombine.low %v418_v41, %v426_v42  ;;  %v2505_v47 = vcombine.high %v419_v44, %v427_v45  ;;  %v3119_v49 = vld [vmem:[%s3450_s7 + $0x150] sm:$0xff]   ;;  %v3123_v53 = vld [vmem:[%s3450_s7 + $0x158] sm:$0xff]   ;;  %v435_v59 = vld [vmem:[%s3452_s8 + $0x108] sm:$0xff] }
  0x52   : > { %2764 = vmatprep.subr.bf16.mxu1 %v3096_v10  ;;  %1810 = vmatprep.mubr.bf16.mxu0 %v2487_v29  ;;  %v2504_v48 = vcombine.low %v419_v44, %v427_v45  ;;  %v3120_v50 = vld [vmem:[%s3450_s7 + $0x1d0] sm:$0xff]   ;;  %v3124_v54 = vld [vmem:[%s3450_s7 + $0x1d8] sm:$0xff]   ;;  %v443_v60 = vld [vmem:[%s3452_s8 + $0x148] sm:$0xff] }
  0x53   : > { %v3121_v51 = vld [vmem:[%s3450_s7 + $0x110] sm:$0xff]   ;;  %v3125_v55 = vld [vmem:[%s3450_s7 + $0x118] sm:$0xff]   ;;  %v2521_v62 = vcombine.high %v435_v59, %v443_v60  ;;  %v2520_v0 = vcombine.low %v435_v59, %v443_v60  ;;  %v3127_v1 = vld [vmem:[%s3450_s7 + $0x160] sm:$0xff]  }
  0x54   : > { %2725 = vmatpush3.bf16.msra.mxu0 %v3097_v11  ;;  %v3122_v52 = vld [vmem:[%s3450_s7 + $0x190] sm:$0xff]   ;;  %v3126_v56 = vld [vmem:[%s3450_s7 + $0x198] sm:$0xff]   ;;  %v3128_v2 = vld [vmem:[%s3450_s7 + $0x1e0] sm:$0xff]  }
  0x55   : > { %2765 = vmatpush3.bf16.msra.mxu1 %v3098_v12  ;;  %2726 = vmatprep.subr.bf16.mxu0 %v3099_v13  ;;  %v434_v57 = vld [vmem:[%s3452_s8 + $0x100] sm:$0xff]  ;;  %v3129_v3 = vld [vmem:[%s3450_s7 + $0x120] sm:$0xff]   ;;  %v3131_v5 = vld [vmem:[%s3450_s7 + $0x168] sm:$0xff]  }
  0x56   : > { %2766 = vmatprep.subr.bf16.mxu1 %v3100_v14  ;;  %v442_v58 = vld [vmem:[%s3452_s8 + $0x140] sm:$0xff]  ;;  %v3130_v4 = vld [vmem:[%s3450_s7 + $0x1a0] sm:$0xff]   ;;  %v3132_v6 = vld [vmem:[%s3450_s7 + $0x1e8] sm:$0xff]  }
  0x57   : > { %v2519_v61 = vcombine.high %v434_v57, %v442_v58  ;;  %v2518_v63 = vcombine.low %v434_v57, %v442_v58  ;;  %v3133_v7 = vld [vmem:[%s3450_s7 + $0x128] sm:$0xff]   ;;  %v450_v9 = vld [vmem:[%s3452_s8 + $0x180] sm:$0xff]  ;;  %v451_v10 = vld [vmem:[%s3452_s8 + $0x188] sm:$0xff] }
  0x58   : > { %2727 = vmatpush3.bf16.msra.mxu0 %v3101_v15  ;;  %v3134_v8 = vld [vmem:[%s3450_s7 + $0x1a8] sm:$0xff]   ;;  %v2535_v11 = vcombine.high %v450_v9, %v450_v9  ;;  %v2537_v12 = vcombine.high %v451_v10, %v451_v10  ;;  %v2534_v13 = vcombine.low %v450_v9, %v450_v9  ;;  %v3139_v14 = vld [vmem:[%s3450_s7 + $0x170] sm:$0xff]   ;;  %v2536_v15 = vcombine.low %v451_v10, %v451_v10  ;;  %v3147_v30 = vld [vmem:[%s3450_s7 + $0x240] sm:$0xff]  }
  0x59   : > { %2767 = vmatpush3.bf16.msra.mxu1 %v3102_v16  ;;  %2728 = vmatprep.subr.bf16.mxu0 %v3103_v17  ;;  %v3140_v16 = vld [vmem:[%s3450_s7 + $0x1f0] sm:$0xff]   ;;  %v3148_v32 = vld [vmem:[%s3450_s7 + $0x2c0] sm:$0xff]  }
  0x5a   : > { %2768 = vmatprep.subr.bf16.mxu1 %v3104_v18  ;;  %v3141_v17 = vld [vmem:[%s3450_s7 + $0x130] sm:$0xff]  }
  0x5b   : > { %v3142_v18 = vld [vmem:[%s3450_s7 + $0x1b0] sm:$0xff]  }
  0x5c   : > { %2729 = vmatpush3.bf16.msra.mxu0 %v3105_v19  ;;  %v3143_v19 = vld [vmem:[%s3450_s7 + $0x178] sm:$0xff]   ;;  %v405_v25 = vld [vmem:[%s3452_s8 + $0x18] sm:$0xff] }
  0x5d   : > { %2769 = vmatpush3.bf16.msra.mxu1 %v3106_v20  ;;  %2730 = vmatprep.subr.bf16.mxu0 %v3107_v21  ;;  %v3144_v20 = vld [vmem:[%s3450_s7 + $0x1f8] sm:$0xff]   ;;  %v413_v26 = vld [vmem:[%s3452_s8 + $0x58] sm:$0xff] }
  0x5e   : > { %2770 = vmatprep.subr.bf16.mxu1 %v3108_v22  ;;  %v3145_v21 = vld [vmem:[%s3450_s7 + $0x138] sm:$0xff]   ;;  %v2492_v29 = vcombine.low %v405_v25, %v413_v26  ;;  %v421_v41 = vld [vmem:[%s3452_s8 + $0x98] sm:$0xff] }
  0x5f   : > { %v3146_v22 = vld [vmem:[%s3450_s7 + $0x1b8] sm:$0xff]   ;;  %v437_v58 = vld [vmem:[%s3452_s8 + $0x118] sm:$0xff] }
  0x60   : > { %2731 = vmatpush3.bf16.msra.mxu0 %v3109_v23  ;;  %v404_v23 = vld [vmem:[%s3452_s8 + $0x10] sm:$0xff]  ;;  %v445_v59 = vld [vmem:[%s3452_s8 + $0x158] sm:$0xff] }
  0x61   : > { %2771 = vmatpush3.bf16.msra.mxu1 %v3110_v24  ;;  %2796 = vmatprep.subr.bf16.mxu0 %v3111_v33  ;;  %v412_v24 = vld [vmem:[%s3452_s8 + $0x50] sm:$0xff]  ;;  %v3149_v33 = vld [vmem:[%s3450_s7 + $0x200] sm:$0xff]   ;;  %v453_v9 = vld [vmem:[%s3452_s8 + $0x198] sm:$0xff] }
  0x62   : > { %2836 = vmatprep.subr.bf16.mxu1 %v3112_v34  ;;  %v2490_v27 = vcombine.low %v404_v23, %v412_v24  ;;  %v3150_v34 = vld [vmem:[%s3450_s7 + $0x280] sm:$0xff]  }
  0x63   : > { %1811 = vmatmul.mubr.bf16.vlgmr.msra.gmra.mrb[0].mxu0 %v2486_v28  ;;  %v2491_v28 = vcombine.high %v404_v23, %v412_v24 }
  0x64   : > { %1875 = vmatmul.mubr.bf16.vlgmr.msra.gmra.mrb[0].mxu1 %v2488_v31  ;;  %2797 = vmatpush3.bf16.msra.mxu0 %v3113_v35  ;;  %v2493_v31 = vcombine.high %v405_v25, %v413_v26  ;;  %v3151_v35 = vld [vmem:[%s3450_s7 + $0x248] sm:$0xff]   ;;  %v407_v25 = vld [vmem:[%s3452_s8 + $0x28] sm:$0xff] }
  0x65   : > { %2837 = vmatpush3.bf16.msra.mxu1 %v3114_v36  ;;  %2798 = vmatprep.subr.bf16.mxu0 %v3115_v37  ;;  %v3152_v36 = vld [vmem:[%s3450_s7 + $0x2c8] sm:$0xff]   ;;  %v415_v26 = vld [vmem:[%s3452_s8 + $0x68] sm:$0xff] }
  0x66   : > { %2838 = vmatprep.subr.bf16.mxu1 %v3116_v38  ;;  %1818 = vmatprep.mubr.bf16.mxu0 %v2503_v43  ;;  %v3153_v37 = vld [vmem:[%s3450_s7 + $0x208] sm:$0xff]   ;;  %v429_v43 = vld [vmem:[%s3452_s8 + $0xd8] sm:$0xff] }
  0x67   : > { %1882 = vmatprep.mubr.bf16.mxu1 %v2505_v47  ;;  %v3154_v38 = vld [vmem:[%s3450_s7 + $0x288] sm:$0xff]   ;;  %v2509_v45 = vcombine.high %v421_v41, %v429_v43  ;;  %v3155_v47 = vld [vmem:[%s3450_s7 + $0x250] sm:$0xff]  }
  0x68   : > { %2799 = vmatpush3.bf16.msra.mxu0 %v3117_v39  ;;  %v420_v39 = vld [vmem:[%s3452_s8 + $0x90] sm:$0xff] }
  0x69   : > { %2839 = vmatpush3.bf16.msra.mxu1 %v3118_v40  ;;  %2800 = vmatprep.subr.bf16.mxu0 %v3119_v49  ;;  %v428_v40 = vld [vmem:[%s3452_s8 + $0xd0] sm:$0xff]  ;;  %v3157_v49 = vld [vmem:[%s3450_s7 + $0x210] sm:$0xff]  }
  0x6a   : > { %2840 = vmatprep.subr.bf16.mxu1 %v3120_v50  ;;  %v2507_v42 = vcombine.high %v420_v39, %v428_v40  ;;  %v2506_v44 = vcombine.low %v420_v39, %v428_v40  ;;  %v3158_v50 = vld [vmem:[%s3450_s7 + $0x290] sm:$0xff]   ;;  %v423_v39 = vld [vmem:[%s3452_s8 + $0xa8] sm:$0xff] }
  0x6b   : > { %1819 = vmatmul.mubr.bf16.gmra.mrb[4].mxu0 %v2502_v46  ;;  %v2508_v46 = vcombine.low %v421_v41, %v429_v43  ;;  %v431_v40 = vld [vmem:[%s3452_s8 + $0xe8] sm:$0xff] }
  0x6c   : > { %1883 = vmatmul.mubr.bf16.gmra.mrb[4].mxu1 %v2504_v48  ;;  %2801 = vmatpush3.bf16.msra.mxu0 %v3121_v51  ;;  %v3156_v48 = vld [vmem:[%s3450_s7 + $0x2d0] sm:$0xff]   ;;  %v3159_v51 = vld [vmem:[%s3450_s7 + $0x258] sm:$0xff]  }
  0x6d   : > { %2841 = vmatpush3.bf16.msra.mxu1 %v3122_v52  ;;  %2802 = vmatprep.subr.bf16.mxu0 %v3123_v53  ;;  %v3160_v52 = vld [vmem:[%s3450_s7 + $0x2d8] sm:$0xff]  }
  0x6e   : > { %2842 = vmatprep.subr.bf16.mxu1 %v3124_v54  ;;  %1826 = vmatprep.mubr.bf16.mxu0 %v2519_v61  ;;  %v3161_v53 = vld [vmem:[%s3450_s7 + $0x218] sm:$0xff]   ;;  %v2525_v61 = vcombine.high %v437_v58, %v445_v59 }
  0x6f   : > { %1890 = vmatprep.mubr.bf16.mxu1 %v2521_v62  ;;  %v3162_v54 = vld [vmem:[%s3450_s7 + $0x298] sm:$0xff]   ;;  %v2524_v62 = vcombine.low %v437_v58, %v445_v59 }
  0x70   : > { %2803 = vmatpush3.bf16.msra.mxu0 %v3125_v55  ;;  %v436_v55 = vld [vmem:[%s3452_s8 + $0x110] sm:$0xff] }
  0x71   : > { %2843 = vmatpush3.bf16.msra.mxu1 %v3126_v56  ;;  %2804 = vmatprep.subr.bf16.mxu0 %v3127_v1  ;;  %v444_v56 = vld [vmem:[%s3452_s8 + $0x150] sm:$0xff]  ;;  %v3165_v1 = vld [vmem:[%s3450_s7 + $0x220] sm:$0xff]  }
  0x72   : > { %2844 = vmatprep.subr.bf16.mxu1 %v3128_v2  ;;  %v2523_v57 = vcombine.high %v436_v55, %v444_v56  ;;  %v2522_v60 = vcombine.low %v436_v55, %v444_v56  ;;  %v3166_v2 = vld [vmem:[%s3450_s7 + $0x2a0] sm:$0xff]  }
  0x73   : > { %1827 = vmatmul.mubr.bf16.gmra.mrb[8].mxu0 %v2518_v63  ;;  %v3163_v63 = vld [vmem:[%s3450_s7 + $0x260] sm:$0xff]  }
  0x74   : > { %1891 = vmatmul.mubr.bf16.gmra.mrb[8].mxu1 %v2520_v0  ;;  %2805 = vmatpush3.bf16.msra.mxu0 %v3129_v3  ;;  %v3164_v0 = vld [vmem:[%s3450_s7 + $0x2e0] sm:$0xff]   ;;  %v3167_v3 = vld [vmem:[%s3450_s7 + $0x268] sm:$0xff]  }
  0x75   : > { %2845 = vmatpush3.bf16.msra.mxu1 %v3130_v4  ;;  %2806 = vmatprep.subr.bf16.mxu0 %v3131_v5  ;;  %v3168_v4 = vld [vmem:[%s3450_s7 + $0x2e8] sm:$0xff]   ;;  %v439_v55 = vld [vmem:[%s3452_s8 + $0x128] sm:$0xff] }
  0x76   : > { %2846 = vmatprep.subr.bf16.mxu1 %v3132_v6  ;;  %1834 = vmatprep.mubr.bf16.mxu0 %v2535_v11  ;;  %v3169_v5 = vld [vmem:[%s3450_s7 + $0x228] sm:$0xff]   ;;  %v2541_v11 = vcombine.high %v453_v9, %v453_v9 }
  0x77   : > { %1898 = vmatprep.mubr.bf16.mxu1 %v2537_v12  ;;  %v3170_v6 = vld [vmem:[%s3450_s7 + $0x2a8] sm:$0xff]   ;;  %v2540_v12 = vcombine.low %v453_v9, %v453_v9 }
  0x78   : > { %2807 = vmatpush3.bf16.msra.mxu0 %v3133_v7  ;;  %v452_v7 = vld [vmem:[%s3452_s8 + $0x190] sm:$0xff] }
  0x79   : > { %2847 = vmatpush3.bf16.msra.mxu1 %v3134_v8  ;;  %2808 = vmatprep.subr.bf16.mxu0 %v3139_v14  ;;  %v2539_v8 = vcombine.high %v452_v7, %v452_v7  ;;  %v2538_v10 = vcombine.low %v452_v7, %v452_v7  ;;  %v3176_v14 = vld [vmem:[%s3450_s7 + $0x2f0] sm:$0xff]  }
  0x7a   : > { %2848 = vmatprep.subr.bf16.mxu1 %v3140_v16  ;;  %v3178_v16 = vld [vmem:[%s3450_s7 + $0x2b0] sm:$0xff]  }
  0x7b   : > { %1835 = vmatmul.mubr.bf16.gmra.mrb[12].mxu0 %v2534_v13  ;;  %v3175_v13 = vld [vmem:[%s3450_s7 + $0x270] sm:$0xff]  }
  0x7c   : > { %1899 = vmatmul.mubr.bf16.gmra.mrb[12].mxu1 %v2536_v15  ;;  %2809 = vmatpush3.bf16.msra.mxu0 %v3141_v17  ;;  %v3177_v15 = vld [vmem:[%s3450_s7 + $0x230] sm:$0xff]   ;;  %v3179_v17 = vld [vmem:[%s3450_s7 + $0x278] sm:$0xff]  }
  0x7d   : > { %2849 = vmatpush3.bf16.msra.mxu1 %v3142_v18  ;;  %2810 = vmatprep.subr.bf16.mxu0 %v3143_v19  ;;  %v3180_v18 = vld [vmem:[%s3450_s7 + $0x2f8] sm:$0xff]  }
  0x7e   : > { %2850 = vmatprep.subr.bf16.mxu1 %v3144_v20  ;;  %1938 = vmatprep.mubr.bf16.mxu0 %v2491_v28  ;;  %v3181_v19 = vld [vmem:[%s3450_s7 + $0x238] sm:$0xff]   ;;  %v2497_v28 = vcombine.high %v407_v25, %v415_v26 }
  0x7f   : > { %2002 = vmatprep.mubr.bf16.mxu1 %v2493_v31  ;;  %v3182_v20 = vld [vmem:[%s3450_s7 + $0x2b8] sm:$0xff]   ;;  %v3185_v31 = vld [vmem:[%s3450_s7 + $0x300] sm:$0xff]  }
  0x80   : > { %2811 = vmatpush3.bf16.msra.mxu0 %v3145_v21  ;;  %v406_v21 = vld [vmem:[%s3452_s8 + $0x20] sm:$0xff] }
  0x81   : > { %2851 = vmatpush3.bf16.msra.mxu1 %v3146_v22  ;;  %2876 = vmatprep.subr.bf16.mxu0 %v3147_v30  ;;  %v414_v22 = vld [vmem:[%s3452_s8 + $0x60] sm:$0xff]  ;;  %v3184_v30 = vld [vmem:[%s3450_s7 + $0x3c0] sm:$0xff]  }
  0x82   : > { %2916 = vmatprep.subr.bf16.mxu1 %v3148_v32  ;;  %v2494_v23 = vcombine.low %v406_v21, %v414_v22  ;;  %v2495_v24 = vcombine.high %v406_v21, %v414_v22  ;;  %v3186_v32 = vld [vmem:[%s3450_s7 + $0x380] sm:$0xff]   ;;  %v409_v21 = vld [vmem:[%s3452_s8 + $0x38] sm:$0xff] }
  0x83   : > { %1939 = vmatmul.mubr.bf16.vlgmr.msra.gmra.mrb[16].mxu0 %v2490_v27  ;;  %v2496_v27 = vcombine.low %v407_v25, %v415_v26  ;;  %v424_v25 = vld [vmem:[%s3452_s8 + $0xb0] sm:$0xff] }
  0x84   : > { %2003 = vmatmul.mubr.bf16.vlgmr.msra.gmra.mrb[16].mxu1 %v2492_v29  ;;  %2877 = vmatpush3.bf16.msra.mxu0 %v3149_v33  ;;  %v3183_v29 = vld [vmem:[%s3450_s7 + $0x340] sm:$0xff]   ;;  %v3187_v33 = vld [vmem:[%s3450_s7 + $0x348] sm:$0xff]  }
  0x85   : > { %2917 = vmatpush3.bf16.msra.mxu1 %v3150_v34  ;;  %2878 = vmatprep.subr.bf16.mxu0 %v3151_v35  ;;  %v3188_v34 = vld [vmem:[%s3450_s7 + $0x3c8] sm:$0xff]  }
  0x86   : > { %2918 = vmatprep.subr.bf16.mxu1 %v3152_v36  ;;  %1946 = vmatprep.mubr.bf16.mxu0 %v2507_v42  ;;  %v3189_v35 = vld [vmem:[%s3450_s7 + $0x308] sm:$0xff]   ;;  %v2513_v42 = vcombine.high %v423_v39, %v431_v40 }
  0x87   : > { %2010 = vmatprep.mubr.bf16.mxu1 %v2509_v45  ;;  %v3190_v36 = vld [vmem:[%s3450_s7 + $0x388] sm:$0xff]   ;;  %v3191_v45 = vld [vmem:[%s3450_s7 + $0x350] sm:$0xff]  }
  0x88   : > { %2879 = vmatpush3.bf16.msra.mxu0 %v3153_v37  ;;  %v422_v37 = vld [vmem:[%s3452_s8 + $0xa0] sm:$0xff]  ;;  %v432_v26 = vld [vmem:[%s3452_s8 + $0xf0] sm:$0xff] }
  0x89   : > { %2919 = vmatpush3.bf16.msra.mxu1 %v3154_v38  ;;  %2880 = vmatprep.subr.bf16.mxu0 %v3155_v47  ;;  %v430_v38 = vld [vmem:[%s3452_s8 + $0xe0] sm:$0xff]  ;;  %v3193_v47 = vld [vmem:[%s3450_s7 + $0x310] sm:$0xff]  }
  0x8a   : > { %2920 = vmatprep.subr.bf16.mxu1 %v3156_v48  ;;  %v2511_v41 = vcombine.high %v422_v37, %v430_v38  ;;  %v2510_v43 = vcombine.low %v422_v37, %v430_v38  ;;  %v3194_v48 = vld [vmem:[%s3450_s7 + $0x390] sm:$0xff]   ;;  %v2514_v37 = vcombine.low %v424_v25, %v432_v26 }
  0x8b   : > { %1947 = vmatmul.mubr.bf16.gmra.mrb[20].mxu0 %v2506_v44  ;;  %v2512_v44 = vcombine.low %v423_v39, %v431_v40 }
  0x8c   : > { %2011 = vmatmul.mubr.bf16.gmra.mrb[20].mxu1 %v2508_v46  ;;  %2881 = vmatpush3.bf16.msra.mxu0 %v3157_v49  ;;  %v3192_v46 = vld [vmem:[%s3450_s7 + $0x3d0] sm:$0xff]   ;;  %v3195_v49 = vld [vmem:[%s3450_s7 + $0x358] sm:$0xff]  }
  0x8d   : > { %2921 = vmatpush3.bf16.msra.mxu1 %v3158_v50  ;;  %2882 = vmatprep.subr.bf16.mxu0 %v3159_v51  ;;  %v3196_v50 = vld [vmem:[%s3450_s7 + $0x3d8] sm:$0xff]  }
  0x8e   : > { %2922 = vmatprep.subr.bf16.mxu1 %v3160_v52  ;;  %1954 = vmatprep.mubr.bf16.mxu0 %v2523_v57  ;;  %v3197_v51 = vld [vmem:[%s3450_s7 + $0x318] sm:$0xff]   ;;  %v447_v57 = vld [vmem:[%s3452_s8 + $0x168] sm:$0xff] }
  0x8f   : > { %2018 = vmatprep.mubr.bf16.mxu1 %v2525_v61  ;;  %v3198_v52 = vld [vmem:[%s3450_s7 + $0x398] sm:$0xff]   ;;  %v2529_v59 = vcombine.high %v439_v55, %v447_v57  ;;  %v3199_v61 = vld [vmem:[%s3450_s7 + $0x360] sm:$0xff]  }
  0x90   : > { %2883 = vmatpush3.bf16.msra.mxu0 %v3161_v53  ;;  %v438_v53 = vld [vmem:[%s3452_s8 + $0x120] sm:$0xff] }
  0x91   : > { %2923 = vmatpush3.bf16.msra.mxu1 %v3162_v54  ;;  %2884 = vmatprep.subr.bf16.mxu0 %v3163_v63  ;;  %v446_v54 = vld [vmem:[%s3452_s8 + $0x160] sm:$0xff]  ;;  %v3201_v63 = vld [vmem:[%s3450_s7 + $0x320] sm:$0xff]  }
  0x92   : > { %2924 = vmatprep.subr.bf16.mxu1 %v3164_v0  ;;  %v2527_v56 = vcombine.high %v438_v53, %v446_v54  ;;  %v2526_v58 = vcombine.low %v438_v53, %v446_v54  ;;  %v3202_v0 = vld [vmem:[%s3450_s7 + $0x3a0] sm:$0xff]  }
  0x93   : > { %1955 = vmatmul.mubr.bf16.gmra.mrb[24].mxu0 %v2522_v60  ;;  %v2528_v60 = vcombine.low %v439_v55, %v447_v57 }
  0x94   : > { %2019 = vmatmul.mubr.bf16.gmra.mrb[24].mxu1 %v2524_v62  ;;  %2885 = vmatpush3.bf16.msra.mxu0 %v3165_v1  ;;  %v3200_v62 = vld [vmem:[%s3450_s7 + $0x3e0] sm:$0xff]   ;;  %v3203_v1 = vld [vmem:[%s3450_s7 + $0x368] sm:$0xff]  }
  0x95   : > { %2925 = vmatpush3.bf16.msra.mxu1 %v3166_v2  ;;  %2886 = vmatprep.subr.bf16.mxu0 %v3167_v3  ;;  %v3204_v2 = vld [vmem:[%s3450_s7 + $0x3e8] sm:$0xff]  }
  0x96   : > { %2926 = vmatprep.subr.bf16.mxu1 %v3168_v4  ;;  %1962 = vmatprep.mubr.bf16.mxu0 %v2539_v8  ;;  %v3205_v3 = vld [vmem:[%s3450_s7 + $0x328] sm:$0xff]  }
  0x97   : > { %2026 = vmatprep.mubr.bf16.mxu1 %v2541_v11  ;;  %v3206_v4 = vld [vmem:[%s3450_s7 + $0x3a8] sm:$0xff]   ;;  %v3211_v11 = vld [vmem:[%s3450_s7 + $0x370] sm:$0xff]  }
  0x98   : > { %2887 = vmatpush3.bf16.msra.mxu0 %v3169_v5  ;;  %v454_v5 = vld [vmem:[%s3452_s8 + $0x1a0] sm:$0xff] }
  0x99   : > { %2927 = vmatpush3.bf16.msra.mxu1 %v3170_v6  ;;  %2888 = vmatprep.subr.bf16.mxu0 %v3175_v13  ;;  %v455_v6 = vld [vmem:[%s3452_s8 + $0x1a8] sm:$0xff]  ;;  %v2543_v7 = vcombine.high %v454_v5, %v454_v5  ;;  %v2542_v9 = vcombine.low %v454_v5, %v454_v5  ;;  %v3213_v13 = vld [vmem:[%s3450_s7 + $0x330] sm:$0xff]  }
  0x9a   : > { %2928 = vmatprep.subr.bf16.mxu1 %v3176_v14  ;;  %v2545_v8 = vcombine.high %v455_v6, %v455_v6  ;;  %v3214_v14 = vld [vmem:[%s3450_s7 + $0x3b0] sm:$0xff]  }
  0x9b   : > { %1963 = vmatmul.mubr.bf16.gmra.mrb[28].mxu0 %v2538_v10  ;;  %v2544_v10 = vcombine.low %v455_v6, %v455_v6 }
  0x9c   : > { %2027 = vmatmul.mubr.bf16.gmra.mrb[28].mxu1 %v2540_v12  ;;  %2889 = vmatpush3.bf16.msra.mxu0 %v3177_v15  ;;  %v3212_v12 = vld [vmem:[%s3450_s7 + $0x3f0] sm:$0xff]   ;;  %v3215_v15 = vld [vmem:[%s3450_s7 + $0x378] sm:$0xff]  }
  0x9d   : > { %2929 = vmatpush3.bf16.msra.mxu1 %v3178_v16  ;;  %2890 = vmatprep.subr.bf16.mxu0 %v3179_v17  ;;  %v3216_v16 = vld [vmem:[%s3450_s7 + $0x3f8] sm:$0xff]  }
  0x9e   : > { %2930 = vmatprep.subr.bf16.mxu1 %v3180_v18  ;;  %2066 = vmatprep.mubr.bf16.mxu0 %v2495_v24  ;;  %v3217_v17 = vld [vmem:[%s3450_s7 + $0x338] sm:$0xff]   ;;  %v417_v24 = vld [vmem:[%s3452_s8 + $0x78] sm:$0xff] }
  0x9f   : > { %2130 = vmatprep.mubr.bf16.mxu1 %v2497_v28  ;;  %v3218_v18 = vld [vmem:[%s3450_s7 + $0x3b8] sm:$0xff]   ;;  %v2501_v28 = vcombine.high %v409_v21, %v417_v24 }
  0xa0   : > { %2891 = vmatpush3.bf16.msra.mxu0 %v3181_v19  ;;  %v408_v19 = vld [vmem:[%s3452_s8 + $0x30] sm:$0xff] }
  0xa1   : > { %2931 = vmatpush3.bf16.msra.mxu1 %v3182_v20  ;;  %2956 = vmatprep.subr.bf16.mxu0 %v3183_v29  ;;  %v416_v20 = vld [vmem:[%s3452_s8 + $0x70] sm:$0xff]  ;;  %v2515_v29 = vcombine.high %v424_v25, %v432_v26 }
  0xa2   : > { %2996 = vmatprep.subr.bf16.mxu1 %v3184_v30  ;;  %v2498_v22 = vcombine.low %v408_v19, %v416_v20  ;;  %v425_v30 = vld [vmem:[%s3452_s8 + $0xb8] sm:$0xff] }
  0xa3   : > { %2067 = vmatmul.mubr.bf16.vlgmr.msra.gmra.mrb[32].mxu0 %v2494_v23  ;;  %v2499_v23 = vcombine.high %v408_v19, %v416_v20 }
  0xa4   : > { %2131 = vmatmul.mubr.bf16.vlgmr.msra.gmra.mrb[32].mxu1 %v2496_v27  ;;  %2957 = vmatpush3.bf16.msra.mxu0 %v3185_v31  ;;  %v2500_v27 = vcombine.low %v409_v21, %v417_v24  ;;  %v433_v31 = vld [vmem:[%s3452_s8 + $0xf8] sm:$0xff] }
  0xa5   : > { %2997 = vmatpush3.bf16.msra.mxu1 %v3186_v32  ;;  %2958 = vmatprep.subr.bf16.mxu0 %v3187_v33  ;;  %v2517_v32 = vcombine.high %v425_v30, %v433_v31  ;;  %v440_v33 = vld [vmem:[%s3452_s8 + $0x130] sm:$0xff]  ;;  %v2516_v38 = vcombine.low %v425_v30, %v433_v31 }
  0xa6   : > { %2998 = vmatprep.subr.bf16.mxu1 %v3188_v34  ;;  %2074 = vmatprep.mubr.bf16.mxu0 %v2511_v41  ;;  %v448_v34 = vld [vmem:[%s3452_s8 + $0x170] sm:$0xff] }
  0xa7   : > { %2138 = vmatprep.mubr.bf16.mxu1 %v2513_v42  ;;  %v2531_v39 = vcombine.high %v440_v33, %v448_v34  ;;  %v456_v41 = vld [vmem:[%s3452_s8 + $0x1b0] sm:$0xff]  ;;  %v457_v42 = vld [vmem:[%s3452_s8 + $0x1b8] sm:$0xff] }
  0xa8   : > { %2959 = vmatpush3.bf16.msra.mxu0 %v3189_v35  ;;  %v441_v35 = vld [vmem:[%s3452_s8 + $0x138] sm:$0xff] }
  0xa9   : > { %2999 = vmatpush3.bf16.msra.mxu1 %v3190_v36  ;;  %2960 = vmatprep.subr.bf16.mxu0 %v3191_v45  ;;  %v449_v36 = vld [vmem:[%s3452_s8 + $0x178] sm:$0xff]  ;;  %v2547_v45 = vcombine.high %v456_v41, %v456_v41 }
  0xaa   : > { %3000 = vmatprep.subr.bf16.mxu1 %v3192_v46  ;;  %v2533_v40 = vcombine.high %v441_v35, %v449_v36  ;;  %v2549_v46 = vcombine.high %v457_v42, %v457_v42 }
  0xab   : > { %2075 = vmatmul.mubr.bf16.gmra.mrb[36].mxu0 %v2510_v43  ;;  %v2530_v43 = vcombine.low %v440_v33, %v448_v34 }
  0xac   : > { %2139 = vmatmul.mubr.bf16.gmra.mrb[36].mxu1 %v2512_v44  ;;  %2961 = vmatpush3.bf16.msra.mxu0 %v3193_v47  ;;  %v2532_v44 = vcombine.low %v441_v35, %v449_v36  ;;  %v2546_v47 = vcombine.low %v456_v41, %v456_v41 }
  0xad   : > { %3001 = vmatpush3.bf16.msra.mxu1 %v3194_v48  ;;  %2962 = vmatprep.subr.bf16.mxu0 %v3195_v49  ;;  %v2548_v48 = vcombine.low %v457_v42, %v457_v42 }
  0xae   : > { %3002 = vmatprep.subr.bf16.mxu1 %v3196_v50  ;;  %2082 = vmatprep.mubr.bf16.mxu0 %v2527_v56 }
  0xaf   : > { %2146 = vmatprep.mubr.bf16.mxu1 %v2529_v59 }
  0xb0   : > { %2963 = vmatpush3.bf16.msra.mxu0 %v3197_v51 }
  0xb1   : > { %3003 = vmatpush3.bf16.msra.mxu1 %v3198_v52  ;;  %2964 = vmatprep.subr.bf16.mxu0 %v3199_v61 }
  0xb2   : > { %3004 = vmatprep.subr.bf16.mxu1 %v3200_v62 }
  0xb3   : > { %2083 = vmatmul.mubr.bf16.gmra.mrb[40].mxu0 %v2526_v58 }
  0xb4   : > { %2147 = vmatmul.mubr.bf16.gmra.mrb[40].mxu1 %v2528_v60  ;;  %2965 = vmatpush3.bf16.msra.mxu0 %v3201_v63 }
  0xb5   : > { %3005 = vmatpush3.bf16.msra.mxu1 %v3202_v0  ;;  %2966 = vmatprep.subr.bf16.mxu0 %v3203_v1 }
  0xb6   : > { %3006 = vmatprep.subr.bf16.mxu1 %v3204_v2  ;;  %2090 = vmatprep.mubr.bf16.mxu0 %v2543_v7 }
  0xb7   : > { %2154 = vmatprep.mubr.bf16.mxu1 %v2545_v8 }
  0xb8   : > { %2967 = vmatpush3.bf16.msra.mxu0 %v3205_v3 }
  0xb9   : > { %3007 = vmatpush3.bf16.msra.mxu1 %v3206_v4  ;;  %2968 = vmatprep.subr.bf16.mxu0 %v3211_v11 }
  0xba   : > { %3008 = vmatprep.subr.bf16.mxu1 %v3212_v12 }
  0xbb   : > { %2091 = vmatmul.mubr.bf16.gmra.mrb[44].mxu0 %v2542_v9 }
  0xbc   : > { %2155 = vmatmul.mubr.bf16.gmra.mrb[44].mxu1 %v2544_v10  ;;  %2969 = vmatpush3.bf16.msra.mxu0 %v3213_v13 }
  0xbd   : > { %3009 = vmatpush3.bf16.msra.mxu1 %v3214_v14  ;;  %2970 = vmatprep.subr.bf16.mxu0 %v3215_v15 }
  0xbe   : > { %3010 = vmatprep.subr.bf16.mxu1 %v3216_v16  ;;  %2194 = vmatprep.mubr.bf16.mxu0 %v2499_v23 }
  0xbf   : > { %2258 = vmatprep.mubr.bf16.mxu1 %v2501_v28 }
  0xc0   : > { %2971 = vmatpush3.bf16.msra.mxu0 %v3217_v17 }
  0xc1   : > { %3011 = vmatpush3.bf16.msra.mxu1 %v3218_v18 }
  0xc3   : > { %2195 = vmatmul.mubr.bf16.vlgmr.msra.gmra.mrb[48].mxu0 %v2498_v22 }
  0xc4   : > { %2259 = vmatmul.mubr.bf16.vlgmr.msra.gmra.mrb[48].mxu1 %v2500_v27  ;;  %2202 = vmatprep.mubr.bf16.mxu0 %v2515_v29 }
  0xc5   : > { %2266 = vmatprep.mubr.bf16.mxu1 %v2517_v32 }
  0xcb   : > { %2203 = vmatmul.mubr.bf16.gmra.mrb[52].mxu0 %v2514_v37 }
  0xcc   : > { %2267 = vmatmul.mubr.bf16.gmra.mrb[52].mxu1 %v2516_v38  ;;  %2210 = vmatprep.mubr.bf16.mxu0 %v2531_v39 }
  0xcd   : > { %2274 = vmatprep.mubr.bf16.mxu1 %v2533_v40 }
  0xd3   : > { %2211 = vmatmul.mubr.bf16.gmra.mrb[56].mxu0 %v2530_v43 }
  0xd4   : > { %2275 = vmatmul.mubr.bf16.gmra.mrb[56].mxu1 %v2532_v44  ;;  %2218 = vmatprep.mubr.bf16.mxu0 %v2547_v45 }
  0xd5   : > { %2282 = vmatprep.mubr.bf16.mxu1 %v2549_v46 }
  0xdb   : > { %2219 = vmatmul.mubr.bf16.gmra.mrb[60].mxu0 %v2546_v47 }
  0xdc   : > { %2283 = vmatmul.mubr.bf16.gmra.mrb[60].mxu1 %v2548_v48 }
 0x136   : > { %v2732_v49 = vpop.f32.mrb[0].mxu0 }
 0x137   : > { %v2772_v50 = vpop.f32.mrb[0].mxu1  ;;  %v2733_v51 = vpop.f32.mrb[1].mxu0 }
 0x138   : > { %v2734_v52 = vadd.f32 %v2733_v51, %v2732_v49  ;;  %v2773_v53 = vpop.f32.mrb[1].mxu1  ;;  %v2735_v54 = vpop.f32.mrb[2].mxu0 }
 0x139   : > { %v2774_v55 = vadd.f32 %v2773_v53, %v2772_v50  ;;  %v2775_v56 = vpop.f32.mrb[2].mxu1  ;;  %v2736_v57 = vpop.f32.mrb[3].mxu0 }
 0x13a   : > { %v2737_v58 = vadd.f32 %v2736_v57, %v2735_v54  ;;  %v2776_v59 = vpop.f32.mrb[3].mxu1 }
 0x13b   : > { %v1877_v60 = vadd.f32 %v2774_v55, %v2734_v52  ;;  %v2777_v61 = vadd.f32 %v2776_v59, %v2775_v56 }
 0x13d   : > { %v1880_v62 = vadd.f32 %v2777_v61, %v2737_v58 }
 0x13e   : > { %v2738_v63 = vpop.f32.mrb[4].mxu0 }
 0x13f   : > { %v2778_v0 = vpop.f32.mrb[4].mxu1  ;;  %v2739_v1 = vpop.f32.mrb[5].mxu0 }
 0x140   : > { %v2740_v2 = vadd.f32 %v2739_v1, %v2738_v63  ;;  %v2779_v3 = vpop.f32.mrb[5].mxu1  ;;  %v2741_v4 = vpop.f32.mrb[6].mxu0 }
 0x141   : > { %v2780_v5 = vadd.f32 %v2779_v3, %v2778_v0  ;;  %v2781_v6 = vpop.f32.mrb[6].mxu1  ;;  %v2742_v7 = vpop.f32.mrb[7].mxu0 }
 0x142   : > { %v2743_v8 = vadd.f32 %v2742_v7, %v2741_v4  ;;  %v2782_v9 = vpop.f32.mrb[7].mxu1 }
 0x143   : > { %v1885_v10 = vadd.f32 %v2780_v5, %v2740_v2  ;;  %v2783_v11 = vadd.f32 %v2782_v9, %v2781_v6 }
 0x145   : > { %v1888_v12 = vadd.f32 %v2783_v11, %v2743_v8 }
 0x146   : > { %v2744_v13 = vpop.f32.mrb[8].mxu0 }
 0x147   : > { %v2784_v14 = vpop.f32.mrb[8].mxu1  ;;  %v2745_v15 = vpop.f32.mrb[9].mxu0 }
 0x148   : > { %v2785_v16 = vpop.f32.mrb[9].mxu1  ;;  %v2746_v17 = vadd.f32 %v2745_v15, %v2744_v13  ;;  %v2747_v19 = vpop.f32.mrb[10].mxu0 }
 0x149   : > { %v2786_v18 = vadd.f32 %v2785_v16, %v2784_v14  ;;  %v2787_v20 = vpop.f32.mrb[10].mxu1  ;;  %v2748_v21 = vpop.f32.mrb[11].mxu0 }
 0x14a   : > { %v2788_v22 = vpop.f32.mrb[11].mxu1  ;;  %v2749_v24 = vadd.f32 %v2748_v21, %v2747_v19 }
 0x14b   : > { %v1893_v23 = vadd.f32 %v2786_v18, %v2746_v17  ;;  %v2789_v25 = vadd.f32 %v2788_v22, %v2787_v20 }
 0x14d   : > { %v1896_v26 = vadd.f32 %v2789_v25, %v2749_v24 }
 0x14e   : > { %v2750_v27 = vpop.f32.mrb[12].mxu0 }
 0x14f   : > { %v2790_v28 = vpop.f32.mrb[12].mxu1  ;;  %v2751_v29 = vpop.f32.mrb[13].mxu0 }
 0x150   : > { %v2791_v30 = vpop.f32.mrb[13].mxu1  ;;  %v2752_v31 = vadd.f32 %v2751_v29, %v2750_v27  ;;  %v2753_v33 = vpop.f32.mrb[14].mxu0 }
 0x151   : > { %v2792_v32 = vadd.f32 %v2791_v30, %v2790_v28  ;;  %v2793_v34 = vpop.f32.mrb[14].mxu1  ;;  %v2754_v35 = vpop.f32.mrb[15].mxu0 }
 0x152   : > { %v2794_v36 = vpop.f32.mrb[15].mxu1 }
 0x153   : > { %v1901_v37 = vadd.f32 %v2792_v32, %v2752_v31 }
 0x156   : > { %v2812_v38 = vpop.f32.mrb[16].mxu0 }
 0x157   : > { %v2852_v39 = vpop.f32.mrb[16].mxu1  ;;  %v2813_v40 = vpop.f32.mrb[17].mxu0 }
 0x158   : > { %v2814_v41 = vadd.f32 %v2813_v40, %v2812_v38  ;;  %v2853_v42 = vpop.f32.mrb[17].mxu1  ;;  %v2815_v43 = vpop.f32.mrb[18].mxu0 }
 0x159   : > { %v2854_v44 = vadd.f32 %v2853_v42, %v2852_v39  ;;  %v2855_v45 = vpop.f32.mrb[18].mxu1  ;;  %v2816_v46 = vpop.f32.mrb[19].mxu0 }
 0x15a   : > { %v1941_v47 = vadd.f32 %v2814_v41, %v1877_v60  ;;  %v2817_v48 = vadd.f32 %v2816_v46, %v2815_v43  ;;  %v2856_v49 = vpop.f32.mrb[19].mxu1 }
 0x15b   : > { %v2857_v50 = vadd.f32 %v2856_v49, %v2855_v45 }
 0x15c   : > { %v2005_v51 = vadd.f32 %v2854_v44, %v1941_v47  ;;  %v1944_v52 = vadd.f32 %v2817_v48, %v1880_v62 }
 0x15e   : > { %v2008_v53 = vadd.f32 %v2857_v50, %v1944_v52  ;;  %v2818_v54 = vpop.f32.mrb[20].mxu0 }
 0x15f   : > { %v2858_v55 = vpop.f32.mrb[20].mxu1  ;;  %v2819_v56 = vpop.f32.mrb[21].mxu0 }
 0x160   : > { %v2820_v57 = vadd.f32 %v2819_v56, %v2818_v54  ;;  %v2859_v58 = vpop.f32.mrb[21].mxu1  ;;  %v2821_v59 = vpop.f32.mrb[22].mxu0 }
 0x161   : > { %v2860_v61 = vadd.f32 %v2859_v58, %v2858_v55  ;;  %v2861_v63 = vpop.f32.mrb[22].mxu1  ;;  %v2822_v0 = vpop.f32.mrb[23].mxu0 }
 0x162   : > { %v1949_v1 = vadd.f32 %v2820_v57, %v1885_v10  ;;  %v2823_v2 = vadd.f32 %v2822_v0, %v2821_v59  ;;  %v2862_v3 = vpop.f32.mrb[23].mxu1 }
 0x163   : > { %v2863_v4 = vadd.f32 %v2862_v3, %v2861_v63 }
 0x164   : > { %v2013_v60 = vadd.f32 %v2860_v61, %v1949_v1  ;;  %v1952_v5 = vadd.f32 %v2823_v2, %v1888_v12 }
 0x166   : > { %v2016_v6 = vadd.f32 %v2863_v4, %v1952_v5  ;;  %v2824_v7 = vpop.f32.mrb[24].mxu0 }
 0x167   : > { %v2864_v8 = vpop.f32.mrb[24].mxu1  ;;  %v2825_v62 = vpop.f32.mrb[25].mxu0 }
 0x168   : > { %v2826_v9 = vadd.f32 %v2825_v62, %v2824_v7  ;;  %v2865_v11 = vpop.f32.mrb[25].mxu1  ;;  %v2827_v13 = vpop.f32.mrb[26].mxu0 }
 0x169   : > { %v2866_v14 = vadd.f32 %v2865_v11, %v2864_v8  ;;  %v2867_v15 = vpop.f32.mrb[26].mxu1  ;;  %v2828_v16 = vpop.f32.mrb[27].mxu0 }
 0x16a   : > { %v1957_v17 = vadd.f32 %v2826_v9, %v1893_v23  ;;  %v2829_v18 = vadd.f32 %v2828_v16, %v2827_v13  ;;  %v2868_v19 = vpop.f32.mrb[27].mxu1 }
 0x16b   : > { %v2869_v20 = vadd.f32 %v2868_v19, %v2867_v15 }
 0x16c   : > { %v2021_v10 = vadd.f32 %v2866_v14, %v1957_v17  ;;  %v1960_v21 = vadd.f32 %v2829_v18, %v1896_v26 }
 0x16e   : > { %v2024_v22 = vadd.f32 %v2869_v20, %v1960_v21  ;;  %v2830_v24 = vpop.f32.mrb[28].mxu0 }
 0x16f   : > { %v2870_v25 = vpop.f32.mrb[28].mxu1  ;;  %v2831_v12 = vpop.f32.mrb[29].mxu0 }
 0x170   : > { %v2832_v27 = vadd.f32 %v2831_v12, %v2830_v24  ;;  %v2871_v28 = vpop.f32.mrb[29].mxu1  ;;  %v2833_v29 = vpop.f32.mrb[30].mxu0 }
 0x171   : > { %v2872_v30 = vadd.f32 %v2871_v28, %v2870_v25  ;;  %v2873_v31 = vpop.f32.mrb[30].mxu1  ;;  %v2834_v32 = vpop.f32.mrb[31].mxu0 }
 0x172   : > { %v1965_v33 = vadd.f32 %v2832_v27, %v1901_v37  ;;  %v2874_v34 = vpop.f32.mrb[31].mxu1 }
 0x174   : > { %v2029_v35 = vadd.f32 %v2872_v30, %v1965_v33 }
 0x176   : > { %v2892_v36 = vpop.f32.mrb[32].mxu0 }
 0x177   : > { %v2932_v23 = vpop.f32.mrb[32].mxu1  ;;  %v2893_v38 = vpop.f32.mrb[33].mxu0 }
 0x178   : > { %v2894_v39 = vadd.f32 %v2893_v38, %v2892_v36  ;;  %v2933_v40 = vpop.f32.mrb[33].mxu1  ;;  %v2895_v41 = vpop.f32.mrb[34].mxu0 }
 0x179   : > { %v2934_v26 = vadd.f32 %v2933_v40, %v2932_v23  ;;  %v2935_v42 = vpop.f32.mrb[34].mxu1  ;;  %v2896_v43 = vpop.f32.mrb[35].mxu0 }
 0x17a   : > { %v2069_v44 = vadd.f32 %v2894_v39, %v2005_v51  ;;  %v2897_v45 = vadd.f32 %v2896_v43, %v2895_v41  ;;  %v2936_v46 = vpop.f32.mrb[35].mxu1 }
 0x17b   : > { %v2937_v47 = vadd.f32 %v2936_v46, %v2935_v42 }
 0x17c   : > { %v2133_v48 = vadd.f32 %v2934_v26, %v2069_v44  ;;  %v2072_v49 = vadd.f32 %v2897_v45, %v2008_v53  ;;  %v395_v44 = vld [vmem:[#allocation2] sm:$0xff] }
 0x17e   : > { %v2136_v50 = vadd.f32 %v2937_v47, %v2072_v49  ;;  %v2898_v52 = vpop.f32.mrb[36].mxu0  ;;  %v396_v49 = vld [vmem:[#allocation2 + $0x8] sm:$0xff] }
 0x17f   : > { %v2938_v37 = vpop.f32.mrb[36].mxu1  ;;  %v2899_v54 = vpop.f32.mrb[37].mxu0 }
 0x180   : > { %v2939_v55 = vpop.f32.mrb[37].mxu1  ;;  %v2900_v56 = vadd.f32 %v2899_v54, %v2898_v52  ;;  %v2901_v58 = vpop.f32.mrb[38].mxu0 }
 0x181   : > { %v2940_v57 = vadd.f32 %v2939_v55, %v2938_v37  ;;  %v2941_v59 = vpop.f32.mrb[38].mxu1  ;;  %v2902_v61 = vpop.f32.mrb[39].mxu0 }
 0x182   : > { %v2942_v63 = vpop.f32.mrb[39].mxu1  ;;  %v2077_v0 = vadd.f32 %v2900_v56, %v2013_v60  ;;  %v2903_v1 = vadd.f32 %v2902_v61, %v2901_v58 }
 0x183   : > { %v2943_v2 = vadd.f32 %v2942_v63, %v2941_v59 }
 0x184   : > { %v2141_v51 = vadd.f32 %v2940_v57, %v2077_v0  ;;  %v2080_v3 = vadd.f32 %v2903_v1, %v2016_v6 }
 0x186   : > { %v3639_v4 = vadd.f32 %v2943_v2, %v2080_v3  ;;  %v2904_v5 = vpop.f32.mrb[40].mxu0  ;;  %v397_v3 = vld [vmem:[#allocation2 + $0x10] sm:$0xff] }
 0x187   : > { %v2944_v53 = vpop.f32.mrb[40].mxu1  ;;  %v2905_v7 = vpop.f32.mrb[41].mxu0 }
 0x188   : > { %v2906_v8 = vadd.f32 %v2905_v7, %v2904_v5  ;;  %v2945_v62 = vpop.f32.mrb[41].mxu1  ;;  %v2907_v9 = vpop.f32.mrb[42].mxu0  ;;  %v398_v7 = vld [vmem:[#allocation2 + $0x18] sm:$0xff] }
 0x189   : > { %v2946_v11 = vadd.f32 %v2945_v62, %v2944_v53  ;;  %v2947_v13 = vpop.f32.mrb[42].mxu1  ;;  %v2908_v14 = vpop.f32.mrb[43].mxu0 }
 0x18a   : > { %v2085_v15 = vadd.f32 %v2906_v8, %v2021_v10  ;;  %v2909_v16 = vadd.f32 %v2908_v14, %v2907_v9  ;;  %v2948_v17 = vpop.f32.mrb[43].mxu1 }
 0x18b   : > { %v2949_v18 = vadd.f32 %v2948_v17, %v2947_v13 }
 0x18c   : > { %v3641_v60 = vadd.f32 %v2946_v11, %v2085_v15  ;;  %v2088_v19 = vadd.f32 %v2909_v16, %v2024_v22 }
 0x18e   : > { %v3643_v20 = vadd.f32 %v2949_v18, %v2088_v19  ;;  %v2910_v6 = vpop.f32.mrb[44].mxu0 }
 0x18f   : > { %v2950_v21 = vpop.f32.mrb[44].mxu1  ;;  %v2911_v24 = vpop.f32.mrb[45].mxu0 }
 0x190   : > { %v2951_v25 = vpop.f32.mrb[45].mxu1  ;;  %v2912_v12 = vadd.f32 %v2911_v24, %v2910_v6  ;;  %v2913_v28 = vpop.f32.mrb[46].mxu0 }
 0x191   : > { %v2952_v27 = vadd.f32 %v2951_v25, %v2950_v21  ;;  %v2953_v29 = vpop.f32.mrb[46].mxu1  ;;  %v2914_v30 = vpop.f32.mrb[47].mxu0  ;;  %v400_v28 = vld [vmem:[#allocation2 + $0x28] sm:$0xff] }
 0x192   : > { %v2954_v31 = vpop.f32.mrb[47].mxu1  ;;  %v2093_v32 = vadd.f32 %v2912_v12, %v2029_v35 }
 0x194   : > { %v3645_v10 = vadd.f32 %v2952_v27, %v2093_v32 }
 0x196   : > { %v2972_v33 = vpop.f32.mrb[48].mxu0 }
 0x197   : > { %v3012_v34 = vpop.f32.mrb[48].mxu1  ;;  %v2973_v36 = vpop.f32.mrb[49].mxu0 }
 0x198   : > { %v2974_v23 = vadd.f32 %v2973_v36, %v2972_v33  ;;  %v3013_v22 = vpop.f32.mrb[49].mxu1  ;;  %v2975_v38 = vpop.f32.mrb[50].mxu0 }
 0x199   : > { %v3014_v39 = vadd.f32 %v3013_v22, %v3012_v34  ;;  %v3015_v40 = vpop.f32.mrb[50].mxu1  ;;  %v2976_v41 = vpop.f32.mrb[51].mxu0 }
 0x19a   : > { %v2197_v26 = vadd.f32 %v2974_v23, %v2133_v48  ;;  %v2977_v42 = vadd.f32 %v2976_v41, %v2975_v38  ;;  %v3016_v43 = vpop.f32.mrb[51].mxu1 }
 0x19b   : > { %v3017_v45 = vadd.f32 %v3016_v43, %v3015_v40 }
 0x19c   : > { %v2261_v46 = vadd.f32 %v3014_v39, %v2197_v26  ;;  %v2200_v47 = vadd.f32 %v2977_v42, %v2136_v50  ;;  %v401_v26 = vld [vmem:[#allocation2 + $0x30] sm:$0xff] }
 0x19e   : > { %v2290_v35 = vadd.f32 %v2261_v46, %v395_v44  ;;  %v2264_v52 = vadd.f32 %v3017_v45, %v2200_v47  ;;  %v2978_v37 = vpop.f32.mrb[52].mxu0  ;;  %v2679_v45 = vld [vmem:[%s3684_s2] ss:$0 sm:$0xff] (!%p2678_p11) }
 0x19f   : > { %v3018_v54 = vpop.f32.mrb[52].mxu1  ;;  %v2979_v55 = vpop.f32.mrb[53].mxu0 }
 0x1a0   : > { %2297 = vst [vmem:[#allocation2] sm:$0xff] %v2290_v35  ;;  %v2291_v56 = vadd.f32 %v2264_v52, %v396_v49  ;;  %v2980_v57 = vadd.f32 %v2979_v55, %v2978_v37  ;;  %v3019_v58 = vpop.f32.mrb[53].mxu1  ;;  %v2981_v59 = vpop.f32.mrb[54].mxu0 }
 0x1a1   : > { %v3020_v61 = vadd.f32 %v3019_v58, %v3018_v54  ;;  %v3021_v63 = vpop.f32.mrb[54].mxu1  ;;  %v2982_v48 = vpop.f32.mrb[55].mxu0 }
 0x1a2   : > { %2298 = vst [vmem:[#allocation2 + $0x8] sm:$0xff] %v2291_v56  ;;  %v2205_v0 = vadd.f32 %v2980_v57, %v2141_v51  ;;  %v2983_v1 = vadd.f32 %v2982_v48, %v2981_v59  ;;  %v3022_v2 = vpop.f32.mrb[55].mxu1 }
 0x1a3   : > { %v3023_v50 = vadd.f32 %v3022_v2, %v3021_v63 }
 0x1a4   : > { %v2269_v5 = vadd.f32 %v3020_v61, %v2205_v0  ;;  %v2208_v53 = vadd.f32 %v2983_v1, %v3639_v4  ;;  %v399_v4 = vld [vmem:[#allocation2 + $0x20] sm:$0xff] }
 0x1a6   : > { %v2292_v8 = vadd.f32 %v2269_v5, %v397_v3  ;;  %v2272_v62 = vadd.f32 %v3023_v50, %v2208_v53  ;;  %v2984_v9 = vpop.f32.mrb[56].mxu0 }
 0x1a7   : > { %v3024_v11 = vpop.f32.mrb[56].mxu1  ;;  %v2985_v13 = vpop.f32.mrb[57].mxu0  ;;  %v2308_v43 = vld [vmem:[#allocation2] sm:$0xff] (!%p2678_p11) }
 0x1a8   : > { %2299 = vst [vmem:[#allocation2 + $0x10] sm:$0xff] %v2292_v8  ;;  %v2293_v14 = vadd.f32 %v2272_v62, %v398_v7  ;;  %v2986_v15 = vadd.f32 %v2985_v13, %v2984_v9  ;;  %v3025_v16 = vpop.f32.mrb[57].mxu1  ;;  %v2987_v17 = vpop.f32.mrb[58].mxu0  ;;  %v2322_v46 = vadd.f32 (!%p2678_p11), %v2679_v45, %v2308_v43 }
 0x1a9   : > { %v3026_v18 = vadd.f32 %v3025_v16, %v3024_v11  ;;  %v3027_v51 = vpop.f32.mrb[58].mxu1  ;;  %v2988_v19 = vpop.f32.mrb[59].mxu0  ;;  %v2309_v44 = vld [vmem:[#allocation2 + $0x8] sm:$0xff] (!%p2678_p11) }
 0x1aa   : > { %2300 = vst [vmem:[#allocation2 + $0x18] sm:$0xff] %v2293_v14  ;;  %v2213_v6 = vadd.f32 %v2986_v15, %v3641_v60  ;;  %v2989_v21 = vadd.f32 %v2988_v19, %v2987_v17  ;;  %v3028_v24 = vpop.f32.mrb[59].mxu1  ;;  %v2323_v47 = vadd.f32 (!%p2678_p11), %v2679_v45, %v2309_v44 }
 0x1ab   : > { %v3029_v25 = vadd.f32 %v3028_v24, %v3027_v51 }
 0x1ac   : > { %v2277_v12 = vadd.f32 %v3026_v18, %v2213_v6  ;;  %v2216_v27 = vadd.f32 %v2989_v21, %v3643_v20  ;;  %v2702_v57 = vpack.c.bf16 (!%p2678_p11), %v2323_v47, %v2322_v46 }
 0x1ae   : > { %v2294_v29 = vadd.f32 %v2277_v12, %v399_v4  ;;  %v2280_v30 = vadd.f32 %v3029_v25, %v2216_v27  ;;  %v2990_v31 = vpop.f32.mrb[60].mxu0  ;;  %2703 = vst [vmem:[%s3685_s3] sm:$0xff] (!%p2678_p11), %v2702_v57  }
 0x1af   : > { %v3030_v32 = vpop.f32.mrb[60].mxu1  ;;  %v2991_v33 = vpop.f32.mrb[61].mxu0  ;;  %v2310_v49 = vld [vmem:[#allocation2 + $0x10] sm:$0xff] (!%p2678_p11) }
 0x1b0   : > { %2301 = vst [vmem:[#allocation2 + $0x20] sm:$0xff] %v2294_v29  ;;  %v2295_v34 = vadd.f32 %v2280_v30, %v400_v28  ;;  %v2992_v36 = vadd.f32 %v2991_v33, %v2990_v31  ;;  %v3031_v23 = vpop.f32.mrb[61].mxu1  ;;  %v2993_v22 = vpop.f32.mrb[62].mxu0 }
 0x1b1   : > { %v3032_v38 = vadd.f32 %v3031_v23, %v3030_v32  ;;  %v3033_v60 = vpop.f32.mrb[62].mxu1  ;;  %v2994_v39 = vpop.f32.mrb[63].mxu0  ;;  %v2311_v35 = vld [vmem:[#allocation2 + $0x18] sm:$0xff] (!%p2678_p11) }
 0x1b2   : > { %2302 = vst [vmem:[#allocation2 + $0x28] sm:$0xff] %v2295_v34  ;;  %v2221_v40 = vadd.f32 %v2992_v36, %v3645_v10  ;;  %v3034_v41 = vpop.f32.mrb[63].mxu1  ;;  %2307 = sbr.rel (%p2678_p11) target bundleno = 453 (0x1c5), region = 63  ;;  %v2324_v10 = vadd.f32 (!%p2678_p11), %v2679_v45, %v2310_v49  ;;  %v2325_v37 = vadd.f32 (!%p2678_p11), %v2679_v45, %v2311_v35 }
 0x1b4   : > { %v2285_v20 = vadd.f32 %v3032_v38, %v2221_v40  ;;  %v2707_v61 = vpack.c.bf16 (!%p2678_p11), %v2325_v37, %v2324_v10 }
 0x1b6   : > { %v2296_v42 = vadd.f32 %v2285_v20, %v401_v26  ;;  %2714 = vst [vmem:[%s3685_s3 + $0x8] sm:$0xff] (!%p2678_p11), %v2707_v61  }
 0x1b7   : > { %v2312_v52 = vld [vmem:[#allocation2 + $0x20] sm:$0xff] (!%p2678_p11) }
 0x1b8   : > { %2303 = vst [vmem:[#allocation2 + $0x30] sm:$0xff] %v2296_v42  ;;  %v2326_v55 = vadd.f32 (!%p2678_p11), %v2679_v45, %v2312_v52 }
 0x1b9   : > { %v2313_v54 = vld [vmem:[#allocation2 + $0x28] sm:$0xff] }
 0x1ba   : > { %v2327_v58 = vadd.f32 %v2679_v45, %v2313_v54 }
 0x1bc   : > { %v2712_v63 = vpack.c.bf16 %v2327_v58, %v2326_v55 }
 0x1be   : > { %2715 = vst [vmem:[%s3685_s3 + $0x10] sm:$0xff] %v2712_v63  }
 0x1bf   : > { %v2314_v56 = vld [vmem:[#allocation2 + $0x30] sm:$0xff] }
 0x1c0   : > { %v2328_v59 = vadd.f32 %v2679_v45, %v2314_v56 }
 0x1c2   : > { %v2698_v48 = vpack.c.bf16 %v2328_v59, %v2328_v59 }
 0x1c4   : > { %2364 = vst [vmem:[%s3685_s3 + $0x18] sm:$0xf] %v2698_v48 }
 0x1c5 PF: > { %s13_s16 = sadd.s32 1, %s3261_s16   ;;  %s3686_s12 = smov %s3249_s13 }
 0x1c6   : > { %p10_p12 = scmp.ge.s32.totalorder %s13_s16, 6   ;;  %s3687_s13 = smov %s3319_s20 }
 0x1c7   : > { %s3688_s14 = smov %s3257_s15  ;;  %s3689_s15 = smov %s3691_s17 }
 0x1c8   :  { %12 = sbr.rel (!%p10_p12) target bundleno = 3 (0x3), region = 104 }

</bundles_post_ra>
